<compile_context>
chip_gen: v6e
topology: v6e:2x2x1
jax: 0.10.0
libtpu: 0.0.40
codegen_flags: <defaults>
</compile_context>

<pallas_src>
import functools
import math

import numpy as np
import jax
import jax.numpy as jnp
from jax.experimental import pallas as pl
from jax.experimental.pallas import tpu as pltpu

# ----------------------------- small "config" -------------------------------
B = 2                    # batch
D_MODEL = 64             # config.tf_d_model
N_HEAD = 2               # config.tf_num_head
D_FFN = 128              # config.tf_d_ffn
N_LAYERS = 2             # config.tf_num_layers (per decoder stack)
NL_TOTAL = 2 * N_LAYERS  # voc_decoder layers [0,N_LAYERS) then tf_decoder2 layers
N_VOC = 16               # number of cluster (vocabulary) points, shape (N_VOC, 3)
BEV_C_IN = 512           # fixed by nn.Conv2d(512, tf_d_model, 1)
BEV_H = BEV_W = 8        # 8*8 == 64 keyval tokens (keyval_embedding2 = Embedding(8**2, d))
SEM_C = 8                # config.bev_features_channels
SEM_H, SEM_W = 8, 16     # spatial size of bev_feature_upscale
NUM_BEV_CLASSES = 4      # config.num_bev_classes
LIDAR_H, LIDAR_W = 32, 32   # upsample target = (LIDAR_H // 2, LIDAR_W) = (16, 32)
STATUS_DIM = 8           # 4 + 2 + 2  (has_history = False path)

OUT_ROWS = 16            # rows of the fused output slab (== N_VOC == LIDAR_H // 2 here)
assert N_VOC == LIDAR_H // 2 == OUT_ROWS
assert SEM_W * SEM_C == 128 and NUM_BEV_CLASSES * LIDAR_W == 128 and D_FFN == 128


# --------------------- flat-index helpers for packed slabs --------------------

def _aidx(l, sc, qkv, h, nhead):
    """Row of the flattened (layers*2*3*nhead, d, hd) attention-weight slab."""
    return ((l * 2 + sc) * 3 + qkv) * nhead + h


def _oidx(l, sc, h, nhead):
    """Row of the flattened (layers*2*nhead, hd, d) out-projection slab."""
    return (l * 2 + sc) * nhead + h


# ============================ in-kernel math helpers ==========================

def _softmax_rows(s):
    s = s - jnp.max(s, axis=-1, keepdims=True)
    p = jnp.exp(s)
    return p * pl.reciprocal(jnp.sum(p, axis=-1, keepdims=True), approx=True)


def _layer_norm(v, g, b):
    mu = jnp.mean(v, axis=-1, keepdims=True)
    var = jnp.mean((v - mu) ** 2, axis=-1, keepdims=True)
    return (v - mu) * jax.lax.rsqrt(var + 1e-5) * g + b


def _mha(xq, xkv, l, sc, attn_w, attn_b, wo_w, nhead):
    """nn.MultiheadAttention (batch_first, eval).  Head-major weights (leading-dim indexed),
    no lane slicing; 1/sqrt(hd) already folded into the Q weights/bias."""
    f32, bf16 = jnp.float32, jnp.bfloat16
    xq_b = xq.astype(bf16)
    xkv_b = xkv.astype(bf16)
    acc = None
    for h in range(nhead):
        q = jnp.dot(xq_b, attn_w[_aidx(l, sc, 0, h, nhead)],
                    preferred_element_type=f32) + attn_b[_aidx(l, sc, 0, h, nhead)]
        k = jnp.dot(xkv_b, attn_w[_aidx(l, sc, 1, h, nhead)],
                    preferred_element_type=f32) + attn_b[_aidx(l, sc, 1, h, nhead)]
        v = jnp.dot(xkv_b, attn_w[_aidx(l, sc, 2, h, nhead)],
                    preferred_element_type=f32) + attn_b[_aidx(l, sc, 2, h, nhead)]
        s = jax.lax.dot_general(q.astype(bf16), k.astype(bf16),
                                (((1,), (1,)), ((), ())),
                                preferred_element_type=f32)          # (Lq, Lk)
        p = _softmax_rows(s)
        pv = jnp.dot(p.astype(bf16), v.astype(bf16), preferred_element_type=f32)   # (Lq, hd)
        contrib = jnp.dot(pv.astype(bf16), wo_w[_oidx(l, sc, h, nhead)],
                          preferred_element_type=f32)                # (Lq, d)
        acc = contrib if acc is None else acc + contrib
    return acc


def _decoder_layer(x, mem, l, attn_w, attn_b, wo_w, misc, ffn_w1, ffn_w2, nhead):
    """nn.TransformerDecoderLayer (post-norm, ReLU FFN, eval/no-dropout).
    misc rows: 0=b1, 1=b2, 2=bo_self, 3=bo_cross, 4..9=ln{1,2,3}.{weight,bias}."""
    f32, bf16 = jnp.float32, jnp.bfloat16
    d = x.shape[-1]
    sa = _mha(x, x, l, 0, attn_w, attn_b, wo_w, nhead) + misc[l, 2:3, 0:d]
    x = _layer_norm(x + sa, misc[l, 4:5, 0:d], misc[l, 5:6, 0:d])
    ca = _mha(x, mem, l, 1, attn_w, attn_b, wo_w, nhead) + misc[l, 3:4, 0:d]
    x = _layer_norm(x + ca, misc[l, 6:7, 0:d], misc[l, 7:8, 0:d])
    h = jnp.maximum(jnp.dot(x.astype(bf16), ffn_w1[l],
                            preferred_element_type=f32) + misc[l, 0:1, 0:D_FFN], 0.0)
    ff = jnp.dot(h.astype(bf16), ffn_w2[l], preferred_element_type=f32) + misc[l, 1:2, 0:d]
    return _layer_norm(x + ff, misc[l, 8:9, 0:d], misc[l, 9:10, 0:d])


# ================================ Pallas kernels ===============================

def _voc_decoder_kernel(cpe_ref, attn_w, attn_b, wo_w, misc, ffn_w1, ffn_w2, out_ref,
                        *, nhead, n_layers):
    """Batch-invariant _voc_decoder(cpe, cpe) -> (N_VOC, d); computed exactly once."""
    cpe = cpe_ref[...]
    x = cpe
    for l in range(n_layers):
        x = _decoder_layer(x, cpe, l, attn_w, attn_b, wo_w, misc, ffn_w1, ffn_w2, nhead)
    out_ref[...] = x


def _main_kernel(bev_ref, cols_ref, stat_ref,
                 voc_ref, bevw_ref, kvadd_ref, statw_ref,
                 attn_w, attn_b, wo_w, misc, ffn_w1, ffn_w2,
                 head_w, head_b, sem_w, sem_b,
                 out_ref, *, nhead, n_layers):
    f32, bf16 = jnp.float32, jnp.bfloat16
    d = D_MODEL

    # ---- _bev_downscale (1x1 conv) + keyval_embedding2: (64tok,512)@(512,d), bf16 MXU ----
    keyval = jnp.dot(bev_ref[0], bevw_ref[...], preferred_element_type=f32) + kvadd_ref[...]

    # ---- _status_encoding (bias folded as homogeneous coordinate) ----
    status_enc = jnp.dot(stat_ref[0], statw_ref[...], preferred_element_type=f32)   # (1, d)

    # ---- _tf_decoder2 on (hoisted voc-decoder output + status encoding) ----
    query = voc_ref[...] + status_enc                                                # (N_VOC, d)
    for l in range(n_layers):
        query = _decoder_layer(query, keyval, l, attn_w, attn_b, wo_w, misc,
                               ffn_w1, ffn_w2, nhead)

    # ---- merged im/dac MLP heads, padded to a 128-lane score slab ----
    h1 = jnp.maximum(jnp.dot(query.astype(bf16), head_w[0, 0:d, :],
                             preferred_element_type=f32) + head_b[0], 0.0)           # (16,128)
    scores = jnp.dot(h1.astype(bf16), head_w[1], preferred_element_type=f32) + head_b[1]

    # ---- _bev_semantic_head: 9-tap block-diag 3x3 conv, fused 1x1 conv + W-upsample,
    #      H-upsample; everything lane-dense (8,128)/(16,128) ----
    acc = jnp.dot(cols_ref[0, 0], sem_w[0], preferred_element_type=f32)
    for t in range(1, 9):
        acc = acc + jnp.dot(cols_ref[0, t], sem_w[t], preferred_element_type=f32)
    y = jnp.maximum(acc + sem_b[0], 0.0)                                             # (8, 128)
    u = jnp.dot(y.astype(bf16), sem_w[9], preferred_element_type=f32) + sem_b[1]     # (8, 128)
    ry = sem_w[10, 0:OUT_ROWS, 0:SEM_H]                                              # (16, 8)
    slab = jnp.dot(ry, u.astype(bf16), preferred_element_type=f32)                   # (16, 128)

    # single lane-dense output block: slot 0 = semantic slab, slot 1 = padded scores
    out_ref[0, 0] = slab
    out_ref[0, 1] = scores


# ====================== plain-JAX glue (constant preprocessing) =====================

def pos2posemb2d(pos, num_pos_feats, temperature=10000.0):
    """Standard 2D sinusoidal embedding of the cluster points (uses coords [..., 0:2])."""
    scale = 2.0 * math.pi
    pos = pos * scale
    dim_t = jnp.arange(num_pos_feats, dtype=jnp.float32)
    dim_t = temperature ** (2.0 * jnp.floor(dim_t / 2.0) / num_pos_feats)

    def interleave(t):
        s = jnp.sin(t[..., 0::2])
        c = jnp.cos(t[..., 1::2])
        return jnp.stack((s, c), axis=-1).reshape(t.shape[:-1] + (-1,))

    pos_x = interleave(pos[..., 0, None] / dim_t)
    pos_y = interleave(pos[..., 1, None] / dim_t)
    return jnp.concatenate((pos_y, pos_x), axis=-1)


def _bilinear_matrix(out_size, in_size):
    """PyTorch bilinear upsample (align_corners=False) as an interpolation matrix."""
    scale = in_size / out_size
    M = np.zeros((out_size, in_size), np.float32)
    for i in range(out_size):
        src = (i + 0.5) * scale - 0.5
        src = max(src, 0.0)
        i0 = min(int(np.floor(src)), in_size - 1)
        i1 = min(i0 + 1, in_size - 1)
        l1 = src - i0
        M[i, i0] += 1.0 - l1
        M[i, i1] += l1
    return M


# ============================== parameters ===================================

def init_params(key):
    """PyTorch-native layouts (Linear (out,in), Conv (Cout,Cin,kh,kw), fused in_proj)."""
    keys = iter(jax.random.split(key, 128))
    rnd = lambda *s: jax.random.normal(next(keys), s, jnp.float32) * 0.05
    d, f, c, k = D_MODEL, D_FFN, SEM_C, NUM_BEV_CLASSES

    def dec_layer():
        return {
            'sa_w': rnd(3 * d, d), 'sa_b': rnd(3 * d), 'sa_ow': rnd(d, d), 'sa_ob': rnd(d),
            'ca_w': rnd(3 * d, d), 'ca_b': rnd(3 * d), 'ca_ow': rnd(d, d), 'ca_ob': rnd(d),
            'l1_w': rnd(f, d), 'l1_b': rnd(f), 'l2_w': rnd(d, f), 'l2_b': rnd(d),
            'ln_w': jnp.ones((3, d), jnp.float32), 'ln_b': jnp.zeros((3, d), jnp.float32),
        }

    return {
        'bev_down_w': rnd(d, BEV_C_IN, 1, 1), 'bev_down_b': rnd(d),
        'keyval_emb': rnd(BEV_H * BEV_W, d),
        'status_w': rnd(d, STATUS_DIM), 'status_b': rnd(d),
        'voc_layers': [dec_layer() for _ in range(N_LAYERS)],
        'tf2_layers': [dec_layer() for _ in range(N_LAYERS)],
        'im0_w': rnd(d // 2, d), 'im0_b': rnd(d // 2),
        'im2_w': rnd(1, d // 2), 'im2_b': rnd(1),
        'dac0_w': rnd(d // 2, d), 'dac0_b': rnd(d // 2),
        'dac2_w': rnd(1, d // 2), 'dac2_b': rnd(1),
        'sem1_w': rnd(c, c, 3, 3), 'sem1_b': rnd(c),
        'sem2_w': rnd(k, c, 1, 1), 'sem2_b': rnd(k),
    }


def pack_params(p):
    """Repack PyTorch-layout params into a small number of kernel-friendly slabs."""
    d, f, nh = D_MODEL, D_FFN, N_HEAD
    hd, nl, d2 = d // nh, NL_TOTAL, d // 2
    scale = 1.0 / math.sqrt(hd)

    att_w = np.zeros((nl * 2 * 3 * nh, d, hd), np.float32)
    att_b = np.zeros((nl * 2 * 3 * nh, 1, hd), np.float32)
    wo_w = np.zeros((nl * 2 * nh, hd, d), np.float32)
    misc = np.zeros((nl, 10, 128), np.float32)
    ffn1 = np.zeros((nl, d, f), np.float32)
    ffn2 = np.zeros((nl, f, d), np.float32)

    layers = list(p['voc_layers']) + list(p['tf2_layers'])     # voc first, then tf_decoder2
    for l, L in enumerate(layers):
        for sc, pre in enumerate(('sa', 'ca')):                 # 0 = self-attn, 1 = cross-attn
            ipw, ipb = np.asarray(L[pre + '_w']), np.asarray(L[pre + '_b'])
            ow, ob = np.asarray(L[pre + '_ow']), np.asarray(L[pre + '_ob'])
            for qkv in range(3):
                W = ipw[qkv * d:(qkv + 1) * d, :]               # (d_out, d_in)
                Bv = ipb[qkv * d:(qkv + 1) * d]
                s = scale if qkv == 0 else 1.0                  # fold 1/sqrt(hd) into Q
                for h in range(nh):
                    att_w[_aidx(l, sc, qkv, h, nh)] = W[h * hd:(h + 1) * hd, :].T * s
                    att_b[_aidx(l, sc, qkv, h, nh), 0] = Bv[h * hd:(h + 1) * hd] * s
            for h in range(nh):
                wo_w[_oidx(l, sc, h, nh)] = ow[:, h * hd:(h + 1) * hd].T
            misc[l, 2 + sc, :d] = ob
        misc[l, 0, :f] = np.asarray(L['l1_b'])
        misc[l, 1, :d] = np.asarray(L['l2_b'])
        for i in range(3):
            misc[l, 4 + 2 * i, :d] = np.asarray(L['ln_w'])[i]
            misc[l, 5 + 2 * i, :d] = np.asarray(L['ln_b'])[i]
        ffn1[l] = np.asarray(L['l1_w']).T
        ffn2[l] = np.asarray(L['l2_w']).T

    # merged im/dac heads: lanes [0:32]=im hidden, [32:64]=dac hidden; score cols 0=im, 1=dac
    head_w = np.zeros((2, 128, 128), np.float32)
    head_b = np.zeros((2, 1, 128), np.float32)
    head_w[0, :d, :d2] = np.asarray(p['im0_w']).T
    head_w[0, :d, d2:2 * d2] = np.asarray(p['dac0_w']).T
    head_b[0, 0, :d2] = np.asarray(p['im0_b'])
    head_b[0, 0, d2:2 * d2] = np.asarray(p['dac0_b'])
    head_w[1, :d2, 0] = np.asarray(p['im2_w'])[0]
    head_w[1, d2:2 * d2, 1] = np.asarray(p['dac2_w'])[0]
    head_b[1, 0, 0] = float(np.asarray(p['im2_b'])[0])
    head_b[1, 0, 1] = float(np.asarray(p['dac2_b'])[0])

    # semantic head: slots 0..8 = per-tap block-diagonal 3x3 conv; slot 9 = 1x1 conv fused with
    # the W-direction bilinear upsample; slot 10 rows[0:16] lanes[0:8] = H-direction upsample.
    C, K, Wd, Hd = SEM_C, NUM_BEV_CLASSES, SEM_W, SEM_H
    Wo, Ho = LIDAR_W, LIDAR_H // 2
    W1 = np.asarray(p['sem1_w'])                # (Cout, Cin, 3, 3)
    W2 = np.asarray(p['sem2_w'])[:, :, 0, 0]    # (K, C)
    rx = _bilinear_matrix(Wo, Wd)               # (Wo, W)
    ry = _bilinear_matrix(Ho, Hd)               # (Ho, H)
    sem_w = np.zeros((11, 128, 128), np.float32)
    for t in range(9):
        dh, dw = t // 3, t % 3
        blk = W1[:, :, dh, dw].T                # (Cin, Cout)
        for w in range(Wd):
            sem_w[t, w * C:(w + 1) * C, w * C:(w + 1) * C] = blk
    for w in range(Wd):
        for kc in range(K):
            sem_w[9, w * C:(w + 1) * C, kc * Wo:(kc + 1) * Wo] = \
                W2[kc, :][:, None] * rx[:, w][None, :]
    sem_w[10, :Ho, :Hd] = ry
    sem_b = np.zeros((2, 1, 128), np.float32)
    sem_b[0, 0, :] = np.tile(np.asarray(p['sem1_b']), Wd)       # b1[c] at lane w*C+c
    sem_b[1, 0, :] = np.repeat(np.asarray(p['sem2_b']), Wo)     # b2[k] at lane k*Wo+wo

    bf = lambda a: jnp.asarray(a, jnp.bfloat16)
    f32 = lambda a: jnp.asarray(a, jnp.float32)
    return {
        'bev_w': bf(np.asarray(p['bev_down_w'])[:, :, 0, 0].T),               # (512, d)
        'kv_add': f32(np.asarray(p['keyval_emb']) + np.asarray(p['bev_down_b'])[None, :]),
        'status_w': f32(np.concatenate([np.asarray(p['status_w']).T,
                                        np.asarray(p['status_b'])[None, :]], 0)),  # (9, d)
        'attn_w': bf(att_w), 'attn_b': f32(att_b), 'wo_w': bf(wo_w),
        'misc': f32(misc), 'ffn_w1': bf(ffn1), 'ffn_w2': bf(ffn2),
        'head_w': bf(head_w), 'head_b': f32(head_b),
        'sem_w': bf(sem_w), 'sem_b': f32(sem_b),
    }


# ================================ forward ====================================

DEC_KEYS = ('attn_w', 'attn_b', 'wo_w', 'misc', 'ffn_w1', 'ffn_w2')
PER_LAYER_ROWS = {'attn_w': 2 * 3 * N_HEAD, 'attn_b': 2 * 3 * N_HEAD,
                  'wo_w': 2 * N_HEAD, 'misc': 1, 'ffn_w1': 1, 'ffn_w2': 1}


def _dec_slice(packed, lo, hi):
    return [packed[k][lo * PER_LAYER_ROWS[k]:hi * PER_LAYER_ROWS[k]] for k in DEC_KEYS]


def _full_spec(a):
    nd = a.ndim
    return pl.BlockSpec(a.shape, lambda b, nd=nd: (0,) * nd)


@jax.jit
def goalflow_navi_forward(packed, bev_feature, bev_feature_upscale,
                          status_feature, cluster_points):
    bsz = status_feature.shape[0]
    n_tok = BEV_H * BEV_W
    f32 = jnp.float32

    # --- tiny batch-invariant / layout prep left to XLA (negligible) ---
    cpe = pos2posemb2d(cluster_points, D_MODEL // 2).astype(f32)              # (N_VOC, d)
    bev_tok = jnp.transpose(bev_feature, (0, 2, 3, 1)).reshape(
        bsz, n_tok, BEV_C_IN).astype(jnp.bfloat16)                            # (B, 64, 512)
    xp = jnp.pad(jnp.transpose(bev_feature_upscale, (0, 2, 3, 1)),
                 ((0, 0), (1, 1), (1, 1), (0, 0)))                            # (B, 10, 18, 8)
    cols9 = jnp.stack(
        [xp[:, dh:dh + SEM_H, dw:dw + SEM_W, :].reshape(bsz, SEM_H, SEM_W * SEM_C)
         for dh in range(3) for dw in range(3)], axis=1).astype(jnp.bfloat16)  # (B, 9, 8, 128)
    status_aug = jnp.concatenate(
        [status_feature.astype(f32), jnp.ones((bsz, 1), f32)], axis=-1
    ).reshape(bsz, 1, STATUS_DIM + 1)

    dec_voc = _dec_slice(packed, 0, N_LAYERS)
    dec_tf2 = _dec_slice(packed, N_LAYERS, NL_TOTAL)

    # --- kernel 1: batch-invariant voc decoder, computed once ---
    voc_q = pl.pallas_call(
        functools.partial(_voc_decoder_kernel, nhead=N_HEAD, n_layers=N_LAYERS),
        grid=(1,),
        in_specs=[_full_spec(cpe)] + [_full_spec(a) for a in dec_voc],
        out_specs=pl.BlockSpec((N_VOC, D_MODEL), lambda i: (0, 0)),
        out_shape=jax.ShapeDtypeStruct((N_VOC, D_MODEL), f32),
        compiler_params=pltpu.CompilerParams(dimension_semantics=("arbitrary",)),
    )(cpe, *dec_voc)

    # --- kernel 2: per-batch fused forward (one TensorCore per batch element on v7x) ---
    shared = [voc_q, packed['bev_w'], packed['kv_add'], packed['status_w'],
              *dec_tf2, packed['head_w'], packed['head_b'], packed['sem_w'], packed['sem_b']]
    out = pl.pallas_call(
        functools.partial(_main_kernel, nhead=N_HEAD, n_layers=N_LAYERS),
        grid=(bsz,),
        in_specs=[pl.BlockSpec((1, n_tok, BEV_C_IN), lambda b: (b, 0, 0)),
                  pl.BlockSpec((1, 9, SEM_H, SEM_W * SEM_C), lambda b: (b, 0, 0, 0)),
                  pl.BlockSpec((1, 1, STATUS_DIM + 1), lambda b: (b, 0, 0))]
                 + [_full_spec(a) for a in shared],
        out_specs=pl.BlockSpec((1, 2, OUT_ROWS, 128), lambda b: (b, 0, 0, 0)),
        out_shape=jax.ShapeDtypeStruct((bsz, 2, OUT_ROWS, 128), f32),
        compiler_params=pltpu.CompilerParams(dimension_semantics=("parallel",)),
    )(bev_tok, cols9, status_aug, *shared)

    # --- tiny wrapper-side unpacking of the single lane-dense slab ---
    sem_slab = out[:, 0]                                                      # (B, 16, 128)
    bev_semantic_map = jnp.transpose(
        sem_slab.reshape(bsz, LIDAR_H // 2, NUM_BEV_CLASSES, LIDAR_W), (0, 2, 1, 3))
    scores = out[:, 1]                                                        # (B, 16, 128)
    return {'bev_semantic_map': bev_semantic_map,
            'im_scores': scores[..., 0:1],
            'dac_scores': scores[..., 1:2]}


# ================================== main =====================================

if __name__ == "__main__":
    key = jax.random.PRNGKey(0)
    k_params, k1, k2, k3, k4 = jax.random.split(key, 5)

    params = init_params(k_params)
    packed = pack_params(params)

    # synthetic V299Backbone outputs + status + cluster vocabulary
    bev_feature = jax.random.normal(k1, (B, BEV_C_IN, BEV_H, BEV_W), jnp.float32)       # NCHW
    bev_feature_upscale = jax.random.normal(k2, (B, SEM_C, SEM_H, SEM_W), jnp.float32)  # NCHW
    status_feature = jax.random.normal(k3, (B, STATUS_DIM), jnp.float32)
    cluster_points = jax.random.uniform(k4, (N_VOC, 3), jnp.float32, minval=-1.0, maxval=1.0)

    out = goalflow_navi_forward(packed, bev_feature, bev_feature_upscale,
                                status_feature, cluster_points)
    out = jax.block_until_ready(out)

    assert out['bev_semantic_map'].shape == (B, NUM_BEV_CLASSES, LIDAR_H // 2, LIDAR_W)
    assert out['im_scores'].shape == (B, N_VOC, 1)
    assert out['dac_scores'].shape == (B, N_VOC, 1)
    for v in out.values():
        assert bool(jnp.all(jnp.isfinite(v)))
    print("KERNEL_OK")
</pallas_src>

<mosaic_0001>
module attributes {stable_mosaic.version = 11 : i64} {
  func.func @_voc_decoder_kernel(%arg0: i32, %arg1: memref<16x64xf32, #tpu.memory_space<vmem>>, %arg2: memref<24x64x32xbf16, #tpu.memory_space<vmem>>, %arg3: memref<24x1x32xf32, #tpu.memory_space<vmem>>, %arg4: memref<8x32x64xbf16, #tpu.memory_space<vmem>>, %arg5: memref<2x10x128xf32, #tpu.memory_space<vmem>>, %arg6: memref<2x64x128xbf16, #tpu.memory_space<vmem>>, %arg7: memref<2x128x64xbf16, #tpu.memory_space<vmem>>, %arg8: memref<16x64xf32, #tpu.memory_space<vmem>>) attributes {dimension_semantics = [#tpu.dimension_semantics<arbitrary>], iteration_bounds = array<i64: 1>, scalar_prefetch = 0 : i64, scratch_operands = 0 : i64, tpu.core_type = #tpu.core_type<tc>, window_params = [{pipeline_mode = #tpu.pipeline_mode<synchronous>, transform_indices = @transform_0, window_bounds = array<i64: 16, 64>}, {pipeline_mode = #tpu.pipeline_mode<synchronous>, transform_indices = @transform_1, window_bounds = array<i64: 24, 64, 32>}, {pipeline_mode = #tpu.pipeline_mode<synchronous>, transform_indices = @transform_2, window_bounds = array<i64: 24, 1, 32>}, {pipeline_mode = #tpu.pipeline_mode<synchronous>, transform_indices = @transform_3, window_bounds = array<i64: 8, 32, 64>}, {pipeline_mode = #tpu.pipeline_mode<synchronous>, transform_indices = @transform_4, window_bounds = array<i64: 2, 10, 128>}, {pipeline_mode = #tpu.pipeline_mode<synchronous>, transform_indices = @transform_5, window_bounds = array<i64: 2, 64, 128>}, {pipeline_mode = #tpu.pipeline_mode<synchronous>, transform_indices = @transform_6, window_bounds = array<i64: 2, 128, 64>}, {pipeline_mode = #tpu.pipeline_mode<synchronous>, transform_indices = @transform_7, window_bounds = array<i64: 16, 64>}]} {
    %c0 = arith.constant 0 : index
    %c0_0 = arith.constant 0 : index
    %0 = vector.load %arg1[%c0, %c0_0] : memref<16x64xf32, #tpu.memory_space<vmem>>, vector<16x64xf32>
    %1 = arith.truncf %0 : vector<16x64xf32> to vector<16x64xbf16>
    %2 = arith.truncf %0 : vector<16x64xf32> to vector<16x64xbf16>
    %c0_1 = arith.constant 0 : index
    %c0_2 = arith.constant 0 : index
    %c0_3 = arith.constant 0 : index
    %3 = vector.load %arg2[%c0_1, %c0_2, %c0_3] : memref<24x64x32xbf16, #tpu.memory_space<vmem>>, vector<1x64x32xbf16>
    %4 = vector.shape_cast %3 : vector<1x64x32xbf16> to vector<64x32xbf16>
    %cst = arith.constant dense<0.000000e+00> : vector<16x32xf32>
    %5 = tpu.matmul %1, %4, %cst {dimension_numbers = #tpu.dot_dimension_numbers<[1], [0], [0], [1], [0, 0, 1, 1], [], []>} : vector<16x64xbf16>, vector<64x32xbf16>, vector<16x32xf32> -> vector<16x32xf32>
    %c0_4 = arith.constant 0 : index
    %c0_5 = arith.constant 0 : index
    %c0_6 = arith.constant 0 : index
    %6 = vector.load %arg3[%c0_4, %c0_5, %c0_6] : memref<24x1x32xf32, #tpu.memory_space<vmem>>, vector<1x1x32xf32>
    %7 = vector.shape_cast %6 : vector<1x1x32xf32> to vector<1x32xf32>
    %8 = vector.broadcast %7 : vector<1x32xf32> to vector<16x32xf32>
    %9 = arith.addf %5, %8 : vector<16x32xf32>
    %c2 = arith.constant 2 : index
    %c0_7 = arith.constant 0 : index
    %c0_8 = arith.constant 0 : index
    %10 = vector.load %arg2[%c2, %c0_7, %c0_8] : memref<24x64x32xbf16, #tpu.memory_space<vmem>>, vector<1x64x32xbf16>
    %11 = vector.shape_cast %10 : vector<1x64x32xbf16> to vector<64x32xbf16>
    %cst_9 = arith.constant dense<0.000000e+00> : vector<16x32xf32>
    %12 = tpu.matmul %2, %11, %cst_9 {dimension_numbers = #tpu.dot_dimension_numbers<[1], [0], [0], [1], [0, 0, 1, 1], [], []>} : vector<16x64xbf16>, vector<64x32xbf16>, vector<16x32xf32> -> vector<16x32xf32>
    %c2_10 = arith.constant 2 : index
    %c0_11 = arith.constant 0 : index
    %c0_12 = arith.constant 0 : index
    %13 = vector.load %arg3[%c2_10, %c0_11, %c0_12] : memref<24x1x32xf32, #tpu.memory_space<vmem>>, vector<1x1x32xf32>
    %14 = vector.shape_cast %13 : vector<1x1x32xf32> to vector<1x32xf32>
    %15 = vector.broadcast %14 : vector<1x32xf32> to vector<16x32xf32>
    %16 = arith.addf %12, %15 : vector<16x32xf32>
    %c4 = arith.constant 4 : index
    %c0_13 = arith.constant 0 : index
    %c0_14 = arith.constant 0 : index
    %17 = vector.load %arg2[%c4, %c0_13, %c0_14] : memref<24x64x32xbf16, #tpu.memory_space<vmem>>, vector<1x64x32xbf16>
    %18 = vector.shape_cast %17 : vector<1x64x32xbf16> to vector<64x32xbf16>
    %cst_15 = arith.constant dense<0.000000e+00> : vector<16x32xf32>
    %19 = tpu.matmul %2, %18, %cst_15 {dimension_numbers = #tpu.dot_dimension_numbers<[1], [0], [0], [1], [0, 0, 1, 1], [], []>} : vector<16x64xbf16>, vector<64x32xbf16>, vector<16x32xf32> -> vector<16x32xf32>
    %c4_16 = arith.constant 4 : index
    %c0_17 = arith.constant 0 : index
    %c0_18 = arith.constant 0 : index
    %20 = vector.load %arg3[%c4_16, %c0_17, %c0_18] : memref<24x1x32xf32, #tpu.memory_space<vmem>>, vector<1x1x32xf32>
    %21 = vector.shape_cast %20 : vector<1x1x32xf32> to vector<1x32xf32>
    %22 = vector.broadcast %21 : vector<1x32xf32> to vector<16x32xf32>
    %23 = arith.addf %19, %22 : vector<16x32xf32>
    %24 = arith.truncf %9 : vector<16x32xf32> to vector<16x32xbf16>
    %25 = arith.truncf %16 : vector<16x32xf32> to vector<16x32xbf16>
    %cst_19 = arith.constant dense<0.000000e+00> : vector<16x16xf32>
    %26 = tpu.matmul %24, %25, %cst_19 {dimension_numbers = #tpu.dot_dimension_numbers<[1], [1], [0], [0], [0, 0, 1, 0], [], []>} : vector<16x32xbf16>, vector<16x32xbf16>, vector<16x16xf32> -> vector<16x16xf32>
    %cst_20 = arith.constant dense<0xFF800000> : vector<16xf32>
    %27 = vector.multi_reduction <maximumf>, %26, %cst_20 [1] : vector<16x16xf32> to vector<16xf32>
    %28 = vector.shape_cast %27 : vector<16xf32> to vector<16x1xf32>
    %29 = vector.broadcast %28 : vector<16x1xf32> to vector<16x16xf32>
    %30 = arith.subf %26, %29 : vector<16x16xf32>
    %31 = math.exp %30 : vector<16x16xf32>
    %cst_21 = arith.constant dense<0.000000e+00> : vector<16xf32>
    %32 = vector.multi_reduction <add>, %31, %cst_21 [1] : vector<16x16xf32> to vector<16xf32>
    %33 = vector.shape_cast %32 : vector<16xf32> to vector<16x1xf32>
    %34 = tpu.reciprocal %33 {approx = true} : vector<16x1xf32> -> vector<16x1xf32>
    %35 = vector.broadcast %34 : vector<16x1xf32> to vector<16x16xf32>
    %36 = arith.mulf %31, %35 : vector<16x16xf32>
    %37 = arith.truncf %36 : vector<16x16xf32> to vector<16x16xbf16>
    %38 = arith.truncf %23 : vector<16x32xf32> to vector<16x32xbf16>
    %cst_22 = arith.constant dense<0.000000e+00> : vector<16x32xf32>
    %39 = tpu.matmul %37, %38, %cst_22 {dimension_numbers = #tpu.dot_dimension_numbers<[1], [0], [0], [1], [0, 0, 1, 1], [], []>} : vector<16x16xbf16>, vector<16x32xbf16>, vector<16x32xf32> -> vector<16x32xf32>
    %40 = arith.truncf %39 : vector<16x32xf32> to vector<16x32xbf16>
    %c0_23 = arith.constant 0 : index
    %c0_24 = arith.constant 0 : index
    %c0_25 = arith.constant 0 : index
    %41 = vector.load %arg4[%c0_23, %c0_24, %c0_25] : memref<8x32x64xbf16, #tpu.memory_space<vmem>>, vector<1x32x64xbf16>
    %42 = vector.shape_cast %41 : vector<1x32x64xbf16> to vector<32x64xbf16>
    %cst_26 = arith.constant dense<0.000000e+00> : vector<16x64xf32>
    %43 = tpu.matmul %40, %42, %cst_26 {dimension_numbers = #tpu.dot_dimension_numbers<[1], [0], [0], [1], [0, 0, 1, 1], [], []>} : vector<16x32xbf16>, vector<32x64xbf16>, vector<16x64xf32> -> vector<16x64xf32>
    %c1 = arith.constant 1 : index
    %c0_27 = arith.constant 0 : index
    %c0_28 = arith.constant 0 : index
    %44 = vector.load %arg2[%c1, %c0_27, %c0_28] : memref<24x64x32xbf16, #tpu.memory_space<vmem>>, vector<1x64x32xbf16>
    %45 = vector.shape_cast %44 : vector<1x64x32xbf16> to vector<64x32xbf16>
    %cst_29 = arith.constant dense<0.000000e+00> : vector<16x32xf32>
    %46 = tpu.matmul %1, %45, %cst_29 {dimension_numbers = #tpu.dot_dimension_numbers<[1], [0], [0], [1], [0, 0, 1, 1], [], []>} : vector<16x64xbf16>, vector<64x32xbf16>, vector<16x32xf32> -> vector<16x32xf32>
    %c1_30 = arith.constant 1 : index
    %c0_31 = arith.constant 0 : index
    %c0_32 = arith.constant 0 : index
    %47 = vector.load %arg3[%c1_30, %c0_31, %c0_32] : memref<24x1x32xf32, #tpu.memory_space<vmem>>, vector<1x1x32xf32>
    %48 = vector.shape_cast %47 : vector<1x1x32xf32> to vector<1x32xf32>
    %49 = vector.broadcast %48 : vector<1x32xf32> to vector<16x32xf32>
    %50 = arith.addf %46, %49 : vector<16x32xf32>
    %c3 = arith.constant 3 : index
    %c0_33 = arith.constant 0 : index
    %c0_34 = arith.constant 0 : index
    %51 = vector.load %arg2[%c3, %c0_33, %c0_34] : memref<24x64x32xbf16, #tpu.memory_space<vmem>>, vector<1x64x32xbf16>
    %52 = vector.shape_cast %51 : vector<1x64x32xbf16> to vector<64x32xbf16>
    %cst_35 = arith.constant dense<0.000000e+00> : vector<16x32xf32>
    %53 = tpu.matmul %2, %52, %cst_35 {dimension_numbers = #tpu.dot_dimension_numbers<[1], [0], [0], [1], [0, 0, 1, 1], [], []>} : vector<16x64xbf16>, vector<64x32xbf16>, vector<16x32xf32> -> vector<16x32xf32>
    %c3_36 = arith.constant 3 : index
    %c0_37 = arith.constant 0 : index
    %c0_38 = arith.constant 0 : index
    %54 = vector.load %arg3[%c3_36, %c0_37, %c0_38] : memref<24x1x32xf32, #tpu.memory_space<vmem>>, vector<1x1x32xf32>
    %55 = vector.shape_cast %54 : vector<1x1x32xf32> to vector<1x32xf32>
    %56 = vector.broadcast %55 : vector<1x32xf32> to vector<16x32xf32>
    %57 = arith.addf %53, %56 : vector<16x32xf32>
    %c5 = arith.constant 5 : index
    %c0_39 = arith.constant 0 : index
    %c0_40 = arith.constant 0 : index
    %58 = vector.load %arg2[%c5, %c0_39, %c0_40] : memref<24x64x32xbf16, #tpu.memory_space<vmem>>, vector<1x64x32xbf16>
    %59 = vector.shape_cast %58 : vector<1x64x32xbf16> to vector<64x32xbf16>
    %cst_41 = arith.constant dense<0.000000e+00> : vector<16x32xf32>
    %60 = tpu.matmul %2, %59, %cst_41 {dimension_numbers = #tpu.dot_dimension_numbers<[1], [0], [0], [1], [0, 0, 1, 1], [], []>} : vector<16x64xbf16>, vector<64x32xbf16>, vector<16x32xf32> -> vector<16x32xf32>
    %c5_42 = arith.constant 5 : index
    %c0_43 = arith.constant 0 : index
    %c0_44 = arith.constant 0 : index
    %61 = vector.load %arg3[%c5_42, %c0_43, %c0_44] : memref<24x1x32xf32, #tpu.memory_space<vmem>>, vector<1x1x32xf32>
    %62 = vector.shape_cast %61 : vector<1x1x32xf32> to vector<1x32xf32>
    %63 = vector.broadcast %62 : vector<1x32xf32> to vector<16x32xf32>
    %64 = arith.addf %60, %63 : vector<16x32xf32>
    %65 = arith.truncf %50 : vector<16x32xf32> to vector<16x32xbf16>
    %66 = arith.truncf %57 : vector<16x32xf32> to vector<16x32xbf16>
    %cst_45 = arith.constant dense<0.000000e+00> : vector<16x16xf32>
    %67 = tpu.matmul %65, %66, %cst_45 {dimension_numbers = #tpu.dot_dimension_numbers<[1], [1], [0], [0], [0, 0, 1, 0], [], []>} : vector<16x32xbf16>, vector<16x32xbf16>, vector<16x16xf32> -> vector<16x16xf32>
    %cst_46 = arith.constant dense<0xFF800000> : vector<16xf32>
    %68 = vector.multi_reduction <maximumf>, %67, %cst_46 [1] : vector<16x16xf32> to vector<16xf32>
    %69 = vector.shape_cast %68 : vector<16xf32> to vector<16x1xf32>
    %70 = vector.broadcast %69 : vector<16x1xf32> to vector<16x16xf32>
    %71 = arith.subf %67, %70 : vector<16x16xf32>
    %72 = math.exp %71 : vector<16x16xf32>
    %cst_47 = arith.constant dense<0.000000e+00> : vector<16xf32>
    %73 = vector.multi_reduction <add>, %72, %cst_47 [1] : vector<16x16xf32> to vector<16xf32>
    %74 = vector.shape_cast %73 : vector<16xf32> to vector<16x1xf32>
    %75 = tpu.reciprocal %74 {approx = true} : vector<16x1xf32> -> vector<16x1xf32>
    %76 = vector.broadcast %75 : vector<16x1xf32> to vector<16x16xf32>
    %77 = arith.mulf %72, %76 : vector<16x16xf32>
    %78 = arith.truncf %77 : vector<16x16xf32> to vector<16x16xbf16>
    %79 = arith.truncf %64 : vector<16x32xf32> to vector<16x32xbf16>
    %cst_48 = arith.constant dense<0.000000e+00> : vector<16x32xf32>
    %80 = tpu.matmul %78, %79, %cst_48 {dimension_numbers = #tpu.dot_dimension_numbers<[1], [0], [0], [1], [0, 0, 1, 1], [], []>} : vector<16x16xbf16>, vector<16x32xbf16>, vector<16x32xf32> -> vector<16x32xf32>
    %81 = arith.truncf %80 : vector<16x32xf32> to vector<16x32xbf16>
    %c1_49 = arith.constant 1 : index
    %c0_50 = arith.constant 0 : index
    %c0_51 = arith.constant 0 : index
    %82 = vector.load %arg4[%c1_49, %c0_50, %c0_51] : memref<8x32x64xbf16, #tpu.memory_space<vmem>>, vector<1x32x64xbf16>
    %83 = vector.shape_cast %82 : vector<1x32x64xbf16> to vector<32x64xbf16>
    %cst_52 = arith.constant dense<0.000000e+00> : vector<16x64xf32>
    %84 = tpu.matmul %81, %83, %cst_52 {dimension_numbers = #tpu.dot_dimension_numbers<[1], [0], [0], [1], [0, 0, 1, 1], [], []>} : vector<16x32xbf16>, vector<32x64xbf16>, vector<16x64xf32> -> vector<16x64xf32>
    %85 = arith.addf %43, %84 : vector<16x64xf32>
    %c0_53 = arith.constant 0 : index
    %c2_54 = arith.constant 2 : index
    %c0_55 = arith.constant 0 : index
    %86 = vector.load %arg5[%c0_53, %c2_54, %c0_55] : memref<2x10x128xf32, #tpu.memory_space<vmem>>, vector<1x1x64xf32>
    %87 = vector.shape_cast %86 : vector<1x1x64xf32> to vector<1x64xf32>
    %88 = vector.broadcast %87 : vector<1x64xf32> to vector<16x64xf32>
    %89 = arith.addf %85, %88 : vector<16x64xf32>
    %90 = arith.addf %0, %89 : vector<16x64xf32>
    %c0_56 = arith.constant 0 : index
    %c4_57 = arith.constant 4 : index
    %c0_58 = arith.constant 0 : index
    %91 = vector.load %arg5[%c0_56, %c4_57, %c0_58] : memref<2x10x128xf32, #tpu.memory_space<vmem>>, vector<1x1x64xf32>
    %92 = vector.shape_cast %91 : vector<1x1x64xf32> to vector<1x64xf32>
    %c0_59 = arith.constant 0 : index
    %c5_60 = arith.constant 5 : index
    %c0_61 = arith.constant 0 : index
    %93 = vector.load %arg5[%c0_59, %c5_60, %c0_61] : memref<2x10x128xf32, #tpu.memory_space<vmem>>, vector<1x1x64xf32>
    %94 = vector.shape_cast %93 : vector<1x1x64xf32> to vector<1x64xf32>
    %cst_62 = arith.constant dense<0.000000e+00> : vector<16xf32>
    %95 = vector.multi_reduction <add>, %90, %cst_62 [1] : vector<16x64xf32> to vector<16xf32>
    %96 = vector.shape_cast %95 : vector<16xf32> to vector<16x1xf32>
    %cst_63 = arith.constant 6.400000e+01 : f32
    %97 = vector.broadcast %cst_63 : f32 to vector<16x1xf32>
    %98 = arith.divf %96, %97 : vector<16x1xf32>
    %99 = vector.broadcast %98 : vector<16x1xf32> to vector<16x64xf32>
    %100 = arith.subf %90, %99 : vector<16x64xf32>
    %101 = arith.mulf %100, %100 : vector<16x64xf32>
    %cst_64 = arith.constant dense<0.000000e+00> : vector<16xf32>
    %102 = vector.multi_reduction <add>, %101, %cst_64 [1] : vector<16x64xf32> to vector<16xf32>
    %103 = vector.shape_cast %102 : vector<16xf32> to vector<16x1xf32>
    %cst_65 = arith.constant 6.400000e+01 : f32
    %104 = vector.broadcast %cst_65 : f32 to vector<16x1xf32>
    %105 = arith.divf %103, %104 : vector<16x1xf32>
    %106 = vector.broadcast %98 : vector<16x1xf32> to vector<16x64xf32>
    %107 = arith.subf %90, %106 : vector<16x64xf32>
    %cst_66 = arith.constant 9.99999974E-6 : f32
    %108 = vector.broadcast %cst_66 : f32 to vector<16x1xf32>
    %109 = arith.addf %105, %108 : vector<16x1xf32>
    %110 = math.rsqrt %109 : vector<16x1xf32>
    %111 = vector.broadcast %110 : vector<16x1xf32> to vector<16x64xf32>
    %112 = arith.mulf %107, %111 : vector<16x64xf32>
    %113 = vector.broadcast %92 : vector<1x64xf32> to vector<16x64xf32>
    %114 = arith.mulf %112, %113 : vector<16x64xf32>
    %115 = vector.broadcast %94 : vector<1x64xf32> to vector<16x64xf32>
    %116 = arith.addf %114, %115 : vector<16x64xf32>
    %117 = arith.truncf %116 : vector<16x64xf32> to vector<16x64xbf16>
    %118 = arith.truncf %0 : vector<16x64xf32> to vector<16x64xbf16>
    %c6 = arith.constant 6 : index
    %c0_67 = arith.constant 0 : index
    %c0_68 = arith.constant 0 : index
    %119 = vector.load %arg2[%c6, %c0_67, %c0_68] : memref<24x64x32xbf16, #tpu.memory_space<vmem>>, vector<1x64x32xbf16>
    %120 = vector.shape_cast %119 : vector<1x64x32xbf16> to vector<64x32xbf16>
    %cst_69 = arith.constant dense<0.000000e+00> : vector<16x32xf32>
    %121 = tpu.matmul %117, %120, %cst_69 {dimension_numbers = #tpu.dot_dimension_numbers<[1], [0], [0], [1], [0, 0, 1, 1], [], []>} : vector<16x64xbf16>, vector<64x32xbf16>, vector<16x32xf32> -> vector<16x32xf32>
    %c6_70 = arith.constant 6 : index
    %c0_71 = arith.constant 0 : index
    %c0_72 = arith.constant 0 : index
    %122 = vector.load %arg3[%c6_70, %c0_71, %c0_72] : memref<24x1x32xf32, #tpu.memory_space<vmem>>, vector<1x1x32xf32>
    %123 = vector.shape_cast %122 : vector<1x1x32xf32> to vector<1x32xf32>
    %124 = vector.broadcast %123 : vector<1x32xf32> to vector<16x32xf32>
    %125 = arith.addf %121, %124 : vector<16x32xf32>
    %c8 = arith.constant 8 : index
    %c0_73 = arith.constant 0 : index
    %c0_74 = arith.constant 0 : index
    %126 = vector.load %arg2[%c8, %c0_73, %c0_74] : memref<24x64x32xbf16, #tpu.memory_space<vmem>>, vector<1x64x32xbf16>
    %127 = vector.shape_cast %126 : vector<1x64x32xbf16> to vector<64x32xbf16>
    %cst_75 = arith.constant dense<0.000000e+00> : vector<16x32xf32>
    %128 = tpu.matmul %118, %127, %cst_75 {dimension_numbers = #tpu.dot_dimension_numbers<[1], [0], [0], [1], [0, 0, 1, 1], [], []>} : vector<16x64xbf16>, vector<64x32xbf16>, vector<16x32xf32> -> vector<16x32xf32>
    %c8_76 = arith.constant 8 : index
    %c0_77 = arith.constant 0 : index
    %c0_78 = arith.constant 0 : index
    %129 = vector.load %arg3[%c8_76, %c0_77, %c0_78] : memref<24x1x32xf32, #tpu.memory_space<vmem>>, vector<1x1x32xf32>
    %130 = vector.shape_cast %129 : vector<1x1x32xf32> to vector<1x32xf32>
    %131 = vector.broadcast %130 : vector<1x32xf32> to vector<16x32xf32>
    %132 = arith.addf %128, %131 : vector<16x32xf32>
    %c10 = arith.constant 10 : index
    %c0_79 = arith.constant 0 : index
    %c0_80 = arith.constant 0 : index
    %133 = vector.load %arg2[%c10, %c0_79, %c0_80] : memref<24x64x32xbf16, #tpu.memory_space<vmem>>, vector<1x64x32xbf16>
    %134 = vector.shape_cast %133 : vector<1x64x32xbf16> to vector<64x32xbf16>
    %cst_81 = arith.constant dense<0.000000e+00> : vector<16x32xf32>
    %135 = tpu.matmul %118, %134, %cst_81 {dimension_numbers = #tpu.dot_dimension_numbers<[1], [0], [0], [1], [0, 0, 1, 1], [], []>} : vector<16x64xbf16>, vector<64x32xbf16>, vector<16x32xf32> -> vector<16x32xf32>
    %c10_82 = arith.constant 10 : index
    %c0_83 = arith.constant 0 : index
    %c0_84 = arith.constant 0 : index
    %136 = vector.load %arg3[%c10_82, %c0_83, %c0_84] : memref<24x1x32xf32, #tpu.memory_space<vmem>>, vector<1x1x32xf32>
    %137 = vector.shape_cast %136 : vector<1x1x32xf32> to vector<1x32xf32>
    %138 = vector.broadcast %137 : vector<1x32xf32> to vector<16x32xf32>
    %139 = arith.addf %135, %138 : vector<16x32xf32>
    %140 = arith.truncf %125 : vector<16x32xf32> to vector<16x32xbf16>
    %141 = arith.truncf %132 : vector<16x32xf32> to vector<16x32xbf16>
    %cst_85 = arith.constant dense<0.000000e+00> : vector<16x16xf32>
    %142 = tpu.matmul %140, %141, %cst_85 {dimension_numbers = #tpu.dot_dimension_numbers<[1], [1], [0], [0], [0, 0, 1, 0], [], []>} : vector<16x32xbf16>, vector<16x32xbf16>, vector<16x16xf32> -> vector<16x16xf32>
    %cst_86 = arith.constant dense<0xFF800000> : vector<16xf32>
    %143 = vector.multi_reduction <maximumf>, %142, %cst_86 [1] : vector<16x16xf32> to vector<16xf32>
    %144 = vector.shape_cast %143 : vector<16xf32> to vector<16x1xf32>
    %145 = vector.broadcast %144 : vector<16x1xf32> to vector<16x16xf32>
    %146 = arith.subf %142, %145 : vector<16x16xf32>
    %147 = math.exp %146 : vector<16x16xf32>
    %cst_87 = arith.constant dense<0.000000e+00> : vector<16xf32>
    %148 = vector.multi_reduction <add>, %147, %cst_87 [1] : vector<16x16xf32> to vector<16xf32>
    %149 = vector.shape_cast %148 : vector<16xf32> to vector<16x1xf32>
    %150 = tpu.reciprocal %149 {approx = true} : vector<16x1xf32> -> vector<16x1xf32>
    %151 = vector.broadcast %150 : vector<16x1xf32> to vector<16x16xf32>
    %152 = arith.mulf %147, %151 : vector<16x16xf32>
    %153 = arith.truncf %152 : vector<16x16xf32> to vector<16x16xbf16>
    %154 = arith.truncf %139 : vector<16x32xf32> to vector<16x32xbf16>
    %cst_88 = arith.constant dense<0.000000e+00> : vector<16x32xf32>
    %155 = tpu.matmul %153, %154, %cst_88 {dimension_numbers = #tpu.dot_dimension_numbers<[1], [0], [0], [1], [0, 0, 1, 1], [], []>} : vector<16x16xbf16>, vector<16x32xbf16>, vector<16x32xf32> -> vector<16x32xf32>
    %156 = arith.truncf %155 : vector<16x32xf32> to vector<16x32xbf16>
    %c2_89 = arith.constant 2 : index
    %c0_90 = arith.constant 0 : index
    %c0_91 = arith.constant 0 : index
    %157 = vector.load %arg4[%c2_89, %c0_90, %c0_91] : memref<8x32x64xbf16, #tpu.memory_space<vmem>>, vector<1x32x64xbf16>
    %158 = vector.shape_cast %157 : vector<1x32x64xbf16> to vector<32x64xbf16>
    %cst_92 = arith.constant dense<0.000000e+00> : vector<16x64xf32>
    %159 = tpu.matmul %156, %158, %cst_92 {dimension_numbers = #tpu.dot_dimension_numbers<[1], [0], [0], [1], [0, 0, 1, 1], [], []>} : vector<16x32xbf16>, vector<32x64xbf16>, vector<16x64xf32> -> vector<16x64xf32>
    %c7 = arith.constant 7 : index
    %c0_93 = arith.constant 0 : index
    %c0_94 = arith.constant 0 : index
    %160 = vector.load %arg2[%c7, %c0_93, %c0_94] : memref<24x64x32xbf16, #tpu.memory_space<vmem>>, vector<1x64x32xbf16>
    %161 = vector.shape_cast %160 : vector<1x64x32xbf16> to vector<64x32xbf16>
    %cst_95 = arith.constant dense<0.000000e+00> : vector<16x32xf32>
    %162 = tpu.matmul %117, %161, %cst_95 {dimension_numbers = #tpu.dot_dimension_numbers<[1], [0], [0], [1], [0, 0, 1, 1], [], []>} : vector<16x64xbf16>, vector<64x32xbf16>, vector<16x32xf32> -> vector<16x32xf32>
    %c7_96 = arith.constant 7 : index
    %c0_97 = arith.constant 0 : index
    %c0_98 = arith.constant 0 : index
    %163 = vector.load %arg3[%c7_96, %c0_97, %c0_98] : memref<24x1x32xf32, #tpu.memory_space<vmem>>, vector<1x1x32xf32>
    %164 = vector.shape_cast %163 : vector<1x1x32xf32> to vector<1x32xf32>
    %165 = vector.broadcast %164 : vector<1x32xf32> to vector<16x32xf32>
    %166 = arith.addf %162, %165 : vector<16x32xf32>
    %c9 = arith.constant 9 : index
    %c0_99 = arith.constant 0 : index
    %c0_100 = arith.constant 0 : index
    %167 = vector.load %arg2[%c9, %c0_99, %c0_100] : memref<24x64x32xbf16, #tpu.memory_space<vmem>>, vector<1x64x32xbf16>
    %168 = vector.shape_cast %167 : vector<1x64x32xbf16> to vector<64x32xbf16>
    %cst_101 = arith.constant dense<0.000000e+00> : vector<16x32xf32>
    %169 = tpu.matmul %118, %168, %cst_101 {dimension_numbers = #tpu.dot_dimension_numbers<[1], [0], [0], [1], [0, 0, 1, 1], [], []>} : vector<16x64xbf16>, vector<64x32xbf16>, vector<16x32xf32> -> vector<16x32xf32>
    %c9_102 = arith.constant 9 : index
    %c0_103 = arith.constant 0 : index
    %c0_104 = arith.constant 0 : index
    %170 = vector.load %arg3[%c9_102, %c0_103, %c0_104] : memref<24x1x32xf32, #tpu.memory_space<vmem>>, vector<1x1x32xf32>
    %171 = vector.shape_cast %170 : vector<1x1x32xf32> to vector<1x32xf32>
    %172 = vector.broadcast %171 : vector<1x32xf32> to vector<16x32xf32>
    %173 = arith.addf %169, %172 : vector<16x32xf32>
    %c11 = arith.constant 11 : index
    %c0_105 = arith.constant 0 : index
    %c0_106 = arith.constant 0 : index
    %174 = vector.load %arg2[%c11, %c0_105, %c0_106] : memref<24x64x32xbf16, #tpu.memory_space<vmem>>, vector<1x64x32xbf16>
    %175 = vector.shape_cast %174 : vector<1x64x32xbf16> to vector<64x32xbf16>
    %cst_107 = arith.constant dense<0.000000e+00> : vector<16x32xf32>
    %176 = tpu.matmul %118, %175, %cst_107 {dimension_numbers = #tpu.dot_dimension_numbers<[1], [0], [0], [1], [0, 0, 1, 1], [], []>} : vector<16x64xbf16>, vector<64x32xbf16>, vector<16x32xf32> -> vector<16x32xf32>
    %c11_108 = arith.constant 11 : index
    %c0_109 = arith.constant 0 : index
    %c0_110 = arith.constant 0 : index
    %177 = vector.load %arg3[%c11_108, %c0_109, %c0_110] : memref<24x1x32xf32, #tpu.memory_space<vmem>>, vector<1x1x32xf32>
    %178 = vector.shape_cast %177 : vector<1x1x32xf32> to vector<1x32xf32>
    %179 = vector.broadcast %178 : vector<1x32xf32> to vector<16x32xf32>
    %180 = arith.addf %176, %179 : vector<16x32xf32>
    %181 = arith.truncf %166 : vector<16x32xf32> to vector<16x32xbf16>
    %182 = arith.truncf %173 : vector<16x32xf32> to vector<16x32xbf16>
    %cst_111 = arith.constant dense<0.000000e+00> : vector<16x16xf32>
    %183 = tpu.matmul %181, %182, %cst_111 {dimension_numbers = #tpu.dot_dimension_numbers<[1], [1], [0], [0], [0, 0, 1, 0], [], []>} : vector<16x32xbf16>, vector<16x32xbf16>, vector<16x16xf32> -> vector<16x16xf32>
    %cst_112 = arith.constant dense<0xFF800000> : vector<16xf32>
    %184 = vector.multi_reduction <maximumf>, %183, %cst_112 [1] : vector<16x16xf32> to vector<16xf32>
    %185 = vector.shape_cast %184 : vector<16xf32> to vector<16x1xf32>
    %186 = vector.broadcast %185 : vector<16x1xf32> to vector<16x16xf32>
    %187 = arith.subf %183, %186 : vector<16x16xf32>
    %188 = math.exp %187 : vector<16x16xf32>
    %cst_113 = arith.constant dense<0.000000e+00> : vector<16xf32>
    %189 = vector.multi_reduction <add>, %188, %cst_113 [1] : vector<16x16xf32> to vector<16xf32>
    %190 = vector.shape_cast %189 : vector<16xf32> to vector<16x1xf32>
    %191 = tpu.reciprocal %190 {approx = true} : vector<16x1xf32> -> vector<16x1xf32>
    %192 = vector.broadcast %191 : vector<16x1xf32> to vector<16x16xf32>
    %193 = arith.mulf %188, %192 : vector<16x16xf32>
    %194 = arith.truncf %193 : vector<16x16xf32> to vector<16x16xbf16>
    %195 = arith.truncf %180 : vector<16x32xf32> to vector<16x32xbf16>
    %cst_114 = arith.constant dense<0.000000e+00> : vector<16x32xf32>
    %196 = tpu.matmul %194, %195, %cst_114 {dimension_numbers = #tpu.dot_dimension_numbers<[1], [0], [0], [1], [0, 0, 1, 1], [], []>} : vector<16x16xbf16>, vector<16x32xbf16>, vector<16x32xf32> -> vector<16x32xf32>
    %197 = arith.truncf %196 : vector<16x32xf32> to vector<16x32xbf16>
    %c3_115 = arith.constant 3 : index
    %c0_116 = arith.constant 0 : index
    %c0_117 = arith.constant 0 : index
    %198 = vector.load %arg4[%c3_115, %c0_116, %c0_117] : memref<8x32x64xbf16, #tpu.memory_space<vmem>>, vector<1x32x64xbf16>
    %199 = vector.shape_cast %198 : vector<1x32x64xbf16> to vector<32x64xbf16>
    %cst_118 = arith.constant dense<0.000000e+00> : vector<16x64xf32>
    %200 = tpu.matmul %197, %199, %cst_118 {dimension_numbers = #tpu.dot_dimension_numbers<[1], [0], [0], [1], [0, 0, 1, 1], [], []>} : vector<16x32xbf16>, vector<32x64xbf16>, vector<16x64xf32> -> vector<16x64xf32>
    %201 = arith.addf %159, %200 : vector<16x64xf32>
    %c0_119 = arith.constant 0 : index
    %c3_120 = arith.constant 3 : index
    %c0_121 = arith.constant 0 : index
    %202 = vector.load %arg5[%c0_119, %c3_120, %c0_121] : memref<2x10x128xf32, #tpu.memory_space<vmem>>, vector<1x1x64xf32>
    %203 = vector.shape_cast %202 : vector<1x1x64xf32> to vector<1x64xf32>
    %204 = vector.broadcast %203 : vector<1x64xf32> to vector<16x64xf32>
    %205 = arith.addf %201, %204 : vector<16x64xf32>
    %206 = arith.addf %116, %205 : vector<16x64xf32>
    %c0_122 = arith.constant 0 : index
    %c6_123 = arith.constant 6 : index
    %c0_124 = arith.constant 0 : index
    %207 = vector.load %arg5[%c0_122, %c6_123, %c0_124] : memref<2x10x128xf32, #tpu.memory_space<vmem>>, vector<1x1x64xf32>
    %208 = vector.shape_cast %207 : vector<1x1x64xf32> to vector<1x64xf32>
    %c0_125 = arith.constant 0 : index
    %c7_126 = arith.constant 7 : index
    %c0_127 = arith.constant 0 : index
    %209 = vector.load %arg5[%c0_125, %c7_126, %c0_127] : memref<2x10x128xf32, #tpu.memory_space<vmem>>, vector<1x1x64xf32>
    %210 = vector.shape_cast %209 : vector<1x1x64xf32> to vector<1x64xf32>
    %cst_128 = arith.constant dense<0.000000e+00> : vector<16xf32>
    %211 = vector.multi_reduction <add>, %206, %cst_128 [1] : vector<16x64xf32> to vector<16xf32>
    %212 = vector.shape_cast %211 : vector<16xf32> to vector<16x1xf32>
    %cst_129 = arith.constant 6.400000e+01 : f32
    %213 = vector.broadcast %cst_129 : f32 to vector<16x1xf32>
    %214 = arith.divf %212, %213 : vector<16x1xf32>
    %215 = vector.broadcast %214 : vector<16x1xf32> to vector<16x64xf32>
    %216 = arith.subf %206, %215 : vector<16x64xf32>
    %217 = arith.mulf %216, %216 : vector<16x64xf32>
    %cst_130 = arith.constant dense<0.000000e+00> : vector<16xf32>
    %218 = vector.multi_reduction <add>, %217, %cst_130 [1] : vector<16x64xf32> to vector<16xf32>
    %219 = vector.shape_cast %218 : vector<16xf32> to vector<16x1xf32>
    %cst_131 = arith.constant 6.400000e+01 : f32
    %220 = vector.broadcast %cst_131 : f32 to vector<16x1xf32>
    %221 = arith.divf %219, %220 : vector<16x1xf32>
    %222 = vector.broadcast %214 : vector<16x1xf32> to vector<16x64xf32>
    %223 = arith.subf %206, %222 : vector<16x64xf32>
    %cst_132 = arith.constant 9.99999974E-6 : f32
    %224 = vector.broadcast %cst_132 : f32 to vector<16x1xf32>
    %225 = arith.addf %221, %224 : vector<16x1xf32>
    %226 = math.rsqrt %225 : vector<16x1xf32>
    %227 = vector.broadcast %226 : vector<16x1xf32> to vector<16x64xf32>
    %228 = arith.mulf %223, %227 : vector<16x64xf32>
    %229 = vector.broadcast %208 : vector<1x64xf32> to vector<16x64xf32>
    %230 = arith.mulf %228, %229 : vector<16x64xf32>
    %231 = vector.broadcast %210 : vector<1x64xf32> to vector<16x64xf32>
    %232 = arith.addf %230, %231 : vector<16x64xf32>
    %233 = arith.truncf %232 : vector<16x64xf32> to vector<16x64xbf16>
    %c0_133 = arith.constant 0 : index
    %c0_134 = arith.constant 0 : index
    %c0_135 = arith.constant 0 : index
    %234 = vector.load %arg6[%c0_133, %c0_134, %c0_135] : memref<2x64x128xbf16, #tpu.memory_space<vmem>>, vector<1x64x128xbf16>
    %235 = vector.shape_cast %234 : vector<1x64x128xbf16> to vector<64x128xbf16>
    %cst_136 = arith.constant dense<0.000000e+00> : vector<16x128xf32>
    %236 = tpu.matmul %233, %235, %cst_136 {dimension_numbers = #tpu.dot_dimension_numbers<[1], [0], [0], [1], [0, 0, 1, 1], [], []>} : vector<16x64xbf16>, vector<64x128xbf16>, vector<16x128xf32> -> vector<16x128xf32>
    %c0_137 = arith.constant 0 : index
    %c0_138 = arith.constant 0 : index
    %c0_139 = arith.constant 0 : index
    %237 = vector.load %arg5[%c0_137, %c0_138, %c0_139] : memref<2x10x128xf32, #tpu.memory_space<vmem>>, vector<1x1x128xf32>
    %238 = vector.shape_cast %237 : vector<1x1x128xf32> to vector<1x128xf32>
    %239 = vector.broadcast %238 : vector<1x128xf32> to vector<16x128xf32>
    %240 = arith.addf %236, %239 : vector<16x128xf32>
    %cst_140 = arith.constant 0.000000e+00 : f32
    %241 = vector.broadcast %cst_140 : f32 to vector<16x128xf32>
    %242 = arith.maximumf %240, %241 : vector<16x128xf32>
    %243 = arith.truncf %242 : vector<16x128xf32> to vector<16x128xbf16>
    %c0_141 = arith.constant 0 : index
    %c0_142 = arith.constant 0 : index
    %c0_143 = arith.constant 0 : index
    %244 = vector.load %arg7[%c0_141, %c0_142, %c0_143] : memref<2x128x64xbf16, #tpu.memory_space<vmem>>, vector<1x128x64xbf16>
    %245 = vector.shape_cast %244 : vector<1x128x64xbf16> to vector<128x64xbf16>
    %cst_144 = arith.constant dense<0.000000e+00> : vector<16x64xf32>
    %246 = tpu.matmul %243, %245, %cst_144 {dimension_numbers = #tpu.dot_dimension_numbers<[1], [0], [0], [1], [0, 0, 1, 1], [], []>} : vector<16x128xbf16>, vector<128x64xbf16>, vector<16x64xf32> -> vector<16x64xf32>
    %c0_145 = arith.constant 0 : index
    %c1_146 = arith.constant 1 : index
    %c0_147 = arith.constant 0 : index
    %247 = vector.load %arg5[%c0_145, %c1_146, %c0_147] : memref<2x10x128xf32, #tpu.memory_space<vmem>>, vector<1x1x64xf32>
    %248 = vector.shape_cast %247 : vector<1x1x64xf32> to vector<1x64xf32>
    %249 = vector.broadcast %248 : vector<1x64xf32> to vector<16x64xf32>
    %250 = arith.addf %246, %249 : vector<16x64xf32>
    %251 = arith.addf %232, %250 : vector<16x64xf32>
    %c0_148 = arith.constant 0 : index
    %c8_149 = arith.constant 8 : index
    %c0_150 = arith.constant 0 : index
    %252 = vector.load %arg5[%c0_148, %c8_149, %c0_150] : memref<2x10x128xf32, #tpu.memory_space<vmem>>, vector<1x1x64xf32>
    %253 = vector.shape_cast %252 : vector<1x1x64xf32> to vector<1x64xf32>
    %c0_151 = arith.constant 0 : index
    %c9_152 = arith.constant 9 : index
    %c0_153 = arith.constant 0 : index
    %254 = vector.load %arg5[%c0_151, %c9_152, %c0_153] : memref<2x10x128xf32, #tpu.memory_space<vmem>>, vector<1x1x64xf32>
    %255 = vector.shape_cast %254 : vector<1x1x64xf32> to vector<1x64xf32>
    %cst_154 = arith.constant dense<0.000000e+00> : vector<16xf32>
    %256 = vector.multi_reduction <add>, %251, %cst_154 [1] : vector<16x64xf32> to vector<16xf32>
    %257 = vector.shape_cast %256 : vector<16xf32> to vector<16x1xf32>
    %cst_155 = arith.constant 6.400000e+01 : f32
    %258 = vector.broadcast %cst_155 : f32 to vector<16x1xf32>
    %259 = arith.divf %257, %258 : vector<16x1xf32>
    %260 = vector.broadcast %259 : vector<16x1xf32> to vector<16x64xf32>
    %261 = arith.subf %251, %260 : vector<16x64xf32>
    %262 = arith.mulf %261, %261 : vector<16x64xf32>
    %cst_156 = arith.constant dense<0.000000e+00> : vector<16xf32>
    %263 = vector.multi_reduction <add>, %262, %cst_156 [1] : vector<16x64xf32> to vector<16xf32>
    %264 = vector.shape_cast %263 : vector<16xf32> to vector<16x1xf32>
    %cst_157 = arith.constant 6.400000e+01 : f32
    %265 = vector.broadcast %cst_157 : f32 to vector<16x1xf32>
    %266 = arith.divf %264, %265 : vector<16x1xf32>
    %267 = vector.broadcast %259 : vector<16x1xf32> to vector<16x64xf32>
    %268 = arith.subf %251, %267 : vector<16x64xf32>
    %cst_158 = arith.constant 9.99999974E-6 : f32
    %269 = vector.broadcast %cst_158 : f32 to vector<16x1xf32>
    %270 = arith.addf %266, %269 : vector<16x1xf32>
    %271 = math.rsqrt %270 : vector<16x1xf32>
    %272 = vector.broadcast %271 : vector<16x1xf32> to vector<16x64xf32>
    %273 = arith.mulf %268, %272 : vector<16x64xf32>
    %274 = vector.broadcast %253 : vector<1x64xf32> to vector<16x64xf32>
    %275 = arith.mulf %273, %274 : vector<16x64xf32>
    %276 = vector.broadcast %255 : vector<1x64xf32> to vector<16x64xf32>
    %277 = arith.addf %275, %276 : vector<16x64xf32>
    %278 = arith.truncf %277 : vector<16x64xf32> to vector<16x64xbf16>
    %279 = arith.truncf %277 : vector<16x64xf32> to vector<16x64xbf16>
    %c12 = arith.constant 12 : index
    %c0_159 = arith.constant 0 : index
    %c0_160 = arith.constant 0 : index
    %280 = vector.load %arg2[%c12, %c0_159, %c0_160] : memref<24x64x32xbf16, #tpu.memory_space<vmem>>, vector<1x64x32xbf16>
    %281 = vector.shape_cast %280 : vector<1x64x32xbf16> to vector<64x32xbf16>
    %cst_161 = arith.constant dense<0.000000e+00> : vector<16x32xf32>
    %282 = tpu.matmul %278, %281, %cst_161 {dimension_numbers = #tpu.dot_dimension_numbers<[1], [0], [0], [1], [0, 0, 1, 1], [], []>} : vector<16x64xbf16>, vector<64x32xbf16>, vector<16x32xf32> -> vector<16x32xf32>
    %c12_162 = arith.constant 12 : index
    %c0_163 = arith.constant 0 : index
    %c0_164 = arith.constant 0 : index
    %283 = vector.load %arg3[%c12_162, %c0_163, %c0_164] : memref<24x1x32xf32, #tpu.memory_space<vmem>>, vector<1x1x32xf32>
    %284 = vector.shape_cast %283 : vector<1x1x32xf32> to vector<1x32xf32>
    %285 = vector.broadcast %284 : vector<1x32xf32> to vector<16x32xf32>
    %286 = arith.addf %282, %285 : vector<16x32xf32>
    %c14 = arith.constant 14 : index
    %c0_165 = arith.constant 0 : index
    %c0_166 = arith.constant 0 : index
    %287 = vector.load %arg2[%c14, %c0_165, %c0_166] : memref<24x64x32xbf16, #tpu.memory_space<vmem>>, vector<1x64x32xbf16>
    %288 = vector.shape_cast %287 : vector<1x64x32xbf16> to vector<64x32xbf16>
    %cst_167 = arith.constant dense<0.000000e+00> : vector<16x32xf32>
    %289 = tpu.matmul %279, %288, %cst_167 {dimension_numbers = #tpu.dot_dimension_numbers<[1], [0], [0], [1], [0, 0, 1, 1], [], []>} : vector<16x64xbf16>, vector<64x32xbf16>, vector<16x32xf32> -> vector<16x32xf32>
    %c14_168 = arith.constant 14 : index
    %c0_169 = arith.constant 0 : index
    %c0_170 = arith.constant 0 : index
    %290 = vector.load %arg3[%c14_168, %c0_169, %c0_170] : memref<24x1x32xf32, #tpu.memory_space<vmem>>, vector<1x1x32xf32>
    %291 = vector.shape_cast %290 : vector<1x1x32xf32> to vector<1x32xf32>
    %292 = vector.broadcast %291 : vector<1x32xf32> to vector<16x32xf32>
    %293 = arith.addf %289, %292 : vector<16x32xf32>
    %c16 = arith.constant 16 : index
    %c0_171 = arith.constant 0 : index
    %c0_172 = arith.constant 0 : index
    %294 = vector.load %arg2[%c16, %c0_171, %c0_172] : memref<24x64x32xbf16, #tpu.memory_space<vmem>>, vector<1x64x32xbf16>
    %295 = vector.shape_cast %294 : vector<1x64x32xbf16> to vector<64x32xbf16>
    %cst_173 = arith.constant dense<0.000000e+00> : vector<16x32xf32>
    %296 = tpu.matmul %279, %295, %cst_173 {dimension_numbers = #tpu.dot_dimension_numbers<[1], [0], [0], [1], [0, 0, 1, 1], [], []>} : vector<16x64xbf16>, vector<64x32xbf16>, vector<16x32xf32> -> vector<16x32xf32>
    %c16_174 = arith.constant 16 : index
    %c0_175 = arith.constant 0 : index
    %c0_176 = arith.constant 0 : index
    %297 = vector.load %arg3[%c16_174, %c0_175, %c0_176] : memref<24x1x32xf32, #tpu.memory_space<vmem>>, vector<1x1x32xf32>
    %298 = vector.shape_cast %297 : vector<1x1x32xf32> to vector<1x32xf32>
    %299 = vector.broadcast %298 : vector<1x32xf32> to vector<16x32xf32>
    %300 = arith.addf %296, %299 : vector<16x32xf32>
    %301 = arith.truncf %286 : vector<16x32xf32> to vector<16x32xbf16>
    %302 = arith.truncf %293 : vector<16x32xf32> to vector<16x32xbf16>
    %cst_177 = arith.constant dense<0.000000e+00> : vector<16x16xf32>
    %303 = tpu.matmul %301, %302, %cst_177 {dimension_numbers = #tpu.dot_dimension_numbers<[1], [1], [0], [0], [0, 0, 1, 0], [], []>} : vector<16x32xbf16>, vector<16x32xbf16>, vector<16x16xf32> -> vector<16x16xf32>
    %cst_178 = arith.constant dense<0xFF800000> : vector<16xf32>
    %304 = vector.multi_reduction <maximumf>, %303, %cst_178 [1] : vector<16x16xf32> to vector<16xf32>
    %305 = vector.shape_cast %304 : vector<16xf32> to vector<16x1xf32>
    %306 = vector.broadcast %305 : vector<16x1xf32> to vector<16x16xf32>
    %307 = arith.subf %303, %306 : vector<16x16xf32>
    %308 = math.exp %307 : vector<16x16xf32>
    %cst_179 = arith.constant dense<0.000000e+00> : vector<16xf32>
    %309 = vector.multi_reduction <add>, %308, %cst_179 [1] : vector<16x16xf32> to vector<16xf32>
    %310 = vector.shape_cast %309 : vector<16xf32> to vector<16x1xf32>
    %311 = tpu.reciprocal %310 {approx = true} : vector<16x1xf32> -> vector<16x1xf32>
    %312 = vector.broadcast %311 : vector<16x1xf32> to vector<16x16xf32>
    %313 = arith.mulf %308, %312 : vector<16x16xf32>
    %314 = arith.truncf %313 : vector<16x16xf32> to vector<16x16xbf16>
    %315 = arith.truncf %300 : vector<16x32xf32> to vector<16x32xbf16>
    %cst_180 = arith.constant dense<0.000000e+00> : vector<16x32xf32>
    %316 = tpu.matmul %314, %315, %cst_180 {dimension_numbers = #tpu.dot_dimension_numbers<[1], [0], [0], [1], [0, 0, 1, 1], [], []>} : vector<16x16xbf16>, vector<16x32xbf16>, vector<16x32xf32> -> vector<16x32xf32>
    %317 = arith.truncf %316 : vector<16x32xf32> to vector<16x32xbf16>
    %c4_181 = arith.constant 4 : index
    %c0_182 = arith.constant 0 : index
    %c0_183 = arith.constant 0 : index
    %318 = vector.load %arg4[%c4_181, %c0_182, %c0_183] : memref<8x32x64xbf16, #tpu.memory_space<vmem>>, vector<1x32x64xbf16>
    %319 = vector.shape_cast %318 : vector<1x32x64xbf16> to vector<32x64xbf16>
    %cst_184 = arith.constant dense<0.000000e+00> : vector<16x64xf32>
    %320 = tpu.matmul %317, %319, %cst_184 {dimension_numbers = #tpu.dot_dimension_numbers<[1], [0], [0], [1], [0, 0, 1, 1], [], []>} : vector<16x32xbf16>, vector<32x64xbf16>, vector<16x64xf32> -> vector<16x64xf32>
    %c13 = arith.constant 13 : index
    %c0_185 = arith.constant 0 : index
    %c0_186 = arith.constant 0 : index
    %321 = vector.load %arg2[%c13, %c0_185, %c0_186] : memref<24x64x32xbf16, #tpu.memory_space<vmem>>, vector<1x64x32xbf16>
    %322 = vector.shape_cast %321 : vector<1x64x32xbf16> to vector<64x32xbf16>
    %cst_187 = arith.constant dense<0.000000e+00> : vector<16x32xf32>
    %323 = tpu.matmul %278, %322, %cst_187 {dimension_numbers = #tpu.dot_dimension_numbers<[1], [0], [0], [1], [0, 0, 1, 1], [], []>} : vector<16x64xbf16>, vector<64x32xbf16>, vector<16x32xf32> -> vector<16x32xf32>
    %c13_188 = arith.constant 13 : index
    %c0_189 = arith.constant 0 : index
    %c0_190 = arith.constant 0 : index
    %324 = vector.load %arg3[%c13_188, %c0_189, %c0_190] : memref<24x1x32xf32, #tpu.memory_space<vmem>>, vector<1x1x32xf32>
    %325 = vector.shape_cast %324 : vector<1x1x32xf32> to vector<1x32xf32>
    %326 = vector.broadcast %325 : vector<1x32xf32> to vector<16x32xf32>
    %327 = arith.addf %323, %326 : vector<16x32xf32>
    %c15 = arith.constant 15 : index
    %c0_191 = arith.constant 0 : index
    %c0_192 = arith.constant 0 : index
    %328 = vector.load %arg2[%c15, %c0_191, %c0_192] : memref<24x64x32xbf16, #tpu.memory_space<vmem>>, vector<1x64x32xbf16>
    %329 = vector.shape_cast %328 : vector<1x64x32xbf16> to vector<64x32xbf16>
    %cst_193 = arith.constant dense<0.000000e+00> : vector<16x32xf32>
    %330 = tpu.matmul %279, %329, %cst_193 {dimension_numbers = #tpu.dot_dimension_numbers<[1], [0], [0], [1], [0, 0, 1, 1], [], []>} : vector<16x64xbf16>, vector<64x32xbf16>, vector<16x32xf32> -> vector<16x32xf32>
    %c15_194 = arith.constant 15 : index
    %c0_195 = arith.constant 0 : index
    %c0_196 = arith.constant 0 : index
    %331 = vector.load %arg3[%c15_194, %c0_195, %c0_196] : memref<24x1x32xf32, #tpu.memory_space<vmem>>, vector<1x1x32xf32>
    %332 = vector.shape_cast %331 : vector<1x1x32xf32> to vector<1x32xf32>
    %333 = vector.broadcast %332 : vector<1x32xf32> to vector<16x32xf32>
    %334 = arith.addf %330, %333 : vector<16x32xf32>
    %c17 = arith.constant 17 : index
    %c0_197 = arith.constant 0 : index
    %c0_198 = arith.constant 0 : index
    %335 = vector.load %arg2[%c17, %c0_197, %c0_198] : memref<24x64x32xbf16, #tpu.memory_space<vmem>>, vector<1x64x32xbf16>
    %336 = vector.shape_cast %335 : vector<1x64x32xbf16> to vector<64x32xbf16>
    %cst_199 = arith.constant dense<0.000000e+00> : vector<16x32xf32>
    %337 = tpu.matmul %279, %336, %cst_199 {dimension_numbers = #tpu.dot_dimension_numbers<[1], [0], [0], [1], [0, 0, 1, 1], [], []>} : vector<16x64xbf16>, vector<64x32xbf16>, vector<16x32xf32> -> vector<16x32xf32>
    %c17_200 = arith.constant 17 : index
    %c0_201 = arith.constant 0 : index
    %c0_202 = arith.constant 0 : index
    %338 = vector.load %arg3[%c17_200, %c0_201, %c0_202] : memref<24x1x32xf32, #tpu.memory_space<vmem>>, vector<1x1x32xf32>
    %339 = vector.shape_cast %338 : vector<1x1x32xf32> to vector<1x32xf32>
    %340 = vector.broadcast %339 : vector<1x32xf32> to vector<16x32xf32>
    %341 = arith.addf %337, %340 : vector<16x32xf32>
    %342 = arith.truncf %327 : vector<16x32xf32> to vector<16x32xbf16>
    %343 = arith.truncf %334 : vector<16x32xf32> to vector<16x32xbf16>
    %cst_203 = arith.constant dense<0.000000e+00> : vector<16x16xf32>
    %344 = tpu.matmul %342, %343, %cst_203 {dimension_numbers = #tpu.dot_dimension_numbers<[1], [1], [0], [0], [0, 0, 1, 0], [], []>} : vector<16x32xbf16>, vector<16x32xbf16>, vector<16x16xf32> -> vector<16x16xf32>
    %cst_204 = arith.constant dense<0xFF800000> : vector<16xf32>
    %345 = vector.multi_reduction <maximumf>, %344, %cst_204 [1] : vector<16x16xf32> to vector<16xf32>
    %346 = vector.shape_cast %345 : vector<16xf32> to vector<16x1xf32>
    %347 = vector.broadcast %346 : vector<16x1xf32> to vector<16x16xf32>
    %348 = arith.subf %344, %347 : vector<16x16xf32>
    %349 = math.exp %348 : vector<16x16xf32>
    %cst_205 = arith.constant dense<0.000000e+00> : vector<16xf32>
    %350 = vector.multi_reduction <add>, %349, %cst_205 [1] : vector<16x16xf32> to vector<16xf32>
    %351 = vector.shape_cast %350 : vector<16xf32> to vector<16x1xf32>
    %352 = tpu.reciprocal %351 {approx = true} : vector<16x1xf32> -> vector<16x1xf32>
    %353 = vector.broadcast %352 : vector<16x1xf32> to vector<16x16xf32>
    %354 = arith.mulf %349, %353 : vector<16x16xf32>
    %355 = arith.truncf %354 : vector<16x16xf32> to vector<16x16xbf16>
    %356 = arith.truncf %341 : vector<16x32xf32> to vector<16x32xbf16>
    %cst_206 = arith.constant dense<0.000000e+00> : vector<16x32xf32>
    %357 = tpu.matmul %355, %356, %cst_206 {dimension_numbers = #tpu.dot_dimension_numbers<[1], [0], [0], [1], [0, 0, 1, 1], [], []>} : vector<16x16xbf16>, vector<16x32xbf16>, vector<16x32xf32> -> vector<16x32xf32>
    %358 = arith.truncf %357 : vector<16x32xf32> to vector<16x32xbf16>
    %c5_207 = arith.constant 5 : index
    %c0_208 = arith.constant 0 : index
    %c0_209 = arith.constant 0 : index
    %359 = vector.load %arg4[%c5_207, %c0_208, %c0_209] : memref<8x32x64xbf16, #tpu.memory_space<vmem>>, vector<1x32x64xbf16>
    %360 = vector.shape_cast %359 : vector<1x32x64xbf16> to vector<32x64xbf16>
    %cst_210 = arith.constant dense<0.000000e+00> : vector<16x64xf32>
    %361 = tpu.matmul %358, %360, %cst_210 {dimension_numbers = #tpu.dot_dimension_numbers<[1], [0], [0], [1], [0, 0, 1, 1], [], []>} : vector<16x32xbf16>, vector<32x64xbf16>, vector<16x64xf32> -> vector<16x64xf32>
    %362 = arith.addf %320, %361 : vector<16x64xf32>
    %c1_211 = arith.constant 1 : index
    %c2_212 = arith.constant 2 : index
    %c0_213 = arith.constant 0 : index
    %363 = vector.load %arg5[%c1_211, %c2_212, %c0_213] : memref<2x10x128xf32, #tpu.memory_space<vmem>>, vector<1x1x64xf32>
    %364 = vector.shape_cast %363 : vector<1x1x64xf32> to vector<1x64xf32>
    %365 = vector.broadcast %364 : vector<1x64xf32> to vector<16x64xf32>
    %366 = arith.addf %362, %365 : vector<16x64xf32>
    %367 = arith.addf %277, %366 : vector<16x64xf32>
    %c1_214 = arith.constant 1 : index
    %c4_215 = arith.constant 4 : index
    %c0_216 = arith.constant 0 : index
    %368 = vector.load %arg5[%c1_214, %c4_215, %c0_216] : memref<2x10x128xf32, #tpu.memory_space<vmem>>, vector<1x1x64xf32>
    %369 = vector.shape_cast %368 : vector<1x1x64xf32> to vector<1x64xf32>
    %c1_217 = arith.constant 1 : index
    %c5_218 = arith.constant 5 : index
    %c0_219 = arith.constant 0 : index
    %370 = vector.load %arg5[%c1_217, %c5_218, %c0_219] : memref<2x10x128xf32, #tpu.memory_space<vmem>>, vector<1x1x64xf32>
    %371 = vector.shape_cast %370 : vector<1x1x64xf32> to vector<1x64xf32>
    %cst_220 = arith.constant dense<0.000000e+00> : vector<16xf32>
    %372 = vector.multi_reduction <add>, %367, %cst_220 [1] : vector<16x64xf32> to vector<16xf32>
    %373 = vector.shape_cast %372 : vector<16xf32> to vector<16x1xf32>
    %cst_221 = arith.constant 6.400000e+01 : f32
    %374 = vector.broadcast %cst_221 : f32 to vector<16x1xf32>
    %375 = arith.divf %373, %374 : vector<16x1xf32>
    %376 = vector.broadcast %375 : vector<16x1xf32> to vector<16x64xf32>
    %377 = arith.subf %367, %376 : vector<16x64xf32>
    %378 = arith.mulf %377, %377 : vector<16x64xf32>
    %cst_222 = arith.constant dense<0.000000e+00> : vector<16xf32>
    %379 = vector.multi_reduction <add>, %378, %cst_222 [1] : vector<16x64xf32> to vector<16xf32>
    %380 = vector.shape_cast %379 : vector<16xf32> to vector<16x1xf32>
    %cst_223 = arith.constant 6.400000e+01 : f32
    %381 = vector.broadcast %cst_223 : f32 to vector<16x1xf32>
    %382 = arith.divf %380, %381 : vector<16x1xf32>
    %383 = vector.broadcast %375 : vector<16x1xf32> to vector<16x64xf32>
    %384 = arith.subf %367, %383 : vector<16x64xf32>
    %cst_224 = arith.constant 9.99999974E-6 : f32
    %385 = vector.broadcast %cst_224 : f32 to vector<16x1xf32>
    %386 = arith.addf %382, %385 : vector<16x1xf32>
    %387 = math.rsqrt %386 : vector<16x1xf32>
    %388 = vector.broadcast %387 : vector<16x1xf32> to vector<16x64xf32>
    %389 = arith.mulf %384, %388 : vector<16x64xf32>
    %390 = vector.broadcast %369 : vector<1x64xf32> to vector<16x64xf32>
    %391 = arith.mulf %389, %390 : vector<16x64xf32>
    %392 = vector.broadcast %371 : vector<1x64xf32> to vector<16x64xf32>
    %393 = arith.addf %391, %392 : vector<16x64xf32>
    %394 = arith.truncf %393 : vector<16x64xf32> to vector<16x64xbf16>
    %395 = arith.truncf %0 : vector<16x64xf32> to vector<16x64xbf16>
    %c18 = arith.constant 18 : index
    %c0_225 = arith.constant 0 : index
    %c0_226 = arith.constant 0 : index
    %396 = vector.load %arg2[%c18, %c0_225, %c0_226] : memref<24x64x32xbf16, #tpu.memory_space<vmem>>, vector<1x64x32xbf16>
    %397 = vector.shape_cast %396 : vector<1x64x32xbf16> to vector<64x32xbf16>
    %cst_227 = arith.constant dense<0.000000e+00> : vector<16x32xf32>
    %398 = tpu.matmul %394, %397, %cst_227 {dimension_numbers = #tpu.dot_dimension_numbers<[1], [0], [0], [1], [0, 0, 1, 1], [], []>} : vector<16x64xbf16>, vector<64x32xbf16>, vector<16x32xf32> -> vector<16x32xf32>
    %c18_228 = arith.constant 18 : index
    %c0_229 = arith.constant 0 : index
    %c0_230 = arith.constant 0 : index
    %399 = vector.load %arg3[%c18_228, %c0_229, %c0_230] : memref<24x1x32xf32, #tpu.memory_space<vmem>>, vector<1x1x32xf32>
    %400 = vector.shape_cast %399 : vector<1x1x32xf32> to vector<1x32xf32>
    %401 = vector.broadcast %400 : vector<1x32xf32> to vector<16x32xf32>
    %402 = arith.addf %398, %401 : vector<16x32xf32>
    %c20 = arith.constant 20 : index
    %c0_231 = arith.constant 0 : index
    %c0_232 = arith.constant 0 : index
    %403 = vector.load %arg2[%c20, %c0_231, %c0_232] : memref<24x64x32xbf16, #tpu.memory_space<vmem>>, vector<1x64x32xbf16>
    %404 = vector.shape_cast %403 : vector<1x64x32xbf16> to vector<64x32xbf16>
    %cst_233 = arith.constant dense<0.000000e+00> : vector<16x32xf32>
    %405 = tpu.matmul %395, %404, %cst_233 {dimension_numbers = #tpu.dot_dimension_numbers<[1], [0], [0], [1], [0, 0, 1, 1], [], []>} : vector<16x64xbf16>, vector<64x32xbf16>, vector<16x32xf32> -> vector<16x32xf32>
    %c20_234 = arith.constant 20 : index
    %c0_235 = arith.constant 0 : index
    %c0_236 = arith.constant 0 : index
    %406 = vector.load %arg3[%c20_234, %c0_235, %c0_236] : memref<24x1x32xf32, #tpu.memory_space<vmem>>, vector<1x1x32xf32>
    %407 = vector.shape_cast %406 : vector<1x1x32xf32> to vector<1x32xf32>
    %408 = vector.broadcast %407 : vector<1x32xf32> to vector<16x32xf32>
    %409 = arith.addf %405, %408 : vector<16x32xf32>
    %c22 = arith.constant 22 : index
    %c0_237 = arith.constant 0 : index
    %c0_238 = arith.constant 0 : index
    %410 = vector.load %arg2[%c22, %c0_237, %c0_238] : memref<24x64x32xbf16, #tpu.memory_space<vmem>>, vector<1x64x32xbf16>
    %411 = vector.shape_cast %410 : vector<1x64x32xbf16> to vector<64x32xbf16>
    %cst_239 = arith.constant dense<0.000000e+00> : vector<16x32xf32>
    %412 = tpu.matmul %395, %411, %cst_239 {dimension_numbers = #tpu.dot_dimension_numbers<[1], [0], [0], [1], [0, 0, 1, 1], [], []>} : vector<16x64xbf16>, vector<64x32xbf16>, vector<16x32xf32> -> vector<16x32xf32>
    %c22_240 = arith.constant 22 : index
    %c0_241 = arith.constant 0 : index
    %c0_242 = arith.constant 0 : index
    %413 = vector.load %arg3[%c22_240, %c0_241, %c0_242] : memref<24x1x32xf32, #tpu.memory_space<vmem>>, vector<1x1x32xf32>
    %414 = vector.shape_cast %413 : vector<1x1x32xf32> to vector<1x32xf32>
    %415 = vector.broadcast %414 : vector<1x32xf32> to vector<16x32xf32>
    %416 = arith.addf %412, %415 : vector<16x32xf32>
    %417 = arith.truncf %402 : vector<16x32xf32> to vector<16x32xbf16>
    %418 = arith.truncf %409 : vector<16x32xf32> to vector<16x32xbf16>
    %cst_243 = arith.constant dense<0.000000e+00> : vector<16x16xf32>
    %419 = tpu.matmul %417, %418, %cst_243 {dimension_numbers = #tpu.dot_dimension_numbers<[1], [1], [0], [0], [0, 0, 1, 0], [], []>} : vector<16x32xbf16>, vector<16x32xbf16>, vector<16x16xf32> -> vector<16x16xf32>
    %cst_244 = arith.constant dense<0xFF800000> : vector<16xf32>
    %420 = vector.multi_reduction <maximumf>, %419, %cst_244 [1] : vector<16x16xf32> to vector<16xf32>
    %421 = vector.shape_cast %420 : vector<16xf32> to vector<16x1xf32>
    %422 = vector.broadcast %421 : vector<16x1xf32> to vector<16x16xf32>
    %423 = arith.subf %419, %422 : vector<16x16xf32>
    %424 = math.exp %423 : vector<16x16xf32>
    %cst_245 = arith.constant dense<0.000000e+00> : vector<16xf32>
    %425 = vector.multi_reduction <add>, %424, %cst_245 [1] : vector<16x16xf32> to vector<16xf32>
    %426 = vector.shape_cast %425 : vector<16xf32> to vector<16x1xf32>
    %427 = tpu.reciprocal %426 {approx = true} : vector<16x1xf32> -> vector<16x1xf32>
    %428 = vector.broadcast %427 : vector<16x1xf32> to vector<16x16xf32>
    %429 = arith.mulf %424, %428 : vector<16x16xf32>
    %430 = arith.truncf %429 : vector<16x16xf32> to vector<16x16xbf16>
    %431 = arith.truncf %416 : vector<16x32xf32> to vector<16x32xbf16>
    %cst_246 = arith.constant dense<0.000000e+00> : vector<16x32xf32>
    %432 = tpu.matmul %430, %431, %cst_246 {dimension_numbers = #tpu.dot_dimension_numbers<[1], [0], [0], [1], [0, 0, 1, 1], [], []>} : vector<16x16xbf16>, vector<16x32xbf16>, vector<16x32xf32> -> vector<16x32xf32>
    %433 = arith.truncf %432 : vector<16x32xf32> to vector<16x32xbf16>
    %c6_247 = arith.constant 6 : index
    %c0_248 = arith.constant 0 : index
    %c0_249 = arith.constant 0 : index
    %434 = vector.load %arg4[%c6_247, %c0_248, %c0_249] : memref<8x32x64xbf16, #tpu.memory_space<vmem>>, vector<1x32x64xbf16>
    %435 = vector.shape_cast %434 : vector<1x32x64xbf16> to vector<32x64xbf16>
    %cst_250 = arith.constant dense<0.000000e+00> : vector<16x64xf32>
    %436 = tpu.matmul %433, %435, %cst_250 {dimension_numbers = #tpu.dot_dimension_numbers<[1], [0], [0], [1], [0, 0, 1, 1], [], []>} : vector<16x32xbf16>, vector<32x64xbf16>, vector<16x64xf32> -> vector<16x64xf32>
    %c19 = arith.constant 19 : index
    %c0_251 = arith.constant 0 : index
    %c0_252 = arith.constant 0 : index
    %437 = vector.load %arg2[%c19, %c0_251, %c0_252] : memref<24x64x32xbf16, #tpu.memory_space<vmem>>, vector<1x64x32xbf16>
    %438 = vector.shape_cast %437 : vector<1x64x32xbf16> to vector<64x32xbf16>
    %cst_253 = arith.constant dense<0.000000e+00> : vector<16x32xf32>
    %439 = tpu.matmul %394, %438, %cst_253 {dimension_numbers = #tpu.dot_dimension_numbers<[1], [0], [0], [1], [0, 0, 1, 1], [], []>} : vector<16x64xbf16>, vector<64x32xbf16>, vector<16x32xf32> -> vector<16x32xf32>
    %c19_254 = arith.constant 19 : index
    %c0_255 = arith.constant 0 : index
    %c0_256 = arith.constant 0 : index
    %440 = vector.load %arg3[%c19_254, %c0_255, %c0_256] : memref<24x1x32xf32, #tpu.memory_space<vmem>>, vector<1x1x32xf32>
    %441 = vector.shape_cast %440 : vector<1x1x32xf32> to vector<1x32xf32>
    %442 = vector.broadcast %441 : vector<1x32xf32> to vector<16x32xf32>
    %443 = arith.addf %439, %442 : vector<16x32xf32>
    %c21 = arith.constant 21 : index
    %c0_257 = arith.constant 0 : index
    %c0_258 = arith.constant 0 : index
    %444 = vector.load %arg2[%c21, %c0_257, %c0_258] : memref<24x64x32xbf16, #tpu.memory_space<vmem>>, vector<1x64x32xbf16>
    %445 = vector.shape_cast %444 : vector<1x64x32xbf16> to vector<64x32xbf16>
    %cst_259 = arith.constant dense<0.000000e+00> : vector<16x32xf32>
    %446 = tpu.matmul %395, %445, %cst_259 {dimension_numbers = #tpu.dot_dimension_numbers<[1], [0], [0], [1], [0, 0, 1, 1], [], []>} : vector<16x64xbf16>, vector<64x32xbf16>, vector<16x32xf32> -> vector<16x32xf32>
    %c21_260 = arith.constant 21 : index
    %c0_261 = arith.constant 0 : index
    %c0_262 = arith.constant 0 : index
    %447 = vector.load %arg3[%c21_260, %c0_261, %c0_262] : memref<24x1x32xf32, #tpu.memory_space<vmem>>, vector<1x1x32xf32>
    %448 = vector.shape_cast %447 : vector<1x1x32xf32> to vector<1x32xf32>
    %449 = vector.broadcast %448 : vector<1x32xf32> to vector<16x32xf32>
    %450 = arith.addf %446, %449 : vector<16x32xf32>
    %c23 = arith.constant 23 : index
    %c0_263 = arith.constant 0 : index
    %c0_264 = arith.constant 0 : index
    %451 = vector.load %arg2[%c23, %c0_263, %c0_264] : memref<24x64x32xbf16, #tpu.memory_space<vmem>>, vector<1x64x32xbf16>
    %452 = vector.shape_cast %451 : vector<1x64x32xbf16> to vector<64x32xbf16>
    %cst_265 = arith.constant dense<0.000000e+00> : vector<16x32xf32>
    %453 = tpu.matmul %395, %452, %cst_265 {dimension_numbers = #tpu.dot_dimension_numbers<[1], [0], [0], [1], [0, 0, 1, 1], [], []>} : vector<16x64xbf16>, vector<64x32xbf16>, vector<16x32xf32> -> vector<16x32xf32>
    %c23_266 = arith.constant 23 : index
    %c0_267 = arith.constant 0 : index
    %c0_268 = arith.constant 0 : index
    %454 = vector.load %arg3[%c23_266, %c0_267, %c0_268] : memref<24x1x32xf32, #tpu.memory_space<vmem>>, vector<1x1x32xf32>
    %455 = vector.shape_cast %454 : vector<1x1x32xf32> to vector<1x32xf32>
    %456 = vector.broadcast %455 : vector<1x32xf32> to vector<16x32xf32>
    %457 = arith.addf %453, %456 : vector<16x32xf32>
    %458 = arith.truncf %443 : vector<16x32xf32> to vector<16x32xbf16>
    %459 = arith.truncf %450 : vector<16x32xf32> to vector<16x32xbf16>
    %cst_269 = arith.constant dense<0.000000e+00> : vector<16x16xf32>
    %460 = tpu.matmul %458, %459, %cst_269 {dimension_numbers = #tpu.dot_dimension_numbers<[1], [1], [0], [0], [0, 0, 1, 0], [], []>} : vector<16x32xbf16>, vector<16x32xbf16>, vector<16x16xf32> -> vector<16x16xf32>
    %cst_270 = arith.constant dense<0xFF800000> : vector<16xf32>
    %461 = vector.multi_reduction <maximumf>, %460, %cst_270 [1] : vector<16x16xf32> to vector<16xf32>
    %462 = vector.shape_cast %461 : vector<16xf32> to vector<16x1xf32>
    %463 = vector.broadcast %462 : vector<16x1xf32> to vector<16x16xf32>
    %464 = arith.subf %460, %463 : vector<16x16xf32>
    %465 = math.exp %464 : vector<16x16xf32>
    %cst_271 = arith.constant dense<0.000000e+00> : vector<16xf32>
    %466 = vector.multi_reduction <add>, %465, %cst_271 [1] : vector<16x16xf32> to vector<16xf32>
    %467 = vector.shape_cast %466 : vector<16xf32> to vector<16x1xf32>
    %468 = tpu.reciprocal %467 {approx = true} : vector<16x1xf32> -> vector<16x1xf32>
    %469 = vector.broadcast %468 : vector<16x1xf32> to vector<16x16xf32>
    %470 = arith.mulf %465, %469 : vector<16x16xf32>
    %471 = arith.truncf %470 : vector<16x16xf32> to vector<16x16xbf16>
    %472 = arith.truncf %457 : vector<16x32xf32> to vector<16x32xbf16>
    %cst_272 = arith.constant dense<0.000000e+00> : vector<16x32xf32>
    %473 = tpu.matmul %471, %472, %cst_272 {dimension_numbers = #tpu.dot_dimension_numbers<[1], [0], [0], [1], [0, 0, 1, 1], [], []>} : vector<16x16xbf16>, vector<16x32xbf16>, vector<16x32xf32> -> vector<16x32xf32>
    %474 = arith.truncf %473 : vector<16x32xf32> to vector<16x32xbf16>
    %c7_273 = arith.constant 7 : index
    %c0_274 = arith.constant 0 : index
    %c0_275 = arith.constant 0 : index
    %475 = vector.load %arg4[%c7_273, %c0_274, %c0_275] : memref<8x32x64xbf16, #tpu.memory_space<vmem>>, vector<1x32x64xbf16>
    %476 = vector.shape_cast %475 : vector<1x32x64xbf16> to vector<32x64xbf16>
    %cst_276 = arith.constant dense<0.000000e+00> : vector<16x64xf32>
    %477 = tpu.matmul %474, %476, %cst_276 {dimension_numbers = #tpu.dot_dimension_numbers<[1], [0], [0], [1], [0, 0, 1, 1], [], []>} : vector<16x32xbf16>, vector<32x64xbf16>, vector<16x64xf32> -> vector<16x64xf32>
    %478 = arith.addf %436, %477 : vector<16x64xf32>
    %c1_277 = arith.constant 1 : index
    %c3_278 = arith.constant 3 : index
    %c0_279 = arith.constant 0 : index
    %479 = vector.load %arg5[%c1_277, %c3_278, %c0_279] : memref<2x10x128xf32, #tpu.memory_space<vmem>>, vector<1x1x64xf32>
    %480 = vector.shape_cast %479 : vector<1x1x64xf32> to vector<1x64xf32>
    %481 = vector.broadcast %480 : vector<1x64xf32> to vector<16x64xf32>
    %482 = arith.addf %478, %481 : vector<16x64xf32>
    %483 = arith.addf %393, %482 : vector<16x64xf32>
    %c1_280 = arith.constant 1 : index
    %c6_281 = arith.constant 6 : index
    %c0_282 = arith.constant 0 : index
    %484 = vector.load %arg5[%c1_280, %c6_281, %c0_282] : memref<2x10x128xf32, #tpu.memory_space<vmem>>, vector<1x1x64xf32>
    %485 = vector.shape_cast %484 : vector<1x1x64xf32> to vector<1x64xf32>
    %c1_283 = arith.constant 1 : index
    %c7_284 = arith.constant 7 : index
    %c0_285 = arith.constant 0 : index
    %486 = vector.load %arg5[%c1_283, %c7_284, %c0_285] : memref<2x10x128xf32, #tpu.memory_space<vmem>>, vector<1x1x64xf32>
    %487 = vector.shape_cast %486 : vector<1x1x64xf32> to vector<1x64xf32>
    %cst_286 = arith.constant dense<0.000000e+00> : vector<16xf32>
    %488 = vector.multi_reduction <add>, %483, %cst_286 [1] : vector<16x64xf32> to vector<16xf32>
    %489 = vector.shape_cast %488 : vector<16xf32> to vector<16x1xf32>
    %cst_287 = arith.constant 6.400000e+01 : f32
    %490 = vector.broadcast %cst_287 : f32 to vector<16x1xf32>
    %491 = arith.divf %489, %490 : vector<16x1xf32>
    %492 = vector.broadcast %491 : vector<16x1xf32> to vector<16x64xf32>
    %493 = arith.subf %483, %492 : vector<16x64xf32>
    %494 = arith.mulf %493, %493 : vector<16x64xf32>
    %cst_288 = arith.constant dense<0.000000e+00> : vector<16xf32>
    %495 = vector.multi_reduction <add>, %494, %cst_288 [1] : vector<16x64xf32> to vector<16xf32>
    %496 = vector.shape_cast %495 : vector<16xf32> to vector<16x1xf32>
    %cst_289 = arith.constant 6.400000e+01 : f32
    %497 = vector.broadcast %cst_289 : f32 to vector<16x1xf32>
    %498 = arith.divf %496, %497 : vector<16x1xf32>
    %499 = vector.broadcast %491 : vector<16x1xf32> to vector<16x64xf32>
    %500 = arith.subf %483, %499 : vector<16x64xf32>
    %cst_290 = arith.constant 9.99999974E-6 : f32
    %501 = vector.broadcast %cst_290 : f32 to vector<16x1xf32>
    %502 = arith.addf %498, %501 : vector<16x1xf32>
    %503 = math.rsqrt %502 : vector<16x1xf32>
    %504 = vector.broadcast %503 : vector<16x1xf32> to vector<16x64xf32>
    %505 = arith.mulf %500, %504 : vector<16x64xf32>
    %506 = vector.broadcast %485 : vector<1x64xf32> to vector<16x64xf32>
    %507 = arith.mulf %505, %506 : vector<16x64xf32>
    %508 = vector.broadcast %487 : vector<1x64xf32> to vector<16x64xf32>
    %509 = arith.addf %507, %508 : vector<16x64xf32>
    %510 = arith.truncf %509 : vector<16x64xf32> to vector<16x64xbf16>
    %c1_291 = arith.constant 1 : index
    %c0_292 = arith.constant 0 : index
    %c0_293 = arith.constant 0 : index
    %511 = vector.load %arg6[%c1_291, %c0_292, %c0_293] : memref<2x64x128xbf16, #tpu.memory_space<vmem>>, vector<1x64x128xbf16>
    %512 = vector.shape_cast %511 : vector<1x64x128xbf16> to vector<64x128xbf16>
    %cst_294 = arith.constant dense<0.000000e+00> : vector<16x128xf32>
    %513 = tpu.matmul %510, %512, %cst_294 {dimension_numbers = #tpu.dot_dimension_numbers<[1], [0], [0], [1], [0, 0, 1, 1], [], []>} : vector<16x64xbf16>, vector<64x128xbf16>, vector<16x128xf32> -> vector<16x128xf32>
    %c1_295 = arith.constant 1 : index
    %c0_296 = arith.constant 0 : index
    %c0_297 = arith.constant 0 : index
    %514 = vector.load %arg5[%c1_295, %c0_296, %c0_297] : memref<2x10x128xf32, #tpu.memory_space<vmem>>, vector<1x1x128xf32>
    %515 = vector.shape_cast %514 : vector<1x1x128xf32> to vector<1x128xf32>
    %516 = vector.broadcast %515 : vector<1x128xf32> to vector<16x128xf32>
    %517 = arith.addf %513, %516 : vector<16x128xf32>
    %cst_298 = arith.constant 0.000000e+00 : f32
    %518 = vector.broadcast %cst_298 : f32 to vector<16x128xf32>
    %519 = arith.maximumf %517, %518 : vector<16x128xf32>
    %520 = arith.truncf %519 : vector<16x128xf32> to vector<16x128xbf16>
    %c1_299 = arith.constant 1 : index
    %c0_300 = arith.constant 0 : index
    %c0_301 = arith.constant 0 : index
    %521 = vector.load %arg7[%c1_299, %c0_300, %c0_301] : memref<2x128x64xbf16, #tpu.memory_space<vmem>>, vector<1x128x64xbf16>
    %522 = vector.shape_cast %521 : vector<1x128x64xbf16> to vector<128x64xbf16>
    %cst_302 = arith.constant dense<0.000000e+00> : vector<16x64xf32>
    %523 = tpu.matmul %520, %522, %cst_302 {dimension_numbers = #tpu.dot_dimension_numbers<[1], [0], [0], [1], [0, 0, 1, 1], [], []>} : vector<16x128xbf16>, vector<128x64xbf16>, vector<16x64xf32> -> vector<16x64xf32>
    %c1_303 = arith.constant 1 : index
    %c1_304 = arith.constant 1 : index
    %c0_305 = arith.constant 0 : index
    %524 = vector.load %arg5[%c1_303, %c1_304, %c0_305] : memref<2x10x128xf32, #tpu.memory_space<vmem>>, vector<1x1x64xf32>
    %525 = vector.shape_cast %524 : vector<1x1x64xf32> to vector<1x64xf32>
    %526 = vector.broadcast %525 : vector<1x64xf32> to vector<16x64xf32>
    %527 = arith.addf %523, %526 : vector<16x64xf32>
    %528 = arith.addf %509, %527 : vector<16x64xf32>
    %c1_306 = arith.constant 1 : index
    %c8_307 = arith.constant 8 : index
    %c0_308 = arith.constant 0 : index
    %529 = vector.load %arg5[%c1_306, %c8_307, %c0_308] : memref<2x10x128xf32, #tpu.memory_space<vmem>>, vector<1x1x64xf32>
    %530 = vector.shape_cast %529 : vector<1x1x64xf32> to vector<1x64xf32>
    %c1_309 = arith.constant 1 : index
    %c9_310 = arith.constant 9 : index
    %c0_311 = arith.constant 0 : index
    %531 = vector.load %arg5[%c1_309, %c9_310, %c0_311] : memref<2x10x128xf32, #tpu.memory_space<vmem>>, vector<1x1x64xf32>
    %532 = vector.shape_cast %531 : vector<1x1x64xf32> to vector<1x64xf32>
    %cst_312 = arith.constant dense<0.000000e+00> : vector<16xf32>
    %533 = vector.multi_reduction <add>, %528, %cst_312 [1] : vector<16x64xf32> to vector<16xf32>
    %534 = vector.shape_cast %533 : vector<16xf32> to vector<16x1xf32>
    %cst_313 = arith.constant 6.400000e+01 : f32
    %535 = vector.broadcast %cst_313 : f32 to vector<16x1xf32>
    %536 = arith.divf %534, %535 : vector<16x1xf32>
    %537 = vector.broadcast %536 : vector<16x1xf32> to vector<16x64xf32>
    %538 = arith.subf %528, %537 : vector<16x64xf32>
    %539 = arith.mulf %538, %538 : vector<16x64xf32>
    %cst_314 = arith.constant dense<0.000000e+00> : vector<16xf32>
    %540 = vector.multi_reduction <add>, %539, %cst_314 [1] : vector<16x64xf32> to vector<16xf32>
    %541 = vector.shape_cast %540 : vector<16xf32> to vector<16x1xf32>
    %cst_315 = arith.constant 6.400000e+01 : f32
    %542 = vector.broadcast %cst_315 : f32 to vector<16x1xf32>
    %543 = arith.divf %541, %542 : vector<16x1xf32>
    %544 = vector.broadcast %536 : vector<16x1xf32> to vector<16x64xf32>
    %545 = arith.subf %528, %544 : vector<16x64xf32>
    %cst_316 = arith.constant 9.99999974E-6 : f32
    %546 = vector.broadcast %cst_316 : f32 to vector<16x1xf32>
    %547 = arith.addf %543, %546 : vector<16x1xf32>
    %548 = math.rsqrt %547 : vector<16x1xf32>
    %549 = vector.broadcast %548 : vector<16x1xf32> to vector<16x64xf32>
    %550 = arith.mulf %545, %549 : vector<16x64xf32>
    %551 = vector.broadcast %530 : vector<1x64xf32> to vector<16x64xf32>
    %552 = arith.mulf %550, %551 : vector<16x64xf32>
    %553 = vector.broadcast %532 : vector<1x64xf32> to vector<16x64xf32>
    %554 = arith.addf %552, %553 : vector<16x64xf32>
    %c0_317 = arith.constant 0 : index
    %c0_318 = arith.constant 0 : index
    %555 = vector.load %arg8[%c0_317, %c0_318] : memref<16x64xf32, #tpu.memory_space<vmem>>, vector<16x64xf32>
    tpu.vector_store %arg8[%c0_317, %c0_318], %554 {strides = array<i32>} : memref<16x64xf32, #tpu.memory_space<vmem>>, vector<16x64xf32>,
    return
  }
  func.func @transform_0(%arg0: i32) -> (i32, i32) {
    %c0_i32 = arith.constant 0 : i32
    %c0_i32_0 = arith.constant 0 : i32
    %c0_i32_1 = arith.constant 0 : i32
    return %c0_i32, %c0_i32_0 : i32, i32
  }
  func.func @transform_1(%arg0: i32) -> (i32, i32, i32) {
    %c0_i32 = arith.constant 0 : i32
    %c0_i32_0 = arith.constant 0 : i32
    %c0_i32_1 = arith.constant 0 : i32
    %c0_i32_2 = arith.constant 0 : i32
    return %c0_i32, %c0_i32_0, %c0_i32_1 : i32, i32, i32
  }
  func.func @transform_2(%arg0: i32) -> (i32, i32, i32) {
    %c0_i32 = arith.constant 0 : i32
    %c0_i32_0 = arith.constant 0 : i32
    %c0_i32_1 = arith.constant 0 : i32
    %c0_i32_2 = arith.constant 0 : i32
    return %c0_i32, %c0_i32_0, %c0_i32_1 : i32, i32, i32
  }
  func.func @transform_3(%arg0: i32) -> (i32, i32, i32) {
    %c0_i32 = arith.constant 0 : i32
    %c0_i32_0 = arith.constant 0 : i32
    %c0_i32_1 = arith.constant 0 : i32
    %c0_i32_2 = arith.constant 0 : i32
    return %c0_i32, %c0_i32_0, %c0_i32_1 : i32, i32, i32
  }
  func.func @transform_4(%arg0: i32) -> (i32, i32, i32) {
    %c0_i32 = arith.constant 0 : i32
    %c0_i32_0 = arith.constant 0 : i32
    %c0_i32_1 = arith.constant 0 : i32
    %c0_i32_2 = arith.constant 0 : i32
    return %c0_i32, %c0_i32_0, %c0_i32_1 : i32, i32, i32
  }
  func.func @transform_5(%arg0: i32) -> (i32, i32, i32) {
    %c0_i32 = arith.constant 0 : i32
    %c0_i32_0 = arith.constant 0 : i32
    %c0_i32_1 = arith.constant 0 : i32
    %c0_i32_2 = arith.constant 0 : i32
    return %c0_i32, %c0_i32_0, %c0_i32_1 : i32, i32, i32
  }
  func.func @transform_6(%arg0: i32) -> (i32, i32, i32) {
    %c0_i32 = arith.constant 0 : i32
    %c0_i32_0 = arith.constant 0 : i32
    %c0_i32_1 = arith.constant 0 : i32
    %c0_i32_2 = arith.constant 0 : i32
    return %c0_i32, %c0_i32_0, %c0_i32_1 : i32, i32, i32
  }
  func.func @transform_7(%arg0: i32) -> (i32, i32) {
    %c0_i32 = arith.constant 0 : i32
    %c0_i32_0 = arith.constant 0 : i32
    %c0_i32_1 = arith.constant 0 : i32
    return %c0_i32, %c0_i32_0 : i32, i32
  }
}

module attributes {stable_mosaic.version = 11 : i64} {
  func.func @_main_kernel(%arg0: i32, %arg1: memref<1x64x512xbf16, #tpu.memory_space<vmem>>, %arg2: memref<1x9x8x128xbf16, #tpu.memory_space<vmem>>, %arg3: memref<1x1x9xf32, #tpu.memory_space<vmem>>, %arg4: memref<16x64xf32, #tpu.memory_space<vmem>>, %arg5: memref<512x64xbf16, #tpu.memory_space<vmem>>, %arg6: memref<64x64xf32, #tpu.memory_space<vmem>>, %arg7: memref<9x64xf32, #tpu.memory_space<vmem>>, %arg8: memref<24x64x32xbf16, #tpu.memory_space<vmem>>, %arg9: memref<24x1x32xf32, #tpu.memory_space<vmem>>, %arg10: memref<8x32x64xbf16, #tpu.memory_space<vmem>>, %arg11: memref<2x10x128xf32, #tpu.memory_space<vmem>>, %arg12: memref<2x64x128xbf16, #tpu.memory_space<vmem>>, %arg13: memref<2x128x64xbf16, #tpu.memory_space<vmem>>, %arg14: memref<2x128x128xbf16, #tpu.memory_space<vmem>>, %arg15: memref<2x1x128xf32, #tpu.memory_space<vmem>>, %arg16: memref<11x128x128xbf16, #tpu.memory_space<vmem>>, %arg17: memref<2x1x128xf32, #tpu.memory_space<vmem>>, %arg18: memref<1x2x16x128xf32, #tpu.memory_space<vmem>>) attributes {dimension_semantics = [#tpu.dimension_semantics<parallel>], iteration_bounds = array<i64: 2>, scalar_prefetch = 0 : i64, scratch_operands = 0 : i64, tpu.core_type = #tpu.core_type<tc>, window_params = [{transform_indices = @transform_0, window_bounds = array<i64: 1, 64, 512>}, {transform_indices = @transform_1, window_bounds = array<i64: 1, 9, 8, 128>}, {transform_indices = @transform_2, window_bounds = array<i64: 1, 1, 9>}, {pipeline_mode = #tpu.pipeline_mode<synchronous>, transform_indices = @transform_3, window_bounds = array<i64: 16, 64>}, {pipeline_mode = #tpu.pipeline_mode<synchronous>, transform_indices = @transform_4, window_bounds = array<i64: 512, 64>}, {pipeline_mode = #tpu.pipeline_mode<synchronous>, transform_indices = @transform_5, window_bounds = array<i64: 64, 64>}, {pipeline_mode = #tpu.pipeline_mode<synchronous>, transform_indices = @transform_6, window_bounds = array<i64: 9, 64>}, {pipeline_mode = #tpu.pipeline_mode<synchronous>, transform_indices = @transform_7, window_bounds = array<i64: 24, 64, 32>}, {pipeline_mode = #tpu.pipeline_mode<synchronous>, transform_indices = @transform_8, window_bounds = array<i64: 24, 1, 32>}, {pipeline_mode = #tpu.pipeline_mode<synchronous>, transform_indices = @transform_9, window_bounds = array<i64: 8, 32, 64>}, {pipeline_mode = #tpu.pipeline_mode<synchronous>, transform_indices = @transform_10, window_bounds = array<i64: 2, 10, 128>}, {pipeline_mode = #tpu.pipeline_mode<synchronous>, transform_indices = @transform_11, window_bounds = array<i64: 2, 64, 128>}, {pipeline_mode = #tpu.pipeline_mode<synchronous>, transform_indices = @transform_12, window_bounds = array<i64: 2, 128, 64>}, {pipeline_mode = #tpu.pipeline_mode<synchronous>, transform_indices = @transform_13, window_bounds = array<i64: 2, 128, 128>}, {pipeline_mode = #tpu.pipeline_mode<synchronous>, transform_indices = @transform_14, window_bounds = array<i64: 2, 1, 128>}, {pipeline_mode = #tpu.pipeline_mode<synchronous>, transform_indices = @transform_15, window_bounds = array<i64: 11, 128, 128>}, {pipeline_mode = #tpu.pipeline_mode<synchronous>, transform_indices = @transform_16, window_bounds = array<i64: 2, 1, 128>}, {transform_indices = @transform_17, window_bounds = array<i64: 1, 2, 16, 128>}]} {
    %c0 = arith.constant 0 : index
    %c0_0 = arith.constant 0 : index
    %c0_1 = arith.constant 0 : index
    %0 = vector.load %arg1[%c0, %c0_0, %c0_1] : memref<1x64x512xbf16, #tpu.memory_space<vmem>>, vector<1x64x512xbf16>
    %1 = vector.shape_cast %0 : vector<1x64x512xbf16> to vector<64x512xbf16>
    %c0_2 = arith.constant 0 : index
    %c0_3 = arith.constant 0 : index
    %2 = vector.load %arg5[%c0_2, %c0_3] : memref<512x64xbf16, #tpu.memory_space<vmem>>, vector<512x64xbf16>
    %cst = arith.constant dense<0.000000e+00> : vector<64x64xf32>
    %3 = tpu.matmul %1, %2, %cst {dimension_numbers = #tpu.dot_dimension_numbers<[1], [0], [0], [1], [0, 0, 1, 1], [], []>} : vector<64x512xbf16>, vector<512x64xbf16>, vector<64x64xf32> -> vector<64x64xf32>
    %c0_4 = arith.constant 0 : index
    %c0_5 = arith.constant 0 : index
    %4 = vector.load %arg6[%c0_4, %c0_5] : memref<64x64xf32, #tpu.memory_space<vmem>>, vector<64x64xf32>
    %5 = arith.addf %3, %4 : vector<64x64xf32>
    %c0_6 = arith.constant 0 : index
    %c0_7 = arith.constant 0 : index
    %c0_8 = arith.constant 0 : index
    %6 = vector.load %arg3[%c0_6, %c0_7, %c0_8] : memref<1x1x9xf32, #tpu.memory_space<vmem>>, vector<1x1x9xf32>
    %7 = vector.shape_cast %6 : vector<1x1x9xf32> to vector<1x9xf32>
    %c0_9 = arith.constant 0 : index
    %c0_10 = arith.constant 0 : index
    %8 = vector.load %arg7[%c0_9, %c0_10] : memref<9x64xf32, #tpu.memory_space<vmem>>, vector<9x64xf32>
    %cst_11 = arith.constant dense<0.000000e+00> : vector<1x64xf32>
    %9 = tpu.matmul %7, %8, %cst_11 {dimension_numbers = #tpu.dot_dimension_numbers<[1], [0], [0], [1], [0, 0, 1, 1], [], []>} : vector<1x9xf32>, vector<9x64xf32>, vector<1x64xf32> -> vector<1x64xf32>
    %c0_12 = arith.constant 0 : index
    %c0_13 = arith.constant 0 : index
    %10 = vector.load %arg4[%c0_12, %c0_13] : memref<16x64xf32, #tpu.memory_space<vmem>>, vector<16x64xf32>
    %11 = vector.broadcast %9 : vector<1x64xf32> to vector<16x64xf32>
    %12 = arith.addf %10, %11 : vector<16x64xf32>
    %13 = arith.truncf %12 : vector<16x64xf32> to vector<16x64xbf16>
    %14 = arith.truncf %12 : vector<16x64xf32> to vector<16x64xbf16>
    %c0_14 = arith.constant 0 : index
    %c0_15 = arith.constant 0 : index
    %c0_16 = arith.constant 0 : index
    %15 = vector.load %arg8[%c0_14, %c0_15, %c0_16] : memref<24x64x32xbf16, #tpu.memory_space<vmem>>, vector<1x64x32xbf16>
    %16 = vector.shape_cast %15 : vector<1x64x32xbf16> to vector<64x32xbf16>
    %cst_17 = arith.constant dense<0.000000e+00> : vector<16x32xf32>
    %17 = tpu.matmul %13, %16, %cst_17 {dimension_numbers = #tpu.dot_dimension_numbers<[1], [0], [0], [1], [0, 0, 1, 1], [], []>} : vector<16x64xbf16>, vector<64x32xbf16>, vector<16x32xf32> -> vector<16x32xf32>
    %c0_18 = arith.constant 0 : index
    %c0_19 = arith.constant 0 : index
    %c0_20 = arith.constant 0 : index
    %18 = vector.load %arg9[%c0_18, %c0_19, %c0_20] : memref<24x1x32xf32, #tpu.memory_space<vmem>>, vector<1x1x32xf32>
    %19 = vector.shape_cast %18 : vector<1x1x32xf32> to vector<1x32xf32>
    %20 = vector.broadcast %19 : vector<1x32xf32> to vector<16x32xf32>
    %21 = arith.addf %17, %20 : vector<16x32xf32>
    %c2 = arith.constant 2 : index
    %c0_21 = arith.constant 0 : index
    %c0_22 = arith.constant 0 : index
    %22 = vector.load %arg8[%c2, %c0_21, %c0_22] : memref<24x64x32xbf16, #tpu.memory_space<vmem>>, vector<1x64x32xbf16>
    %23 = vector.shape_cast %22 : vector<1x64x32xbf16> to vector<64x32xbf16>
    %cst_23 = arith.constant dense<0.000000e+00> : vector<16x32xf32>
    %24 = tpu.matmul %14, %23, %cst_23 {dimension_numbers = #tpu.dot_dimension_numbers<[1], [0], [0], [1], [0, 0, 1, 1], [], []>} : vector<16x64xbf16>, vector<64x32xbf16>, vector<16x32xf32> -> vector<16x32xf32>
    %c2_24 = arith.constant 2 : index
    %c0_25 = arith.constant 0 : index
    %c0_26 = arith.constant 0 : index
    %25 = vector.load %arg9[%c2_24, %c0_25, %c0_26] : memref<24x1x32xf32, #tpu.memory_space<vmem>>, vector<1x1x32xf32>
    %26 = vector.shape_cast %25 : vector<1x1x32xf32> to vector<1x32xf32>
    %27 = vector.broadcast %26 : vector<1x32xf32> to vector<16x32xf32>
    %28 = arith.addf %24, %27 : vector<16x32xf32>
    %c4 = arith.constant 4 : index
    %c0_27 = arith.constant 0 : index
    %c0_28 = arith.constant 0 : index
    %29 = vector.load %arg8[%c4, %c0_27, %c0_28] : memref<24x64x32xbf16, #tpu.memory_space<vmem>>, vector<1x64x32xbf16>
    %30 = vector.shape_cast %29 : vector<1x64x32xbf16> to vector<64x32xbf16>
    %cst_29 = arith.constant dense<0.000000e+00> : vector<16x32xf32>
    %31 = tpu.matmul %14, %30, %cst_29 {dimension_numbers = #tpu.dot_dimension_numbers<[1], [0], [0], [1], [0, 0, 1, 1], [], []>} : vector<16x64xbf16>, vector<64x32xbf16>, vector<16x32xf32> -> vector<16x32xf32>
    %c4_30 = arith.constant 4 : index
    %c0_31 = arith.constant 0 : index
    %c0_32 = arith.constant 0 : index
    %32 = vector.load %arg9[%c4_30, %c0_31, %c0_32] : memref<24x1x32xf32, #tpu.memory_space<vmem>>, vector<1x1x32xf32>
    %33 = vector.shape_cast %32 : vector<1x1x32xf32> to vector<1x32xf32>
    %34 = vector.broadcast %33 : vector<1x32xf32> to vector<16x32xf32>
    %35 = arith.addf %31, %34 : vector<16x32xf32>
    %36 = arith.truncf %21 : vector<16x32xf32> to vector<16x32xbf16>
    %37 = arith.truncf %28 : vector<16x32xf32> to vector<16x32xbf16>
    %cst_33 = arith.constant dense<0.000000e+00> : vector<16x16xf32>
    %38 = tpu.matmul %36, %37, %cst_33 {dimension_numbers = #tpu.dot_dimension_numbers<[1], [1], [0], [0], [0, 0, 1, 0], [], []>} : vector<16x32xbf16>, vector<16x32xbf16>, vector<16x16xf32> -> vector<16x16xf32>
    %cst_34 = arith.constant dense<0xFF800000> : vector<16xf32>
    %39 = vector.multi_reduction <maximumf>, %38, %cst_34 [1] : vector<16x16xf32> to vector<16xf32>
    %40 = vector.shape_cast %39 : vector<16xf32> to vector<16x1xf32>
    %41 = vector.broadcast %40 : vector<16x1xf32> to vector<16x16xf32>
    %42 = arith.subf %38, %41 : vector<16x16xf32>
    %43 = math.exp %42 : vector<16x16xf32>
    %cst_35 = arith.constant dense<0.000000e+00> : vector<16xf32>
    %44 = vector.multi_reduction <add>, %43, %cst_35 [1] : vector<16x16xf32> to vector<16xf32>
    %45 = vector.shape_cast %44 : vector<16xf32> to vector<16x1xf32>
    %46 = tpu.reciprocal %45 {approx = true} : vector<16x1xf32> -> vector<16x1xf32>
    %47 = vector.broadcast %46 : vector<16x1xf32> to vector<16x16xf32>
    %48 = arith.mulf %43, %47 : vector<16x16xf32>
    %49 = arith.truncf %48 : vector<16x16xf32> to vector<16x16xbf16>
    %50 = arith.truncf %35 : vector<16x32xf32> to vector<16x32xbf16>
    %cst_36 = arith.constant dense<0.000000e+00> : vector<16x32xf32>
    %51 = tpu.matmul %49, %50, %cst_36 {dimension_numbers = #tpu.dot_dimension_numbers<[1], [0], [0], [1], [0, 0, 1, 1], [], []>} : vector<16x16xbf16>, vector<16x32xbf16>, vector<16x32xf32> -> vector<16x32xf32>
    %52 = arith.truncf %51 : vector<16x32xf32> to vector<16x32xbf16>
    %c0_37 = arith.constant 0 : index
    %c0_38 = arith.constant 0 : index
    %c0_39 = arith.constant 0 : index
    %53 = vector.load %arg10[%c0_37, %c0_38, %c0_39] : memref<8x32x64xbf16, #tpu.memory_space<vmem>>, vector<1x32x64xbf16>
    %54 = vector.shape_cast %53 : vector<1x32x64xbf16> to vector<32x64xbf16>
    %cst_40 = arith.constant dense<0.000000e+00> : vector<16x64xf32>
    %55 = tpu.matmul %52, %54, %cst_40 {dimension_numbers = #tpu.dot_dimension_numbers<[1], [0], [0], [1], [0, 0, 1, 1], [], []>} : vector<16x32xbf16>, vector<32x64xbf16>, vector<16x64xf32> -> vector<16x64xf32>
    %c1 = arith.constant 1 : index
    %c0_41 = arith.constant 0 : index
    %c0_42 = arith.constant 0 : index
    %56 = vector.load %arg8[%c1, %c0_41, %c0_42] : memref<24x64x32xbf16, #tpu.memory_space<vmem>>, vector<1x64x32xbf16>
    %57 = vector.shape_cast %56 : vector<1x64x32xbf16> to vector<64x32xbf16>
    %cst_43 = arith.constant dense<0.000000e+00> : vector<16x32xf32>
    %58 = tpu.matmul %13, %57, %cst_43 {dimension_numbers = #tpu.dot_dimension_numbers<[1], [0], [0], [1], [0, 0, 1, 1], [], []>} : vector<16x64xbf16>, vector<64x32xbf16>, vector<16x32xf32> -> vector<16x32xf32>
    %c1_44 = arith.constant 1 : index
    %c0_45 = arith.constant 0 : index
    %c0_46 = arith.constant 0 : index
    %59 = vector.load %arg9[%c1_44, %c0_45, %c0_46] : memref<24x1x32xf32, #tpu.memory_space<vmem>>, vector<1x1x32xf32>
    %60 = vector.shape_cast %59 : vector<1x1x32xf32> to vector<1x32xf32>
    %61 = vector.broadcast %60 : vector<1x32xf32> to vector<16x32xf32>
    %62 = arith.addf %58, %61 : vector<16x32xf32>
    %c3 = arith.constant 3 : index
    %c0_47 = arith.constant 0 : index
    %c0_48 = arith.constant 0 : index
    %63 = vector.load %arg8[%c3, %c0_47, %c0_48] : memref<24x64x32xbf16, #tpu.memory_space<vmem>>, vector<1x64x32xbf16>
    %64 = vector.shape_cast %63 : vector<1x64x32xbf16> to vector<64x32xbf16>
    %cst_49 = arith.constant dense<0.000000e+00> : vector<16x32xf32>
    %65 = tpu.matmul %14, %64, %cst_49 {dimension_numbers = #tpu.dot_dimension_numbers<[1], [0], [0], [1], [0, 0, 1, 1], [], []>} : vector<16x64xbf16>, vector<64x32xbf16>, vector<16x32xf32> -> vector<16x32xf32>
    %c3_50 = arith.constant 3 : index
    %c0_51 = arith.constant 0 : index
    %c0_52 = arith.constant 0 : index
    %66 = vector.load %arg9[%c3_50, %c0_51, %c0_52] : memref<24x1x32xf32, #tpu.memory_space<vmem>>, vector<1x1x32xf32>
    %67 = vector.shape_cast %66 : vector<1x1x32xf32> to vector<1x32xf32>
    %68 = vector.broadcast %67 : vector<1x32xf32> to vector<16x32xf32>
    %69 = arith.addf %65, %68 : vector<16x32xf32>
    %c5 = arith.constant 5 : index
    %c0_53 = arith.constant 0 : index
    %c0_54 = arith.constant 0 : index
    %70 = vector.load %arg8[%c5, %c0_53, %c0_54] : memref<24x64x32xbf16, #tpu.memory_space<vmem>>, vector<1x64x32xbf16>
    %71 = vector.shape_cast %70 : vector<1x64x32xbf16> to vector<64x32xbf16>
    %cst_55 = arith.constant dense<0.000000e+00> : vector<16x32xf32>
    %72 = tpu.matmul %14, %71, %cst_55 {dimension_numbers = #tpu.dot_dimension_numbers<[1], [0], [0], [1], [0, 0, 1, 1], [], []>} : vector<16x64xbf16>, vector<64x32xbf16>, vector<16x32xf32> -> vector<16x32xf32>
    %c5_56 = arith.constant 5 : index
    %c0_57 = arith.constant 0 : index
    %c0_58 = arith.constant 0 : index
    %73 = vector.load %arg9[%c5_56, %c0_57, %c0_58] : memref<24x1x32xf32, #tpu.memory_space<vmem>>, vector<1x1x32xf32>
    %74 = vector.shape_cast %73 : vector<1x1x32xf32> to vector<1x32xf32>
    %75 = vector.broadcast %74 : vector<1x32xf32> to vector<16x32xf32>
    %76 = arith.addf %72, %75 : vector<16x32xf32>
    %77 = arith.truncf %62 : vector<16x32xf32> to vector<16x32xbf16>
    %78 = arith.truncf %69 : vector<16x32xf32> to vector<16x32xbf16>
    %cst_59 = arith.constant dense<0.000000e+00> : vector<16x16xf32>
    %79 = tpu.matmul %77, %78, %cst_59 {dimension_numbers = #tpu.dot_dimension_numbers<[1], [1], [0], [0], [0, 0, 1, 0], [], []>} : vector<16x32xbf16>, vector<16x32xbf16>, vector<16x16xf32> -> vector<16x16xf32>
    %cst_60 = arith.constant dense<0xFF800000> : vector<16xf32>
    %80 = vector.multi_reduction <maximumf>, %79, %cst_60 [1] : vector<16x16xf32> to vector<16xf32>
    %81 = vector.shape_cast %80 : vector<16xf32> to vector<16x1xf32>
    %82 = vector.broadcast %81 : vector<16x1xf32> to vector<16x16xf32>
    %83 = arith.subf %79, %82 : vector<16x16xf32>
    %84 = math.exp %83 : vector<16x16xf32>
    %cst_61 = arith.constant dense<0.000000e+00> : vector<16xf32>
    %85 = vector.multi_reduction <add>, %84, %cst_61 [1] : vector<16x16xf32> to vector<16xf32>
    %86 = vector.shape_cast %85 : vector<16xf32> to vector<16x1xf32>
    %87 = tpu.reciprocal %86 {approx = true} : vector<16x1xf32> -> vector<16x1xf32>
    %88 = vector.broadcast %87 : vector<16x1xf32> to vector<16x16xf32>
    %89 = arith.mulf %84, %88 : vector<16x16xf32>
    %90 = arith.truncf %89 : vector<16x16xf32> to vector<16x16xbf16>
    %91 = arith.truncf %76 : vector<16x32xf32> to vector<16x32xbf16>
    %cst_62 = arith.constant dense<0.000000e+00> : vector<16x32xf32>
    %92 = tpu.matmul %90, %91, %cst_62 {dimension_numbers = #tpu.dot_dimension_numbers<[1], [0], [0], [1], [0, 0, 1, 1], [], []>} : vector<16x16xbf16>, vector<16x32xbf16>, vector<16x32xf32> -> vector<16x32xf32>
    %93 = arith.truncf %92 : vector<16x32xf32> to vector<16x32xbf16>
    %c1_63 = arith.constant 1 : index
    %c0_64 = arith.constant 0 : index
    %c0_65 = arith.constant 0 : index
    %94 = vector.load %arg10[%c1_63, %c0_64, %c0_65] : memref<8x32x64xbf16, #tpu.memory_space<vmem>>, vector<1x32x64xbf16>
    %95 = vector.shape_cast %94 : vector<1x32x64xbf16> to vector<32x64xbf16>
    %cst_66 = arith.constant dense<0.000000e+00> : vector<16x64xf32>
    %96 = tpu.matmul %93, %95, %cst_66 {dimension_numbers = #tpu.dot_dimension_numbers<[1], [0], [0], [1], [0, 0, 1, 1], [], []>} : vector<16x32xbf16>, vector<32x64xbf16>, vector<16x64xf32> -> vector<16x64xf32>
    %97 = arith.addf %55, %96 : vector<16x64xf32>
    %c0_67 = arith.constant 0 : index
    %c2_68 = arith.constant 2 : index
    %c0_69 = arith.constant 0 : index
    %98 = vector.load %arg11[%c0_67, %c2_68, %c0_69] : memref<2x10x128xf32, #tpu.memory_space<vmem>>, vector<1x1x64xf32>
    %99 = vector.shape_cast %98 : vector<1x1x64xf32> to vector<1x64xf32>
    %100 = vector.broadcast %99 : vector<1x64xf32> to vector<16x64xf32>
    %101 = arith.addf %97, %100 : vector<16x64xf32>
    %102 = arith.addf %12, %101 : vector<16x64xf32>
    %c0_70 = arith.constant 0 : index
    %c4_71 = arith.constant 4 : index
    %c0_72 = arith.constant 0 : index
    %103 = vector.load %arg11[%c0_70, %c4_71, %c0_72] : memref<2x10x128xf32, #tpu.memory_space<vmem>>, vector<1x1x64xf32>
    %104 = vector.shape_cast %103 : vector<1x1x64xf32> to vector<1x64xf32>
    %c0_73 = arith.constant 0 : index
    %c5_74 = arith.constant 5 : index
    %c0_75 = arith.constant 0 : index
    %105 = vector.load %arg11[%c0_73, %c5_74, %c0_75] : memref<2x10x128xf32, #tpu.memory_space<vmem>>, vector<1x1x64xf32>
    %106 = vector.shape_cast %105 : vector<1x1x64xf32> to vector<1x64xf32>
    %cst_76 = arith.constant dense<0.000000e+00> : vector<16xf32>
    %107 = vector.multi_reduction <add>, %102, %cst_76 [1] : vector<16x64xf32> to vector<16xf32>
    %108 = vector.shape_cast %107 : vector<16xf32> to vector<16x1xf32>
    %cst_77 = arith.constant 6.400000e+01 : f32
    %109 = vector.broadcast %cst_77 : f32 to vector<16x1xf32>
    %110 = arith.divf %108, %109 : vector<16x1xf32>
    %111 = vector.broadcast %110 : vector<16x1xf32> to vector<16x64xf32>
    %112 = arith.subf %102, %111 : vector<16x64xf32>
    %113 = arith.mulf %112, %112 : vector<16x64xf32>
    %cst_78 = arith.constant dense<0.000000e+00> : vector<16xf32>
    %114 = vector.multi_reduction <add>, %113, %cst_78 [1] : vector<16x64xf32> to vector<16xf32>
    %115 = vector.shape_cast %114 : vector<16xf32> to vector<16x1xf32>
    %cst_79 = arith.constant 6.400000e+01 : f32
    %116 = vector.broadcast %cst_79 : f32 to vector<16x1xf32>
    %117 = arith.divf %115, %116 : vector<16x1xf32>
    %118 = vector.broadcast %110 : vector<16x1xf32> to vector<16x64xf32>
    %119 = arith.subf %102, %118 : vector<16x64xf32>
    %cst_80 = arith.constant 9.99999974E-6 : f32
    %120 = vector.broadcast %cst_80 : f32 to vector<16x1xf32>
    %121 = arith.addf %117, %120 : vector<16x1xf32>
    %122 = math.rsqrt %121 : vector<16x1xf32>
    %123 = vector.broadcast %122 : vector<16x1xf32> to vector<16x64xf32>
    %124 = arith.mulf %119, %123 : vector<16x64xf32>
    %125 = vector.broadcast %104 : vector<1x64xf32> to vector<16x64xf32>
    %126 = arith.mulf %124, %125 : vector<16x64xf32>
    %127 = vector.broadcast %106 : vector<1x64xf32> to vector<16x64xf32>
    %128 = arith.addf %126, %127 : vector<16x64xf32>
    %129 = arith.truncf %128 : vector<16x64xf32> to vector<16x64xbf16>
    %130 = arith.truncf %5 : vector<64x64xf32> to vector<64x64xbf16>
    %c6 = arith.constant 6 : index
    %c0_81 = arith.constant 0 : index
    %c0_82 = arith.constant 0 : index
    %131 = vector.load %arg8[%c6, %c0_81, %c0_82] : memref<24x64x32xbf16, #tpu.memory_space<vmem>>, vector<1x64x32xbf16>
    %132 = vector.shape_cast %131 : vector<1x64x32xbf16> to vector<64x32xbf16>
    %cst_83 = arith.constant dense<0.000000e+00> : vector<16x32xf32>
    %133 = tpu.matmul %129, %132, %cst_83 {dimension_numbers = #tpu.dot_dimension_numbers<[1], [0], [0], [1], [0, 0, 1, 1], [], []>} : vector<16x64xbf16>, vector<64x32xbf16>, vector<16x32xf32> -> vector<16x32xf32>
    %c6_84 = arith.constant 6 : index
    %c0_85 = arith.constant 0 : index
    %c0_86 = arith.constant 0 : index
    %134 = vector.load %arg9[%c6_84, %c0_85, %c0_86] : memref<24x1x32xf32, #tpu.memory_space<vmem>>, vector<1x1x32xf32>
    %135 = vector.shape_cast %134 : vector<1x1x32xf32> to vector<1x32xf32>
    %136 = vector.broadcast %135 : vector<1x32xf32> to vector<16x32xf32>
    %137 = arith.addf %133, %136 : vector<16x32xf32>
    %c8 = arith.constant 8 : index
    %c0_87 = arith.constant 0 : index
    %c0_88 = arith.constant 0 : index
    %138 = vector.load %arg8[%c8, %c0_87, %c0_88] : memref<24x64x32xbf16, #tpu.memory_space<vmem>>, vector<1x64x32xbf16>
    %139 = vector.shape_cast %138 : vector<1x64x32xbf16> to vector<64x32xbf16>
    %cst_89 = arith.constant dense<0.000000e+00> : vector<64x32xf32>
    %140 = tpu.matmul %130, %139, %cst_89 {dimension_numbers = #tpu.dot_dimension_numbers<[1], [0], [0], [1], [0, 0, 1, 1], [], []>} : vector<64x64xbf16>, vector<64x32xbf16>, vector<64x32xf32> -> vector<64x32xf32>
    %c8_90 = arith.constant 8 : index
    %c0_91 = arith.constant 0 : index
    %c0_92 = arith.constant 0 : index
    %141 = vector.load %arg9[%c8_90, %c0_91, %c0_92] : memref<24x1x32xf32, #tpu.memory_space<vmem>>, vector<1x1x32xf32>
    %142 = vector.shape_cast %141 : vector<1x1x32xf32> to vector<1x32xf32>
    %143 = vector.broadcast %142 : vector<1x32xf32> to vector<64x32xf32>
    %144 = arith.addf %140, %143 : vector<64x32xf32>
    %c10 = arith.constant 10 : index
    %c0_93 = arith.constant 0 : index
    %c0_94 = arith.constant 0 : index
    %145 = vector.load %arg8[%c10, %c0_93, %c0_94] : memref<24x64x32xbf16, #tpu.memory_space<vmem>>, vector<1x64x32xbf16>
    %146 = vector.shape_cast %145 : vector<1x64x32xbf16> to vector<64x32xbf16>
    %cst_95 = arith.constant dense<0.000000e+00> : vector<64x32xf32>
    %147 = tpu.matmul %130, %146, %cst_95 {dimension_numbers = #tpu.dot_dimension_numbers<[1], [0], [0], [1], [0, 0, 1, 1], [], []>} : vector<64x64xbf16>, vector<64x32xbf16>, vector<64x32xf32> -> vector<64x32xf32>
    %c10_96 = arith.constant 10 : index
    %c0_97 = arith.constant 0 : index
    %c0_98 = arith.constant 0 : index
    %148 = vector.load %arg9[%c10_96, %c0_97, %c0_98] : memref<24x1x32xf32, #tpu.memory_space<vmem>>, vector<1x1x32xf32>
    %149 = vector.shape_cast %148 : vector<1x1x32xf32> to vector<1x32xf32>
    %150 = vector.broadcast %149 : vector<1x32xf32> to vector<64x32xf32>
    %151 = arith.addf %147, %150 : vector<64x32xf32>
    %152 = arith.truncf %137 : vector<16x32xf32> to vector<16x32xbf16>
    %153 = arith.truncf %144 : vector<64x32xf32> to vector<64x32xbf16>
    %cst_99 = arith.constant dense<0.000000e+00> : vector<16x64xf32>
    %154 = tpu.matmul %152, %153, %cst_99 {dimension_numbers = #tpu.dot_dimension_numbers<[1], [1], [0], [0], [0, 0, 1, 0], [], []>} : vector<16x32xbf16>, vector<64x32xbf16>, vector<16x64xf32> -> vector<16x64xf32>
    %cst_100 = arith.constant dense<0xFF800000> : vector<16xf32>
    %155 = vector.multi_reduction <maximumf>, %154, %cst_100 [1] : vector<16x64xf32> to vector<16xf32>
    %156 = vector.shape_cast %155 : vector<16xf32> to vector<16x1xf32>
    %157 = vector.broadcast %156 : vector<16x1xf32> to vector<16x64xf32>
    %158 = arith.subf %154, %157 : vector<16x64xf32>
    %159 = math.exp %158 : vector<16x64xf32>
    %cst_101 = arith.constant dense<0.000000e+00> : vector<16xf32>
    %160 = vector.multi_reduction <add>, %159, %cst_101 [1] : vector<16x64xf32> to vector<16xf32>
    %161 = vector.shape_cast %160 : vector<16xf32> to vector<16x1xf32>
    %162 = tpu.reciprocal %161 {approx = true} : vector<16x1xf32> -> vector<16x1xf32>
    %163 = vector.broadcast %162 : vector<16x1xf32> to vector<16x64xf32>
    %164 = arith.mulf %159, %163 : vector<16x64xf32>
    %165 = arith.truncf %164 : vector<16x64xf32> to vector<16x64xbf16>
    %166 = arith.truncf %151 : vector<64x32xf32> to vector<64x32xbf16>
    %cst_102 = arith.constant dense<0.000000e+00> : vector<16x32xf32>
    %167 = tpu.matmul %165, %166, %cst_102 {dimension_numbers = #tpu.dot_dimension_numbers<[1], [0], [0], [1], [0, 0, 1, 1], [], []>} : vector<16x64xbf16>, vector<64x32xbf16>, vector<16x32xf32> -> vector<16x32xf32>
    %168 = arith.truncf %167 : vector<16x32xf32> to vector<16x32xbf16>
    %c2_103 = arith.constant 2 : index
    %c0_104 = arith.constant 0 : index
    %c0_105 = arith.constant 0 : index
    %169 = vector.load %arg10[%c2_103, %c0_104, %c0_105] : memref<8x32x64xbf16, #tpu.memory_space<vmem>>, vector<1x32x64xbf16>
    %170 = vector.shape_cast %169 : vector<1x32x64xbf16> to vector<32x64xbf16>
    %cst_106 = arith.constant dense<0.000000e+00> : vector<16x64xf32>
    %171 = tpu.matmul %168, %170, %cst_106 {dimension_numbers = #tpu.dot_dimension_numbers<[1], [0], [0], [1], [0, 0, 1, 1], [], []>} : vector<16x32xbf16>, vector<32x64xbf16>, vector<16x64xf32> -> vector<16x64xf32>
    %c7 = arith.constant 7 : index
    %c0_107 = arith.constant 0 : index
    %c0_108 = arith.constant 0 : index
    %172 = vector.load %arg8[%c7, %c0_107, %c0_108] : memref<24x64x32xbf16, #tpu.memory_space<vmem>>, vector<1x64x32xbf16>
    %173 = vector.shape_cast %172 : vector<1x64x32xbf16> to vector<64x32xbf16>
    %cst_109 = arith.constant dense<0.000000e+00> : vector<16x32xf32>
    %174 = tpu.matmul %129, %173, %cst_109 {dimension_numbers = #tpu.dot_dimension_numbers<[1], [0], [0], [1], [0, 0, 1, 1], [], []>} : vector<16x64xbf16>, vector<64x32xbf16>, vector<16x32xf32> -> vector<16x32xf32>
    %c7_110 = arith.constant 7 : index
    %c0_111 = arith.constant 0 : index
    %c0_112 = arith.constant 0 : index
    %175 = vector.load %arg9[%c7_110, %c0_111, %c0_112] : memref<24x1x32xf32, #tpu.memory_space<vmem>>, vector<1x1x32xf32>
    %176 = vector.shape_cast %175 : vector<1x1x32xf32> to vector<1x32xf32>
    %177 = vector.broadcast %176 : vector<1x32xf32> to vector<16x32xf32>
    %178 = arith.addf %174, %177 : vector<16x32xf32>
    %c9 = arith.constant 9 : index
    %c0_113 = arith.constant 0 : index
    %c0_114 = arith.constant 0 : index
    %179 = vector.load %arg8[%c9, %c0_113, %c0_114] : memref<24x64x32xbf16, #tpu.memory_space<vmem>>, vector<1x64x32xbf16>
    %180 = vector.shape_cast %179 : vector<1x64x32xbf16> to vector<64x32xbf16>
    %cst_115 = arith.constant dense<0.000000e+00> : vector<64x32xf32>
    %181 = tpu.matmul %130, %180, %cst_115 {dimension_numbers = #tpu.dot_dimension_numbers<[1], [0], [0], [1], [0, 0, 1, 1], [], []>} : vector<64x64xbf16>, vector<64x32xbf16>, vector<64x32xf32> -> vector<64x32xf32>
    %c9_116 = arith.constant 9 : index
    %c0_117 = arith.constant 0 : index
    %c0_118 = arith.constant 0 : index
    %182 = vector.load %arg9[%c9_116, %c0_117, %c0_118] : memref<24x1x32xf32, #tpu.memory_space<vmem>>, vector<1x1x32xf32>
    %183 = vector.shape_cast %182 : vector<1x1x32xf32> to vector<1x32xf32>
    %184 = vector.broadcast %183 : vector<1x32xf32> to vector<64x32xf32>
    %185 = arith.addf %181, %184 : vector<64x32xf32>
    %c11 = arith.constant 11 : index
    %c0_119 = arith.constant 0 : index
    %c0_120 = arith.constant 0 : index
    %186 = vector.load %arg8[%c11, %c0_119, %c0_120] : memref<24x64x32xbf16, #tpu.memory_space<vmem>>, vector<1x64x32xbf16>
    %187 = vector.shape_cast %186 : vector<1x64x32xbf16> to vector<64x32xbf16>
    %cst_121 = arith.constant dense<0.000000e+00> : vector<64x32xf32>
    %188 = tpu.matmul %130, %187, %cst_121 {dimension_numbers = #tpu.dot_dimension_numbers<[1], [0], [0], [1], [0, 0, 1, 1], [], []>} : vector<64x64xbf16>, vector<64x32xbf16>, vector<64x32xf32> -> vector<64x32xf32>
    %c11_122 = arith.constant 11 : index
    %c0_123 = arith.constant 0 : index
    %c0_124 = arith.constant 0 : index
    %189 = vector.load %arg9[%c11_122, %c0_123, %c0_124] : memref<24x1x32xf32, #tpu.memory_space<vmem>>, vector<1x1x32xf32>
    %190 = vector.shape_cast %189 : vector<1x1x32xf32> to vector<1x32xf32>
    %191 = vector.broadcast %190 : vector<1x32xf32> to vector<64x32xf32>
    %192 = arith.addf %188, %191 : vector<64x32xf32>
    %193 = arith.truncf %178 : vector<16x32xf32> to vector<16x32xbf16>
    %194 = arith.truncf %185 : vector<64x32xf32> to vector<64x32xbf16>
    %cst_125 = arith.constant dense<0.000000e+00> : vector<16x64xf32>
    %195 = tpu.matmul %193, %194, %cst_125 {dimension_numbers = #tpu.dot_dimension_numbers<[1], [1], [0], [0], [0, 0, 1, 0], [], []>} : vector<16x32xbf16>, vector<64x32xbf16>, vector<16x64xf32> -> vector<16x64xf32>
    %cst_126 = arith.constant dense<0xFF800000> : vector<16xf32>
    %196 = vector.multi_reduction <maximumf>, %195, %cst_126 [1] : vector<16x64xf32> to vector<16xf32>
    %197 = vector.shape_cast %196 : vector<16xf32> to vector<16x1xf32>
    %198 = vector.broadcast %197 : vector<16x1xf32> to vector<16x64xf32>
    %199 = arith.subf %195, %198 : vector<16x64xf32>
    %200 = math.exp %199 : vector<16x64xf32>
    %cst_127 = arith.constant dense<0.000000e+00> : vector<16xf32>
    %201 = vector.multi_reduction <add>, %200, %cst_127 [1] : vector<16x64xf32> to vector<16xf32>
    %202 = vector.shape_cast %201 : vector<16xf32> to vector<16x1xf32>
    %203 = tpu.reciprocal %202 {approx = true} : vector<16x1xf32> -> vector<16x1xf32>
    %204 = vector.broadcast %203 : vector<16x1xf32> to vector<16x64xf32>
    %205 = arith.mulf %200, %204 : vector<16x64xf32>
    %206 = arith.truncf %205 : vector<16x64xf32> to vector<16x64xbf16>
    %207 = arith.truncf %192 : vector<64x32xf32> to vector<64x32xbf16>
    %cst_128 = arith.constant dense<0.000000e+00> : vector<16x32xf32>
    %208 = tpu.matmul %206, %207, %cst_128 {dimension_numbers = #tpu.dot_dimension_numbers<[1], [0], [0], [1], [0, 0, 1, 1], [], []>} : vector<16x64xbf16>, vector<64x32xbf16>, vector<16x32xf32> -> vector<16x32xf32>
    %209 = arith.truncf %208 : vector<16x32xf32> to vector<16x32xbf16>
    %c3_129 = arith.constant 3 : index
    %c0_130 = arith.constant 0 : index
    %c0_131 = arith.constant 0 : index
    %210 = vector.load %arg10[%c3_129, %c0_130, %c0_131] : memref<8x32x64xbf16, #tpu.memory_space<vmem>>, vector<1x32x64xbf16>
    %211 = vector.shape_cast %210 : vector<1x32x64xbf16> to vector<32x64xbf16>
    %cst_132 = arith.constant dense<0.000000e+00> : vector<16x64xf32>
    %212 = tpu.matmul %209, %211, %cst_132 {dimension_numbers = #tpu.dot_dimension_numbers<[1], [0], [0], [1], [0, 0, 1, 1], [], []>} : vector<16x32xbf16>, vector<32x64xbf16>, vector<16x64xf32> -> vector<16x64xf32>
    %213 = arith.addf %171, %212 : vector<16x64xf32>
    %c0_133 = arith.constant 0 : index
    %c3_134 = arith.constant 3 : index
    %c0_135 = arith.constant 0 : index
    %214 = vector.load %arg11[%c0_133, %c3_134, %c0_135] : memref<2x10x128xf32, #tpu.memory_space<vmem>>, vector<1x1x64xf32>
    %215 = vector.shape_cast %214 : vector<1x1x64xf32> to vector<1x64xf32>
    %216 = vector.broadcast %215 : vector<1x64xf32> to vector<16x64xf32>
    %217 = arith.addf %213, %216 : vector<16x64xf32>
    %218 = arith.addf %128, %217 : vector<16x64xf32>
    %c0_136 = arith.constant 0 : index
    %c6_137 = arith.constant 6 : index
    %c0_138 = arith.constant 0 : index
    %219 = vector.load %arg11[%c0_136, %c6_137, %c0_138] : memref<2x10x128xf32, #tpu.memory_space<vmem>>, vector<1x1x64xf32>
    %220 = vector.shape_cast %219 : vector<1x1x64xf32> to vector<1x64xf32>
    %c0_139 = arith.constant 0 : index
    %c7_140 = arith.constant 7 : index
    %c0_141 = arith.constant 0 : index
    %221 = vector.load %arg11[%c0_139, %c7_140, %c0_141] : memref<2x10x128xf32, #tpu.memory_space<vmem>>, vector<1x1x64xf32>
    %222 = vector.shape_cast %221 : vector<1x1x64xf32> to vector<1x64xf32>
    %cst_142 = arith.constant dense<0.000000e+00> : vector<16xf32>
    %223 = vector.multi_reduction <add>, %218, %cst_142 [1] : vector<16x64xf32> to vector<16xf32>
    %224 = vector.shape_cast %223 : vector<16xf32> to vector<16x1xf32>
    %cst_143 = arith.constant 6.400000e+01 : f32
    %225 = vector.broadcast %cst_143 : f32 to vector<16x1xf32>
    %226 = arith.divf %224, %225 : vector<16x1xf32>
    %227 = vector.broadcast %226 : vector<16x1xf32> to vector<16x64xf32>
    %228 = arith.subf %218, %227 : vector<16x64xf32>
    %229 = arith.mulf %228, %228 : vector<16x64xf32>
    %cst_144 = arith.constant dense<0.000000e+00> : vector<16xf32>
    %230 = vector.multi_reduction <add>, %229, %cst_144 [1] : vector<16x64xf32> to vector<16xf32>
    %231 = vector.shape_cast %230 : vector<16xf32> to vector<16x1xf32>
    %cst_145 = arith.constant 6.400000e+01 : f32
    %232 = vector.broadcast %cst_145 : f32 to vector<16x1xf32>
    %233 = arith.divf %231, %232 : vector<16x1xf32>
    %234 = vector.broadcast %226 : vector<16x1xf32> to vector<16x64xf32>
    %235 = arith.subf %218, %234 : vector<16x64xf32>
    %cst_146 = arith.constant 9.99999974E-6 : f32
    %236 = vector.broadcast %cst_146 : f32 to vector<16x1xf32>
    %237 = arith.addf %233, %236 : vector<16x1xf32>
    %238 = math.rsqrt %237 : vector<16x1xf32>
    %239 = vector.broadcast %238 : vector<16x1xf32> to vector<16x64xf32>
    %240 = arith.mulf %235, %239 : vector<16x64xf32>
    %241 = vector.broadcast %220 : vector<1x64xf32> to vector<16x64xf32>
    %242 = arith.mulf %240, %241 : vector<16x64xf32>
    %243 = vector.broadcast %222 : vector<1x64xf32> to vector<16x64xf32>
    %244 = arith.addf %242, %243 : vector<16x64xf32>
    %245 = arith.truncf %244 : vector<16x64xf32> to vector<16x64xbf16>
    %c0_147 = arith.constant 0 : index
    %c0_148 = arith.constant 0 : index
    %c0_149 = arith.constant 0 : index
    %246 = vector.load %arg12[%c0_147, %c0_148, %c0_149] : memref<2x64x128xbf16, #tpu.memory_space<vmem>>, vector<1x64x128xbf16>
    %247 = vector.shape_cast %246 : vector<1x64x128xbf16> to vector<64x128xbf16>
    %cst_150 = arith.constant dense<0.000000e+00> : vector<16x128xf32>
    %248 = tpu.matmul %245, %247, %cst_150 {dimension_numbers = #tpu.dot_dimension_numbers<[1], [0], [0], [1], [0, 0, 1, 1], [], []>} : vector<16x64xbf16>, vector<64x128xbf16>, vector<16x128xf32> -> vector<16x128xf32>
    %c0_151 = arith.constant 0 : index
    %c0_152 = arith.constant 0 : index
    %c0_153 = arith.constant 0 : index
    %249 = vector.load %arg11[%c0_151, %c0_152, %c0_153] : memref<2x10x128xf32, #tpu.memory_space<vmem>>, vector<1x1x128xf32>
    %250 = vector.shape_cast %249 : vector<1x1x128xf32> to vector<1x128xf32>
    %251 = vector.broadcast %250 : vector<1x128xf32> to vector<16x128xf32>
    %252 = arith.addf %248, %251 : vector<16x128xf32>
    %cst_154 = arith.constant 0.000000e+00 : f32
    %253 = vector.broadcast %cst_154 : f32 to vector<16x128xf32>
    %254 = arith.maximumf %252, %253 : vector<16x128xf32>
    %255 = arith.truncf %254 : vector<16x128xf32> to vector<16x128xbf16>
    %c0_155 = arith.constant 0 : index
    %c0_156 = arith.constant 0 : index
    %c0_157 = arith.constant 0 : index
    %256 = vector.load %arg13[%c0_155, %c0_156, %c0_157] : memref<2x128x64xbf16, #tpu.memory_space<vmem>>, vector<1x128x64xbf16>
    %257 = vector.shape_cast %256 : vector<1x128x64xbf16> to vector<128x64xbf16>
    %cst_158 = arith.constant dense<0.000000e+00> : vector<16x64xf32>
    %258 = tpu.matmul %255, %257, %cst_158 {dimension_numbers = #tpu.dot_dimension_numbers<[1], [0], [0], [1], [0, 0, 1, 1], [], []>} : vector<16x128xbf16>, vector<128x64xbf16>, vector<16x64xf32> -> vector<16x64xf32>
    %c0_159 = arith.constant 0 : index
    %c1_160 = arith.constant 1 : index
    %c0_161 = arith.constant 0 : index
    %259 = vector.load %arg11[%c0_159, %c1_160, %c0_161] : memref<2x10x128xf32, #tpu.memory_space<vmem>>, vector<1x1x64xf32>
    %260 = vector.shape_cast %259 : vector<1x1x64xf32> to vector<1x64xf32>
    %261 = vector.broadcast %260 : vector<1x64xf32> to vector<16x64xf32>
    %262 = arith.addf %258, %261 : vector<16x64xf32>
    %263 = arith.addf %244, %262 : vector<16x64xf32>
    %c0_162 = arith.constant 0 : index
    %c8_163 = arith.constant 8 : index
    %c0_164 = arith.constant 0 : index
    %264 = vector.load %arg11[%c0_162, %c8_163, %c0_164] : memref<2x10x128xf32, #tpu.memory_space<vmem>>, vector<1x1x64xf32>
    %265 = vector.shape_cast %264 : vector<1x1x64xf32> to vector<1x64xf32>
    %c0_165 = arith.constant 0 : index
    %c9_166 = arith.constant 9 : index
    %c0_167 = arith.constant 0 : index
    %266 = vector.load %arg11[%c0_165, %c9_166, %c0_167] : memref<2x10x128xf32, #tpu.memory_space<vmem>>, vector<1x1x64xf32>
    %267 = vector.shape_cast %266 : vector<1x1x64xf32> to vector<1x64xf32>
    %cst_168 = arith.constant dense<0.000000e+00> : vector<16xf32>
    %268 = vector.multi_reduction <add>, %263, %cst_168 [1] : vector<16x64xf32> to vector<16xf32>
    %269 = vector.shape_cast %268 : vector<16xf32> to vector<16x1xf32>
    %cst_169 = arith.constant 6.400000e+01 : f32
    %270 = vector.broadcast %cst_169 : f32 to vector<16x1xf32>
    %271 = arith.divf %269, %270 : vector<16x1xf32>
    %272 = vector.broadcast %271 : vector<16x1xf32> to vector<16x64xf32>
    %273 = arith.subf %263, %272 : vector<16x64xf32>
    %274 = arith.mulf %273, %273 : vector<16x64xf32>
    %cst_170 = arith.constant dense<0.000000e+00> : vector<16xf32>
    %275 = vector.multi_reduction <add>, %274, %cst_170 [1] : vector<16x64xf32> to vector<16xf32>
    %276 = vector.shape_cast %275 : vector<16xf32> to vector<16x1xf32>
    %cst_171 = arith.constant 6.400000e+01 : f32
    %277 = vector.broadcast %cst_171 : f32 to vector<16x1xf32>
    %278 = arith.divf %276, %277 : vector<16x1xf32>
    %279 = vector.broadcast %271 : vector<16x1xf32> to vector<16x64xf32>
    %280 = arith.subf %263, %279 : vector<16x64xf32>
    %cst_172 = arith.constant 9.99999974E-6 : f32
    %281 = vector.broadcast %cst_172 : f32 to vector<16x1xf32>
    %282 = arith.addf %278, %281 : vector<16x1xf32>
    %283 = math.rsqrt %282 : vector<16x1xf32>
    %284 = vector.broadcast %283 : vector<16x1xf32> to vector<16x64xf32>
    %285 = arith.mulf %280, %284 : vector<16x64xf32>
    %286 = vector.broadcast %265 : vector<1x64xf32> to vector<16x64xf32>
    %287 = arith.mulf %285, %286 : vector<16x64xf32>
    %288 = vector.broadcast %267 : vector<1x64xf32> to vector<16x64xf32>
    %289 = arith.addf %287, %288 : vector<16x64xf32>
    %290 = arith.truncf %289 : vector<16x64xf32> to vector<16x64xbf16>
    %291 = arith.truncf %289 : vector<16x64xf32> to vector<16x64xbf16>
    %c12 = arith.constant 12 : index
    %c0_173 = arith.constant 0 : index
    %c0_174 = arith.constant 0 : index
    %292 = vector.load %arg8[%c12, %c0_173, %c0_174] : memref<24x64x32xbf16, #tpu.memory_space<vmem>>, vector<1x64x32xbf16>
    %293 = vector.shape_cast %292 : vector<1x64x32xbf16> to vector<64x32xbf16>
    %cst_175 = arith.constant dense<0.000000e+00> : vector<16x32xf32>
    %294 = tpu.matmul %290, %293, %cst_175 {dimension_numbers = #tpu.dot_dimension_numbers<[1], [0], [0], [1], [0, 0, 1, 1], [], []>} : vector<16x64xbf16>, vector<64x32xbf16>, vector<16x32xf32> -> vector<16x32xf32>
    %c12_176 = arith.constant 12 : index
    %c0_177 = arith.constant 0 : index
    %c0_178 = arith.constant 0 : index
    %295 = vector.load %arg9[%c12_176, %c0_177, %c0_178] : memref<24x1x32xf32, #tpu.memory_space<vmem>>, vector<1x1x32xf32>
    %296 = vector.shape_cast %295 : vector<1x1x32xf32> to vector<1x32xf32>
    %297 = vector.broadcast %296 : vector<1x32xf32> to vector<16x32xf32>
    %298 = arith.addf %294, %297 : vector<16x32xf32>
    %c14 = arith.constant 14 : index
    %c0_179 = arith.constant 0 : index
    %c0_180 = arith.constant 0 : index
    %299 = vector.load %arg8[%c14, %c0_179, %c0_180] : memref<24x64x32xbf16, #tpu.memory_space<vmem>>, vector<1x64x32xbf16>
    %300 = vector.shape_cast %299 : vector<1x64x32xbf16> to vector<64x32xbf16>
    %cst_181 = arith.constant dense<0.000000e+00> : vector<16x32xf32>
    %301 = tpu.matmul %291, %300, %cst_181 {dimension_numbers = #tpu.dot_dimension_numbers<[1], [0], [0], [1], [0, 0, 1, 1], [], []>} : vector<16x64xbf16>, vector<64x32xbf16>, vector<16x32xf32> -> vector<16x32xf32>
    %c14_182 = arith.constant 14 : index
    %c0_183 = arith.constant 0 : index
    %c0_184 = arith.constant 0 : index
    %302 = vector.load %arg9[%c14_182, %c0_183, %c0_184] : memref<24x1x32xf32, #tpu.memory_space<vmem>>, vector<1x1x32xf32>
    %303 = vector.shape_cast %302 : vector<1x1x32xf32> to vector<1x32xf32>
    %304 = vector.broadcast %303 : vector<1x32xf32> to vector<16x32xf32>
    %305 = arith.addf %301, %304 : vector<16x32xf32>
    %c16 = arith.constant 16 : index
    %c0_185 = arith.constant 0 : index
    %c0_186 = arith.constant 0 : index
    %306 = vector.load %arg8[%c16, %c0_185, %c0_186] : memref<24x64x32xbf16, #tpu.memory_space<vmem>>, vector<1x64x32xbf16>
    %307 = vector.shape_cast %306 : vector<1x64x32xbf16> to vector<64x32xbf16>
    %cst_187 = arith.constant dense<0.000000e+00> : vector<16x32xf32>
    %308 = tpu.matmul %291, %307, %cst_187 {dimension_numbers = #tpu.dot_dimension_numbers<[1], [0], [0], [1], [0, 0, 1, 1], [], []>} : vector<16x64xbf16>, vector<64x32xbf16>, vector<16x32xf32> -> vector<16x32xf32>
    %c16_188 = arith.constant 16 : index
    %c0_189 = arith.constant 0 : index
    %c0_190 = arith.constant 0 : index
    %309 = vector.load %arg9[%c16_188, %c0_189, %c0_190] : memref<24x1x32xf32, #tpu.memory_space<vmem>>, vector<1x1x32xf32>
    %310 = vector.shape_cast %309 : vector<1x1x32xf32> to vector<1x32xf32>
    %311 = vector.broadcast %310 : vector<1x32xf32> to vector<16x32xf32>
    %312 = arith.addf %308, %311 : vector<16x32xf32>
    %313 = arith.truncf %298 : vector<16x32xf32> to vector<16x32xbf16>
    %314 = arith.truncf %305 : vector<16x32xf32> to vector<16x32xbf16>
    %cst_191 = arith.constant dense<0.000000e+00> : vector<16x16xf32>
    %315 = tpu.matmul %313, %314, %cst_191 {dimension_numbers = #tpu.dot_dimension_numbers<[1], [1], [0], [0], [0, 0, 1, 0], [], []>} : vector<16x32xbf16>, vector<16x32xbf16>, vector<16x16xf32> -> vector<16x16xf32>
    %cst_192 = arith.constant dense<0xFF800000> : vector<16xf32>
    %316 = vector.multi_reduction <maximumf>, %315, %cst_192 [1] : vector<16x16xf32> to vector<16xf32>
    %317 = vector.shape_cast %316 : vector<16xf32> to vector<16x1xf32>
    %318 = vector.broadcast %317 : vector<16x1xf32> to vector<16x16xf32>
    %319 = arith.subf %315, %318 : vector<16x16xf32>
    %320 = math.exp %319 : vector<16x16xf32>
    %cst_193 = arith.constant dense<0.000000e+00> : vector<16xf32>
    %321 = vector.multi_reduction <add>, %320, %cst_193 [1] : vector<16x16xf32> to vector<16xf32>
    %322 = vector.shape_cast %321 : vector<16xf32> to vector<16x1xf32>
    %323 = tpu.reciprocal %322 {approx = true} : vector<16x1xf32> -> vector<16x1xf32>
    %324 = vector.broadcast %323 : vector<16x1xf32> to vector<16x16xf32>
    %325 = arith.mulf %320, %324 : vector<16x16xf32>
    %326 = arith.truncf %325 : vector<16x16xf32> to vector<16x16xbf16>
    %327 = arith.truncf %312 : vector<16x32xf32> to vector<16x32xbf16>
    %cst_194 = arith.constant dense<0.000000e+00> : vector<16x32xf32>
    %328 = tpu.matmul %326, %327, %cst_194 {dimension_numbers = #tpu.dot_dimension_numbers<[1], [0], [0], [1], [0, 0, 1, 1], [], []>} : vector<16x16xbf16>, vector<16x32xbf16>, vector<16x32xf32> -> vector<16x32xf32>
    %329 = arith.truncf %328 : vector<16x32xf32> to vector<16x32xbf16>
    %c4_195 = arith.constant 4 : index
    %c0_196 = arith.constant 0 : index
    %c0_197 = arith.constant 0 : index
    %330 = vector.load %arg10[%c4_195, %c0_196, %c0_197] : memref<8x32x64xbf16, #tpu.memory_space<vmem>>, vector<1x32x64xbf16>
    %331 = vector.shape_cast %330 : vector<1x32x64xbf16> to vector<32x64xbf16>
    %cst_198 = arith.constant dense<0.000000e+00> : vector<16x64xf32>
    %332 = tpu.matmul %329, %331, %cst_198 {dimension_numbers = #tpu.dot_dimension_numbers<[1], [0], [0], [1], [0, 0, 1, 1], [], []>} : vector<16x32xbf16>, vector<32x64xbf16>, vector<16x64xf32> -> vector<16x64xf32>
    %c13 = arith.constant 13 : index
    %c0_199 = arith.constant 0 : index
    %c0_200 = arith.constant 0 : index
    %333 = vector.load %arg8[%c13, %c0_199, %c0_200] : memref<24x64x32xbf16, #tpu.memory_space<vmem>>, vector<1x64x32xbf16>
    %334 = vector.shape_cast %333 : vector<1x64x32xbf16> to vector<64x32xbf16>
    %cst_201 = arith.constant dense<0.000000e+00> : vector<16x32xf32>
    %335 = tpu.matmul %290, %334, %cst_201 {dimension_numbers = #tpu.dot_dimension_numbers<[1], [0], [0], [1], [0, 0, 1, 1], [], []>} : vector<16x64xbf16>, vector<64x32xbf16>, vector<16x32xf32> -> vector<16x32xf32>
    %c13_202 = arith.constant 13 : index
    %c0_203 = arith.constant 0 : index
    %c0_204 = arith.constant 0 : index
    %336 = vector.load %arg9[%c13_202, %c0_203, %c0_204] : memref<24x1x32xf32, #tpu.memory_space<vmem>>, vector<1x1x32xf32>
    %337 = vector.shape_cast %336 : vector<1x1x32xf32> to vector<1x32xf32>
    %338 = vector.broadcast %337 : vector<1x32xf32> to vector<16x32xf32>
    %339 = arith.addf %335, %338 : vector<16x32xf32>
    %c15 = arith.constant 15 : index
    %c0_205 = arith.constant 0 : index
    %c0_206 = arith.constant 0 : index
    %340 = vector.load %arg8[%c15, %c0_205, %c0_206] : memref<24x64x32xbf16, #tpu.memory_space<vmem>>, vector<1x64x32xbf16>
    %341 = vector.shape_cast %340 : vector<1x64x32xbf16> to vector<64x32xbf16>
    %cst_207 = arith.constant dense<0.000000e+00> : vector<16x32xf32>
    %342 = tpu.matmul %291, %341, %cst_207 {dimension_numbers = #tpu.dot_dimension_numbers<[1], [0], [0], [1], [0, 0, 1, 1], [], []>} : vector<16x64xbf16>, vector<64x32xbf16>, vector<16x32xf32> -> vector<16x32xf32>
    %c15_208 = arith.constant 15 : index
    %c0_209 = arith.constant 0 : index
    %c0_210 = arith.constant 0 : index
    %343 = vector.load %arg9[%c15_208, %c0_209, %c0_210] : memref<24x1x32xf32, #tpu.memory_space<vmem>>, vector<1x1x32xf32>
    %344 = vector.shape_cast %343 : vector<1x1x32xf32> to vector<1x32xf32>
    %345 = vector.broadcast %344 : vector<1x32xf32> to vector<16x32xf32>
    %346 = arith.addf %342, %345 : vector<16x32xf32>
    %c17 = arith.constant 17 : index
    %c0_211 = arith.constant 0 : index
    %c0_212 = arith.constant 0 : index
    %347 = vector.load %arg8[%c17, %c0_211, %c0_212] : memref<24x64x32xbf16, #tpu.memory_space<vmem>>, vector<1x64x32xbf16>
    %348 = vector.shape_cast %347 : vector<1x64x32xbf16> to vector<64x32xbf16>
    %cst_213 = arith.constant dense<0.000000e+00> : vector<16x32xf32>
    %349 = tpu.matmul %291, %348, %cst_213 {dimension_numbers = #tpu.dot_dimension_numbers<[1], [0], [0], [1], [0, 0, 1, 1], [], []>} : vector<16x64xbf16>, vector<64x32xbf16>, vector<16x32xf32> -> vector<16x32xf32>
    %c17_214 = arith.constant 17 : index
    %c0_215 = arith.constant 0 : index
    %c0_216 = arith.constant 0 : index
    %350 = vector.load %arg9[%c17_214, %c0_215, %c0_216] : memref<24x1x32xf32, #tpu.memory_space<vmem>>, vector<1x1x32xf32>
    %351 = vector.shape_cast %350 : vector<1x1x32xf32> to vector<1x32xf32>
    %352 = vector.broadcast %351 : vector<1x32xf32> to vector<16x32xf32>
    %353 = arith.addf %349, %352 : vector<16x32xf32>
    %354 = arith.truncf %339 : vector<16x32xf32> to vector<16x32xbf16>
    %355 = arith.truncf %346 : vector<16x32xf32> to vector<16x32xbf16>
    %cst_217 = arith.constant dense<0.000000e+00> : vector<16x16xf32>
    %356 = tpu.matmul %354, %355, %cst_217 {dimension_numbers = #tpu.dot_dimension_numbers<[1], [1], [0], [0], [0, 0, 1, 0], [], []>} : vector<16x32xbf16>, vector<16x32xbf16>, vector<16x16xf32> -> vector<16x16xf32>
    %cst_218 = arith.constant dense<0xFF800000> : vector<16xf32>
    %357 = vector.multi_reduction <maximumf>, %356, %cst_218 [1] : vector<16x16xf32> to vector<16xf32>
    %358 = vector.shape_cast %357 : vector<16xf32> to vector<16x1xf32>
    %359 = vector.broadcast %358 : vector<16x1xf32> to vector<16x16xf32>
    %360 = arith.subf %356, %359 : vector<16x16xf32>
    %361 = math.exp %360 : vector<16x16xf32>
    %cst_219 = arith.constant dense<0.000000e+00> : vector<16xf32>
    %362 = vector.multi_reduction <add>, %361, %cst_219 [1] : vector<16x16xf32> to vector<16xf32>
    %363 = vector.shape_cast %362 : vector<16xf32> to vector<16x1xf32>
    %364 = tpu.reciprocal %363 {approx = true} : vector<16x1xf32> -> vector<16x1xf32>
    %365 = vector.broadcast %364 : vector<16x1xf32> to vector<16x16xf32>
    %366 = arith.mulf %361, %365 : vector<16x16xf32>
    %367 = arith.truncf %366 : vector<16x16xf32> to vector<16x16xbf16>
    %368 = arith.truncf %353 : vector<16x32xf32> to vector<16x32xbf16>
    %cst_220 = arith.constant dense<0.000000e+00> : vector<16x32xf32>
    %369 = tpu.matmul %367, %368, %cst_220 {dimension_numbers = #tpu.dot_dimension_numbers<[1], [0], [0], [1], [0, 0, 1, 1], [], []>} : vector<16x16xbf16>, vector<16x32xbf16>, vector<16x32xf32> -> vector<16x32xf32>
    %370 = arith.truncf %369 : vector<16x32xf32> to vector<16x32xbf16>
    %c5_221 = arith.constant 5 : index
    %c0_222 = arith.constant 0 : index
    %c0_223 = arith.constant 0 : index
    %371 = vector.load %arg10[%c5_221, %c0_222, %c0_223] : memref<8x32x64xbf16, #tpu.memory_space<vmem>>, vector<1x32x64xbf16>
    %372 = vector.shape_cast %371 : vector<1x32x64xbf16> to vector<32x64xbf16>
    %cst_224 = arith.constant dense<0.000000e+00> : vector<16x64xf32>
    %373 = tpu.matmul %370, %372, %cst_224 {dimension_numbers = #tpu.dot_dimension_numbers<[1], [0], [0], [1], [0, 0, 1, 1], [], []>} : vector<16x32xbf16>, vector<32x64xbf16>, vector<16x64xf32> -> vector<16x64xf32>
    %374 = arith.addf %332, %373 : vector<16x64xf32>
    %c1_225 = arith.constant 1 : index
    %c2_226 = arith.constant 2 : index
    %c0_227 = arith.constant 0 : index
    %375 = vector.load %arg11[%c1_225, %c2_226, %c0_227] : memref<2x10x128xf32, #tpu.memory_space<vmem>>, vector<1x1x64xf32>
    %376 = vector.shape_cast %375 : vector<1x1x64xf32> to vector<1x64xf32>
    %377 = vector.broadcast %376 : vector<1x64xf32> to vector<16x64xf32>
    %378 = arith.addf %374, %377 : vector<16x64xf32>
    %379 = arith.addf %289, %378 : vector<16x64xf32>
    %c1_228 = arith.constant 1 : index
    %c4_229 = arith.constant 4 : index
    %c0_230 = arith.constant 0 : index
    %380 = vector.load %arg11[%c1_228, %c4_229, %c0_230] : memref<2x10x128xf32, #tpu.memory_space<vmem>>, vector<1x1x64xf32>
    %381 = vector.shape_cast %380 : vector<1x1x64xf32> to vector<1x64xf32>
    %c1_231 = arith.constant 1 : index
    %c5_232 = arith.constant 5 : index
    %c0_233 = arith.constant 0 : index
    %382 = vector.load %arg11[%c1_231, %c5_232, %c0_233] : memref<2x10x128xf32, #tpu.memory_space<vmem>>, vector<1x1x64xf32>
    %383 = vector.shape_cast %382 : vector<1x1x64xf32> to vector<1x64xf32>
    %cst_234 = arith.constant dense<0.000000e+00> : vector<16xf32>
    %384 = vector.multi_reduction <add>, %379, %cst_234 [1] : vector<16x64xf32> to vector<16xf32>
    %385 = vector.shape_cast %384 : vector<16xf32> to vector<16x1xf32>
    %cst_235 = arith.constant 6.400000e+01 : f32
    %386 = vector.broadcast %cst_235 : f32 to vector<16x1xf32>
    %387 = arith.divf %385, %386 : vector<16x1xf32>
    %388 = vector.broadcast %387 : vector<16x1xf32> to vector<16x64xf32>
    %389 = arith.subf %379, %388 : vector<16x64xf32>
    %390 = arith.mulf %389, %389 : vector<16x64xf32>
    %cst_236 = arith.constant dense<0.000000e+00> : vector<16xf32>
    %391 = vector.multi_reduction <add>, %390, %cst_236 [1] : vector<16x64xf32> to vector<16xf32>
    %392 = vector.shape_cast %391 : vector<16xf32> to vector<16x1xf32>
    %cst_237 = arith.constant 6.400000e+01 : f32
    %393 = vector.broadcast %cst_237 : f32 to vector<16x1xf32>
    %394 = arith.divf %392, %393 : vector<16x1xf32>
    %395 = vector.broadcast %387 : vector<16x1xf32> to vector<16x64xf32>
    %396 = arith.subf %379, %395 : vector<16x64xf32>
    %cst_238 = arith.constant 9.99999974E-6 : f32
    %397 = vector.broadcast %cst_238 : f32 to vector<16x1xf32>
    %398 = arith.addf %394, %397 : vector<16x1xf32>
    %399 = math.rsqrt %398 : vector<16x1xf32>
    %400 = vector.broadcast %399 : vector<16x1xf32> to vector<16x64xf32>
    %401 = arith.mulf %396, %400 : vector<16x64xf32>
    %402 = vector.broadcast %381 : vector<1x64xf32> to vector<16x64xf32>
    %403 = arith.mulf %401, %402 : vector<16x64xf32>
    %404 = vector.broadcast %383 : vector<1x64xf32> to vector<16x64xf32>
    %405 = arith.addf %403, %404 : vector<16x64xf32>
    %406 = arith.truncf %405 : vector<16x64xf32> to vector<16x64xbf16>
    %407 = arith.truncf %5 : vector<64x64xf32> to vector<64x64xbf16>
    %c18 = arith.constant 18 : index
    %c0_239 = arith.constant 0 : index
    %c0_240 = arith.constant 0 : index
    %408 = vector.load %arg8[%c18, %c0_239, %c0_240] : memref<24x64x32xbf16, #tpu.memory_space<vmem>>, vector<1x64x32xbf16>
    %409 = vector.shape_cast %408 : vector<1x64x32xbf16> to vector<64x32xbf16>
    %cst_241 = arith.constant dense<0.000000e+00> : vector<16x32xf32>
    %410 = tpu.matmul %406, %409, %cst_241 {dimension_numbers = #tpu.dot_dimension_numbers<[1], [0], [0], [1], [0, 0, 1, 1], [], []>} : vector<16x64xbf16>, vector<64x32xbf16>, vector<16x32xf32> -> vector<16x32xf32>
    %c18_242 = arith.constant 18 : index
    %c0_243 = arith.constant 0 : index
    %c0_244 = arith.constant 0 : index
    %411 = vector.load %arg9[%c18_242, %c0_243, %c0_244] : memref<24x1x32xf32, #tpu.memory_space<vmem>>, vector<1x1x32xf32>
    %412 = vector.shape_cast %411 : vector<1x1x32xf32> to vector<1x32xf32>
    %413 = vector.broadcast %412 : vector<1x32xf32> to vector<16x32xf32>
    %414 = arith.addf %410, %413 : vector<16x32xf32>
    %c20 = arith.constant 20 : index
    %c0_245 = arith.constant 0 : index
    %c0_246 = arith.constant 0 : index
    %415 = vector.load %arg8[%c20, %c0_245, %c0_246] : memref<24x64x32xbf16, #tpu.memory_space<vmem>>, vector<1x64x32xbf16>
    %416 = vector.shape_cast %415 : vector<1x64x32xbf16> to vector<64x32xbf16>
    %cst_247 = arith.constant dense<0.000000e+00> : vector<64x32xf32>
    %417 = tpu.matmul %407, %416, %cst_247 {dimension_numbers = #tpu.dot_dimension_numbers<[1], [0], [0], [1], [0, 0, 1, 1], [], []>} : vector<64x64xbf16>, vector<64x32xbf16>, vector<64x32xf32> -> vector<64x32xf32>
    %c20_248 = arith.constant 20 : index
    %c0_249 = arith.constant 0 : index
    %c0_250 = arith.constant 0 : index
    %418 = vector.load %arg9[%c20_248, %c0_249, %c0_250] : memref<24x1x32xf32, #tpu.memory_space<vmem>>, vector<1x1x32xf32>
    %419 = vector.shape_cast %418 : vector<1x1x32xf32> to vector<1x32xf32>
    %420 = vector.broadcast %419 : vector<1x32xf32> to vector<64x32xf32>
    %421 = arith.addf %417, %420 : vector<64x32xf32>
    %c22 = arith.constant 22 : index
    %c0_251 = arith.constant 0 : index
    %c0_252 = arith.constant 0 : index
    %422 = vector.load %arg8[%c22, %c0_251, %c0_252] : memref<24x64x32xbf16, #tpu.memory_space<vmem>>, vector<1x64x32xbf16>
    %423 = vector.shape_cast %422 : vector<1x64x32xbf16> to vector<64x32xbf16>
    %cst_253 = arith.constant dense<0.000000e+00> : vector<64x32xf32>
    %424 = tpu.matmul %407, %423, %cst_253 {dimension_numbers = #tpu.dot_dimension_numbers<[1], [0], [0], [1], [0, 0, 1, 1], [], []>} : vector<64x64xbf16>, vector<64x32xbf16>, vector<64x32xf32> -> vector<64x32xf32>
    %c22_254 = arith.constant 22 : index
    %c0_255 = arith.constant 0 : index
    %c0_256 = arith.constant 0 : index
    %425 = vector.load %arg9[%c22_254, %c0_255, %c0_256] : memref<24x1x32xf32, #tpu.memory_space<vmem>>, vector<1x1x32xf32>
    %426 = vector.shape_cast %425 : vector<1x1x32xf32> to vector<1x32xf32>
    %427 = vector.broadcast %426 : vector<1x32xf32> to vector<64x32xf32>
    %428 = arith.addf %424, %427 : vector<64x32xf32>
    %429 = arith.truncf %414 : vector<16x32xf32> to vector<16x32xbf16>
    %430 = arith.truncf %421 : vector<64x32xf32> to vector<64x32xbf16>
    %cst_257 = arith.constant dense<0.000000e+00> : vector<16x64xf32>
    %431 = tpu.matmul %429, %430, %cst_257 {dimension_numbers = #tpu.dot_dimension_numbers<[1], [1], [0], [0], [0, 0, 1, 0], [], []>} : vector<16x32xbf16>, vector<64x32xbf16>, vector<16x64xf32> -> vector<16x64xf32>
    %cst_258 = arith.constant dense<0xFF800000> : vector<16xf32>
    %432 = vector.multi_reduction <maximumf>, %431, %cst_258 [1] : vector<16x64xf32> to vector<16xf32>
    %433 = vector.shape_cast %432 : vector<16xf32> to vector<16x1xf32>
    %434 = vector.broadcast %433 : vector<16x1xf32> to vector<16x64xf32>
    %435 = arith.subf %431, %434 : vector<16x64xf32>
    %436 = math.exp %435 : vector<16x64xf32>
    %cst_259 = arith.constant dense<0.000000e+00> : vector<16xf32>
    %437 = vector.multi_reduction <add>, %436, %cst_259 [1] : vector<16x64xf32> to vector<16xf32>
    %438 = vector.shape_cast %437 : vector<16xf32> to vector<16x1xf32>
    %439 = tpu.reciprocal %438 {approx = true} : vector<16x1xf32> -> vector<16x1xf32>
    %440 = vector.broadcast %439 : vector<16x1xf32> to vector<16x64xf32>
    %441 = arith.mulf %436, %440 : vector<16x64xf32>
    %442 = arith.truncf %441 : vector<16x64xf32> to vector<16x64xbf16>
    %443 = arith.truncf %428 : vector<64x32xf32> to vector<64x32xbf16>
    %cst_260 = arith.constant dense<0.000000e+00> : vector<16x32xf32>
    %444 = tpu.matmul %442, %443, %cst_260 {dimension_numbers = #tpu.dot_dimension_numbers<[1], [0], [0], [1], [0, 0, 1, 1], [], []>} : vector<16x64xbf16>, vector<64x32xbf16>, vector<16x32xf32> -> vector<16x32xf32>
    %445 = arith.truncf %444 : vector<16x32xf32> to vector<16x32xbf16>
    %c6_261 = arith.constant 6 : index
    %c0_262 = arith.constant 0 : index
    %c0_263 = arith.constant 0 : index
    %446 = vector.load %arg10[%c6_261, %c0_262, %c0_263] : memref<8x32x64xbf16, #tpu.memory_space<vmem>>, vector<1x32x64xbf16>
    %447 = vector.shape_cast %446 : vector<1x32x64xbf16> to vector<32x64xbf16>
    %cst_264 = arith.constant dense<0.000000e+00> : vector<16x64xf32>
    %448 = tpu.matmul %445, %447, %cst_264 {dimension_numbers = #tpu.dot_dimension_numbers<[1], [0], [0], [1], [0, 0, 1, 1], [], []>} : vector<16x32xbf16>, vector<32x64xbf16>, vector<16x64xf32> -> vector<16x64xf32>
    %c19 = arith.constant 19 : index
    %c0_265 = arith.constant 0 : index
    %c0_266 = arith.constant 0 : index
    %449 = vector.load %arg8[%c19, %c0_265, %c0_266] : memref<24x64x32xbf16, #tpu.memory_space<vmem>>, vector<1x64x32xbf16>
    %450 = vector.shape_cast %449 : vector<1x64x32xbf16> to vector<64x32xbf16>
    %cst_267 = arith.constant dense<0.000000e+00> : vector<16x32xf32>
    %451 = tpu.matmul %406, %450, %cst_267 {dimension_numbers = #tpu.dot_dimension_numbers<[1], [0], [0], [1], [0, 0, 1, 1], [], []>} : vector<16x64xbf16>, vector<64x32xbf16>, vector<16x32xf32> -> vector<16x32xf32>
    %c19_268 = arith.constant 19 : index
    %c0_269 = arith.constant 0 : index
    %c0_270 = arith.constant 0 : index
    %452 = vector.load %arg9[%c19_268, %c0_269, %c0_270] : memref<24x1x32xf32, #tpu.memory_space<vmem>>, vector<1x1x32xf32>
    %453 = vector.shape_cast %452 : vector<1x1x32xf32> to vector<1x32xf32>
    %454 = vector.broadcast %453 : vector<1x32xf32> to vector<16x32xf32>
    %455 = arith.addf %451, %454 : vector<16x32xf32>
    %c21 = arith.constant 21 : index
    %c0_271 = arith.constant 0 : index
    %c0_272 = arith.constant 0 : index
    %456 = vector.load %arg8[%c21, %c0_271, %c0_272] : memref<24x64x32xbf16, #tpu.memory_space<vmem>>, vector<1x64x32xbf16>
    %457 = vector.shape_cast %456 : vector<1x64x32xbf16> to vector<64x32xbf16>
    %cst_273 = arith.constant dense<0.000000e+00> : vector<64x32xf32>
    %458 = tpu.matmul %407, %457, %cst_273 {dimension_numbers = #tpu.dot_dimension_numbers<[1], [0], [0], [1], [0, 0, 1, 1], [], []>} : vector<64x64xbf16>, vector<64x32xbf16>, vector<64x32xf32> -> vector<64x32xf32>
    %c21_274 = arith.constant 21 : index
    %c0_275 = arith.constant 0 : index
    %c0_276 = arith.constant 0 : index
    %459 = vector.load %arg9[%c21_274, %c0_275, %c0_276] : memref<24x1x32xf32, #tpu.memory_space<vmem>>, vector<1x1x32xf32>
    %460 = vector.shape_cast %459 : vector<1x1x32xf32> to vector<1x32xf32>
    %461 = vector.broadcast %460 : vector<1x32xf32> to vector<64x32xf32>
    %462 = arith.addf %458, %461 : vector<64x32xf32>
    %c23 = arith.constant 23 : index
    %c0_277 = arith.constant 0 : index
    %c0_278 = arith.constant 0 : index
    %463 = vector.load %arg8[%c23, %c0_277, %c0_278] : memref<24x64x32xbf16, #tpu.memory_space<vmem>>, vector<1x64x32xbf16>
    %464 = vector.shape_cast %463 : vector<1x64x32xbf16> to vector<64x32xbf16>
    %cst_279 = arith.constant dense<0.000000e+00> : vector<64x32xf32>
    %465 = tpu.matmul %407, %464, %cst_279 {dimension_numbers = #tpu.dot_dimension_numbers<[1], [0], [0], [1], [0, 0, 1, 1], [], []>} : vector<64x64xbf16>, vector<64x32xbf16>, vector<64x32xf32> -> vector<64x32xf32>
    %c23_280 = arith.constant 23 : index
    %c0_281 = arith.constant 0 : index
    %c0_282 = arith.constant 0 : index
    %466 = vector.load %arg9[%c23_280, %c0_281, %c0_282] : memref<24x1x32xf32, #tpu.memory_space<vmem>>, vector<1x1x32xf32>
    %467 = vector.shape_cast %466 : vector<1x1x32xf32> to vector<1x32xf32>
    %468 = vector.broadcast %467 : vector<1x32xf32> to vector<64x32xf32>
    %469 = arith.addf %465, %468 : vector<64x32xf32>
    %470 = arith.truncf %455 : vector<16x32xf32> to vector<16x32xbf16>
    %471 = arith.truncf %462 : vector<64x32xf32> to vector<64x32xbf16>
    %cst_283 = arith.constant dense<0.000000e+00> : vector<16x64xf32>
    %472 = tpu.matmul %470, %471, %cst_283 {dimension_numbers = #tpu.dot_dimension_numbers<[1], [1], [0], [0], [0, 0, 1, 0], [], []>} : vector<16x32xbf16>, vector<64x32xbf16>, vector<16x64xf32> -> vector<16x64xf32>
    %cst_284 = arith.constant dense<0xFF800000> : vector<16xf32>
    %473 = vector.multi_reduction <maximumf>, %472, %cst_284 [1] : vector<16x64xf32> to vector<16xf32>
    %474 = vector.shape_cast %473 : vector<16xf32> to vector<16x1xf32>
    %475 = vector.broadcast %474 : vector<16x1xf32> to vector<16x64xf32>
    %476 = arith.subf %472, %475 : vector<16x64xf32>
    %477 = math.exp %476 : vector<16x64xf32>
    %cst_285 = arith.constant dense<0.000000e+00> : vector<16xf32>
    %478 = vector.multi_reduction <add>, %477, %cst_285 [1] : vector<16x64xf32> to vector<16xf32>
    %479 = vector.shape_cast %478 : vector<16xf32> to vector<16x1xf32>
    %480 = tpu.reciprocal %479 {approx = true} : vector<16x1xf32> -> vector<16x1xf32>
    %481 = vector.broadcast %480 : vector<16x1xf32> to vector<16x64xf32>
    %482 = arith.mulf %477, %481 : vector<16x64xf32>
    %483 = arith.truncf %482 : vector<16x64xf32> to vector<16x64xbf16>
    %484 = arith.truncf %469 : vector<64x32xf32> to vector<64x32xbf16>
    %cst_286 = arith.constant dense<0.000000e+00> : vector<16x32xf32>
    %485 = tpu.matmul %483, %484, %cst_286 {dimension_numbers = #tpu.dot_dimension_numbers<[1], [0], [0], [1], [0, 0, 1, 1], [], []>} : vector<16x64xbf16>, vector<64x32xbf16>, vector<16x32xf32> -> vector<16x32xf32>
    %486 = arith.truncf %485 : vector<16x32xf32> to vector<16x32xbf16>
    %c7_287 = arith.constant 7 : index
    %c0_288 = arith.constant 0 : index
    %c0_289 = arith.constant 0 : index
    %487 = vector.load %arg10[%c7_287, %c0_288, %c0_289] : memref<8x32x64xbf16, #tpu.memory_space<vmem>>, vector<1x32x64xbf16>
    %488 = vector.shape_cast %487 : vector<1x32x64xbf16> to vector<32x64xbf16>
    %cst_290 = arith.constant dense<0.000000e+00> : vector<16x64xf32>
    %489 = tpu.matmul %486, %488, %cst_290 {dimension_numbers = #tpu.dot_dimension_numbers<[1], [0], [0], [1], [0, 0, 1, 1], [], []>} : vector<16x32xbf16>, vector<32x64xbf16>, vector<16x64xf32> -> vector<16x64xf32>
    %490 = arith.addf %448, %489 : vector<16x64xf32>
    %c1_291 = arith.constant 1 : index
    %c3_292 = arith.constant 3 : index
    %c0_293 = arith.constant 0 : index
    %491 = vector.load %arg11[%c1_291, %c3_292, %c0_293] : memref<2x10x128xf32, #tpu.memory_space<vmem>>, vector<1x1x64xf32>
    %492 = vector.shape_cast %491 : vector<1x1x64xf32> to vector<1x64xf32>
    %493 = vector.broadcast %492 : vector<1x64xf32> to vector<16x64xf32>
    %494 = arith.addf %490, %493 : vector<16x64xf32>
    %495 = arith.addf %405, %494 : vector<16x64xf32>
    %c1_294 = arith.constant 1 : index
    %c6_295 = arith.constant 6 : index
    %c0_296 = arith.constant 0 : index
    %496 = vector.load %arg11[%c1_294, %c6_295, %c0_296] : memref<2x10x128xf32, #tpu.memory_space<vmem>>, vector<1x1x64xf32>
    %497 = vector.shape_cast %496 : vector<1x1x64xf32> to vector<1x64xf32>
    %c1_297 = arith.constant 1 : index
    %c7_298 = arith.constant 7 : index
    %c0_299 = arith.constant 0 : index
    %498 = vector.load %arg11[%c1_297, %c7_298, %c0_299] : memref<2x10x128xf32, #tpu.memory_space<vmem>>, vector<1x1x64xf32>
    %499 = vector.shape_cast %498 : vector<1x1x64xf32> to vector<1x64xf32>
    %cst_300 = arith.constant dense<0.000000e+00> : vector<16xf32>
    %500 = vector.multi_reduction <add>, %495, %cst_300 [1] : vector<16x64xf32> to vector<16xf32>
    %501 = vector.shape_cast %500 : vector<16xf32> to vector<16x1xf32>
    %cst_301 = arith.constant 6.400000e+01 : f32
    %502 = vector.broadcast %cst_301 : f32 to vector<16x1xf32>
    %503 = arith.divf %501, %502 : vector<16x1xf32>
    %504 = vector.broadcast %503 : vector<16x1xf32> to vector<16x64xf32>
    %505 = arith.subf %495, %504 : vector<16x64xf32>
    %506 = arith.mulf %505, %505 : vector<16x64xf32>
    %cst_302 = arith.constant dense<0.000000e+00> : vector<16xf32>
    %507 = vector.multi_reduction <add>, %506, %cst_302 [1] : vector<16x64xf32> to vector<16xf32>
    %508 = vector.shape_cast %507 : vector<16xf32> to vector<16x1xf32>
    %cst_303 = arith.constant 6.400000e+01 : f32
    %509 = vector.broadcast %cst_303 : f32 to vector<16x1xf32>
    %510 = arith.divf %508, %509 : vector<16x1xf32>
    %511 = vector.broadcast %503 : vector<16x1xf32> to vector<16x64xf32>
    %512 = arith.subf %495, %511 : vector<16x64xf32>
    %cst_304 = arith.constant 9.99999974E-6 : f32
    %513 = vector.broadcast %cst_304 : f32 to vector<16x1xf32>
    %514 = arith.addf %510, %513 : vector<16x1xf32>
    %515 = math.rsqrt %514 : vector<16x1xf32>
    %516 = vector.broadcast %515 : vector<16x1xf32> to vector<16x64xf32>
    %517 = arith.mulf %512, %516 : vector<16x64xf32>
    %518 = vector.broadcast %497 : vector<1x64xf32> to vector<16x64xf32>
    %519 = arith.mulf %517, %518 : vector<16x64xf32>
    %520 = vector.broadcast %499 : vector<1x64xf32> to vector<16x64xf32>
    %521 = arith.addf %519, %520 : vector<16x64xf32>
    %522 = arith.truncf %521 : vector<16x64xf32> to vector<16x64xbf16>
    %c1_305 = arith.constant 1 : index
    %c0_306 = arith.constant 0 : index
    %c0_307 = arith.constant 0 : index
    %523 = vector.load %arg12[%c1_305, %c0_306, %c0_307] : memref<2x64x128xbf16, #tpu.memory_space<vmem>>, vector<1x64x128xbf16>
    %524 = vector.shape_cast %523 : vector<1x64x128xbf16> to vector<64x128xbf16>
    %cst_308 = arith.constant dense<0.000000e+00> : vector<16x128xf32>
    %525 = tpu.matmul %522, %524, %cst_308 {dimension_numbers = #tpu.dot_dimension_numbers<[1], [0], [0], [1], [0, 0, 1, 1], [], []>} : vector<16x64xbf16>, vector<64x128xbf16>, vector<16x128xf32> -> vector<16x128xf32>
    %c1_309 = arith.constant 1 : index
    %c0_310 = arith.constant 0 : index
    %c0_311 = arith.constant 0 : index
    %526 = vector.load %arg11[%c1_309, %c0_310, %c0_311] : memref<2x10x128xf32, #tpu.memory_space<vmem>>, vector<1x1x128xf32>
    %527 = vector.shape_cast %526 : vector<1x1x128xf32> to vector<1x128xf32>
    %528 = vector.broadcast %527 : vector<1x128xf32> to vector<16x128xf32>
    %529 = arith.addf %525, %528 : vector<16x128xf32>
    %cst_312 = arith.constant 0.000000e+00 : f32
    %530 = vector.broadcast %cst_312 : f32 to vector<16x128xf32>
    %531 = arith.maximumf %529, %530 : vector<16x128xf32>
    %532 = arith.truncf %531 : vector<16x128xf32> to vector<16x128xbf16>
    %c1_313 = arith.constant 1 : index
    %c0_314 = arith.constant 0 : index
    %c0_315 = arith.constant 0 : index
    %533 = vector.load %arg13[%c1_313, %c0_314, %c0_315] : memref<2x128x64xbf16, #tpu.memory_space<vmem>>, vector<1x128x64xbf16>
    %534 = vector.shape_cast %533 : vector<1x128x64xbf16> to vector<128x64xbf16>
    %cst_316 = arith.constant dense<0.000000e+00> : vector<16x64xf32>
    %535 = tpu.matmul %532, %534, %cst_316 {dimension_numbers = #tpu.dot_dimension_numbers<[1], [0], [0], [1], [0, 0, 1, 1], [], []>} : vector<16x128xbf16>, vector<128x64xbf16>, vector<16x64xf32> -> vector<16x64xf32>
    %c1_317 = arith.constant 1 : index
    %c1_318 = arith.constant 1 : index
    %c0_319 = arith.constant 0 : index
    %536 = vector.load %arg11[%c1_317, %c1_318, %c0_319] : memref<2x10x128xf32, #tpu.memory_space<vmem>>, vector<1x1x64xf32>
    %537 = vector.shape_cast %536 : vector<1x1x64xf32> to vector<1x64xf32>
    %538 = vector.broadcast %537 : vector<1x64xf32> to vector<16x64xf32>
    %539 = arith.addf %535, %538 : vector<16x64xf32>
    %540 = arith.addf %521, %539 : vector<16x64xf32>
    %c1_320 = arith.constant 1 : index
    %c8_321 = arith.constant 8 : index
    %c0_322 = arith.constant 0 : index
    %541 = vector.load %arg11[%c1_320, %c8_321, %c0_322] : memref<2x10x128xf32, #tpu.memory_space<vmem>>, vector<1x1x64xf32>
    %542 = vector.shape_cast %541 : vector<1x1x64xf32> to vector<1x64xf32>
    %c1_323 = arith.constant 1 : index
    %c9_324 = arith.constant 9 : index
    %c0_325 = arith.constant 0 : index
    %543 = vector.load %arg11[%c1_323, %c9_324, %c0_325] : memref<2x10x128xf32, #tpu.memory_space<vmem>>, vector<1x1x64xf32>
    %544 = vector.shape_cast %543 : vector<1x1x64xf32> to vector<1x64xf32>
    %cst_326 = arith.constant dense<0.000000e+00> : vector<16xf32>
    %545 = vector.multi_reduction <add>, %540, %cst_326 [1] : vector<16x64xf32> to vector<16xf32>
    %546 = vector.shape_cast %545 : vector<16xf32> to vector<16x1xf32>
    %cst_327 = arith.constant 6.400000e+01 : f32
    %547 = vector.broadcast %cst_327 : f32 to vector<16x1xf32>
    %548 = arith.divf %546, %547 : vector<16x1xf32>
    %549 = vector.broadcast %548 : vector<16x1xf32> to vector<16x64xf32>
    %550 = arith.subf %540, %549 : vector<16x64xf32>
    %551 = arith.mulf %550, %550 : vector<16x64xf32>
    %cst_328 = arith.constant dense<0.000000e+00> : vector<16xf32>
    %552 = vector.multi_reduction <add>, %551, %cst_328 [1] : vector<16x64xf32> to vector<16xf32>
    %553 = vector.shape_cast %552 : vector<16xf32> to vector<16x1xf32>
    %cst_329 = arith.constant 6.400000e+01 : f32
    %554 = vector.broadcast %cst_329 : f32 to vector<16x1xf32>
    %555 = arith.divf %553, %554 : vector<16x1xf32>
    %556 = vector.broadcast %548 : vector<16x1xf32> to vector<16x64xf32>
    %557 = arith.subf %540, %556 : vector<16x64xf32>
    %cst_330 = arith.constant 9.99999974E-6 : f32
    %558 = vector.broadcast %cst_330 : f32 to vector<16x1xf32>
    %559 = arith.addf %555, %558 : vector<16x1xf32>
    %560 = math.rsqrt %559 : vector<16x1xf32>
    %561 = vector.broadcast %560 : vector<16x1xf32> to vector<16x64xf32>
    %562 = arith.mulf %557, %561 : vector<16x64xf32>
    %563 = vector.broadcast %542 : vector<1x64xf32> to vector<16x64xf32>
    %564 = arith.mulf %562, %563 : vector<16x64xf32>
    %565 = vector.broadcast %544 : vector<1x64xf32> to vector<16x64xf32>
    %566 = arith.addf %564, %565 : vector<16x64xf32>
    %567 = arith.truncf %566 : vector<16x64xf32> to vector<16x64xbf16>
    %c0_331 = arith.constant 0 : index
    %c0_332 = arith.constant 0 : index
    %c0_333 = arith.constant 0 : index
    %568 = vector.load %arg14[%c0_331, %c0_332, %c0_333] : memref<2x128x128xbf16, #tpu.memory_space<vmem>>, vector<1x64x128xbf16>
    %569 = vector.shape_cast %568 : vector<1x64x128xbf16> to vector<64x128xbf16>
    %cst_334 = arith.constant dense<0.000000e+00> : vector<16x128xf32>
    %570 = tpu.matmul %567, %569, %cst_334 {dimension_numbers = #tpu.dot_dimension_numbers<[1], [0], [0], [1], [0, 0, 1, 1], [], []>} : vector<16x64xbf16>, vector<64x128xbf16>, vector<16x128xf32> -> vector<16x128xf32>
    %c0_335 = arith.constant 0 : index
    %c0_336 = arith.constant 0 : index
    %c0_337 = arith.constant 0 : index
    %571 = vector.load %arg15[%c0_335, %c0_336, %c0_337] : memref<2x1x128xf32, #tpu.memory_space<vmem>>, vector<1x1x128xf32>
    %572 = vector.shape_cast %571 : vector<1x1x128xf32> to vector<1x128xf32>
    %573 = vector.broadcast %572 : vector<1x128xf32> to vector<16x128xf32>
    %574 = arith.addf %570, %573 : vector<16x128xf32>
    %cst_338 = arith.constant 0.000000e+00 : f32
    %575 = vector.broadcast %cst_338 : f32 to vector<16x128xf32>
    %576 = arith.maximumf %574, %575 : vector<16x128xf32>
    %577 = arith.truncf %576 : vector<16x128xf32> to vector<16x128xbf16>
    %c1_339 = arith.constant 1 : index
    %c0_340 = arith.constant 0 : index
    %c0_341 = arith.constant 0 : index
    %578 = vector.load %arg14[%c1_339, %c0_340, %c0_341] : memref<2x128x128xbf16, #tpu.memory_space<vmem>>, vector<1x128x128xbf16>
    %579 = vector.shape_cast %578 : vector<1x128x128xbf16> to vector<128x128xbf16>
    %cst_342 = arith.constant dense<0.000000e+00> : vector<16x128xf32>
    %580 = tpu.matmul %577, %579, %cst_342 {dimension_numbers = #tpu.dot_dimension_numbers<[1], [0], [0], [1], [0, 0, 1, 1], [], []>} : vector<16x128xbf16>, vector<128x128xbf16>, vector<16x128xf32> -> vector<16x128xf32>
    %c1_343 = arith.constant 1 : index
    %c0_344 = arith.constant 0 : index
    %c0_345 = arith.constant 0 : index
    %581 = vector.load %arg15[%c1_343, %c0_344, %c0_345] : memref<2x1x128xf32, #tpu.memory_space<vmem>>, vector<1x1x128xf32>
    %582 = vector.shape_cast %581 : vector<1x1x128xf32> to vector<1x128xf32>
    %583 = vector.broadcast %582 : vector<1x128xf32> to vector<16x128xf32>
    %584 = arith.addf %580, %583 : vector<16x128xf32>
    %c0_346 = arith.constant 0 : index
    %c0_347 = arith.constant 0 : index
    %c0_348 = arith.constant 0 : index
    %c0_349 = arith.constant 0 : index
    %585 = vector.load %arg2[%c0_346, %c0_347, %c0_348, %c0_349] : memref<1x9x8x128xbf16, #tpu.memory_space<vmem>>, vector<1x1x8x128xbf16>
    %586 = vector.shape_cast %585 : vector<1x1x8x128xbf16> to vector<8x128xbf16>
    %c0_350 = arith.constant 0 : index
    %c0_351 = arith.constant 0 : index
    %c0_352 = arith.constant 0 : index
    %587 = vector.load %arg16[%c0_350, %c0_351, %c0_352] : memref<11x128x128xbf16, #tpu.memory_space<vmem>>, vector<1x128x128xbf16>
    %588 = vector.shape_cast %587 : vector<1x128x128xbf16> to vector<128x128xbf16>
    %cst_353 = arith.constant dense<0.000000e+00> : vector<8x128xf32>
    %589 = tpu.matmul %586, %588, %cst_353 {dimension_numbers = #tpu.dot_dimension_numbers<[1], [0], [0], [1], [0, 0, 1, 1], [], []>} : vector<8x128xbf16>, vector<128x128xbf16>, vector<8x128xf32> -> vector<8x128xf32>
    %c0_354 = arith.constant 0 : index
    %c1_355 = arith.constant 1 : index
    %c0_356 = arith.constant 0 : index
    %c0_357 = arith.constant 0 : index
    %590 = vector.load %arg2[%c0_354, %c1_355, %c0_356, %c0_357] : memref<1x9x8x128xbf16, #tpu.memory_space<vmem>>, vector<1x1x8x128xbf16>
    %591 = vector.shape_cast %590 : vector<1x1x8x128xbf16> to vector<8x128xbf16>
    %c1_358 = arith.constant 1 : index
    %c0_359 = arith.constant 0 : index
    %c0_360 = arith.constant 0 : index
    %592 = vector.load %arg16[%c1_358, %c0_359, %c0_360] : memref<11x128x128xbf16, #tpu.memory_space<vmem>>, vector<1x128x128xbf16>
    %593 = vector.shape_cast %592 : vector<1x128x128xbf16> to vector<128x128xbf16>
    %cst_361 = arith.constant dense<0.000000e+00> : vector<8x128xf32>
    %594 = tpu.matmul %591, %593, %cst_361 {dimension_numbers = #tpu.dot_dimension_numbers<[1], [0], [0], [1], [0, 0, 1, 1], [], []>} : vector<8x128xbf16>, vector<128x128xbf16>, vector<8x128xf32> -> vector<8x128xf32>
    %595 = arith.addf %589, %594 : vector<8x128xf32>
    %c0_362 = arith.constant 0 : index
    %c2_363 = arith.constant 2 : index
    %c0_364 = arith.constant 0 : index
    %c0_365 = arith.constant 0 : index
    %596 = vector.load %arg2[%c0_362, %c2_363, %c0_364, %c0_365] : memref<1x9x8x128xbf16, #tpu.memory_space<vmem>>, vector<1x1x8x128xbf16>
    %597 = vector.shape_cast %596 : vector<1x1x8x128xbf16> to vector<8x128xbf16>
    %c2_366 = arith.constant 2 : index
    %c0_367 = arith.constant 0 : index
    %c0_368 = arith.constant 0 : index
    %598 = vector.load %arg16[%c2_366, %c0_367, %c0_368] : memref<11x128x128xbf16, #tpu.memory_space<vmem>>, vector<1x128x128xbf16>
    %599 = vector.shape_cast %598 : vector<1x128x128xbf16> to vector<128x128xbf16>
    %cst_369 = arith.constant dense<0.000000e+00> : vector<8x128xf32>
    %600 = tpu.matmul %597, %599, %cst_369 {dimension_numbers = #tpu.dot_dimension_numbers<[1], [0], [0], [1], [0, 0, 1, 1], [], []>} : vector<8x128xbf16>, vector<128x128xbf16>, vector<8x128xf32> -> vector<8x128xf32>
    %601 = arith.addf %595, %600 : vector<8x128xf32>
    %c0_370 = arith.constant 0 : index
    %c3_371 = arith.constant 3 : index
    %c0_372 = arith.constant 0 : index
    %c0_373 = arith.constant 0 : index
    %602 = vector.load %arg2[%c0_370, %c3_371, %c0_372, %c0_373] : memref<1x9x8x128xbf16, #tpu.memory_space<vmem>>, vector<1x1x8x128xbf16>
    %603 = vector.shape_cast %602 : vector<1x1x8x128xbf16> to vector<8x128xbf16>
    %c3_374 = arith.constant 3 : index
    %c0_375 = arith.constant 0 : index
    %c0_376 = arith.constant 0 : index
    %604 = vector.load %arg16[%c3_374, %c0_375, %c0_376] : memref<11x128x128xbf16, #tpu.memory_space<vmem>>, vector<1x128x128xbf16>
    %605 = vector.shape_cast %604 : vector<1x128x128xbf16> to vector<128x128xbf16>
    %cst_377 = arith.constant dense<0.000000e+00> : vector<8x128xf32>
    %606 = tpu.matmul %603, %605, %cst_377 {dimension_numbers = #tpu.dot_dimension_numbers<[1], [0], [0], [1], [0, 0, 1, 1], [], []>} : vector<8x128xbf16>, vector<128x128xbf16>, vector<8x128xf32> -> vector<8x128xf32>
    %607 = arith.addf %601, %606 : vector<8x128xf32>
    %c0_378 = arith.constant 0 : index
    %c4_379 = arith.constant 4 : index
    %c0_380 = arith.constant 0 : index
    %c0_381 = arith.constant 0 : index
    %608 = vector.load %arg2[%c0_378, %c4_379, %c0_380, %c0_381] : memref<1x9x8x128xbf16, #tpu.memory_space<vmem>>, vector<1x1x8x128xbf16>
    %609 = vector.shape_cast %608 : vector<1x1x8x128xbf16> to vector<8x128xbf16>
    %c4_382 = arith.constant 4 : index
    %c0_383 = arith.constant 0 : index
    %c0_384 = arith.constant 0 : index
    %610 = vector.load %arg16[%c4_382, %c0_383, %c0_384] : memref<11x128x128xbf16, #tpu.memory_space<vmem>>, vector<1x128x128xbf16>
    %611 = vector.shape_cast %610 : vector<1x128x128xbf16> to vector<128x128xbf16>
    %cst_385 = arith.constant dense<0.000000e+00> : vector<8x128xf32>
    %612 = tpu.matmul %609, %611, %cst_385 {dimension_numbers = #tpu.dot_dimension_numbers<[1], [0], [0], [1], [0, 0, 1, 1], [], []>} : vector<8x128xbf16>, vector<128x128xbf16>, vector<8x128xf32> -> vector<8x128xf32>
    %613 = arith.addf %607, %612 : vector<8x128xf32>
    %c0_386 = arith.constant 0 : index
    %c5_387 = arith.constant 5 : index
    %c0_388 = arith.constant 0 : index
    %c0_389 = arith.constant 0 : index
    %614 = vector.load %arg2[%c0_386, %c5_387, %c0_388, %c0_389] : memref<1x9x8x128xbf16, #tpu.memory_space<vmem>>, vector<1x1x8x128xbf16>
    %615 = vector.shape_cast %614 : vector<1x1x8x128xbf16> to vector<8x128xbf16>
    %c5_390 = arith.constant 5 : index
    %c0_391 = arith.constant 0 : index
    %c0_392 = arith.constant 0 : index
    %616 = vector.load %arg16[%c5_390, %c0_391, %c0_392] : memref<11x128x128xbf16, #tpu.memory_space<vmem>>, vector<1x128x128xbf16>
    %617 = vector.shape_cast %616 : vector<1x128x128xbf16> to vector<128x128xbf16>
    %cst_393 = arith.constant dense<0.000000e+00> : vector<8x128xf32>
    %618 = tpu.matmul %615, %617, %cst_393 {dimension_numbers = #tpu.dot_dimension_numbers<[1], [0], [0], [1], [0, 0, 1, 1], [], []>} : vector<8x128xbf16>, vector<128x128xbf16>, vector<8x128xf32> -> vector<8x128xf32>
    %619 = arith.addf %613, %618 : vector<8x128xf32>
    %c0_394 = arith.constant 0 : index
    %c6_395 = arith.constant 6 : index
    %c0_396 = arith.constant 0 : index
    %c0_397 = arith.constant 0 : index
    %620 = vector.load %arg2[%c0_394, %c6_395, %c0_396, %c0_397] : memref<1x9x8x128xbf16, #tpu.memory_space<vmem>>, vector<1x1x8x128xbf16>
    %621 = vector.shape_cast %620 : vector<1x1x8x128xbf16> to vector<8x128xbf16>
    %c6_398 = arith.constant 6 : index
    %c0_399 = arith.constant 0 : index
    %c0_400 = arith.constant 0 : index
    %622 = vector.load %arg16[%c6_398, %c0_399, %c0_400] : memref<11x128x128xbf16, #tpu.memory_space<vmem>>, vector<1x128x128xbf16>
    %623 = vector.shape_cast %622 : vector<1x128x128xbf16> to vector<128x128xbf16>
    %cst_401 = arith.constant dense<0.000000e+00> : vector<8x128xf32>
    %624 = tpu.matmul %621, %623, %cst_401 {dimension_numbers = #tpu.dot_dimension_numbers<[1], [0], [0], [1], [0, 0, 1, 1], [], []>} : vector<8x128xbf16>, vector<128x128xbf16>, vector<8x128xf32> -> vector<8x128xf32>
    %625 = arith.addf %619, %624 : vector<8x128xf32>
    %c0_402 = arith.constant 0 : index
    %c7_403 = arith.constant 7 : index
    %c0_404 = arith.constant 0 : index
    %c0_405 = arith.constant 0 : index
    %626 = vector.load %arg2[%c0_402, %c7_403, %c0_404, %c0_405] : memref<1x9x8x128xbf16, #tpu.memory_space<vmem>>, vector<1x1x8x128xbf16>
    %627 = vector.shape_cast %626 : vector<1x1x8x128xbf16> to vector<8x128xbf16>
    %c7_406 = arith.constant 7 : index
    %c0_407 = arith.constant 0 : index
    %c0_408 = arith.constant 0 : index
    %628 = vector.load %arg16[%c7_406, %c0_407, %c0_408] : memref<11x128x128xbf16, #tpu.memory_space<vmem>>, vector<1x128x128xbf16>
    %629 = vector.shape_cast %628 : vector<1x128x128xbf16> to vector<128x128xbf16>
    %cst_409 = arith.constant dense<0.000000e+00> : vector<8x128xf32>
    %630 = tpu.matmul %627, %629, %cst_409 {dimension_numbers = #tpu.dot_dimension_numbers<[1], [0], [0], [1], [0, 0, 1, 1], [], []>} : vector<8x128xbf16>, vector<128x128xbf16>, vector<8x128xf32> -> vector<8x128xf32>
    %631 = arith.addf %625, %630 : vector<8x128xf32>
    %c0_410 = arith.constant 0 : index
    %c8_411 = arith.constant 8 : index
    %c0_412 = arith.constant 0 : index
    %c0_413 = arith.constant 0 : index
    %632 = vector.load %arg2[%c0_410, %c8_411, %c0_412, %c0_413] : memref<1x9x8x128xbf16, #tpu.memory_space<vmem>>, vector<1x1x8x128xbf16>
    %633 = vector.shape_cast %632 : vector<1x1x8x128xbf16> to vector<8x128xbf16>
    %c8_414 = arith.constant 8 : index
    %c0_415 = arith.constant 0 : index
    %c0_416 = arith.constant 0 : index
    %634 = vector.load %arg16[%c8_414, %c0_415, %c0_416] : memref<11x128x128xbf16, #tpu.memory_space<vmem>>, vector<1x128x128xbf16>
    %635 = vector.shape_cast %634 : vector<1x128x128xbf16> to vector<128x128xbf16>
    %cst_417 = arith.constant dense<0.000000e+00> : vector<8x128xf32>
    %636 = tpu.matmul %633, %635, %cst_417 {dimension_numbers = #tpu.dot_dimension_numbers<[1], [0], [0], [1], [0, 0, 1, 1], [], []>} : vector<8x128xbf16>, vector<128x128xbf16>, vector<8x128xf32> -> vector<8x128xf32>
    %637 = arith.addf %631, %636 : vector<8x128xf32>
    %c0_418 = arith.constant 0 : index
    %c0_419 = arith.constant 0 : index
    %c0_420 = arith.constant 0 : index
    %638 = vector.load %arg17[%c0_418, %c0_419, %c0_420] : memref<2x1x128xf32, #tpu.memory_space<vmem>>, vector<1x1x128xf32>
    %639 = vector.shape_cast %638 : vector<1x1x128xf32> to vector<1x128xf32>
    %640 = vector.broadcast %639 : vector<1x128xf32> to vector<8x128xf32>
    %641 = arith.addf %637, %640 : vector<8x128xf32>
    %cst_421 = arith.constant 0.000000e+00 : f32
    %642 = vector.broadcast %cst_421 : f32 to vector<8x128xf32>
    %643 = arith.maximumf %641, %642 : vector<8x128xf32>
    %644 = arith.truncf %643 : vector<8x128xf32> to vector<8x128xbf16>
    %c9_422 = arith.constant 9 : index
    %c0_423 = arith.constant 0 : index
    %c0_424 = arith.constant 0 : index
    %645 = vector.load %arg16[%c9_422, %c0_423, %c0_424] : memref<11x128x128xbf16, #tpu.memory_space<vmem>>, vector<1x128x128xbf16>
    %646 = vector.shape_cast %645 : vector<1x128x128xbf16> to vector<128x128xbf16>
    %cst_425 = arith.constant dense<0.000000e+00> : vector<8x128xf32>
    %647 = tpu.matmul %644, %646, %cst_425 {dimension_numbers = #tpu.dot_dimension_numbers<[1], [0], [0], [1], [0, 0, 1, 1], [], []>} : vector<8x128xbf16>, vector<128x128xbf16>, vector<8x128xf32> -> vector<8x128xf32>
    %c1_426 = arith.constant 1 : index
    %c0_427 = arith.constant 0 : index
    %c0_428 = arith.constant 0 : index
    %648 = vector.load %arg17[%c1_426, %c0_427, %c0_428] : memref<2x1x128xf32, #tpu.memory_space<vmem>>, vector<1x1x128xf32>
    %649 = vector.shape_cast %648 : vector<1x1x128xf32> to vector<1x128xf32>
    %650 = vector.broadcast %649 : vector<1x128xf32> to vector<8x128xf32>
    %651 = arith.addf %647, %650 : vector<8x128xf32>
    %c10_429 = arith.constant 10 : index
    %c0_430 = arith.constant 0 : index
    %c0_431 = arith.constant 0 : index
    %652 = vector.load %arg16[%c10_429, %c0_430, %c0_431] : memref<11x128x128xbf16, #tpu.memory_space<vmem>>, vector<1x16x8xbf16>
    %653 = vector.shape_cast %652 : vector<1x16x8xbf16> to vector<16x8xbf16>
    %654 = arith.truncf %651 : vector<8x128xf32> to vector<8x128xbf16>
    %cst_432 = arith.constant dense<0.000000e+00> : vector<16x128xf32>
    %655 = tpu.matmul %653, %654, %cst_432 {dimension_numbers = #tpu.dot_dimension_numbers<[1], [0], [0], [1], [0, 0, 1, 1], [], []>} : vector<16x8xbf16>, vector<8x128xbf16>, vector<16x128xf32> -> vector<16x128xf32>
    %c0_433 = arith.constant 0 : index
    %c0_434 = arith.constant 0 : index
    %c0_435 = arith.constant 0 : index
    %c0_436 = arith.constant 0 : index
    %656 = vector.load %arg18[%c0_433, %c0_434, %c0_435, %c0_436] : memref<1x2x16x128xf32, #tpu.memory_space<vmem>>, vector<1x1x16x128xf32>
    %657 = vector.shape_cast %656 : vector<1x1x16x128xf32> to vector<16x128xf32>
    %658 = vector.shape_cast %655 : vector<16x128xf32> to vector<1x1x16x128xf32>
    tpu.vector_store %arg18[%c0_433, %c0_434, %c0_435, %c0_436], %658 {strides = array<i32>} : memref<1x2x16x128xf32, #tpu.memory_space<vmem>>, vector<1x1x16x128xf32>,
    %c0_437 = arith.constant 0 : index
    %c1_438 = arith.constant 1 : index
    %c0_439 = arith.constant 0 : index
    %c0_440 = arith.constant 0 : index
    %659 = vector.load %arg18[%c0_437, %c1_438, %c0_439, %c0_440] : memref<1x2x16x128xf32, #tpu.memory_space<vmem>>, vector<1x1x16x128xf32>
    %660 = vector.shape_cast %659 : vector<1x1x16x128xf32> to vector<16x128xf32>
    %661 = vector.shape_cast %584 : vector<16x128xf32> to vector<1x1x16x128xf32>
    tpu.vector_store %arg18[%c0_437, %c1_438, %c0_439, %c0_440], %661 {strides = array<i32>} : memref<1x2x16x128xf32, #tpu.memory_space<vmem>>, vector<1x1x16x128xf32>,
    return
  }
  func.func @transform_0(%arg0: i32) -> (i32, i32, i32) {
    %c0_i32 = arith.constant 0 : i32
    %c0_i32_0 = arith.constant 0 : i32
    %c0_i32_1 = arith.constant 0 : i32
    return %arg0, %c0_i32, %c0_i32_0 : i32, i32, i32
  }
  func.func @transform_1(%arg0: i32) -> (i32, i32, i32, i32) {
    %c0_i32 = arith.constant 0 : i32
    %c0_i32_0 = arith.constant 0 : i32
    %c0_i32_1 = arith.constant 0 : i32
    %c0_i32_2 = arith.constant 0 : i32
    return %arg0, %c0_i32, %c0_i32_0, %c0_i32_1 : i32, i32, i32, i32
  }
  func.func @transform_2(%arg0: i32) -> (i32, i32, i32) {
    %c0_i32 = arith.constant 0 : i32
    %c0_i32_0 = arith.constant 0 : i32
    %c0_i32_1 = arith.constant 0 : i32
    return %arg0, %c0_i32, %c0_i32_0 : i32, i32, i32
  }
  func.func @transform_3(%arg0: i32) -> (i32, i32) {
    %c0_i32 = arith.constant 0 : i32
    %c0_i32_0 = arith.constant 0 : i32
    %c0_i32_1 = arith.constant 0 : i32
    return %c0_i32, %c0_i32_0 : i32, i32
  }
  func.func @transform_4(%arg0: i32) -> (i32, i32) {
    %c0_i32 = arith.constant 0 : i32
    %c0_i32_0 = arith.constant 0 : i32
    %c0_i32_1 = arith.constant 0 : i32
    return %c0_i32, %c0_i32_0 : i32, i32
  }
  func.func @transform_5(%arg0: i32) -> (i32, i32) {
    %c0_i32 = arith.constant 0 : i32
    %c0_i32_0 = arith.constant 0 : i32
    %c0_i32_1 = arith.constant 0 : i32
    return %c0_i32, %c0_i32_0 : i32, i32
  }
  func.func @transform_6(%arg0: i32) -> (i32, i32) {
    %c0_i32 = arith.constant 0 : i32
    %c0_i32_0 = arith.constant 0 : i32
    %c0_i32_1 = arith.constant 0 : i32
    return %c0_i32, %c0_i32_0 : i32, i32
  }
  func.func @transform_7(%arg0: i32) -> (i32, i32, i32) {
    %c0_i32 = arith.constant 0 : i32
    %c0_i32_0 = arith.constant 0 : i32
    %c0_i32_1 = arith.constant 0 : i32
    %c0_i32_2 = arith.constant 0 : i32
    return %c0_i32, %c0_i32_0, %c0_i32_1 : i32, i32, i32
  }
  func.func @transform_8(%arg0: i32) -> (i32, i32, i32) {
    %c0_i32 = arith.constant 0 : i32
    %c0_i32_0 = arith.constant 0 : i32
    %c0_i32_1 = arith.constant 0 : i32
    %c0_i32_2 = arith.constant 0 : i32
    return %c0_i32, %c0_i32_0, %c0_i32_1 : i32, i32, i32
  }
  func.func @transform_9(%arg0: i32) -> (i32, i32, i32) {
    %c0_i32 = arith.constant 0 : i32
    %c0_i32_0 = arith.constant 0 : i32
    %c0_i32_1 = arith.constant 0 : i32
    %c0_i32_2 = arith.constant 0 : i32
    return %c0_i32, %c0_i32_0, %c0_i32_1 : i32, i32, i32
  }
  func.func @transform_10(%arg0: i32) -> (i32, i32, i32) {
    %c0_i32 = arith.constant 0 : i32
    %c0_i32_0 = arith.constant 0 : i32
    %c0_i32_1 = arith.constant 0 : i32
    %c0_i32_2 = arith.constant 0 : i32
    return %c0_i32, %c0_i32_0, %c0_i32_1 : i32, i32, i32
  }
  func.func @transform_11(%arg0: i32) -> (i32, i32, i32) {
    %c0_i32 = arith.constant 0 : i32
    %c0_i32_0 = arith.constant 0 : i32
    %c0_i32_1 = arith.constant 0 : i32
    %c0_i32_2 = arith.constant 0 : i32
    return %c0_i32, %c0_i32_0, %c0_i32_1 : i32, i32, i32
  }
  func.func @transform_12(%arg0: i32) -> (i32, i32, i32) {
    %c0_i32 = arith.constant 0 : i32
    %c0_i32_0 = arith.constant 0 : i32
    %c0_i32_1 = arith.constant 0 : i32
    %c0_i32_2 = arith.constant 0 : i32
    return %c0_i32, %c0_i32_0, %c0_i32_1 : i32, i32, i32
  }
  func.func @transform_13(%arg0: i32) -> (i32, i32, i32) {
    %c0_i32 = arith.constant 0 : i32
    %c0_i32_0 = arith.constant 0 : i32
    %c0_i32_1 = arith.constant 0 : i32
    %c0_i32_2 = arith.constant 0 : i32
    return %c0_i32, %c0_i32_0, %c0_i32_1 : i32, i32, i32
  }
  func.func @transform_14(%arg0: i32) -> (i32, i32, i32) {
    %c0_i32 = arith.constant 0 : i32
    %c0_i32_0 = arith.constant 0 : i32
    %c0_i32_1 = arith.constant 0 : i32
    %c0_i32_2 = arith.constant 0 : i32
    return %c0_i32, %c0_i32_0, %c0_i32_1 : i32, i32, i32
  }
  func.func @transform_15(%arg0: i32) -> (i32, i32, i32) {
    %c0_i32 = arith.constant 0 : i32
    %c0_i32_0 = arith.constant 0 : i32
    %c0_i32_1 = arith.constant 0 : i32
    %c0_i32_2 = arith.constant 0 : i32
    return %c0_i32, %c0_i32_0, %c0_i32_1 : i32, i32, i32
  }
  func.func @transform_16(%arg0: i32) -> (i32, i32, i32) {
    %c0_i32 = arith.constant 0 : i32
    %c0_i32_0 = arith.constant 0 : i32
    %c0_i32_1 = arith.constant 0 : i32
    %c0_i32_2 = arith.constant 0 : i32
    return %c0_i32, %c0_i32_0, %c0_i32_1 : i32, i32, i32
  }
  func.func @transform_17(%arg0: i32) -> (i32, i32, i32, i32) {
    %c0_i32 = arith.constant 0 : i32
    %c0_i32_0 = arith.constant 0 : i32
    %c0_i32_1 = arith.constant 0 : i32
    %c0_i32_2 = arith.constant 0 : i32
    return %arg0, %c0_i32, %c0_i32_0, %c0_i32_1 : i32, i32, i32, i32
  }
}

</mosaic_0001>

<bundles_post_ra>
// kernel: squeeze.2
= control target key start
LH: loop header
LB: loop body
LE: loop exit
PB: predicated region body
PF: predicated region fallthrough
CT: control target
= control target key end

     0   :  { %vm3_vm0 = vcmask 261120   ;;  %s432_s12 = smov 96   ;;  %s434_s15 = smov 32   ;;  %s585_s0 = inlined_call_operand.vmem [shape: f32[2,1,16,128], index: 0, kind: input, shape index: {}]   ;;  %s586_s1 = inlined_call_operand.vmem [shape: f32[2,16,4,32], index: 1, kind: output, shape index: {}]  }
   0x1   :  { %v390_v0 = vld [vmem:[%s585_s0 + $0x10] sm:$0xff]   ;;  %v27_v1 = vld [vmem:[%s585_s0] sm:$0xff]   ;;  %v391_v2 = vld [vmem:[%s585_s0 + $0x18] sm:$0xff]  }
   0x2   :  { %46 = vrot.lane.b32.xlu1 %v390_v0, %s432_s12  ;;  %28 = vrot.lane.b32.xlu0 %v27_v1, %s432_s12  ;;  %v389_v3 = vld [vmem:[%s585_s0 + $0x8] sm:$0xff]   ;;  %4 = vst.msk [vmem:[#allocation0] ss:$8 sm:$0xf] %vm3_vm0, %v27_v1   ;;  %s433_s0 = smov 64  }
   0x3   :  { %5 = vst.msk [vmem:[#allocation0] ss:$8 sm:$0xf0] %vm3_vm0, %v27_v1   ;;  %24 = vst.msk [vmem:[#allocation0 + $0xc0] ss:$8 sm:$0xf] %vm3_vm0, %v391_v2  }
   0x4   :  { %26 = vst.msk [vmem:[#allocation0 + $0xc0] ss:$8 sm:$0xf0] %vm3_vm0, %v391_v2   ;;  %17 = vst.msk [vmem:[#allocation0 + $0x80] ss:$8 sm:$0xf] %vm3_vm0, %v390_v0  }
   0x5   :  { %19 = vst.msk [vmem:[#allocation0 + $0x80] ss:$8 sm:$0xf0] %vm3_vm0, %v390_v0   ;;  %12 = vst.msk [vmem:[#allocation0 + $0x40] ss:$8 sm:$0xf0] %vm3_vm0, %v389_v3  }
   0x6   :  { %10 = vst.msk [vmem:[#allocation0 + $0x40] ss:$8 sm:$0xf] %vm3_vm0, %v389_v3   ;;  %55 = vrot.lane.b32.xlu1 %v391_v2, %s432_s12  ;;  %37 = vrot.lane.b32.xlu0 %v389_v3, %s432_s12 }
   0xa   :  { %72 = vrot.lane.b32.xlu1 %v389_v3, %s433_s0  ;;  %63 = vrot.lane.b32.xlu0 %v27_v1, %s433_s0 }
   0xe   :  { %90 = vrot.lane.b32.xlu1 %v391_v2, %s433_s0  ;;  %81 = vrot.lane.b32.xlu0 %v390_v0, %s433_s0 }
  0x12   :  { %107 = vrot.lane.b32.xlu1 %v389_v3, %s434_s15  ;;  %98 = vrot.lane.b32.xlu0 %v27_v1, %s434_s15 }
  0x16   :  { %125 = vrot.lane.b32.xlu1 %v391_v2, %s434_s15  ;;  %116 = vrot.lane.b32.xlu0 %v390_v0, %s434_s15 }
  0x74   :  { %v47_v4 = vpop.permute.xlu1 %46   ;;  %v29_v5 = vpop.permute.xlu0 %28  }
  0x75   :  { %50 = vst.msk [vmem:[#allocation0 + $0x81] ss:$8 sm:$0xf] %vm3_vm0, %v47_v4   ;;  %52 = vst.msk [vmem:[#allocation0 + $0x81] ss:$8 sm:$0xf0] %vm3_vm0, %v47_v4  }
  0x76   :  { %32 = vst.msk [vmem:[#allocation0 + $0x1] ss:$8 sm:$0xf] %vm3_vm0, %v29_v5   ;;  %34 = vst.msk [vmem:[#allocation0 + $0x1] ss:$8 sm:$0xf0] %vm3_vm0, %v29_v5  }
  0x78   :  { %v56_v6 = vpop.permute.xlu1 %55   ;;  %v38_v7 = vpop.permute.xlu0 %37  }
  0x79   :  { %59 = vst.msk [vmem:[#allocation0 + $0xc1] ss:$8 sm:$0xf] %vm3_vm0, %v56_v6   ;;  %61 = vst.msk [vmem:[#allocation0 + $0xc1] ss:$8 sm:$0xf0] %vm3_vm0, %v56_v6  }
  0x7a   :  { %41 = vst.msk [vmem:[#allocation0 + $0x41] ss:$8 sm:$0xf] %vm3_vm0, %v38_v7   ;;  %43 = vst.msk [vmem:[#allocation0 + $0x41] ss:$8 sm:$0xf0] %vm3_vm0, %v38_v7  }
  0x7c   :  { %v73_v8 = vpop.permute.xlu1 %72   ;;  %v64_v9 = vpop.permute.xlu0 %63  }
  0x7d   :  { %76 = vst.msk [vmem:[#allocation0 + $0x42] ss:$8 sm:$0xf] %vm3_vm0, %v73_v8   ;;  %78 = vst.msk [vmem:[#allocation0 + $0x42] ss:$8 sm:$0xf0] %vm3_vm0, %v73_v8  }
  0x7e   :  { %67 = vst.msk [vmem:[#allocation0 + $0x2] ss:$8 sm:$0xf] %vm3_vm0, %v64_v9   ;;  %69 = vst.msk [vmem:[#allocation0 + $0x2] ss:$8 sm:$0xf0] %vm3_vm0, %v64_v9  }
  0x80   :  { %v91_v10 = vpop.permute.xlu1 %90   ;;  %v82_v11 = vpop.permute.xlu0 %81  }
  0x81   :  { %94 = vst.msk [vmem:[#allocation0 + $0xc2] ss:$8 sm:$0xf] %vm3_vm0, %v91_v10   ;;  %96 = vst.msk [vmem:[#allocation0 + $0xc2] ss:$8 sm:$0xf0] %vm3_vm0, %v91_v10  }
  0x82   :  { %85 = vst.msk [vmem:[#allocation0 + $0x82] ss:$8 sm:$0xf] %vm3_vm0, %v82_v11   ;;  %87 = vst.msk [vmem:[#allocation0 + $0x82] ss:$8 sm:$0xf0] %vm3_vm0, %v82_v11  }
  0x84   :  { %v108_v12 = vpop.permute.xlu1 %107   ;;  %v99_v13 = vpop.permute.xlu0 %98  }
  0x85   :  { %111 = vst.msk [vmem:[#allocation0 + $0x43] ss:$8 sm:$0xf] %vm3_vm0, %v108_v12   ;;  %113 = vst.msk [vmem:[#allocation0 + $0x43] ss:$8 sm:$0xf0] %vm3_vm0, %v108_v12  }
  0x86   :  { %102 = vst.msk [vmem:[#allocation0 + $0x3] ss:$8 sm:$0xf] %vm3_vm0, %v99_v13   ;;  %104 = vst.msk [vmem:[#allocation0 + $0x3] ss:$8 sm:$0xf0] %vm3_vm0, %v99_v13  }
  0x88   :  { %v126_v14 = vpop.permute.xlu1 %125   ;;  %v117_v15 = vpop.permute.xlu0 %116  }
  0x89   :  { %129 = vst.msk [vmem:[#allocation0 + $0xc3] ss:$8 sm:$0xf] %vm3_vm0, %v126_v14   ;;  %131 = vst.msk [vmem:[#allocation0 + $0xc3] ss:$8 sm:$0xf0] %vm3_vm0, %v126_v14  }
  0x8a   :  { %120 = vst.msk [vmem:[#allocation0 + $0x83] ss:$8 sm:$0xf] %vm3_vm0, %v117_v15   ;;  %122 = vst.msk [vmem:[#allocation0 + $0x83] ss:$8 sm:$0xf0] %vm3_vm0, %v117_v15  }
  0x8c   :  { %v189_v16 = vld [vmem:[#allocation0 + $0x40] sm:$0xf]  ;;  %v196_v17 = vld [vmem:[#allocation0 + $0x48] sm:$0xf]  ;;  %v203_v18 = vld [vmem:[#allocation0 + $0x50] sm:$0xf] }
  0x8d   :  { %405 = vst [vmem:[%s586_s1 + $0x20] sm:$0xf] %v189_v16  ;;  %406 = vst [vmem:[%s586_s1 + $0x24] sm:$0xf] %v196_v17  ;;  %v210_v19 = vld [vmem:[#allocation0 + $0x58] sm:$0xf] }
  0x8e   :  { %407 = vst [vmem:[%s586_s1 + $0x28] sm:$0xf] %v203_v18  ;;  %v217_v20 = vld [vmem:[#allocation0 + $0x60] sm:$0xf]  ;;  %v224_v21 = vld [vmem:[#allocation0 + $0x68] sm:$0xf] }
  0x8f   :  { %408 = vst [vmem:[%s586_s1 + $0x2c] sm:$0xf] %v210_v19  ;;  %v231_v22 = vld [vmem:[#allocation0 + $0x70] sm:$0xf]  ;;  %v238_v23 = vld [vmem:[#allocation0 + $0x78] sm:$0xf] }
  0x90   :  { %v136_v24 = vld [vmem:[#allocation0] sm:$0xf]  ;;  %409 = vst [vmem:[%s586_s1 + $0x30] sm:$0xf] %v217_v20  ;;  %410 = vst [vmem:[%s586_s1 + $0x34] sm:$0xf] %v224_v21 }
  0x91   :  { %139 = vst [vmem:[%s586_s1] sm:$0xf] %v136_v24  ;;  %v141_v25 = vld [vmem:[#allocation0 + $0x8] sm:$0xf]  ;;  %v147_v26 = vld [vmem:[#allocation0 + $0x10] sm:$0xf] }
  0x92   :  { %v154_v27 = vld [vmem:[#allocation0 + $0x18] sm:$0xf]  ;;  %411 = vst [vmem:[%s586_s1 + $0x38] sm:$0xf] %v231_v22  ;;  %412 = vst [vmem:[%s586_s1 + $0x3c] sm:$0xf] %v238_v23 }
  0x93   :  { %398 = vst [vmem:[%s586_s1 + $0x4] sm:$0xf] %v141_v25  ;;  %399 = vst [vmem:[%s586_s1 + $0x8] sm:$0xf] %v147_v26  ;;  %v161_v28 = vld [vmem:[#allocation0 + $0x20] sm:$0xf] }
  0x94   :  { %400 = vst [vmem:[%s586_s1 + $0xc] sm:$0xf] %v154_v27  ;;  %v168_v29 = vld [vmem:[#allocation0 + $0x28] sm:$0xf]  ;;  %v175_v30 = vld [vmem:[#allocation0 + $0x30] sm:$0xf] }
  0x95   :  { %401 = vst [vmem:[%s586_s1 + $0x10] sm:$0xf] %v161_v28  ;;  %402 = vst [vmem:[%s586_s1 + $0x14] sm:$0xf] %v168_v29  ;;  %v182_v31 = vld [vmem:[#allocation0 + $0x38] sm:$0xf] }
  0x96   :  { %403 = vst [vmem:[%s586_s1 + $0x18] sm:$0xf] %v175_v30  ;;  %v301_v32 = vld [vmem:[#allocation0 + $0xc0] sm:$0xf]  ;;  %v308_v33 = vld [vmem:[#allocation0 + $0xc8] sm:$0xf] }
  0x97   :  { %404 = vst [vmem:[%s586_s1 + $0x1c] sm:$0xf] %v182_v31  ;;  %421 = vst [vmem:[%s586_s1 + $0x60] sm:$0xf] %v301_v32  ;;  %v315_v34 = vld [vmem:[#allocation0 + $0xd0] sm:$0xf] }
  0x98   :  { %422 = vst [vmem:[%s586_s1 + $0x64] sm:$0xf] %v308_v33  ;;  %v322_v35 = vld [vmem:[#allocation0 + $0xd8] sm:$0xf]  ;;  %v329_v36 = vld [vmem:[#allocation0 + $0xe0] sm:$0xf] }
  0x99   :  { %423 = vst [vmem:[%s586_s1 + $0x68] sm:$0xf] %v315_v34  ;;  %424 = vst [vmem:[%s586_s1 + $0x6c] sm:$0xf] %v322_v35  ;;  %v336_v37 = vld [vmem:[#allocation0 + $0xe8] sm:$0xf] }
  0x9a   :  { %425 = vst [vmem:[%s586_s1 + $0x70] sm:$0xf] %v329_v36  ;;  %v343_v38 = vld [vmem:[#allocation0 + $0xf0] sm:$0xf]  ;;  %v350_v39 = vld [vmem:[#allocation0 + $0xf8] sm:$0xf] }
  0x9b   :  { %426 = vst [vmem:[%s586_s1 + $0x74] sm:$0xf] %v336_v37  ;;  %427 = vst [vmem:[%s586_s1 + $0x78] sm:$0xf] %v343_v38  ;;  %v245_v40 = vld [vmem:[#allocation0 + $0x80] sm:$0xf] }
  0x9c   :  { %428 = vst [vmem:[%s586_s1 + $0x7c] sm:$0xf] %v350_v39  ;;  %v252_v41 = vld [vmem:[#allocation0 + $0x88] sm:$0xf]  ;;  %v259_v42 = vld [vmem:[#allocation0 + $0x90] sm:$0xf] }
  0x9d   :  { %413 = vst [vmem:[%s586_s1 + $0x40] sm:$0xf] %v245_v40  ;;  %414 = vst [vmem:[%s586_s1 + $0x44] sm:$0xf] %v252_v41  ;;  %v266_v43 = vld [vmem:[#allocation0 + $0x98] sm:$0xf] }
  0x9e   :  { %415 = vst [vmem:[%s586_s1 + $0x48] sm:$0xf] %v259_v42  ;;  %v273_v44 = vld [vmem:[#allocation0 + $0xa0] sm:$0xf]  ;;  %v280_v45 = vld [vmem:[#allocation0 + $0xa8] sm:$0xf] }
  0x9f   :  { %416 = vst [vmem:[%s586_s1 + $0x4c] sm:$0xf] %v266_v43  ;;  %417 = vst [vmem:[%s586_s1 + $0x50] sm:$0xf] %v273_v44  ;;  %v287_v46 = vld [vmem:[#allocation0 + $0xb0] sm:$0xf] }
  0xa0   :  { %418 = vst [vmem:[%s586_s1 + $0x54] sm:$0xf] %v280_v45  ;;  %v294_v47 = vld [vmem:[#allocation0 + $0xb8] sm:$0xf]  ;;  %419 = vst [vmem:[%s586_s1 + $0x58] sm:$0xf] %v287_v46 }
  0xa1   :  { %420 = vst [vmem:[%s586_s1 + $0x5c] sm:$0xf] %v294_v47 }

// kernel: goalflow_navi_forward.2
= control target key start
LH: loop header
LB: loop body
LE: loop exit
PB: predicated region body
PF: predicated region fallthrough
CT: control target
= control target key end

     0   :  { %v5566_v0 = vmov 0.0   ;;  %vm5567_vm0 = vmmov 0   ;;  %vm69_vm1 = vcmask 523264   ;;  %vm280_vm2 = vcmask 261120   ;;  %s6642_s1 = inlined_call_operand.vmem [shape: bf16[24,64,32], index: 1, kind: input, shape index: {}]   ;;  %s6643_s0 = inlined_call_operand.vmem [shape: f32[16,64], index: 0, kind: input, shape index: {}]   ;;  %s6644_s2 = inlined_call_operand.vmem [shape: f32[24,1,32], index: 2, kind: input, shape index: {}]   ;;  %s6645_s3 = inlined_call_operand.vmem [shape: bf16[8,32,64], index: 3, kind: input, shape index: {}]   ;;  %s6646_s4 = inlined_call_operand.vmem [shape: f32[2,10,128], index: 4, kind: input, shape index: {}]   ;;  %s6647_s5 = inlined_call_operand.vmem [shape: bf16[2,64,128], index: 5, kind: input, shape index: {}]   ;;  %s6648_s6 = inlined_call_operand.vmem [shape: bf16[2,128,64], index: 6, kind: input, shape index: {}]   ;;  %s6649_s7 = inlined_call_operand.vmem [shape: f32[16,64], index: 7, kind: output, shape index: {}]  }
   0x1   :  { %4840 = vmatprep.subr.bf16.mxu1 %v5566_v0  ;;  %v5342_v1 = vld [vmem:[%s6642_s1 + $0x58] sm:$0xff]   ;;  %4828 = vmatprep.subr.bf16.mxu0 %v5566_v0  ;;  %v5344_v3 = vld [vmem:[%s6642_s1 + $0x50] sm:$0xff]   ;;  %v5346_v5 = vld [vmem:[%s6642_s1 + $0x48] sm:$0xff]   ;;  %vm328_vm3 = vcmask 130048  }
   0x2   :  { %v5343_v2 = vld [vmem:[%s6642_s1 + $0x18] sm:$0xff]   ;;  %4848 = vmatprep.mubr.msk.bf16.mxu1 %vm5567_vm0, %v5566_v0  ;;  %4836 = vmatprep.mubr.msk.bf16.mxu0 %vm5567_vm0, %v5566_v0  ;;  %v5345_v4 = vld [vmem:[%s6642_s1 + $0x10] sm:$0xff]   ;;  %v5347_v6 = vld [vmem:[%s6642_s1 + $0x8] sm:$0xff]  }
   0x3   :  { %4841 = vmatpush3.bf16.msra.mxu1 %v5342_v1  ;;  %4829 = vmatpush3.bf16.msra.mxu0 %v5343_v2  ;;  %v5348_v7 = vld [vmem:[%s6642_s1 + $0x40] sm:$0xff]   ;;  %v5647_v9 = vld [vmem:[%s6643_s0 + $0x8] sm:$0xff]  ;;  %v5350_v12 = vld [vmem:[%s6642_s1 + $0x98] sm:$0xff]  }
   0x4   :  { %4842 = vmatprep.subr.bf16.mxu1 %v5566_v0  ;;  %4830 = vmatprep.subr.bf16.mxu0 %v5566_v0  ;;  %v5642_v8 = vld [vmem:[%s6643_s0] sm:$0xff]  ;;  %v5351_v13 = vld [vmem:[%s6642_s1 + $0x90] sm:$0xff]   ;;  %v5352_v14 = vld [vmem:[%s6642_s1 + $0x88] sm:$0xff]  }
   0x5   :  { %v5349_v10 = vld [vmem:[%s6642_s1] sm:$0xff]   ;;  %v5656_v11 = vpack.c.bf16 %v5647_v9, %v5642_v8  ;;  %v5355_v57 = vld [vmem:[%s6642_s1 + $0x38] sm:$0xff]   ;;  %v5357_v58 = vld [vmem:[%s6642_s1 + $0x30] sm:$0xff]  }
   0x6   :  { %v5353_v15 = vld [vmem:[%s6642_s1 + $0x80] sm:$0xff]   ;;  %v5359_v59 = vld [vmem:[%s6642_s1 + $0x28] sm:$0xff]  }
   0x7   :  { %4843 = vmatpush3.bf16.msra.mxu1 %v5344_v3  ;;  %4831 = vmatpush3.bf16.msra.mxu0 %v5345_v4  ;;  %v4140_v18 = vld [vmem:[%s6644_s2 + $0x2] ss:$0 sm:$0xff]  ;;  %v4125_v28 = vld [vmem:[%s6644_s2] ss:$0 sm:$0xff]  ;;  %v4155_v33 = vld [vmem:[%s6644_s2 + $0x4] ss:$0 sm:$0xff] }
   0x8   :  { %4844 = vmatprep.subr.bf16.mxu1 %v5566_v0  ;;  %4832 = vmatprep.subr.bf16.mxu0 %v5566_v0  ;;  %v5361_v60 = vld [vmem:[%s6642_s1 + $0x20] sm:$0xff]   ;;  %v5354_v4 = vld [vmem:[%s6642_s1 + $0x78] sm:$0xff]  }
   0xb   :  { %4845 = vmatpush3.bf16.msra.mxu1 %v5346_v5  ;;  %4833 = vmatpush3.bf16.msra.mxu0 %v5347_v6  ;;  %v5356_v6 = vld [vmem:[%s6642_s1 + $0x70] sm:$0xff]  }
   0xc   :  { %4846 = vmatprep.subr.bf16.mxu1 %v5566_v0  ;;  %4834 = vmatprep.subr.bf16.mxu0 %v5566_v0 }
   0xf   :  { %4847 = vmatpush3.bf16.msra.mxu1 %v5348_v7  ;;  %4835 = vmatpush3.bf16.msra.mxu0 %v5349_v10  ;;  %v5358_v7 = vld [vmem:[%s6642_s1 + $0x68] sm:$0xff]   ;;  %v5360_v10 = vld [vmem:[%s6642_s1 + $0x60] sm:$0xff]  }
  0x10   :  { %4870 = vmatprep.subr.bf16.mxu1 %v5566_v0  ;;  %4852 = vmatprep.subr.bf16.mxu0 %v5566_v0 }
  0x12   :  { %4849 = vmatmul.mubr.msk.bf16.vlgmr.msra.gmra.mxu1 %vm69_vm1, %v5656_v11  ;;  %4837 = vmatmul.mubr.msk.bf16.vlgmr.msra.gmra.mxu0 %vm69_vm1, %v5656_v11 }
  0x13   :  { %4872 = vmatprep.mubr.msk.bf16.mxu1 %vm5567_vm0, %v5566_v0  ;;  %4853 = vmatpush3.bf16.msra.mxu0 %v5350_v12  ;;  %v4172_v12 = vld [vmem:[%s6644_s2 + $0x1] ss:$0 sm:$0xff] }
  0x14   :  { %4860 = vmatprep.mubr.msk.bf16.mxu0 %vm5567_vm0, %v5566_v0  ;;  %4854 = vmatprep.subr.bf16.mxu0 %v5566_v0 }
  0x17   :  { %4855 = vmatpush3.bf16.msra.mxu0 %v5351_v13 }
  0x18   :  { %4856 = vmatprep.subr.bf16.mxu0 %v5566_v0 }
  0x1b   :  { %4857 = vmatpush3.bf16.msra.mxu0 %v5352_v14 }
  0x1c   :  { %4858 = vmatprep.subr.bf16.mxu0 %v5566_v0 }
  0x1f   :  { %4859 = vmatpush3.bf16.msra.mxu0 %v5353_v15 }
  0x20   :  { %4864 = vmatprep.subr.bf16.mxu0 %v5566_v0 }
  0x22   :  { %4861 = vmatmul.mubr.msk.bf16.vlgmr.msra.gmra.mxu0 %vm69_vm1, %v5656_v11 }
  0x23   :  { %4866 = vmatprep.mubr.msk.bf16.mxu0 %vm5567_vm0, %v5566_v0 }
  0xd2   :  { %v189_v16 = vpop.f32.mrf.mxu1  ;;  %v107_v17 = vpop.f32.mrf.mxu0 }
  0xd3   :  { %v190_v22 = vadd.f32 %v4140_v18, %v189_v16  ;;  %v108_v30 = vadd.f32 %v4125_v28, %v107_v17 }
  0xd4   :  { %v4850_v19 = vpop.f32.mrf.mxu1  ;;  %v4838_v20 = vpop.f32.mrf.mxu0 }
  0xd6   :  { %v192_v21 = vpop.f32.mrf.mxu1  ;;  %v110_v24 = vpop.f32.mrf.mxu0 }
  0xd7   :  { %v193_v23 = vadd.f32 %v4140_v18, %v192_v21  ;;  %v111_v31 = vadd.f32 %v4125_v28, %v110_v24 }
  0xd8   :  { %v4851_v25 = vpop.f32.mrf.mxu1  ;;  %v4839_v27 = vpop.f32.mrf.mxu0 }
  0xd9   :  { %v279_v26 = vpack.c.bf16 %v193_v23, %v190_v22  ;;  %v278_v32 = vpack.c.bf16 %v111_v31, %v108_v30 }
  0xdb   :  { %v285_v29 = vsel %vm280_vm2, %v279_v26, 0  ;;  %v4187_v26 = vld [vmem:[%s6644_s2 + $0x3] ss:$0 sm:$0xff] }
  0xdc   :  { %4865 = vmatpush3.bf16.xpose.msra.mxu0 %v285_v29 }
  0xdd   :  { %4876 = vmatprep.subr.bf16.mxu0 %v5566_v0 }
  0xe2   :  { %v271_v34 = vpop.f32.mrf.mxu0 }
  0xe3   :  { %4867 = vmatmul.mubr.msk.bf16.vlgmr.msra.gmra.mxu0 %vm280_vm2, %v278_v32  ;;  %v272_v36 = vadd.f32 %v4155_v33, %v271_v34  ;;  %v5362_v34 = vld [vmem:[%s6642_s1 + $0xb8] sm:$0xff]  }
  0xe4   :  { %4884 = vmatprep.mubr.msk.bf16.mxu0 %vm5567_vm0, %v5566_v0  ;;  %v4862_v35 = vpop.f32.mrf.mxu0  ;;  %4877 = vmatpush3.bf16.msra.mxu0 %v5355_v57 }
  0xe5   :  { %4878 = vmatprep.subr.bf16.mxu0 %v5566_v0  ;;  %v5363_v35 = vld [vmem:[%s6642_s1 + $0xb0] sm:$0xff]  }
  0xe6   :  { %v274_v37 = vpop.f32.mrf.mxu0 }
  0xe7   :  { %v275_v38 = vadd.f32 %v4155_v33, %v274_v37  ;;  %v5365_v37 = vld [vmem:[%s6642_s1 + $0xa0] sm:$0xff]  }
  0xe8   :  { %v4863_v39 = vpop.f32.mrf.mxu0  ;;  %4879 = vmatpush3.bf16.msra.mxu0 %v5357_v58 }
  0xe9   :  { %v352_v40 = vpack.c.bf16 %v275_v38, %v272_v36  ;;  %4880 = vmatprep.subr.bf16.mxu0 %v5566_v0  ;;  %v5364_v36 = vld [vmem:[%s6642_s1 + $0xa8] sm:$0xff]  }
  0xeb   :  { %4871 = vmatpush3.bf16.msra.mxu1 %v352_v40 }
  0xec   :  { %4888 = vmatprep.subr.bf16.mxu1 %v5566_v0  ;;  %4881 = vmatpush3.bf16.msra.mxu0 %v5359_v59 }
  0xed   :  { %4882 = vmatprep.subr.bf16.mxu0 %v5566_v0 }
  0xf0   :  { %4883 = vmatpush3.bf16.msra.mxu0 %v5361_v60 }
  0xf1   :  { %4900 = vmatprep.subr.bf16.mxu0 %v5566_v0 }
  0xf3   :  { %4885 = vmatmul.mubr.msk.bf16.vlgmr.msra.gmra.mxu0 %vm69_vm1, %v5656_v11 }
  0xf4   :  { %4908 = vmatprep.mubr.msk.bf16.mxu0 %vm5567_vm0, %v5566_v0  ;;  %4901 = vmatpush3.bf16.msra.mxu0 %v5362_v34 }
  0xf5   :  { %4902 = vmatprep.subr.bf16.mxu0 %v5566_v0 }
  0xf8   :  { %4903 = vmatpush3.bf16.msra.mxu0 %v5363_v35 }
  0xf9   :  { %4904 = vmatprep.subr.bf16.mxu0 %v5566_v0 }
  0xfc   :  { %4905 = vmatpush3.bf16.msra.mxu0 %v5364_v36 }
  0xfd   :  { %4906 = vmatprep.subr.bf16.mxu0 %v5566_v0 }
 0x100   :  { %4907 = vmatpush3.bf16.msra.mxu0 %v5365_v37 }
 0x101   :  { %4924 = vmatprep.subr.bf16.mxu0 %v5566_v0 }
 0x103   :  { %4909 = vmatmul.mubr.msk.bf16.vlgmr.msra.gmra.mxu0 %vm69_vm1, %v5656_v11 }
 0x104   :  { %4928 = vmatprep.mubr.msk.bf16.mxu0 %vm5567_vm0, %v5566_v0 }
 0x1a3   :  { %v321_v41 = vpop.f32.mrf.mxu0 }
 0x1a4   :  { %v329_v42 = vsel %vm328_vm3, %v321_v41, -inf }
 0x1a5   :  { %330 = vmax.xlane.f32.xlu0 %v329_v42  ;;  %v4868_v43 = vpop.f32.mrf.mxu0 }
 0x1a7   :  { %v324_v44 = vpop.f32.mrf.mxu0 }
 0x1a8   :  { %v332_v45 = vsel %vm328_vm3, %v324_v44, -inf }
 0x1a9   :  { %333 = vmax.xlane.f32.xlu0 %v332_v45  ;;  %v4869_v46 = vpop.f32.mrf.mxu0 }
 0x1b3   :  { %v477_v13 = vpop.f32.mrf.mxu0 }
 0x1b4   :  { %v478_v15 = vadd.f32 %v4172_v12, %v477_v13 }
 0x1b5   :  { %v4886_v14 = vpop.f32.mrf.mxu0 }
 0x1b7   :  { %v480_v16 = vpop.f32.mrf.mxu0 }
 0x1b8   :  { %v481_v17 = vadd.f32 %v4172_v12, %v480_v16  ;;  %v5369_v12 = vld [vmem:[%s6645_s3 + $0x10] sm:$0xff]  }
 0x1b9   :  { %v4887_v18 = vpop.f32.mrf.mxu0 }
 0x1ba   :  { %v648_v19 = vpack.c.bf16 %v481_v17, %v478_v15 }
 0x22e   :  { %v331_v47 = vpop.xlane.xlu0 %330 }
 0x22f   :  { %v335_v48 = vsub.f32 %v321_v41, %v331_v47 }
 0x231   :  { %v337_v49 = vmul.f32 1.442695, %v335_v48 }
 0x232   :  { %v334_v50 = vpop.xlane.xlu0 %333 }
 0x233   :  { %5478 = vpow2.f32 %v337_v49  ;;  %v336_v51 = vsub.f32 %v324_v44, %v334_v50 }
 0x235   :  { %v339_v52 = vmul.f32 1.442695, %v336_v51 }
 0x237   :  { %5480 = vpow2.f32 %v339_v52 }
 0x240   :  { %v5479_v53 = vpop.eup %5478 }
 0x241   :  { %v341_v54 = vsel %vm328_vm3, %v5479_v53, 0.0 }
 0x242   :  { %342 = vadd.xlane.f32.xlu1 %v341_v54  ;;  %v4202_v54 = vld [vmem:[%s6644_s2 + $0x5] ss:$0 sm:$0xff] }
 0x244   :  { %v5481_v55 = vpop.eup %5480 }
 0x245   :  { %v344_v56 = vsel %vm328_vm3, %v5481_v55, 0.0 }
 0x246   :  { %345 = vadd.xlane.f32.xlu1 %v344_v56 }
 0x2cb   :  { %v343_v61 = vpop.xlane.xlu1 %342 }
 0x2cc   :  { %5482 = vrcp.f32 %v343_v61 }
 0x2cf   :  { %v346_v62 = vpop.xlane.xlu1 %345 }
 0x2d0   :  { %5484 = vrcp.f32 %v346_v62 }
 0x2d9   :  { %v5483_v63 = vpop.eup %5482 }
 0x2da   :  { %v349_v2 = vmul.f32 %v5483_v63, %v5479_v53 }
 0x2dd   :  { %v5485_v1 = vpop.eup %5484 }
 0x2de   :  { %v350_v3 = vmul.f32 %v5485_v1, %v5481_v55  ;;  %v641_v55 = vpop.f32.mrf.mxu0 }
 0x2df   :  { %v642_v57 = vadd.f32 %v4202_v54, %v641_v55 }
 0x2e0   :  { %v351_v5 = vpack.c.bf16 %v350_v3, %v349_v2  ;;  %v4910_v56 = vpop.f32.mrf.mxu0 }
 0x2e2   :  { %4873 = vmatmul.mubr.msk.bf16.vlgmr.msra.gmra.mxu1 %vm328_vm3, %v351_v5  ;;  %v644_v58 = vpop.f32.mrf.mxu0  ;;  %v5366_v5 = vld [vmem:[%s6645_s3 + $0x8] sm:$0xff]  }
 0x2e3   :  { %4889 = vmatpush3.bf16.msra.mxu1 %v5354_v4  ;;  %4896 = vmatprep.mubr.msk.bf16.mxu1 %vm5567_vm0, %v5566_v0  ;;  %v645_v59 = vadd.f32 %v4202_v54, %v644_v58 }
 0x2e4   :  { %4890 = vmatprep.subr.bf16.mxu1 %v5566_v0  ;;  %v4911_v60 = vpop.f32.mrf.mxu0 }
 0x2e5   :  { %v720_v61 = vpack.c.bf16 %v645_v59, %v642_v57  ;;  %v4221_v59 = vld [vmem:[%s6646_s4 + $0x4] ss:$0 sm:$0xff] }
 0x2e7   :  { %4891 = vmatpush3.bf16.msra.mxu1 %v5356_v6 }
 0x2e8   :  { %4892 = vmatprep.subr.bf16.mxu1 %v5566_v0 }
 0x2eb   :  { %4893 = vmatpush3.bf16.msra.mxu1 %v5358_v7  ;;  %v5367_v7 = vld [vmem:[%s6645_s3] sm:$0xff]  }
 0x2ec   :  { %4894 = vmatprep.subr.bf16.mxu1 %v5566_v0 }
 0x2ef   :  { %4895 = vmatpush3.bf16.msra.mxu1 %v5360_v10  ;;  %v5368_v10 = vld [vmem:[%s6645_s3 + $0x18] sm:$0xff]  }
 0x2f0   :  { %4912 = vmatprep.subr.bf16.mxu1 %v5566_v0  ;;  %4925 = vmatpush3.bf16.msra.mxu0 %v5368_v10  ;;  %v5381_v10 = vld [vmem:[%s6642_s1 + $0x140] sm:$0xff]  }
 0x2f1   :  { %4926 = vmatprep.subr.bf16.mxu0 %v5566_v0 }
 0x2f2   :  { %4897 = vmatmul.mubr.msk.bf16.vlgmr.msra.gmra.mxu1 %vm69_vm1, %v5656_v11 }
 0x2f3   :  { %4914 = vmatprep.mubr.msk.bf16.mxu1 %vm5567_vm0, %v5566_v0 }
 0x2f4   :  { %4927 = vmatpush3.bf16.msra.mxu0 %v5369_v12  ;;  %v5382_v12 = vld [vmem:[%s6642_s1 + $0xf8] sm:$0xff]  }
 0x2f5   :  { %4940 = vmatprep.subr.bf16.mxu0 %v5566_v0 }
 0x3a2   :  { %v5753_v20 = vpop.f32.mrf.mxu1 }
 0x3a4   :  { %v4874_v21 = vpop.f32.mrf.mxu1 }
 0x3a6   :  { %v5755_v22 = vpop.f32.mrf.mxu1 }
 0x3a7   :  { %v397_v23 = vpack.c.bf16 %v5755_v22, %v5753_v20 }
 0x3a8   :  { %v4875_v24 = vpop.f32.mrf.mxu1 }
 0x3b2   :  { %v559_v25 = vpop.f32.mrf.mxu1 }
 0x3b3   :  { %v560_v29 = vadd.f32 %v4187_v26, %v559_v25 }
 0x3b4   :  { %v4898_v27 = vpop.f32.mrf.mxu1 }
 0x3b6   :  { %v562_v28 = vpop.f32.mrf.mxu1 }
 0x3b7   :  { %v563_v30 = vadd.f32 %v4187_v26, %v562_v28 }
 0x3b8   :  { %v4899_v31 = vpop.f32.mrf.mxu1 }
 0x3b9   :  { %v649_v32 = vpack.c.bf16 %v563_v30, %v560_v29 }
 0x3bb   :  { %v654_v33 = vsel %vm280_vm2, %v649_v32, 0 }
 0x3bc   :  { %4913 = vmatpush3.bf16.xpose.msra.mxu1 %v654_v33 }
 0x3bd   :  { %4918 = vmatprep.subr.bf16.mxu1 %v5566_v0 }
 0x3c3   :  { %4915 = vmatmul.mubr.msk.bf16.vlgmr.msra.gmra.mxu1 %vm280_vm2, %v648_v19 }
 0x3c4   :  { %4920 = vmatprep.mubr.msk.bf16.mxu1 %vm5567_vm0, %v5566_v0  ;;  %4919 = vmatpush3.bf16.msra.mxu1 %v720_v61 }
 0x3c5   :  { %4932 = vmatprep.subr.bf16.mxu1 %v5566_v0 }
 0x483   :  { %v690_v38 = vpop.f32.mrf.mxu1 }
 0x484   :  { %v697_v39 = vsel %vm328_vm3, %v690_v38, -inf }
 0x485   :  { %698 = vmax.xlane.f32.xlu0 %v697_v39  ;;  %v4916_v40 = vpop.f32.mrf.mxu1 }
 0x487   :  { %v693_v41 = vpop.f32.mrf.mxu1 }
 0x488   :  { %v700_v42 = vsel %vm328_vm3, %v693_v41, -inf }
 0x489   :  { %701 = vmax.xlane.f32.xlu1 %v700_v42  ;;  %v4917_v43 = vpop.f32.mrf.mxu1 }
 0x50e   :  { %v699_v44 = vpop.xlane.xlu0 %698 }
 0x50f   :  { %v703_v45 = vsub.f32 %v690_v38, %v699_v44  ;;  %v5371_v44 = vld [vmem:[%s6642_s1 + $0x110] sm:$0xff]  }
 0x511   :  { %v705_v46 = vmul.f32 1.442695, %v703_v45  ;;  %v5372_v45 = vld [vmem:[%s6642_s1 + $0x108] sm:$0xff]  }
 0x512   :  { %v702_v47 = vpop.xlane.xlu1 %701 }
 0x513   :  { %5486 = vpow2.f32 %v705_v46  ;;  %v704_v48 = vsub.f32 %v693_v41, %v702_v47  ;;  %v5373_v46 = vld [vmem:[%s6642_s1 + $0x100] sm:$0xff]   ;;  %v5374_v47 = vld [vmem:[%s6642_s1 + $0xd8] sm:$0xff]  }
 0x515   :  { %v707_v49 = vmul.f32 1.442695, %v704_v48  ;;  %v5375_v48 = vld [vmem:[%s6642_s1 + $0xd0] sm:$0xff]  }
 0x517   :  { %5488 = vpow2.f32 %v707_v49  ;;  %v5376_v49 = vld [vmem:[%s6642_s1 + $0xc8] sm:$0xff]  }
 0x520   :  { %v5487_v50 = vpop.eup %5486 }
 0x521   :  { %v709_v51 = vsel %vm328_vm3, %v5487_v50, 0.0 }
 0x522   :  { %710 = vadd.xlane.f32.xlu0 %v709_v51 }
 0x524   :  { %v5489_v52 = vpop.eup %5488 }
 0x525   :  { %v712_v53 = vsel %vm328_vm3, %v5489_v52, 0.0 }
 0x526   :  { %713 = vadd.xlane.f32.xlu1 %v712_v53 }
 0x5ab   :  { %v711_v62 = vpop.xlane.xlu0 %710 }
 0x5ac   :  { %5490 = vrcp.f32 %v711_v62 }
 0x5af   :  { %v714_v63 = vpop.xlane.xlu1 %713 }
 0x5b0   :  { %5492 = vrcp.f32 %v714_v63  ;;  %v4222_v63 = vld [vmem:[%s6646_s4 + $0x5] ss:$0 sm:$0xff] }
 0x5b9   :  { %v5491_v1 = vpop.eup %5490 }
 0x5ba   :  { %v717_v3 = vmul.f32 %v5491_v1, %v5487_v50  ;;  %v5377_v50 = vld [vmem:[%s6642_s1 + $0xc0] sm:$0xff]  }
 0x5bd   :  { %v5493_v2 = vpop.eup %5492 }
 0x5be   :  { %v718_v4 = vmul.f32 %v5493_v2, %v5489_v52 }
 0x5c0   :  { %v719_v6 = vpack.c.bf16 %v718_v4, %v717_v3  ;;  %v5378_v4 = vld [vmem:[%s6642_s1 + $0x158] sm:$0xff]  }
 0x5c2   :  { %4921 = vmatmul.mubr.msk.bf16.vlgmr.msra.gmra.mxu1 %vm328_vm3, %v719_v6  ;;  %v5379_v6 = vld [vmem:[%s6642_s1 + $0x150] sm:$0xff]  }
 0x5c3   :  { %4933 = vmatpush3.bf16.msra.mxu1 %v5366_v5  ;;  %4936 = vmatprep.mubr.msk.bf16.mxu1 %vm5567_vm0, %v5566_v0 }
 0x5c4   :  { %4934 = vmatprep.subr.bf16.mxu1 %v5566_v0 }
 0x5c7   :  { %4935 = vmatpush3.bf16.msra.mxu1 %v5367_v7  ;;  %v5380_v7 = vld [vmem:[%s6642_s1 + $0x148] sm:$0xff]  }
 0x5c8   :  { %4952 = vmatprep.subr.bf16.mxu1 %v5566_v0 }
 0x5ca   :  { %4937 = vmatmul.mubr.msk.bf16.vlgmr.msra.gmra.mxu1 %vm280_vm2, %v397_v23  ;;  %v4220_v23 = vld [vmem:[%s6646_s4 + $0x2] ss:$0 sm:$0xff] }
 0x5cb   :  { %4960 = vmatprep.mubr.msk.bf16.mxu1 %vm5567_vm0, %v5566_v0 }
 0x682   :  { %v758_v13 = vpop.f32.mrf.mxu1 }
 0x684   :  { %v4922_v14 = vpop.f32.mrf.mxu1 }
 0x685   :  { %v5384_v14 = vld [vmem:[%s6642_s1 + $0xe8] sm:$0xff]  }
 0x686   :  { %v761_v15 = vpop.f32.mrf.mxu1 }
 0x687   :  { %v765_v16 = vpack.c.bf16 %v761_v15, %v758_v13  ;;  %v5383_v13 = vld [vmem:[%s6642_s1 + $0xf0] sm:$0xff]   ;;  %v5385_v15 = vld [vmem:[%s6642_s1 + $0xe0] sm:$0xff]  }
 0x688   :  { %v4923_v17 = vpop.f32.mrf.mxu1 }
 0x689   :  { %4929 = vmatmul.mubr.msk.bf16.vlgmr.msra.gmra.mxu0 %vm280_vm2, %v765_v16  ;;  %v4247_v16 = vld [vmem:[%s6644_s2 + $0x8] ss:$0 sm:$0xff] }
 0x68a   :  { %v876_v18 = vpop.f32.mrf.mxu1  ;;  %4948 = vmatprep.mubr.msk.bf16.mxu0 %vm5567_vm0, %v5566_v0  ;;  %4941 = vmatpush3.bf16.msra.mxu0 %v5374_v47 }
 0x68b   :  { %4942 = vmatprep.subr.bf16.mxu0 %v5566_v0 }
 0x68c   :  { %v4938_v19 = vpop.f32.mrf.mxu1 }
 0x68e   :  { %v879_v20 = vpop.f32.mrf.mxu1  ;;  %4943 = vmatpush3.bf16.msra.mxu0 %v5375_v48 }
 0x68f   :  { %4944 = vmatprep.subr.bf16.mxu0 %v5566_v0 }
 0x690   :  { %v4939_v21 = vpop.f32.mrf.mxu1 }
 0x692   :  { %4945 = vmatpush3.bf16.msra.mxu0 %v5376_v49 }
 0x693   :  { %4946 = vmatprep.subr.bf16.mxu0 %v5566_v0 }
 0x696   :  { %4947 = vmatpush3.bf16.msra.mxu0 %v5377_v50 }
 0x697   :  { %4964 = vmatprep.subr.bf16.mxu0 %v5566_v0 }
 0x749   :  { %v820_v22 = vpop.f32.mrf.mxu0 }
 0x74a   :  { %v877_v24 = vadd.f32 %v876_v18, %v820_v22 }
 0x74b   :  { %v4930_v25 = vpop.f32.mrf.mxu0 }
 0x74c   :  { %v888_v26 = vadd.f32 %v4220_v23, %v877_v24 }
 0x74d   :  { %v823_v27 = vpop.f32.mrf.mxu0 }
 0x74e   :  { %v880_v28 = vadd.f32 %v879_v20, %v823_v27  ;;  %v890_v29 = vadd.f32 %v888_v26, %v5642_v8  ;;  %v4232_v26 = vld [vmem:[%s6644_s2 + $0x6] ss:$0 sm:$0xff] }
 0x74f   :  { %v4931_v30 = vpop.f32.mrf.mxu0 }
 0x750   :  { %v889_v31 = vadd.f32 %v4220_v23, %v880_v28  ;;  %v894_v32 = vsel %vm69_vm1, %v890_v29, 0.0 }
 0x751   :  { %895 = vadd.xlane.f32.xlu0 %v894_v32 }
 0x752   :  { %v891_v33 = vadd.f32 %v889_v31, %v5647_v9  ;;  %v5370_v9 = vld [vmem:[%s6642_s1 + $0x118] sm:$0xff]  }
 0x753   :  { %4953 = vmatpush3.bf16.msra.mxu1 %v5370_v9 }
 0x754   :  { %v897_v34 = vsel %vm69_vm1, %v891_v33, 0.0  ;;  %4954 = vmatprep.subr.bf16.mxu1 %v5566_v0 }
 0x755   :  { %898 = vadd.xlane.f32.xlu1 %v897_v34 }
 0x757   :  { %4955 = vmatpush3.bf16.msra.mxu1 %v5371_v44 }
 0x758   :  { %4956 = vmatprep.subr.bf16.mxu1 %v5566_v0 }
 0x75b   :  { %4957 = vmatpush3.bf16.msra.mxu1 %v5372_v45 }
 0x75c   :  { %4958 = vmatprep.subr.bf16.mxu1 %v5566_v0 }
 0x75f   :  { %4959 = vmatpush3.bf16.msra.mxu1 %v5373_v46 }
 0x760   :  { %4976 = vmatprep.subr.bf16.mxu1 %v5566_v0 }
 0x762   :  { %4961 = vmatmul.mubr.msk.bf16.vlgmr.msra.gmra.mxu1 %vm69_vm1, %v5656_v11 }
 0x763   :  { %4978 = vmatprep.mubr.msk.bf16.mxu1 %vm5567_vm0, %v5566_v0 }
 0x7da   :  { %v896_v35 = vpop.xlane.xlu0 %895 }
 0x7db   :  { %v901_v36 = vmul.f32 0.015625, %v896_v35 }
 0x7dd   :  { %v903_v37 = vsub.f32 %v890_v29, %v901_v36 }
 0x7de   :  { %v899_v38 = vpop.xlane.xlu1 %898 }
 0x7df   :  { %v902_v39 = vmul.f32 0.015625, %v899_v38  ;;  %v905_v40 = vmul.f32 %v903_v37, %v903_v37 }
 0x7e1   :  { %v904_v41 = vsub.f32 %v891_v33, %v902_v39  ;;  %v907_v42 = vsel %vm69_vm1, %v905_v40, 0.0  ;;  %v4262_v33 = vld [vmem:[%s6644_s2 + $0xa] ss:$0 sm:$0xff] }
 0x7e2   :  { %908 = vadd.xlane.f32.xlu0 %v907_v42  ;;  %v4283_v42 = vld [vmem:[%s6644_s2 + $0x7] ss:$0 sm:$0xff] }
 0x7e3   :  { %v906_v8 = vmul.f32 %v904_v41, %v904_v41 }
 0x7e5   :  { %v910_v43 = vsel %vm69_vm1, %v906_v8, 0.0 }
 0x7e6   :  { %911 = vadd.xlane.f32.xlu1 %v910_v43 }
 0x822   :  { %v1094_v17 = vpop.f32.mrf.mxu1 }
 0x823   :  { %v1095_v19 = vadd.f32 %v4247_v16, %v1094_v17 }
 0x824   :  { %v4962_v18 = vpop.f32.mrf.mxu1 }
 0x826   :  { %v1097_v20 = vpop.f32.mrf.mxu1 }
 0x827   :  { %v1098_v21 = vadd.f32 %v4247_v16, %v1097_v20 }
 0x828   :  { %v4963_v22 = vpop.f32.mrf.mxu1 }
 0x829   :  { %v1184_v23 = vpack.c.bf16 %v1098_v21, %v1095_v19  ;;  %v4298_v22 = vld [vmem:[%s6644_s2 + $0x9] ss:$0 sm:$0xff] }
 0x82b   :  { %v1189_v24 = vsel %vm280_vm2, %v1184_v23, 0 }
 0x82c   :  { %4977 = vmatpush3.bf16.xpose.msra.mxu1 %v1189_v24 }
 0x82d   :  { %4982 = vmatprep.subr.bf16.mxu1 %v5566_v0 }
 0x86b   :  { %v909_v51 = vpop.xlane.xlu0 %908 }
 0x86c   :  { %v913_v52 = vmul.f32 0.015625, %v909_v51 }
 0x86e   :  { %v915_v53 = vadd.f32 1e-05, %v913_v52 }
 0x86f   :  { %v912_v54 = vpop.xlane.xlu1 %911 }
 0x870   :  { %5494 = vrsqrt.f32 %v915_v53  ;;  %v914_v55 = vmul.f32 0.015625, %v912_v54 }
 0x872   :  { %v916_v56 = vadd.f32 1e-05, %v914_v55 }
 0x874   :  { %5496 = vrsqrt.f32 %v916_v56 }
 0x87d   :  { %v5495_v57 = vpop.eup %5494 }
 0x87e   :  { %v919_v58 = vmul.f32 %v5495_v57, %v903_v37 }
 0x880   :  { %v925_v62 = vmul.f32 %v4221_v59, %v919_v58 }
 0x881   :  { %v5497_v60 = vpop.eup %5496 }
 0x882   :  { %v920_v61 = vmul.f32 %v5497_v60, %v904_v41  ;;  %v5874_v2 = vadd.f32 %v4222_v63, %v925_v62 }
 0x884   :  { %v926_v1 = vmul.f32 %v4221_v59, %v920_v61 }
 0x886   :  { %v5876_v3 = vadd.f32 %v4222_v63, %v926_v1 }
 0x888   :  { %v933_v5 = vpack.c.bf16 %v5876_v3, %v5874_v2 }
 0x88a   :  { %4949 = vmatmul.mubr.msk.bf16.vlgmr.msra.gmra.mxu0 %vm69_vm1, %v933_v5 }
 0x88b   :  { %4965 = vmatpush3.bf16.msra.mxu0 %v5378_v4  ;;  %4972 = vmatprep.mubr.msk.bf16.mxu0 %vm5567_vm0, %v5566_v0 }
 0x88c   :  { %4966 = vmatprep.subr.bf16.mxu0 %v5566_v0 }
 0x88f   :  { %4967 = vmatpush3.bf16.msra.mxu0 %v5379_v6 }
 0x890   :  { %4968 = vmatprep.subr.bf16.mxu0 %v5566_v0 }
 0x893   :  { %4969 = vmatpush3.bf16.msra.mxu0 %v5380_v7 }
 0x894   :  { %4970 = vmatprep.subr.bf16.mxu0 %v5566_v0 }
 0x897   :  { %4971 = vmatpush3.bf16.msra.mxu0 %v5381_v10  ;;  %v5386_v10 = vld [vmem:[%s6642_s1 + $0x138] sm:$0xff]  }
 0x898   :  { %4988 = vmatprep.subr.bf16.mxu0 %v5566_v0 }
 0x89a   :  { %4973 = vmatmul.mubr.msk.bf16.vlgmr.msra.gmra.mxu0 %vm69_vm1, %v5656_v11 }
 0x89b   :  { %4989 = vmatpush3.bf16.msra.mxu0 %v5382_v12  ;;  %4996 = vmatprep.mubr.msk.bf16.mxu0 %vm5567_vm0, %v5566_v0 }
 0x89c   :  { %4990 = vmatprep.subr.bf16.mxu0 %v5566_v0 }
 0x89f   :  { %4991 = vmatpush3.bf16.msra.mxu0 %v5383_v13  ;;  %v5387_v13 = vld [vmem:[%s6642_s1 + $0x130] sm:$0xff]  }
 0x8a0   :  { %4992 = vmatprep.subr.bf16.mxu0 %v5566_v0 }
 0x8a3   :  { %4993 = vmatpush3.bf16.msra.mxu0 %v5384_v14  ;;  %v5388_v14 = vld [vmem:[%s6642_s1 + $0x128] sm:$0xff]  }
 0x8a4   :  { %4994 = vmatprep.subr.bf16.mxu0 %v5566_v0 }
 0x8a7   :  { %4995 = vmatpush3.bf16.msra.mxu0 %v5385_v15  ;;  %v5389_v15 = vld [vmem:[%s6642_s1 + $0x120] sm:$0xff]  }
 0x8a8   :  { %5012 = vmatprep.subr.bf16.mxu0 %v5566_v0 }
 0x8aa   :  { %4997 = vmatmul.mubr.msk.bf16.vlgmr.msra.gmra.mxu0 %vm69_vm1, %v933_v5 }
 0x8ab   :  { %5020 = vmatprep.mubr.msk.bf16.mxu0 %vm5567_vm0, %v5566_v0 }
 0x94a   :  { %v1012_v25 = vpop.f32.mrf.mxu0 }
 0x94b   :  { %v1013_v29 = vadd.f32 %v4232_v26, %v1012_v25 }
 0x94c   :  { %v4950_v27 = vpop.f32.mrf.mxu0 }
 0x94e   :  { %v1015_v28 = vpop.f32.mrf.mxu0 }
 0x94f   :  { %v1016_v30 = vadd.f32 %v4232_v26, %v1015_v28 }
 0x950   :  { %v4951_v31 = vpop.f32.mrf.mxu0 }
 0x951   :  { %v1183_v32 = vpack.c.bf16 %v1016_v30, %v1013_v29  ;;  %v5390_v30 = vld [vmem:[%s6642_s1 + $0x178] sm:$0xff]   ;;  %v5391_v31 = vld [vmem:[%s6642_s1 + $0x170] sm:$0xff]  }
 0x952   :  { %5013 = vmatpush3.bf16.msra.mxu0 %v5390_v30 }
 0x953   :  { %4979 = vmatmul.mubr.msk.bf16.vlgmr.msra.gmra.mxu1 %vm280_vm2, %v1183_v32  ;;  %5014 = vmatprep.subr.bf16.mxu0 %v5566_v0  ;;  %v5392_v32 = vld [vmem:[%s6642_s1 + $0x168] sm:$0xff]  }
 0x954   :  { %4984 = vmatprep.mubr.msk.bf16.mxu1 %vm5567_vm0, %v5566_v0 }
 0x956   :  { %5015 = vmatpush3.bf16.msra.mxu0 %v5391_v31 }
 0x957   :  { %5016 = vmatprep.subr.bf16.mxu0 %v5566_v0 }
 0x95a   :  { %v1176_v34 = vpop.f32.mrf.mxu0  ;;  %5017 = vmatpush3.bf16.msra.mxu0 %v5392_v32 }
 0x95b   :  { %v1177_v36 = vadd.f32 %v4262_v33, %v1176_v34  ;;  %5018 = vmatprep.subr.bf16.mxu0 %v5566_v0 }
 0x95c   :  { %v4974_v35 = vpop.f32.mrf.mxu0 }
 0x95e   :  { %v1179_v37 = vpop.f32.mrf.mxu0 }
 0x95f   :  { %v1180_v38 = vadd.f32 %v4262_v33, %v1179_v37  ;;  %v5393_v33 = vld [vmem:[%s6642_s1 + $0x160] sm:$0xff]  }
 0x960   :  { %v4975_v39 = vpop.f32.mrf.mxu0  ;;  %5019 = vmatpush3.bf16.msra.mxu0 %v5393_v33 }
 0x961   :  { %v1255_v40 = vpack.c.bf16 %v1180_v38, %v1177_v36  ;;  %5036 = vmatprep.subr.bf16.mxu0 %v5566_v0 }
 0x963   :  { %4983 = vmatpush3.bf16.msra.mxu1 %v1255_v40  ;;  %5021 = vmatmul.mubr.msk.bf16.vlgmr.msra.gmra.mxu0 %vm69_vm1, %v5656_v11 }
 0x964   :  { %5000 = vmatprep.subr.bf16.mxu1 %v5566_v0  ;;  %5040 = vmatprep.mubr.msk.bf16.mxu0 %vm5567_vm0, %v5566_v0 }
 0x96a   :  { %v1381_v41 = vpop.f32.mrf.mxu0 }
 0x96b   :  { %v5940_v9 = vadd.f32 %v4283_v42, %v1381_v41 }
 0x96c   :  { %v4998_v8 = vpop.f32.mrf.mxu0 }
 0x96e   :  { %v1384_v43 = vpop.f32.mrf.mxu0 }
 0x96f   :  { %v5942_v44 = vadd.f32 %v4283_v42, %v1384_v43 }
 0x970   :  { %v4999_v45 = vpop.f32.mrf.mxu0 }
 0x971   :  { %v1552_v46 = vpack.c.bf16 %v5942_v44, %v5940_v9 }
 0xa13   :  { %v1225_v47 = vpop.f32.mrf.mxu1 }
 0xa14   :  { %v1232_v48 = vsel %vm328_vm3, %v1225_v47, -inf }
 0xa15   :  { %1233 = vmax.xlane.f32.xlu0 %v1232_v48  ;;  %v4980_v49 = vpop.f32.mrf.mxu1  ;;  %v4313_v48 = vld [vmem:[%s6644_s2 + $0xb] ss:$0 sm:$0xff] }
 0xa17   :  { %v1228_v50 = vpop.f32.mrf.mxu1 }
 0xa18   :  { %v1235_v51 = vsel %vm328_vm3, %v1228_v50, -inf }
 0xa19   :  { %1236 = vmax.xlane.f32.xlu1 %v1235_v51  ;;  %v4981_v52 = vpop.f32.mrf.mxu1 }
 0xa23   :  { %v1545_v49 = vpop.f32.mrf.mxu0 }
 0xa24   :  { %v1546_v51 = vadd.f32 %v4313_v48, %v1545_v49 }
 0xa9e   :  { %v1234_v53 = vpop.xlane.xlu0 %1233 }
 0xa9f   :  { %v1238_v54 = vsub.f32 %v1225_v47, %v1234_v53 }
 0xaa1   :  { %v1240_v55 = vmul.f32 1.442695, %v1238_v54 }
 0xaa2   :  { %v1237_v56 = vpop.xlane.xlu1 %1236 }
 0xaa3   :  { %5498 = vpow2.f32 %v1240_v55  ;;  %v1239_v57 = vsub.f32 %v1228_v50, %v1237_v56  ;;  %v5022_v50 = vpop.f32.mrf.mxu0 }
 0xaa5   :  { %v1242_v58 = vmul.f32 1.442695, %v1239_v57  ;;  %v1548_v52 = vpop.f32.mrf.mxu0 }
 0xaa6   :  { %v1549_v53 = vadd.f32 %v4313_v48, %v1548_v52 }
 0xaa7   :  { %5500 = vpow2.f32 %v1242_v58  ;;  %v5023_v54 = vpop.f32.mrf.mxu0 }
 0xaa8   :  { %v1624_v55 = vpack.c.bf16 %v1549_v53, %v1546_v51  ;;  %v4332_v54 = vld [vmem:[%s6646_s4 + $0x6] ss:$0 sm:$0xff] }
 0xab0   :  { %v5499_v59 = vpop.eup %5498 }
 0xab1   :  { %v1244_v60 = vsel %vm328_vm3, %v5499_v59, 0.0 }
 0xab2   :  { %1245 = vadd.xlane.f32.xlu0 %v1244_v60 }
 0xab4   :  { %v5501_v61 = vpop.eup %5500 }
 0xab5   :  { %v1247_v62 = vsel %vm328_vm3, %v5501_v61, 0.0 }
 0xab6   :  { %1248 = vadd.xlane.f32.xlu1 %v1247_v62  ;;  %v5394_v62 = vld [vmem:[%s6645_s3 + $0x28] sm:$0xff]  }
 0xb3b   :  { %v1246_v63 = vpop.xlane.xlu0 %1245 }
 0xb3c   :  { %5502 = vrcp.f32 %v1246_v63 }
 0xb3f   :  { %v1249_v1 = vpop.xlane.xlu1 %1248 }
 0xb40   :  { %5504 = vrcp.f32 %v1249_v1  ;;  %v5395_v1 = vld [vmem:[%s6645_s3 + $0x20] sm:$0xff]  }
 0xb49   :  { %v5503_v4 = vpop.eup %5502 }
 0xb4a   :  { %v1252_v6 = vmul.f32 %v5503_v4, %v5499_v59  ;;  %v5396_v4 = vld [vmem:[%s6645_s3 + $0x38] sm:$0xff]  }
 0xb4b   :  { %5037 = vmatpush3.bf16.msra.mxu0 %v5396_v4  ;;  %v5409_v4 = vld [vmem:[%s6648_s6] sm:$0xff]  }
 0xb4c   :  { %5038 = vmatprep.subr.bf16.mxu0 %v5566_v0 }
 0xb4d   :  { %v5505_v5 = vpop.eup %5504 }
 0xb4e   :  { %v1253_v7 = vmul.f32 %v5505_v5, %v5501_v61  ;;  %v5397_v5 = vld [vmem:[%s6645_s3 + $0x30] sm:$0xff]  }
 0xb4f   :  { %5039 = vmatpush3.bf16.msra.mxu0 %v5397_v5  ;;  %v4334_v5 = vld [vmem:[%s6646_s4] ss:$0 sm:$0xff] }
 0xb50   :  { %v1254_v12 = vpack.c.bf16 %v1253_v7, %v1252_v6  ;;  %5052 = vmatprep.subr.bf16.mxu0 %v5566_v0 }
 0xb52   :  { %4985 = vmatmul.mubr.msk.bf16.vlgmr.msra.gmra.mxu1 %vm328_vm3, %v1254_v12 }
 0xb53   :  { %5001 = vmatpush3.bf16.msra.mxu1 %v5386_v10  ;;  %5008 = vmatprep.mubr.msk.bf16.mxu1 %vm5567_vm0, %v5566_v0 }
 0xb54   :  { %5002 = vmatprep.subr.bf16.mxu1 %v5566_v0 }
 0xb57   :  { %5003 = vmatpush3.bf16.msra.mxu1 %v5387_v13 }
 0xb58   :  { %5004 = vmatprep.subr.bf16.mxu1 %v5566_v0 }
 0xb5b   :  { %5005 = vmatpush3.bf16.msra.mxu1 %v5388_v14 }
 0xb5c   :  { %5006 = vmatprep.subr.bf16.mxu1 %v5566_v0 }
 0xb5f   :  { %5007 = vmatpush3.bf16.msra.mxu1 %v5389_v15 }
 0xb60   :  { %5024 = vmatprep.subr.bf16.mxu1 %v5566_v0 }
 0xb62   :  { %5009 = vmatmul.mubr.msk.bf16.vlgmr.msra.gmra.mxu1 %vm69_vm1, %v5656_v11 }
 0xb63   :  { %5026 = vmatprep.mubr.msk.bf16.mxu1 %vm5567_vm0, %v5566_v0 }
 0xc12   :  { %v5973_v16 = vpop.f32.mrf.mxu1 }
 0xc14   :  { %v4986_v17 = vpop.f32.mrf.mxu1 }
 0xc16   :  { %v5975_v18 = vpop.f32.mrf.mxu1 }
 0xc17   :  { %v1300_v19 = vpack.c.bf16 %v5975_v18, %v5973_v16 }
 0xc18   :  { %v4987_v20 = vpop.f32.mrf.mxu1 }
 0xc22   :  { %v1463_v21 = vpop.f32.mrf.mxu1 }
 0xc23   :  { %v1464_v25 = vadd.f32 %v4298_v22, %v1463_v21 }
 0xc24   :  { %v5010_v23 = vpop.f32.mrf.mxu1 }
 0xc26   :  { %v1466_v24 = vpop.f32.mrf.mxu1 }
 0xc27   :  { %v1467_v26 = vadd.f32 %v4298_v22, %v1466_v24 }
 0xc28   :  { %v5011_v27 = vpop.f32.mrf.mxu1 }
 0xc29   :  { %v1553_v28 = vpack.c.bf16 %v1467_v26, %v1464_v25 }
 0xc2b   :  { %v1558_v29 = vsel %vm280_vm2, %v1553_v28, 0 }
 0xc2c   :  { %5025 = vmatpush3.bf16.xpose.msra.mxu1 %v1558_v29 }
 0xc2d   :  { %5030 = vmatprep.subr.bf16.mxu1 %v5566_v0 }
 0xc33   :  { %5027 = vmatmul.mubr.msk.bf16.vlgmr.msra.gmra.mxu1 %vm280_vm2, %v1552_v46 }
 0xc34   :  { %5032 = vmatprep.mubr.msk.bf16.mxu1 %vm5567_vm0, %v5566_v0  ;;  %5031 = vmatpush3.bf16.msra.mxu1 %v1624_v55 }
 0xc35   :  { %5044 = vmatprep.subr.bf16.mxu1 %v5566_v0 }
 0xcf3   :  { %v1594_v34 = vpop.f32.mrf.mxu1 }
 0xcf4   :  { %v1601_v35 = vsel %vm328_vm3, %v1594_v34, -inf }
 0xcf5   :  { %1602 = vmax.xlane.f32.xlu0 %v1601_v35  ;;  %v5028_v36 = vpop.f32.mrf.mxu1 }
 0xcf7   :  { %v1597_v37 = vpop.f32.mrf.mxu1 }
 0xcf8   :  { %v1604_v38 = vsel %vm328_vm3, %v1597_v37, -inf }
 0xcf9   :  { %1605 = vmax.xlane.f32.xlu1 %v1604_v38  ;;  %v5029_v39 = vpop.f32.mrf.mxu1 }
 0xd7e   :  { %v1603_v40 = vpop.xlane.xlu0 %1602 }
 0xd7f   :  { %v1607_v41 = vsub.f32 %v1594_v34, %v1603_v40  ;;  %v5399_v40 = vld [vmem:[%s6647_s5 + $0x10] sm:$0xff]  }
 0xd81   :  { %v1609_v42 = vmul.f32 1.442695, %v1607_v41  ;;  %v5400_v41 = vld [vmem:[%s6647_s5 + $0x8] sm:$0xff]  }
 0xd82   :  { %v1606_v8 = vpop.xlane.xlu1 %1605 }
 0xd83   :  { %5506 = vpow2.f32 %v1609_v42  ;;  %v1608_v43 = vsub.f32 %v1597_v37, %v1606_v8  ;;  %v5401_v42 = vld [vmem:[%s6647_s5] sm:$0xff]   ;;  %v5402_v8 = vld [vmem:[%s6648_s6 + $0x38] sm:$0xff]  }
 0xd85   :  { %v1611_v9 = vmul.f32 1.442695, %v1608_v43  ;;  %v5403_v43 = vld [vmem:[%s6648_s6 + $0x30] sm:$0xff]  }
 0xd87   :  { %5508 = vpow2.f32 %v1611_v9  ;;  %v5404_v9 = vld [vmem:[%s6648_s6 + $0x28] sm:$0xff]  }
 0xd90   :  { %v5507_v44 = vpop.eup %5506 }
 0xd91   :  { %v1613_v45 = vsel %vm328_vm3, %v5507_v44, 0.0 }
 0xd92   :  { %1614 = vadd.xlane.f32.xlu0 %v1613_v45  ;;  %v5406_v45 = vld [vmem:[%s6648_s6 + $0x18] sm:$0xff]  }
 0xd94   :  { %v5509_v46 = vpop.eup %5508 }
 0xd95   :  { %v1616_v47 = vsel %vm328_vm3, %v5509_v46, 0.0 }
 0xd96   :  { %1617 = vadd.xlane.f32.xlu1 %v1616_v47 }
 0xe1b   :  { %v1615_v56 = vpop.xlane.xlu0 %1614 }
 0xe1c   :  { %5510 = vrcp.f32 %v1615_v56 }
 0xe1f   :  { %v1618_v57 = vpop.xlane.xlu1 %1617 }
 0xe20   :  { %5512 = vrcp.f32 %v1618_v57 }
 0xe29   :  { %v5511_v58 = vpop.eup %5510 }
 0xe2a   :  { %v1621_v60 = vmul.f32 %v5511_v58, %v5507_v44  ;;  %v5405_v44 = vld [vmem:[%s6648_s6 + $0x20] sm:$0xff]  }
 0xe2b   :  { %v4333_v58 = vld [vmem:[%s6646_s4 + $0x7] ss:$0 sm:$0xff] }
 0xe2d   :  { %v5513_v59 = vpop.eup %5512 }
 0xe2e   :  { %v1622_v61 = vmul.f32 %v5513_v59, %v5509_v46 }
 0xe30   :  { %v1623_v63 = vpack.c.bf16 %v1622_v61, %v1621_v60 }
 0xe32   :  { %5033 = vmatmul.mubr.msk.bf16.vlgmr.msra.gmra.mxu1 %vm328_vm3, %v1623_v63  ;;  %v5407_v63 = vld [vmem:[%s6648_s6 + $0x10] sm:$0xff]  }
 0xe33   :  { %5045 = vmatpush3.bf16.msra.mxu1 %v5394_v62  ;;  %5048 = vmatprep.mubr.msk.bf16.mxu1 %vm5567_vm0, %v5566_v0 }
 0xe34   :  { %5046 = vmatprep.subr.bf16.mxu1 %v5566_v0 }
 0xe37   :  { %5047 = vmatpush3.bf16.msra.mxu1 %v5395_v1  ;;  %v5408_v1 = vld [vmem:[%s6648_s6 + $0x8] sm:$0xff]  }
 0xe38   :  { %5064 = vmatprep.subr.bf16.mxu1 %v5566_v0 }
 0xe3a   :  { %5049 = vmatmul.mubr.msk.bf16.vlgmr.msra.gmra.mxu1 %vm280_vm2, %v1300_v19  ;;  %v4331_v19 = vld [vmem:[%s6646_s4 + $0x3] ss:$0 sm:$0xff] }
 0xe3b   :  { %5080 = vmatprep.mubr.msk.bf16.mxu1 %vm5567_vm0, %v5566_v0  ;;  %5065 = vmatpush3.bf16.msra.mxu1 %v5402_v8  ;;  %v5416_v8 = vld [vmem:[%s6642_s1 + $0x180] sm:$0xff]  }
 0xe3c   :  { %5066 = vmatprep.subr.bf16.mxu1 %v5566_v0 }
 0xe3f   :  { %5067 = vmatpush3.bf16.msra.mxu1 %v5403_v43  ;;  %v5417_v43 = vld [vmem:[%s6642_s1 + $0x200] sm:$0xff]  }
 0xe40   :  { %5068 = vmatprep.subr.bf16.mxu1 %v5566_v0 }
 0xe43   :  { %5069 = vmatpush3.bf16.msra.mxu1 %v5404_v9 }
 0xe44   :  { %5070 = vmatprep.subr.bf16.mxu1 %v5566_v0 }
 0xe47   :  { %5071 = vmatpush3.bf16.msra.mxu1 %v5405_v44 }
 0xe48   :  { %5072 = vmatprep.subr.bf16.mxu1 %v5566_v0 }
 0xe4b   :  { %5073 = vmatpush3.bf16.msra.mxu1 %v5406_v45 }
 0xe4c   :  { %5074 = vmatprep.subr.bf16.mxu1 %v5566_v0 }
 0xe4f   :  { %5075 = vmatpush3.bf16.msra.mxu1 %v5407_v63  ;;  %v5421_v63 = vld [vmem:[%s6642_s1 + $0x1c0] sm:$0xff]  }
 0xe50   :  { %5076 = vmatprep.subr.bf16.mxu1 %v5566_v0 }
 0xe53   :  { %5077 = vmatpush3.bf16.msra.mxu1 %v5408_v1 }
 0xe54   :  { %5078 = vmatprep.subr.bf16.mxu1 %v5566_v0 }
 0xe57   :  { %5079 = vmatpush3.bf16.msra.mxu1 %v5409_v4 }
 0xe58   :  { %5108 = vmatprep.subr.bf16.mxu1 %v5566_v0 }
 0xef2   :  { %v1662_v6 = vpop.f32.mrf.mxu1 }
 0xef4   :  { %v5034_v7 = vpop.f32.mrf.mxu1 }
 0xef6   :  { %v1665_v10 = vpop.f32.mrf.mxu1 }
 0xef7   :  { %v1669_v12 = vpack.c.bf16 %v1665_v10, %v1662_v6 }
 0xef8   :  { %v5035_v13 = vpop.f32.mrf.mxu1 }
 0xef9   :  { %5041 = vmatmul.mubr.msk.bf16.vlgmr.msra.gmra.mxu0 %vm280_vm2, %v1669_v12 }
 0xefa   :  { %v1780_v14 = vpop.f32.mrf.mxu1  ;;  %5060 = vmatprep.mubr.msk.bf16.mxu0 %vm5567_vm0, %v5566_v0 }
 0xefc   :  { %v5050_v15 = vpop.f32.mrf.mxu1 }
 0xefe   :  { %v1783_v16 = vpop.f32.mrf.mxu1 }
 0xf00   :  { %v5051_v17 = vpop.f32.mrf.mxu1 }
 0xfb9   :  { %v1724_v18 = vpop.f32.mrf.mxu0 }
 0xfba   :  { %v1781_v20 = vadd.f32 %v1780_v14, %v1724_v18  ;;  %v4340_v18 = vld [vmem:[%s6646_s4 + $0x1] ss:$0 sm:$0xff] }
 0xfbb   :  { %v5042_v21 = vpop.f32.mrf.mxu0 }
 0xfbc   :  { %v1792_v22 = vadd.f32 %v4331_v19, %v1781_v20 }
 0xfbd   :  { %v1727_v23 = vpop.f32.mrf.mxu0 }
 0xfbe   :  { %v1784_v24 = vadd.f32 %v1783_v16, %v1727_v23  ;;  %v1794_v25 = vadd.f32 %v1792_v22, %v5874_v2 }
 0xfbf   :  { %v5043_v26 = vpop.f32.mrf.mxu0 }
 0xfc0   :  { %v1793_v27 = vadd.f32 %v4331_v19, %v1784_v24  ;;  %v1798_v28 = vsel %vm69_vm1, %v1794_v25, 0.0 }
 0xfc1   :  { %1799 = vadd.xlane.f32.xlu0 %v1798_v28 }
 0xfc2   :  { %v1795_v29 = vadd.f32 %v1793_v27, %v5876_v3  ;;  %v5398_v3 = vld [vmem:[%s6647_s5 + $0x18] sm:$0xff]  }
 0xfc3   :  { %5053 = vmatpush3.bf16.msra.mxu0 %v5398_v3  ;;  %v5412_v3 = vld [vmem:[%s6642_s1 + $0x190] sm:$0xff]  }
 0xfc4   :  { %v1801_v30 = vsel %vm69_vm1, %v1795_v29, 0.0  ;;  %5054 = vmatprep.subr.bf16.mxu0 %v5566_v0 }
 0xfc5   :  { %1802 = vadd.xlane.f32.xlu1 %v1801_v30 }
 0xfc7   :  { %5055 = vmatpush3.bf16.msra.mxu0 %v5399_v40  ;;  %v5413_v40 = vld [vmem:[%s6642_s1 + $0x210] sm:$0xff]  }
 0xfc8   :  { %5056 = vmatprep.subr.bf16.mxu0 %v5566_v0 }
 0xfcb   :  { %5057 = vmatpush3.bf16.msra.mxu0 %v5400_v41  ;;  %v5414_v41 = vld [vmem:[%s6642_s1 + $0x188] sm:$0xff]  }
 0xfcc   :  { %5058 = vmatprep.subr.bf16.mxu0 %v5566_v0 }
 0xfcf   :  { %5059 = vmatpush3.bf16.msra.mxu0 %v5401_v42  ;;  %v5415_v42 = vld [vmem:[%s6642_s1 + $0x208] sm:$0xff]  }
 0xfd0   :  { %5084 = vmatprep.subr.bf16.mxu0 %v5566_v0 }
0x104a   :  { %v1800_v31 = vpop.xlane.xlu0 %1799 }
0x104b   :  { %v1804_v32 = vmul.f32 0.015625, %v1800_v31 }
0x104d   :  { %v1806_v33 = vsub.f32 %v1794_v25, %v1804_v32 }
0x104e   :  { %v1803_v34 = vpop.xlane.xlu1 %1802 }
0x104f   :  { %v1805_v35 = vmul.f32 0.015625, %v1803_v34  ;;  %v1808_v36 = vmul.f32 %v1806_v33, %v1806_v33 }
0x1051   :  { %v1807_v37 = vsub.f32 %v1795_v29, %v1805_v35  ;;  %v1810_v38 = vsel %vm69_vm1, %v1808_v36, 0.0 }
0x1052   :  { %1811 = vadd.xlane.f32.xlu0 %v1810_v38 }
0x1053   :  { %v1809_v2 = vmul.f32 %v1807_v37, %v1807_v37 }
0x1055   :  { %v1813_v39 = vsel %vm69_vm1, %v1809_v2, 0.0  ;;  %v5410_v2 = vld [vmem:[%s6642_s1 + $0x198] sm:$0xff]  }
0x1056   :  { %1814 = vadd.xlane.f32.xlu1 %v1813_v39  ;;  %v5411_v39 = vld [vmem:[%s6642_s1 + $0x218] sm:$0xff]  }
0x10db   :  { %v1812_v46 = vpop.xlane.xlu0 %1811 }
0x10dc   :  { %v1816_v47 = vmul.f32 0.015625, %v1812_v46 }
0x10de   :  { %v1818_v48 = vadd.f32 1e-05, %v1816_v47 }
0x10df   :  { %v1815_v49 = vpop.xlane.xlu1 %1814 }
0x10e0   :  { %5514 = vrsqrt.f32 %v1818_v48  ;;  %v1817_v50 = vmul.f32 0.015625, %v1815_v49 }
0x10e2   :  { %v1819_v51 = vadd.f32 1e-05, %v1817_v50 }
0x10e4   :  { %5516 = vrsqrt.f32 %v1819_v51  ;;  %v4349_v51 = vld [vmem:[%s6646_s4 + $0x8] ss:$0 sm:$0xff] }
0x10ed   :  { %v5515_v52 = vpop.eup %5514 }
0x10ee   :  { %v1822_v53 = vmul.f32 %v5515_v52, %v1806_v33 }
0x10f0   :  { %v1828_v57 = vmul.f32 %v4332_v54, %v1822_v53 }
0x10f1   :  { %v5517_v55 = vpop.eup %5516 }
0x10f2   :  { %v1823_v56 = vmul.f32 %v5517_v55, %v1807_v37  ;;  %v1834_v60 = vadd.f32 %v4333_v58, %v1828_v57  ;;  %v4350_v55 = vld [vmem:[%s6646_s4 + $0x9] ss:$0 sm:$0xff] }
0x10f4   :  { %v1829_v59 = vmul.f32 %v4332_v54, %v1823_v56 }
0x10f6   :  { %v1835_v61 = vadd.f32 %v4333_v58, %v1829_v59  ;;  %v5418_v59 = vld [vmem:[%s6642_s1 + $0x1d8] sm:$0xff]  }
0x10f8   :  { %v1836_v62 = vpack.c.bf16 %v1835_v61, %v1834_v60 }
0x10fa   :  { %5061 = vmatmul.mubr.msk.bf16.vlgmr.msra.gmra.mxu0 %vm69_vm1, %v1836_v62  ;;  %v5420_v62 = vld [vmem:[%s6642_s1 + $0x1c8] sm:$0xff]  }
0x10fb   :  { %5092 = vmatprep.mubr.msk.bf16.mxu0 %vm5567_vm0, %v5566_v0  ;;  %5085 = vmatpush3.bf16.msra.mxu0 %v5410_v2 }
0x10fc   :  { %5086 = vmatprep.subr.bf16.mxu0 %v5566_v0 }
0x10ff   :  { %5087 = vmatpush3.bf16.msra.mxu0 %v5412_v3 }
0x1100   :  { %5088 = vmatprep.subr.bf16.mxu0 %v5566_v0 }
0x1103   :  { %5089 = vmatpush3.bf16.msra.mxu0 %v5414_v41 }
0x1104   :  { %5090 = vmatprep.subr.bf16.mxu0 %v5566_v0 }
0x1107   :  { %5091 = vmatpush3.bf16.msra.mxu0 %v5416_v8 }
0x1108   :  { %5096 = vmatprep.subr.bf16.mxu0 %v5566_v0 }
0x11ba   :  { %v1911_v6 = vpop.f32.mrf.mxu0 }
0x11bb   :  { %v1912_v10 = vadd.f32 %v4334_v5, %v1911_v6 }
0x11bc   :  { %v5062_v7 = vpop.f32.mrf.mxu0 }
0x11bd   :  { %v1918_v15 = vmax.f32 %v1912_v10, 0.0 }
0x11be   :  { %v1914_v12 = vpop.f32.mrf.mxu0 }
0x11bf   :  { %v1915_v13 = vadd.f32 %v4334_v5, %v1914_v12  ;;  %v4390_v5 = vld [vmem:[%s6644_s2 + $0x10] ss:$0 sm:$0xff] }
0x11c0   :  { %v5063_v14 = vpop.f32.mrf.mxu0 }
0x11c1   :  { %v1919_v16 = vmax.f32 %v1915_v13, 0.0 }
0x11c3   :  { %v1920_v17 = vpack.c.bf16 %v1919_v16, %v1918_v15 }
0x11c5   :  { %5081 = vmatmul.mubr.bf16.vlgmr.msra.gmra.mxu1 %v1920_v17 }
0x11c6   :  { %5116 = vmatprep.mubr.msk.bf16.mxu1 %vm5567_vm0, %v5566_v0  ;;  %5109 = vmatpush3.bf16.msra.mxu1 %v5411_v39 }
0x11c7   :  { %5110 = vmatprep.subr.bf16.mxu1 %v5566_v0 }
0x11ca   :  { %5111 = vmatpush3.bf16.msra.mxu1 %v5413_v40 }
0x11cb   :  { %5112 = vmatprep.subr.bf16.mxu1 %v5566_v0 }
0x11ce   :  { %5113 = vmatpush3.bf16.msra.mxu1 %v5415_v42 }
0x11cf   :  { %5114 = vmatprep.subr.bf16.mxu1 %v5566_v0 }
0x11d2   :  { %5115 = vmatpush3.bf16.msra.mxu1 %v5417_v43  ;;  %v4411_v43 = vld [vmem:[%s6644_s2 + $0xd] ss:$0 sm:$0xff] }
0x11d3   :  { %5126 = vmatprep.subr.bf16.mxu1 %v5566_v0 }
0x1285   :  { %v2024_v19 = vpop.f32.mrf.mxu1 }
0x1286   :  { %v2025_v20 = vadd.f32 %v4340_v18, %v2024_v19  ;;  %v4375_v19 = vld [vmem:[%s6644_s2 + $0xe] ss:$0 sm:$0xff] }
0x1287   :  { %v5082_v21 = vpop.f32.mrf.mxu1 }
0x1288   :  { %v2031_v22 = vadd.f32 %v2025_v20, %v1834_v60 }
0x1289   :  { %v2027_v23 = vpop.f32.mrf.mxu1 }
0x128a   :  { %v2028_v24 = vadd.f32 %v4340_v18, %v2027_v23  ;;  %v2035_v25 = vsel %vm69_vm1, %v2031_v22, 0.0 }
0x128b   :  { %2036 = vadd.xlane.f32.xlu0 %v2035_v25  ;;  %v5083_v26 = vpop.f32.mrf.mxu1 }
0x128c   :  { %v2032_v27 = vadd.f32 %v2028_v24, %v1835_v61  ;;  %v5419_v61 = vld [vmem:[%s6642_s1 + $0x1d0] sm:$0xff]  }
0x128e   :  { %v2038_v28 = vsel %vm69_vm1, %v2032_v27, 0.0 }
0x128f   :  { %2039 = vadd.xlane.f32.xlu1 %v2038_v28 }
0x1314   :  { %v2037_v29 = vpop.xlane.xlu0 %2036 }
0x1315   :  { %v2041_v30 = vmul.f32 0.015625, %v2037_v29 }
0x1317   :  { %v2043_v31 = vsub.f32 %v2031_v22, %v2041_v30  ;;  %v5422_v30 = vld [vmem:[%s6642_s1 + $0x1b8] sm:$0xff]  }
0x1318   :  { %v2040_v32 = vpop.xlane.xlu1 %2039 }
0x1319   :  { %v2042_v33 = vmul.f32 0.015625, %v2040_v32  ;;  %v2045_v34 = vmul.f32 %v2043_v31, %v2043_v31  ;;  %v5423_v32 = vld [vmem:[%s6642_s1 + $0x1b0] sm:$0xff]  }
0x131b   :  { %v2044_v35 = vsub.f32 %v2032_v27, %v2042_v33  ;;  %v2047_v36 = vsel %vm69_vm1, %v2045_v34, 0.0  ;;  %v4360_v27 = vld [vmem:[%s6644_s2 + $0xc] ss:$0 sm:$0xff]  ;;  %v5425_v34 = vld [vmem:[%s6642_s1 + $0x1a0] sm:$0xff]  }
0x131c   :  { %2048 = vadd.xlane.f32.xlu0 %v2047_v36  ;;  %v5424_v33 = vld [vmem:[%s6642_s1 + $0x1a8] sm:$0xff]   ;;  %v5427_v36 = vld [vmem:[%s6642_s1 + $0x230] sm:$0xff]  }
0x131d   :  { %v2046_v37 = vmul.f32 %v2044_v35, %v2044_v35 }
0x131f   :  { %v2050_v38 = vsel %vm69_vm1, %v2046_v37, 0.0  ;;  %v5428_v37 = vld [vmem:[%s6642_s1 + $0x228] sm:$0xff]  }
0x1320   :  { %2051 = vadd.xlane.f32.xlu1 %v2050_v38  ;;  %v5429_v38 = vld [vmem:[%s6642_s1 + $0x220] sm:$0xff]  }
0x13a5   :  { %v2049_v9 = vpop.xlane.xlu0 %2048 }
0x13a6   :  { %v2053_v44 = vmul.f32 0.015625, %v2049_v9 }
0x13a8   :  { %v2055_v45 = vadd.f32 1e-05, %v2053_v44 }
0x13a9   :  { %v2052_v46 = vpop.xlane.xlu1 %2051 }
0x13aa   :  { %5518 = vrsqrt.f32 %v2055_v45  ;;  %v2054_v47 = vmul.f32 0.015625, %v2052_v46 }
0x13ac   :  { %v2056_v48 = vadd.f32 1e-05, %v2054_v47 }
0x13ae   :  { %5520 = vrsqrt.f32 %v2056_v48 }
0x13b7   :  { %v5519_v49 = vpop.eup %5518 }
0x13b8   :  { %v2059_v50 = vmul.f32 %v5519_v49, %v2043_v31 }
0x13ba   :  { %v2065_v53 = vmul.f32 %v4349_v51, %v2059_v50  ;;  %v4441_v50 = vld [vmem:[%s6644_s2 + $0x11] ss:$0 sm:$0xff] }
0x13bb   :  { %v5521_v52 = vpop.eup %5520 }
0x13bc   :  { %v2060_v54 = vmul.f32 %v5521_v52, %v2044_v35  ;;  %v6162_v57 = vadd.f32 %v4350_v55, %v2065_v53  ;;  %v5426_v35 = vld [vmem:[%s6642_s1 + $0x238] sm:$0xff]  }
0x13be   :  { %v2066_v56 = vmul.f32 %v4349_v51, %v2060_v54 }
0x13c0   :  { %v6164_v58 = vadd.f32 %v4350_v55, %v2066_v56 }
0x13c2   :  { %v6171_v60 = vpack.c.bf16 %v6164_v58, %v6162_v57 }
0x13c4   :  { %5093 = vmatmul.mubr.msk.bf16.vlgmr.msra.gmra.mxu0 %vm69_vm1, %v6171_v60  ;;  %5117 = vmatmul.mubr.msk.bf16.vlgmr.msra.gmra.mxu1 %vm69_vm1, %v6171_v60 }
0x13c5   :  { %5097 = vmatpush3.bf16.msra.mxu0 %v5418_v59  ;;  %5104 = vmatprep.mubr.msk.bf16.mxu0 %vm5567_vm0, %v5566_v0 }
0x13c6   :  { %5098 = vmatprep.subr.bf16.mxu0 %v5566_v0  ;;  %5128 = vmatprep.mubr.msk.bf16.mxu1 %vm5567_vm0, %v5566_v0 }
0x13c9   :  { %5099 = vmatpush3.bf16.msra.mxu0 %v5419_v61 }
0x13ca   :  { %5100 = vmatprep.subr.bf16.mxu0 %v5566_v0 }
0x13cd   :  { %5101 = vmatpush3.bf16.msra.mxu0 %v5420_v62 }
0x13ce   :  { %5102 = vmatprep.subr.bf16.mxu0 %v5566_v0 }
0x13d1   :  { %5103 = vmatpush3.bf16.msra.mxu0 %v5421_v63 }
0x13d2   :  { %5120 = vmatprep.subr.bf16.mxu0 %v5566_v0 }
0x13d4   :  { %5105 = vmatmul.mubr.msk.bf16.vlgmr.msra.gmra.mxu0 %vm69_vm1, %v6171_v60 }
0x13d5   :  { %5122 = vmatprep.mubr.msk.bf16.mxu0 %vm5567_vm0, %v5566_v0 }
0x1484   :  { %v2152_v1 = vpop.f32.mrf.mxu0  ;;  %v2316_v4 = vpop.f32.mrf.mxu1 }
0x1485   :  { %v2317_v13 = vadd.f32 %v4390_v5, %v2316_v4  ;;  %v2153_v29 = vadd.f32 %v4360_v27, %v2152_v1 }
0x1486   :  { %v5094_v6 = vpop.f32.mrf.mxu0  ;;  %v5118_v7 = vpop.f32.mrf.mxu1 }
0x1488   :  { %v2155_v10 = vpop.f32.mrf.mxu0  ;;  %v2319_v12 = vpop.f32.mrf.mxu1 }
0x1489   :  { %v2320_v14 = vadd.f32 %v4390_v5, %v2319_v12  ;;  %v2156_v28 = vadd.f32 %v4360_v27, %v2155_v10 }
0x148a   :  { %v5095_v15 = vpop.f32.mrf.mxu0  ;;  %v5119_v16 = vpop.f32.mrf.mxu1 }
0x148b   :  { %v2395_v17 = vpack.c.bf16 %v2320_v14, %v2317_v13  ;;  %v2323_v31 = vpack.c.bf16 %v2156_v28, %v2153_v29  ;;  %v4426_v29 = vld [vmem:[%s6644_s2 + $0xf] ss:$0 sm:$0xff] }
0x148d   :  { %5127 = vmatpush3.bf16.msra.mxu1 %v2395_v17 }
0x148e   :  { %5144 = vmatprep.subr.bf16.mxu1 %v5566_v0 }
0x1494   :  { %v2234_v18 = vpop.f32.mrf.mxu0 }
0x1495   :  { %v2235_v22 = vadd.f32 %v4375_v19, %v2234_v18  ;;  %v5430_v18 = vld [vmem:[%s6642_s1 + $0x1f8] sm:$0xff]  }
0x1496   :  { %v5106_v20 = vpop.f32.mrf.mxu0 }
0x1497   :  { %v5431_v20 = vld [vmem:[%s6642_s1 + $0x1f0] sm:$0xff]  }
0x1498   :  { %v2237_v21 = vpop.f32.mrf.mxu0 }
0x1499   :  { %v2238_v23 = vadd.f32 %v4375_v19, %v2237_v21  ;;  %v5432_v21 = vld [vmem:[%s6642_s1 + $0x1e8] sm:$0xff]  }
0x149a   :  { %v5107_v24 = vpop.f32.mrf.mxu0 }
0x149b   :  { %v2324_v25 = vpack.c.bf16 %v2238_v23, %v2235_v22  ;;  %v5433_v22 = vld [vmem:[%s6642_s1 + $0x1e0] sm:$0xff]  }
0x149d   :  { %v2329_v26 = vsel %vm280_vm2, %v2324_v25, 0 }
0x149e   :  { %5121 = vmatpush3.bf16.xpose.msra.mxu0 %v2329_v26 }
0x149f   :  { %5132 = vmatprep.subr.bf16.mxu0 %v5566_v0 }
0x14a5   :  { %5123 = vmatmul.mubr.msk.bf16.vlgmr.msra.gmra.mxu0 %vm280_vm2, %v2323_v31 }
0x14a6   :  { %5133 = vmatpush3.bf16.msra.mxu0 %v5422_v30  ;;  %5140 = vmatprep.mubr.msk.bf16.mxu0 %vm5567_vm0, %v5566_v0 }
0x14a7   :  { %5134 = vmatprep.subr.bf16.mxu0 %v5566_v0 }
0x14aa   :  { %5135 = vmatpush3.bf16.msra.mxu0 %v5423_v32 }
0x14ab   :  { %5136 = vmatprep.subr.bf16.mxu0 %v5566_v0 }
0x14ae   :  { %5137 = vmatpush3.bf16.msra.mxu0 %v5424_v33 }
0x14af   :  { %5138 = vmatprep.subr.bf16.mxu0 %v5566_v0 }
0x14b2   :  { %5139 = vmatpush3.bf16.msra.mxu0 %v5425_v34 }
0x14b3   :  { %5156 = vmatprep.subr.bf16.mxu0 %v5566_v0 }
0x14b5   :  { %5141 = vmatmul.mubr.msk.bf16.vlgmr.msra.gmra.mxu0 %vm69_vm1, %v6171_v60 }
0x14b6   :  { %5157 = vmatpush3.bf16.msra.mxu0 %v5426_v35  ;;  %5164 = vmatprep.mubr.msk.bf16.mxu0 %vm5567_vm0, %v5566_v0 }
0x14b7   :  { %5158 = vmatprep.subr.bf16.mxu0 %v5566_v0 }
0x14ba   :  { %5159 = vmatpush3.bf16.msra.mxu0 %v5427_v36 }
0x14bb   :  { %5160 = vmatprep.subr.bf16.mxu0 %v5566_v0 }
0x14be   :  { %5161 = vmatpush3.bf16.msra.mxu0 %v5428_v37 }
0x14bf   :  { %5162 = vmatprep.subr.bf16.mxu0 %v5566_v0 }
0x14c2   :  { %5163 = vmatpush3.bf16.msra.mxu0 %v5429_v38 }
0x14c3   :  { %5180 = vmatprep.subr.bf16.mxu0 %v5566_v0 }
0x14c5   :  { %5165 = vmatmul.mubr.msk.bf16.vlgmr.msra.gmra.mxu0 %vm69_vm1, %v6171_v60 }
0x14c6   :  { %5184 = vmatprep.mubr.msk.bf16.mxu0 %vm5567_vm0, %v5566_v0 }
0x1565   :  { %v2365_v2 = vpop.f32.mrf.mxu0 }
0x1566   :  { %v2372_v39 = vsel %vm328_vm3, %v2365_v2, -inf }
0x1567   :  { %2373 = vmax.xlane.f32.xlu0 %v2372_v39  ;;  %v5124_v3 = vpop.f32.mrf.mxu0 }
0x1569   :  { %v2368_v40 = vpop.f32.mrf.mxu0 }
0x156a   :  { %v2375_v41 = vsel %vm328_vm3, %v2368_v40, -inf }
0x156b   :  { %2376 = vmax.xlane.f32.xlu1 %v2375_v41  ;;  %v5125_v42 = vpop.f32.mrf.mxu0 }
0x1575   :  { %v2521_v8 = vpop.f32.mrf.mxu0 }
0x1576   :  { %v6258_v45 = vadd.f32 %v4411_v43, %v2521_v8 }
0x1577   :  { %v5142_v9 = vpop.f32.mrf.mxu0 }
0x1579   :  { %v2524_v44 = vpop.f32.mrf.mxu0 }
0x157a   :  { %v6260_v46 = vadd.f32 %v4411_v43, %v2524_v44 }
0x157b   :  { %v5143_v47 = vpop.f32.mrf.mxu0 }
0x157c   :  { %v2692_v48 = vpack.c.bf16 %v6260_v46, %v6258_v45 }
0x1585   :  { %v2685_v49 = vpop.f32.mrf.mxu0 }
0x1586   :  { %v2686_v53 = vadd.f32 %v4441_v50, %v2685_v49 }
0x1587   :  { %v5166_v51 = vpop.f32.mrf.mxu0 }
0x1589   :  { %v2688_v52 = vpop.f32.mrf.mxu0 }
0x158a   :  { %v2689_v54 = vadd.f32 %v4441_v50, %v2688_v52 }
0x158b   :  { %v5167_v55 = vpop.f32.mrf.mxu0 }
0x158c   :  { %v2764_v56 = vpack.c.bf16 %v2689_v54, %v2686_v53  ;;  %v5434_v54 = vld [vmem:[%s6645_s3 + $0x48] sm:$0xff]  }
0x15f0   :  { %v2374_v59 = vpop.xlane.xlu0 %2373 }
0x15f1   :  { %v2378_v61 = vsub.f32 %v2365_v2, %v2374_v59  ;;  %v5436_v59 = vld [vmem:[%s6645_s3 + $0x58] sm:$0xff]  }
0x15f2   :  { %5181 = vmatpush3.bf16.msra.mxu0 %v5436_v59  ;;  %v5449_v59 = vld [vmem:[%s6642_s1 + $0x2c0] sm:$0xff]  }
0x15f3   :  { %v2380_v62 = vmul.f32 1.442695, %v2378_v61  ;;  %5182 = vmatprep.subr.bf16.mxu0 %v5566_v0  ;;  %v5437_v61 = vld [vmem:[%s6645_s3 + $0x50] sm:$0xff]  }
0x15f4   :  { %v2377_v63 = vpop.xlane.xlu1 %2376 }
0x15f5   :  { %5522 = vpow2.f32 %v2380_v62  ;;  %v2379_v1 = vsub.f32 %v2368_v40, %v2377_v63 }
0x15f6   :  { %5183 = vmatpush3.bf16.msra.mxu0 %v5437_v61  ;;  %v5450_v61 = vld [vmem:[%s6642_s1 + $0x278] sm:$0xff]  }
0x15f7   :  { %v2382_v4 = vmul.f32 1.442695, %v2379_v1  ;;  %5196 = vmatprep.subr.bf16.mxu0 %v5566_v0 }
0x15f9   :  { %5524 = vpow2.f32 %v2382_v4 }
0x1602   :  { %v5523_v5 = vpop.eup %5522 }
0x1603   :  { %v2384_v6 = vsel %vm328_vm3, %v5523_v5, 0.0 }
0x1604   :  { %2385 = vadd.xlane.f32.xlu0 %v2384_v6 }
0x1606   :  { %v5525_v7 = vpop.eup %5524 }
0x1607   :  { %v2387_v10 = vsel %vm328_vm3, %v5525_v7, 0.0 }
0x1608   :  { %2388 = vadd.xlane.f32.xlu1 %v2387_v10 }
0x168d   :  { %v2386_v12 = vpop.xlane.xlu0 %2385 }
0x168e   :  { %5526 = vrcp.f32 %v2386_v12 }
0x1691   :  { %v2389_v13 = vpop.xlane.xlu1 %2388 }
0x1692   :  { %5528 = vrcp.f32 %v2389_v13 }
0x169b   :  { %v5527_v14 = vpop.eup %5526 }
0x169c   :  { %v2392_v16 = vmul.f32 %v5527_v14, %v5523_v5  ;;  %v4460_v14 = vld [vmem:[%s6646_s4 + $0x12] ss:$0 sm:$0xff] }
0x169f   :  { %v5529_v15 = vpop.eup %5528 }
0x16a0   :  { %v2393_v17 = vmul.f32 %v5529_v15, %v5525_v7 }
0x16a2   :  { %v2394_v19 = vpack.c.bf16 %v2393_v17, %v2392_v16 }
0x16a4   :  { %5129 = vmatmul.mubr.msk.bf16.vlgmr.msra.gmra.mxu1 %vm328_vm3, %v2394_v19 }
0x16a5   :  { %5145 = vmatpush3.bf16.msra.mxu1 %v5430_v18  ;;  %5152 = vmatprep.mubr.msk.bf16.mxu1 %vm5567_vm0, %v5566_v0 }
0x16a6   :  { %5146 = vmatprep.subr.bf16.mxu1 %v5566_v0 }
0x16a9   :  { %5147 = vmatpush3.bf16.msra.mxu1 %v5431_v20 }
0x16aa   :  { %5148 = vmatprep.subr.bf16.mxu1 %v5566_v0 }
0x16ad   :  { %5149 = vmatpush3.bf16.msra.mxu1 %v5432_v21 }
0x16ae   :  { %5150 = vmatprep.subr.bf16.mxu1 %v5566_v0 }
0x16b1   :  { %5151 = vmatpush3.bf16.msra.mxu1 %v5433_v22 }
0x16b2   :  { %5168 = vmatprep.subr.bf16.mxu1 %v5566_v0 }
0x16b4   :  { %5153 = vmatmul.mubr.msk.bf16.vlgmr.msra.gmra.mxu1 %vm69_vm1, %v6171_v60 }
0x16b5   :  { %5170 = vmatprep.mubr.msk.bf16.mxu1 %vm5567_vm0, %v5566_v0 }
0x1764   :  { %v2433_v23 = vpop.f32.mrf.mxu1 }
0x1766   :  { %v5130_v24 = vpop.f32.mrf.mxu1 }
0x1768   :  { %v2436_v25 = vpop.f32.mrf.mxu1 }
0x1769   :  { %v2440_v26 = vpack.c.bf16 %v2436_v25, %v2433_v23 }
0x176a   :  { %v5131_v27 = vpop.f32.mrf.mxu1 }
0x1774   :  { %v2603_v28 = vpop.f32.mrf.mxu1 }
0x1775   :  { %v2604_v32 = vadd.f32 %v4426_v29, %v2603_v28 }
0x1776   :  { %v5154_v30 = vpop.f32.mrf.mxu1 }
0x1778   :  { %v2606_v31 = vpop.f32.mrf.mxu1 }
0x1779   :  { %v2607_v33 = vadd.f32 %v4426_v29, %v2606_v31 }
0x177a   :  { %v5155_v34 = vpop.f32.mrf.mxu1 }
0x177b   :  { %v2693_v35 = vpack.c.bf16 %v2607_v33, %v2604_v32 }
0x177d   :  { %v2698_v60 = vsel %vm280_vm2, %v2693_v35, 0  ;;  %v5439_v35 = vld [vmem:[%s6642_s1 + $0x290] sm:$0xff]  }
0x177e   :  { %5169 = vmatpush3.bf16.xpose.msra.mxu1 %v2698_v60  ;;  %v5440_v60 = vld [vmem:[%s6642_s1 + $0x288] sm:$0xff]  }
0x177f   :  { %5174 = vmatprep.subr.bf16.mxu1 %v5566_v0 }
0x1785   :  { %5171 = vmatmul.mubr.msk.bf16.vlgmr.msra.gmra.mxu1 %vm280_vm2, %v2692_v48 }
0x1786   :  { %5175 = vmatpush3.bf16.msra.mxu1 %v2764_v56  ;;  %5176 = vmatprep.mubr.msk.bf16.mxu1 %vm5567_vm0, %v5566_v0  ;;  %v5435_v56 = vld [vmem:[%s6645_s3 + $0x40] sm:$0xff]  }
0x1787   :  { %5188 = vmatprep.subr.bf16.mxu1 %v5566_v0 }
0x1845   :  { %v2734_v36 = vpop.f32.mrf.mxu1 }
0x1846   :  { %v2741_v37 = vsel %vm328_vm3, %v2734_v36, -inf }
0x1847   :  { %2742 = vmax.xlane.f32.xlu0 %v2741_v37  ;;  %v5172_v38 = vpop.f32.mrf.mxu1  ;;  %v5442_v37 = vld [vmem:[%s6642_s1 + $0x258] sm:$0xff]  }
0x1848   :  { %v5443_v38 = vld [vmem:[%s6642_s1 + $0x250] sm:$0xff]  }
0x1849   :  { %v2737_v2 = vpop.f32.mrf.mxu1 }
0x184a   :  { %v2744_v39 = vsel %vm328_vm3, %v2737_v2, -inf }
0x184b   :  { %2745 = vmax.xlane.f32.xlu1 %v2744_v39  ;;  %v5173_v3 = vpop.f32.mrf.mxu1  ;;  %v5445_v39 = vld [vmem:[%s6642_s1 + $0x240] sm:$0xff]  }
0x18d0   :  { %v2743_v40 = vpop.xlane.xlu0 %2742 }
0x18d1   :  { %v2747_v41 = vsub.f32 %v2734_v36, %v2743_v40  ;;  %v5441_v36 = vld [vmem:[%s6642_s1 + $0x280] sm:$0xff]  }
0x18d3   :  { %v2749_v42 = vmul.f32 1.442695, %v2747_v41 }
0x18d4   :  { %v2746_v8 = vpop.xlane.xlu1 %2745 }
0x18d5   :  { %5530 = vpow2.f32 %v2749_v42  ;;  %v2748_v43 = vsub.f32 %v2737_v2, %v2746_v8  ;;  %v5444_v2 = vld [vmem:[%s6642_s1 + $0x248] sm:$0xff]  }
0x18d7   :  { %v2751_v9 = vmul.f32 1.442695, %v2748_v43 }
0x18d9   :  { %5532 = vpow2.f32 %v2751_v9 }
0x18e2   :  { %v5531_v44 = vpop.eup %5530 }
0x18e3   :  { %v2753_v45 = vsel %vm328_vm3, %v5531_v44, 0.0 }
0x18e4   :  { %2754 = vadd.xlane.f32.xlu0 %v2753_v45  ;;  %v4463_v45 = vld [vmem:[%s6646_s4 + $0x14] ss:$0 sm:$0xff] }
0x18e6   :  { %v5533_v46 = vpop.eup %5532 }
0x18e7   :  { %v2756_v47 = vsel %vm328_vm3, %v5533_v46, 0.0 }
0x18e8   :  { %2757 = vadd.xlane.f32.xlu1 %v2756_v47 }
0x196d   :  { %v2755_v48 = vpop.xlane.xlu0 %2754 }
0x196e   :  { %5534 = vrcp.f32 %v2755_v48 }
0x1971   :  { %v2758_v49 = vpop.xlane.xlu1 %2757 }
0x1972   :  { %5536 = vrcp.f32 %v2758_v49  ;;  %v4464_v49 = vld [vmem:[%s6646_s4 + $0x15] ss:$0 sm:$0xff] }
0x197b   :  { %v5535_v50 = vpop.eup %5534 }
0x197c   :  { %v2761_v52 = vmul.f32 %v5535_v50, %v5531_v44 }
0x197f   :  { %v5537_v51 = vpop.eup %5536 }
0x1980   :  { %v2762_v53 = vmul.f32 %v5537_v51, %v5533_v46 }
0x1982   :  { %v2763_v55 = vpack.c.bf16 %v2762_v53, %v2761_v52  ;;  %v5446_v53 = vld [vmem:[%s6642_s1 + $0x2d8] sm:$0xff]  }
0x1984   :  { %5177 = vmatmul.mubr.msk.bf16.vlgmr.msra.gmra.mxu1 %vm328_vm3, %v2763_v55  ;;  %v5447_v55 = vld [vmem:[%s6642_s1 + $0x2d0] sm:$0xff]  }
0x1985   :  { %5189 = vmatpush3.bf16.msra.mxu1 %v5434_v54  ;;  %5192 = vmatprep.mubr.msk.bf16.mxu1 %vm5567_vm0, %v5566_v0 }
0x1986   :  { %5190 = vmatprep.subr.bf16.mxu1 %v5566_v0 }
0x1989   :  { %5191 = vmatpush3.bf16.msra.mxu1 %v5435_v56  ;;  %v5448_v56 = vld [vmem:[%s6642_s1 + $0x2c8] sm:$0xff]  }
0x198a   :  { %5208 = vmatprep.subr.bf16.mxu1 %v5566_v0 }
0x198c   :  { %5193 = vmatmul.mubr.msk.bf16.vlgmr.msra.gmra.mxu1 %vm280_vm2, %v2440_v26 }
0x198d   :  { %5216 = vmatprep.mubr.msk.bf16.mxu1 %vm5567_vm0, %v5566_v0 }
0x1a44   :  { %v2802_v62 = vpop.f32.mrf.mxu1 }
0x1a46   :  { %v5178_v63 = vpop.f32.mrf.mxu1 }
0x1a47   :  { %v5452_v63 = vld [vmem:[%s6642_s1 + $0x268] sm:$0xff]  }
0x1a48   :  { %v2805_v1 = vpop.f32.mrf.mxu1 }
0x1a49   :  { %v2809_v4 = vpack.c.bf16 %v2805_v1, %v2802_v62  ;;  %v5451_v62 = vld [vmem:[%s6642_s1 + $0x270] sm:$0xff]   ;;  %v5453_v1 = vld [vmem:[%s6642_s1 + $0x260] sm:$0xff]  }
0x1a4a   :  { %v5179_v5 = vpop.f32.mrf.mxu1 }
0x1a4b   :  { %5185 = vmatmul.mubr.msk.bf16.vlgmr.msra.gmra.mxu0 %vm280_vm2, %v2809_v4  ;;  %v4489_v4 = vld [vmem:[%s6644_s2 + $0x14] ss:$0 sm:$0xff] }
0x1a4c   :  { %v2920_v6 = vpop.f32.mrf.mxu1  ;;  %5204 = vmatprep.mubr.msk.bf16.mxu0 %vm5567_vm0, %v5566_v0  ;;  %5197 = vmatpush3.bf16.msra.mxu0 %v5442_v37 }
0x1a4d   :  { %5198 = vmatprep.subr.bf16.mxu0 %v5566_v0 }
0x1a4e   :  { %v5194_v7 = vpop.f32.mrf.mxu1 }
0x1a50   :  { %v2923_v10 = vpop.f32.mrf.mxu1  ;;  %5199 = vmatpush3.bf16.msra.mxu0 %v5443_v38 }
0x1a51   :  { %5200 = vmatprep.subr.bf16.mxu0 %v5566_v0 }
0x1a52   :  { %v5195_v12 = vpop.f32.mrf.mxu1 }
0x1a54   :  { %5201 = vmatpush3.bf16.msra.mxu0 %v5444_v2 }
0x1a55   :  { %5202 = vmatprep.subr.bf16.mxu0 %v5566_v0 }
0x1a58   :  { %5203 = vmatpush3.bf16.msra.mxu0 %v5445_v39 }
0x1a59   :  { %5220 = vmatprep.subr.bf16.mxu0 %v5566_v0 }
0x1b0b   :  { %v2864_v13 = vpop.f32.mrf.mxu0 }
0x1b0c   :  { %v2921_v15 = vadd.f32 %v2920_v6, %v2864_v13 }
0x1b0d   :  { %v5186_v16 = vpop.f32.mrf.mxu0 }
0x1b0e   :  { %v2933_v17 = vadd.f32 %v4460_v14, %v2921_v15 }
0x1b0f   :  { %v2867_v18 = vpop.f32.mrf.mxu0 }
0x1b10   :  { %v2924_v19 = vadd.f32 %v2923_v10, %v2867_v18  ;;  %v2935_v20 = vadd.f32 %v2933_v17, %v6162_v57  ;;  %v4474_v17 = vld [vmem:[%s6644_s2 + $0x12] ss:$0 sm:$0xff] }
0x1b11   :  { %v5187_v21 = vpop.f32.mrf.mxu0 }
0x1b12   :  { %v2934_v22 = vadd.f32 %v4460_v14, %v2924_v19  ;;  %v2939_v23 = vsel %vm69_vm1, %v2935_v20, 0.0 }
0x1b13   :  { %2940 = vadd.xlane.f32.xlu0 %v2939_v23 }
0x1b14   :  { %v2936_v24 = vadd.f32 %v2934_v22, %v6164_v58  ;;  %v5438_v58 = vld [vmem:[%s6642_s1 + $0x298] sm:$0xff]  }
0x1b15   :  { %5209 = vmatpush3.bf16.msra.mxu1 %v5438_v58 }
0x1b16   :  { %v2942_v25 = vsel %vm69_vm1, %v2936_v24, 0.0  ;;  %5210 = vmatprep.subr.bf16.mxu1 %v5566_v0 }
0x1b17   :  { %2943 = vadd.xlane.f32.xlu1 %v2942_v25 }
0x1b19   :  { %5211 = vmatpush3.bf16.msra.mxu1 %v5439_v35 }
0x1b1a   :  { %5212 = vmatprep.subr.bf16.mxu1 %v5566_v0 }
0x1b1d   :  { %5213 = vmatpush3.bf16.msra.mxu1 %v5440_v60 }
0x1b1e   :  { %5214 = vmatprep.subr.bf16.mxu1 %v5566_v0 }
0x1b21   :  { %5215 = vmatpush3.bf16.msra.mxu1 %v5441_v36 }
0x1b22   :  { %5232 = vmatprep.subr.bf16.mxu1 %v5566_v0 }
0x1b24   :  { %5217 = vmatmul.mubr.msk.bf16.vlgmr.msra.gmra.mxu1 %vm69_vm1, %v5656_v11 }
0x1b25   :  { %5234 = vmatprep.mubr.msk.bf16.mxu1 %vm5567_vm0, %v5566_v0 }
0x1b9c   :  { %v2941_v26 = vpop.xlane.xlu0 %2940 }
0x1b9d   :  { %v2945_v27 = vmul.f32 0.015625, %v2941_v26 }
0x1b9f   :  { %v2947_v28 = vsub.f32 %v2935_v20, %v2945_v27 }
0x1ba0   :  { %v2944_v29 = vpop.xlane.xlu1 %2943 }
0x1ba1   :  { %v2946_v30 = vmul.f32 0.015625, %v2944_v29  ;;  %v2949_v31 = vmul.f32 %v2947_v28, %v2947_v28 }
0x1ba3   :  { %v2948_v32 = vsub.f32 %v2936_v24, %v2946_v30  ;;  %v2951_v33 = vsel %vm69_vm1, %v2949_v31, 0.0  ;;  %v4504_v24 = vld [vmem:[%s6644_s2 + $0x16] ss:$0 sm:$0xff] }
0x1ba4   :  { %2952 = vadd.xlane.f32.xlu0 %v2951_v33  ;;  %v4525_v33 = vld [vmem:[%s6644_s2 + $0x13] ss:$0 sm:$0xff] }
0x1ba5   :  { %v2950_v57 = vmul.f32 %v2948_v32, %v2948_v32 }
0x1ba7   :  { %v2954_v34 = vsel %vm69_vm1, %v2950_v57, 0.0 }
0x1ba8   :  { %2955 = vadd.xlane.f32.xlu1 %v2954_v34 }
0x1be4   :  { %v3138_v5 = vpop.f32.mrf.mxu1 }
0x1be5   :  { %v3139_v7 = vadd.f32 %v4489_v4, %v3138_v5 }
0x1be6   :  { %v5218_v6 = vpop.f32.mrf.mxu1 }
0x1be8   :  { %v3141_v10 = vpop.f32.mrf.mxu1 }
0x1be9   :  { %v3142_v12 = vadd.f32 %v4489_v4, %v3141_v10 }
0x1bea   :  { %v5219_v13 = vpop.f32.mrf.mxu1 }
0x1beb   :  { %v3228_v14 = vpack.c.bf16 %v3142_v12, %v3139_v7  ;;  %v4540_v13 = vld [vmem:[%s6644_s2 + $0x15] ss:$0 sm:$0xff] }
0x1bed   :  { %v3233_v15 = vsel %vm280_vm2, %v3228_v14, 0 }
0x1bee   :  { %5233 = vmatpush3.bf16.xpose.msra.mxu1 %v3233_v15 }
0x1bef   :  { %5238 = vmatprep.subr.bf16.mxu1 %v5566_v0 }
0x1c2d   :  { %v2953_v3 = vpop.xlane.xlu0 %2952 }
0x1c2e   :  { %v2957_v40 = vmul.f32 0.015625, %v2953_v3 }
0x1c30   :  { %v2959_v41 = vadd.f32 1e-05, %v2957_v40 }
0x1c31   :  { %v2956_v42 = vpop.xlane.xlu1 %2955 }
0x1c32   :  { %5538 = vrsqrt.f32 %v2959_v41  ;;  %v2958_v8 = vmul.f32 0.015625, %v2956_v42 }
0x1c34   :  { %v2960_v43 = vadd.f32 1e-05, %v2958_v8 }
0x1c36   :  { %5540 = vrsqrt.f32 %v2960_v43 }
0x1c3f   :  { %v5539_v9 = vpop.eup %5538 }
0x1c40   :  { %v2963_v44 = vmul.f32 %v5539_v9, %v2947_v28 }
0x1c42   :  { %v2969_v48 = vmul.f32 %v4463_v45, %v2963_v44 }
0x1c43   :  { %v5541_v46 = vpop.eup %5540 }
0x1c44   :  { %v2964_v47 = vmul.f32 %v5541_v46, %v2948_v32  ;;  %v6384_v51 = vadd.f32 %v4464_v49, %v2969_v48 }
0x1c46   :  { %v2970_v50 = vmul.f32 %v4463_v45, %v2964_v47 }
0x1c48   :  { %v6386_v52 = vadd.f32 %v4464_v49, %v2970_v50 }
0x1c4a   :  { %v2977_v54 = vpack.c.bf16 %v6386_v52, %v6384_v51 }
0x1c4c   :  { %5205 = vmatmul.mubr.msk.bf16.vlgmr.msra.gmra.mxu0 %vm69_vm1, %v2977_v54 }
0x1c4d   :  { %5221 = vmatpush3.bf16.msra.mxu0 %v5446_v53  ;;  %5228 = vmatprep.mubr.msk.bf16.mxu0 %vm5567_vm0, %v5566_v0 }
0x1c4e   :  { %5222 = vmatprep.subr.bf16.mxu0 %v5566_v0 }
0x1c51   :  { %5223 = vmatpush3.bf16.msra.mxu0 %v5447_v55 }
0x1c52   :  { %5224 = vmatprep.subr.bf16.mxu0 %v5566_v0 }
0x1c55   :  { %5225 = vmatpush3.bf16.msra.mxu0 %v5448_v56 }
0x1c56   :  { %5226 = vmatprep.subr.bf16.mxu0 %v5566_v0 }
0x1c59   :  { %5227 = vmatpush3.bf16.msra.mxu0 %v5449_v59  ;;  %v5454_v59 = vld [vmem:[%s6642_s1 + $0x2b8] sm:$0xff]  }
0x1c5a   :  { %5244 = vmatprep.subr.bf16.mxu0 %v5566_v0 }
0x1c5c   :  { %5229 = vmatmul.mubr.msk.bf16.vlgmr.msra.gmra.mxu0 %vm69_vm1, %v5656_v11 }
0x1c5d   :  { %5245 = vmatpush3.bf16.msra.mxu0 %v5450_v61  ;;  %5252 = vmatprep.mubr.msk.bf16.mxu0 %vm5567_vm0, %v5566_v0 }
0x1c5e   :  { %5246 = vmatprep.subr.bf16.mxu0 %v5566_v0 }
0x1c61   :  { %5247 = vmatpush3.bf16.msra.mxu0 %v5451_v62  ;;  %v5455_v62 = vld [vmem:[%s6642_s1 + $0x2b0] sm:$0xff]  }
0x1c62   :  { %5248 = vmatprep.subr.bf16.mxu0 %v5566_v0 }
0x1c65   :  { %5249 = vmatpush3.bf16.msra.mxu0 %v5452_v63  ;;  %v5456_v63 = vld [vmem:[%s6642_s1 + $0x2a8] sm:$0xff]  }
0x1c66   :  { %5250 = vmatprep.subr.bf16.mxu0 %v5566_v0 }
0x1c69   :  { %5251 = vmatpush3.bf16.msra.mxu0 %v5453_v1  ;;  %v5457_v1 = vld [vmem:[%s6642_s1 + $0x2a0] sm:$0xff]  }
0x1c6a   :  { %5268 = vmatprep.subr.bf16.mxu0 %v5566_v0 }
0x1c6c   :  { %5253 = vmatmul.mubr.msk.bf16.vlgmr.msra.gmra.mxu0 %vm69_vm1, %v2977_v54 }
0x1c6d   :  { %5276 = vmatprep.mubr.msk.bf16.mxu0 %vm5567_vm0, %v5566_v0 }
0x1d0c   :  { %v3056_v16 = vpop.f32.mrf.mxu0 }
0x1d0d   :  { %v3057_v20 = vadd.f32 %v4474_v17, %v3056_v16 }
0x1d0e   :  { %v5206_v18 = vpop.f32.mrf.mxu0 }
0x1d10   :  { %v3059_v19 = vpop.f32.mrf.mxu0 }
0x1d11   :  { %v3060_v21 = vadd.f32 %v4474_v17, %v3059_v19 }
0x1d12   :  { %v5207_v22 = vpop.f32.mrf.mxu0 }
0x1d13   :  { %v3227_v23 = vpack.c.bf16 %v3060_v21, %v3057_v20  ;;  %v5458_v21 = vld [vmem:[%s6642_s1 + $0x2f8] sm:$0xff]   ;;  %v5459_v22 = vld [vmem:[%s6642_s1 + $0x2f0] sm:$0xff]  }
0x1d14   :  { %5269 = vmatpush3.bf16.msra.mxu0 %v5458_v21 }
0x1d15   :  { %5235 = vmatmul.mubr.msk.bf16.vlgmr.msra.gmra.mxu1 %vm280_vm2, %v3227_v23  ;;  %5270 = vmatprep.subr.bf16.mxu0 %v5566_v0  ;;  %v5460_v23 = vld [vmem:[%s6642_s1 + $0x2e8] sm:$0xff]  }
0x1d16   :  { %5240 = vmatprep.mubr.msk.bf16.mxu1 %vm5567_vm0, %v5566_v0 }
0x1d18   :  { %5271 = vmatpush3.bf16.msra.mxu0 %v5459_v22 }
0x1d19   :  { %5272 = vmatprep.subr.bf16.mxu0 %v5566_v0 }
0x1d1c   :  { %v3220_v25 = vpop.f32.mrf.mxu0  ;;  %5273 = vmatpush3.bf16.msra.mxu0 %v5460_v23 }
0x1d1d   :  { %v3221_v27 = vadd.f32 %v4504_v24, %v3220_v25  ;;  %5274 = vmatprep.subr.bf16.mxu0 %v5566_v0 }
0x1d1e   :  { %v5230_v26 = vpop.f32.mrf.mxu0 }
0x1d20   :  { %v3223_v28 = vpop.f32.mrf.mxu0 }
0x1d21   :  { %v3224_v29 = vadd.f32 %v4504_v24, %v3223_v28  ;;  %v5461_v24 = vld [vmem:[%s6642_s1 + $0x2e0] sm:$0xff]  }
0x1d22   :  { %v5231_v30 = vpop.f32.mrf.mxu0  ;;  %5275 = vmatpush3.bf16.msra.mxu0 %v5461_v24 }
0x1d23   :  { %v3299_v31 = vpack.c.bf16 %v3224_v29, %v3221_v27  ;;  %5292 = vmatprep.subr.bf16.mxu0 %v5566_v0 }
0x1d25   :  { %5239 = vmatpush3.bf16.msra.mxu1 %v3299_v31  ;;  %5277 = vmatmul.mubr.msk.bf16.vlgmr.msra.gmra.mxu0 %vm69_vm1, %v5656_v11 }
0x1d26   :  { %5256 = vmatprep.subr.bf16.mxu1 %v5566_v0  ;;  %5296 = vmatprep.mubr.msk.bf16.mxu0 %vm5567_vm0, %v5566_v0 }
0x1d2c   :  { %v3425_v32 = vpop.f32.mrf.mxu0 }
0x1d2d   :  { %v6450_v58 = vadd.f32 %v4525_v33, %v3425_v32 }
0x1d2e   :  { %v5254_v57 = vpop.f32.mrf.mxu0 }
0x1d30   :  { %v3428_v34 = vpop.f32.mrf.mxu0 }
0x1d31   :  { %v6452_v35 = vadd.f32 %v4525_v33, %v3428_v34 }
0x1d32   :  { %v5255_v60 = vpop.f32.mrf.mxu0 }
0x1d33   :  { %v3596_v36 = vpack.c.bf16 %v6452_v35, %v6450_v58 }
0x1dd5   :  { %v3269_v37 = vpop.f32.mrf.mxu1 }
0x1dd6   :  { %v3276_v38 = vsel %vm328_vm3, %v3269_v37, -inf }
0x1dd7   :  { %3277 = vmax.xlane.f32.xlu0 %v3276_v38  ;;  %v5236_v2 = vpop.f32.mrf.mxu1 }
0x1dd9   :  { %v3272_v39 = vpop.f32.mrf.mxu1 }
0x1dda   :  { %v3279_v3 = vsel %vm328_vm3, %v3272_v39, -inf }
0x1ddb   :  { %3280 = vmax.xlane.f32.xlu1 %v3279_v3  ;;  %v5237_v40 = vpop.f32.mrf.mxu1 }
0x1de5   :  { %v3589_v38 = vpop.f32.mrf.mxu0 }
0x1de7   :  { %v5278_v2 = vpop.f32.mrf.mxu0 }
0x1de9   :  { %v3592_v3 = vpop.f32.mrf.mxu0 }
0x1e60   :  { %v3278_v41 = vpop.xlane.xlu0 %3277 }
0x1e61   :  { %v3282_v42 = vsub.f32 %v3269_v37, %v3278_v41  ;;  %v4555_v37 = vld [vmem:[%s6644_s2 + $0x17] ss:$0 sm:$0xff]  ;;  %v5279_v41 = vpop.f32.mrf.mxu0 }
0x1e62   :  { %v3593_v40 = vadd.f32 %v4555_v37, %v3592_v3 }
0x1e63   :  { %v3284_v8 = vmul.f32 1.442695, %v3282_v42 }
0x1e64   :  { %v3281_v43 = vpop.xlane.xlu1 %3280 }
0x1e65   :  { %5542 = vpow2.f32 %v3284_v8  ;;  %v3283_v9 = vsub.f32 %v3272_v39, %v3281_v43  ;;  %v3590_v39 = vadd.f32 %v4555_v37, %v3589_v38 }
0x1e67   :  { %v3286_v44 = vmul.f32 1.442695, %v3283_v9  ;;  %v3668_v42 = vpack.c.bf16 %v3593_v40, %v3590_v39  ;;  %v4577_v40 = vld [vmem:[%s6646_s4 + $0x16] ss:$0 sm:$0xff] }
0x1e69   :  { %5544 = vpow2.f32 %v3286_v44 }
0x1e72   :  { %v5543_v45 = vpop.eup %5542 }
0x1e73   :  { %v3288_v46 = vsel %vm328_vm3, %v5543_v45, 0.0 }
0x1e74   :  { %3289 = vadd.xlane.f32.xlu0 %v3288_v46 }
0x1e76   :  { %v5545_v47 = vpop.eup %5544 }
0x1e77   :  { %v3291_v48 = vsel %vm328_vm3, %v5545_v47, 0.0 }
0x1e78   :  { %3292 = vadd.xlane.f32.xlu1 %v3291_v48 }
0x1efd   :  { %v3290_v49 = vpop.xlane.xlu0 %3289 }
0x1efe   :  { %5546 = vrcp.f32 %v3290_v49  ;;  %v5463_v49 = vld [vmem:[%s6645_s3 + $0x60] sm:$0xff]  }
0x1f01   :  { %v3293_v50 = vpop.xlane.xlu1 %3292 }
0x1f02   :  { %5548 = vrcp.f32 %v3293_v50  ;;  %v5464_v50 = vld [vmem:[%s6645_s3 + $0x78] sm:$0xff]  }
0x1f03   :  { %5293 = vmatpush3.bf16.msra.mxu0 %v5464_v50  ;;  %v4588_v50 = vld [vmem:[%s6646_s4 + $0x10] ss:$0 sm:$0xff] }
0x1f04   :  { %5294 = vmatprep.subr.bf16.mxu0 %v5566_v0 }
0x1f0b   :  { %v5547_v53 = vpop.eup %5546 }
0x1f0c   :  { %v3296_v55 = vmul.f32 %v5547_v53, %v5543_v45  ;;  %v5465_v53 = vld [vmem:[%s6645_s3 + $0x70] sm:$0xff]  }
0x1f0d   :  { %5295 = vmatpush3.bf16.msra.mxu0 %v5465_v53 }
0x1f0e   :  { %5308 = vmatprep.subr.bf16.mxu0 %v5566_v0 }
0x1f0f   :  { %v5549_v54 = vpop.eup %5548 }
0x1f10   :  { %v3297_v56 = vmul.f32 %v5549_v54, %v5545_v47  ;;  %v5462_v47 = vld [vmem:[%s6645_s3 + $0x68] sm:$0xff]  }
0x1f12   :  { %v3298_v61 = vpack.c.bf16 %v3297_v56, %v3296_v55 }
0x1f14   :  { %5241 = vmatmul.mubr.msk.bf16.vlgmr.msra.gmra.mxu1 %vm328_vm3, %v3298_v61 }
0x1f15   :  { %5257 = vmatpush3.bf16.msra.mxu1 %v5454_v59  ;;  %5264 = vmatprep.mubr.msk.bf16.mxu1 %vm5567_vm0, %v5566_v0 }
0x1f16   :  { %5258 = vmatprep.subr.bf16.mxu1 %v5566_v0 }
0x1f19   :  { %5259 = vmatpush3.bf16.msra.mxu1 %v5455_v62 }
0x1f1a   :  { %5260 = vmatprep.subr.bf16.mxu1 %v5566_v0 }
0x1f1d   :  { %5261 = vmatpush3.bf16.msra.mxu1 %v5456_v63 }
0x1f1e   :  { %5262 = vmatprep.subr.bf16.mxu1 %v5566_v0 }
0x1f21   :  { %5263 = vmatpush3.bf16.msra.mxu1 %v5457_v1 }
0x1f22   :  { %5280 = vmatprep.subr.bf16.mxu1 %v5566_v0 }
0x1f24   :  { %5265 = vmatmul.mubr.msk.bf16.vlgmr.msra.gmra.mxu1 %vm69_vm1, %v5656_v11 }
0x1f25   :  { %5282 = vmatprep.mubr.msk.bf16.mxu1 %vm5567_vm0, %v5566_v0 }
0x1fd4   :  { %v6483_v4 = vpop.f32.mrf.mxu1 }
0x1fd6   :  { %v5242_v5 = vpop.f32.mrf.mxu1 }
0x1fd8   :  { %v6485_v6 = vpop.f32.mrf.mxu1 }
0x1fd9   :  { %v3344_v7 = vpack.c.bf16 %v6485_v6, %v6483_v4  ;;  %v4574_v6 = vld [vmem:[%s6646_s4 + $0x13] ss:$0 sm:$0xff] }
0x1fda   :  { %v5243_v10 = vpop.f32.mrf.mxu1 }
0x1fe4   :  { %v3507_v12 = vpop.f32.mrf.mxu1 }
0x1fe5   :  { %v3508_v16 = vadd.f32 %v4540_v13, %v3507_v12 }
0x1fe6   :  { %v5266_v14 = vpop.f32.mrf.mxu1 }
0x1fe8   :  { %v3510_v15 = vpop.f32.mrf.mxu1 }
0x1fe9   :  { %v3511_v17 = vadd.f32 %v4540_v13, %v3510_v15 }
0x1fea   :  { %v5267_v18 = vpop.f32.mrf.mxu1 }
0x1feb   :  { %v3597_v19 = vpack.c.bf16 %v3511_v17, %v3508_v16 }
0x1fed   :  { %v3602_v20 = vsel %vm280_vm2, %v3597_v19, 0 }
0x1fee   :  { %5281 = vmatpush3.bf16.xpose.msra.mxu1 %v3602_v20 }
0x1fef   :  { %5286 = vmatprep.subr.bf16.mxu1 %v5566_v0 }
0x1ff5   :  { %5283 = vmatmul.mubr.msk.bf16.vlgmr.msra.gmra.mxu1 %vm280_vm2, %v3596_v36 }
0x1ff6   :  { %5288 = vmatprep.mubr.msk.bf16.mxu1 %vm5567_vm0, %v5566_v0  ;;  %5287 = vmatpush3.bf16.msra.mxu1 %v3668_v42 }
0x1ff7   :  { %5300 = vmatprep.subr.bf16.mxu1 %v5566_v0 }
0x20b5   :  { %v3638_v25 = vpop.f32.mrf.mxu1 }
0x20b6   :  { %v3645_v26 = vsel %vm328_vm3, %v3638_v25, -inf }
0x20b7   :  { %3646 = vmax.xlane.f32.xlu0 %v3645_v26  ;;  %v5284_v27 = vpop.f32.mrf.mxu1 }
0x20b9   :  { %v3641_v28 = vpop.f32.mrf.mxu1 }
0x20ba   :  { %v3648_v29 = vsel %vm328_vm3, %v3641_v28, -inf }
0x20bb   :  { %3649 = vmax.xlane.f32.xlu1 %v3648_v29  ;;  %v5285_v30 = vpop.f32.mrf.mxu1 }
0x20bc   :  { %v5467_v30 = vld [vmem:[%s6647_s5 + $0x30] sm:$0xff]  }
0x2140   :  { %v3647_v31 = vpop.xlane.xlu0 %3646 }
0x2141   :  { %v3651_v32 = vsub.f32 %v3638_v25, %v3647_v31  ;;  %v5468_v31 = vld [vmem:[%s6647_s5 + $0x28] sm:$0xff]  }
0x2143   :  { %v3653_v33 = vmul.f32 1.442695, %v3651_v32  ;;  %v5469_v32 = vld [vmem:[%s6647_s5 + $0x20] sm:$0xff]  }
0x2144   :  { %v3650_v57 = vpop.xlane.xlu1 %3649 }
0x2145   :  { %5550 = vpow2.f32 %v3653_v33  ;;  %v3652_v34 = vsub.f32 %v3641_v28, %v3650_v57  ;;  %v5470_v33 = vld [vmem:[%s6648_s6 + $0x78] sm:$0xff]   ;;  %v5471_v57 = vld [vmem:[%s6648_s6 + $0x70] sm:$0xff]  }
0x2147   :  { %v3655_v11 = vmul.f32 1.442695, %v3652_v34  ;;  %v5472_v34 = vld [vmem:[%s6648_s6 + $0x68] sm:$0xff]  }
0x2149   :  { %5552 = vpow2.f32 %v3655_v11  ;;  %v5473_v11 = vld [vmem:[%s6648_s6 + $0x60] sm:$0xff]  }
0x2152   :  { %v5551_v58 = vpop.eup %5550 }
0x2153   :  { %v3657_v35 = vsel %vm328_vm3, %v5551_v58, 0.0 }
0x2154   :  { %3658 = vadd.xlane.f32.xlu0 %v3657_v35 }
0x2156   :  { %v5553_v60 = vpop.eup %5552 }
0x2157   :  { %v3660_v36 = vsel %vm328_vm3, %v5553_v60, 0.0 }
0x2158   :  { %3661 = vadd.xlane.f32.xlu1 %v3660_v36 }
0x21dd   :  { %v3659_v8 = vpop.xlane.xlu0 %3658 }
0x21de   :  { %5554 = vrcp.f32 %v3659_v8 }
0x21e1   :  { %v3662_v43 = vpop.xlane.xlu1 %3661 }
0x21e2   :  { %5556 = vrcp.f32 %v3662_v43  ;;  %v4578_v43 = vld [vmem:[%s6646_s4 + $0x17] ss:$0 sm:$0xff] }
0x21eb   :  { %v5555_v9 = vpop.eup %5554 }
0x21ec   :  { %v3665_v45 = vmul.f32 %v5555_v9, %v5551_v58  ;;  %v5474_v58 = vld [vmem:[%s6648_s6 + $0x58] sm:$0xff]  }
0x21ef   :  { %v5557_v44 = vpop.eup %5556 }
0x21f0   :  { %v3666_v46 = vmul.f32 %v5557_v44, %v5553_v60 }
0x21f2   :  { %v3667_v48 = vpack.c.bf16 %v3666_v46, %v3665_v45 }
0x21f4   :  { %5289 = vmatmul.mubr.msk.bf16.vlgmr.msra.gmra.mxu1 %vm328_vm3, %v3667_v48  ;;  %v5476_v48 = vld [vmem:[%s6648_s6 + $0x48] sm:$0xff]  }
0x21f5   :  { %5301 = vmatpush3.bf16.msra.mxu1 %v5462_v47  ;;  %5304 = vmatprep.mubr.msk.bf16.mxu1 %vm5567_vm0, %v5566_v0  ;;  %v5475_v47 = vld [vmem:[%s6648_s6 + $0x50] sm:$0xff]  }
0x21f6   :  { %5302 = vmatprep.subr.bf16.mxu1 %v5566_v0 }
0x21f9   :  { %5303 = vmatpush3.bf16.msra.mxu1 %v5463_v49  ;;  %v5477_v49 = vld [vmem:[%s6648_s6 + $0x40] sm:$0xff]  }
0x21fa   :  { %5320 = vmatprep.subr.bf16.mxu1 %v5566_v0 }
0x21fc   :  { %5305 = vmatmul.mubr.msk.bf16.vlgmr.msra.gmra.mxu1 %vm280_vm2, %v3344_v7 }
0x21fd   :  { %5336 = vmatprep.mubr.msk.bf16.mxu1 %vm5567_vm0, %v5566_v0  ;;  %5321 = vmatpush3.bf16.msra.mxu1 %v5470_v33 }
0x21fe   :  { %5322 = vmatprep.subr.bf16.mxu1 %v5566_v0 }
0x2201   :  { %5323 = vmatpush3.bf16.msra.mxu1 %v5471_v57  ;;  %v4623_v57 = vld [vmem:[%s6646_s4 + $0x19] ss:$0 sm:$0xff] }
0x2202   :  { %5324 = vmatprep.subr.bf16.mxu1 %v5566_v0 }
0x2205   :  { %5325 = vmatpush3.bf16.msra.mxu1 %v5472_v34 }
0x2206   :  { %5326 = vmatprep.subr.bf16.mxu1 %v5566_v0 }
0x2209   :  { %5327 = vmatpush3.bf16.msra.mxu1 %v5473_v11 }
0x220a   :  { %5328 = vmatprep.subr.bf16.mxu1 %v5566_v0 }
0x220d   :  { %5329 = vmatpush3.bf16.msra.mxu1 %v5474_v58 }
0x220e   :  { %5330 = vmatprep.subr.bf16.mxu1 %v5566_v0 }
0x2211   :  { %5331 = vmatpush3.bf16.msra.mxu1 %v5475_v47 }
0x2212   :  { %5332 = vmatprep.subr.bf16.mxu1 %v5566_v0 }
0x2215   :  { %5333 = vmatpush3.bf16.msra.mxu1 %v5476_v48 }
0x2216   :  { %5334 = vmatprep.subr.bf16.mxu1 %v5566_v0 }
0x2219   :  { %5335 = vmatpush3.bf16.msra.mxu1 %v5477_v49 }
0x22b4   :  { %v3706_v54 = vpop.f32.mrf.mxu1 }
0x22b6   :  { %v5290_v55 = vpop.f32.mrf.mxu1 }
0x22b8   :  { %v3709_v56 = vpop.f32.mrf.mxu1 }
0x22b9   :  { %v3713_v59 = vpack.c.bf16 %v3709_v56, %v3706_v54 }
0x22ba   :  { %v5291_v61 = vpop.f32.mrf.mxu1 }
0x22bb   :  { %5297 = vmatmul.mubr.msk.bf16.vlgmr.msra.gmra.mxu0 %vm280_vm2, %v3713_v59 }
0x22bc   :  { %v3824_v62 = vpop.f32.mrf.mxu1  ;;  %5316 = vmatprep.mubr.msk.bf16.mxu0 %vm5567_vm0, %v5566_v0 }
0x22be   :  { %v5306_v63 = vpop.f32.mrf.mxu1 }
0x22c0   :  { %v3827_v1 = vpop.f32.mrf.mxu1 }
0x22c2   :  { %v5307_v4 = vpop.f32.mrf.mxu1 }
0x237b   :  { %v3768_v5 = vpop.f32.mrf.mxu0 }
0x237c   :  { %v3825_v7 = vadd.f32 %v3824_v62, %v3768_v5 }
0x237d   :  { %v5298_v10 = vpop.f32.mrf.mxu0 }
0x237e   :  { %v3836_v12 = vadd.f32 %v4574_v6, %v3825_v7 }
0x237f   :  { %v3771_v13 = vpop.f32.mrf.mxu0 }
0x2380   :  { %v3828_v14 = vadd.f32 %v3827_v1, %v3771_v13  ;;  %v3838_v15 = vadd.f32 %v3836_v12, %v6384_v51 }
0x2381   :  { %v5299_v16 = vpop.f32.mrf.mxu0 }
0x2382   :  { %v3837_v17 = vadd.f32 %v4574_v6, %v3828_v14  ;;  %v3842_v18 = vsel %vm69_vm1, %v3838_v15, 0.0 }
0x2383   :  { %3843 = vadd.xlane.f32.xlu0 %v3842_v18 }
0x2384   :  { %v3839_v19 = vadd.f32 %v3837_v17, %v6386_v52  ;;  %v5466_v52 = vld [vmem:[%s6647_s5 + $0x38] sm:$0xff]  }
0x2385   :  { %5309 = vmatpush3.bf16.msra.mxu0 %v5466_v52 }
0x2386   :  { %v3845_v20 = vsel %vm69_vm1, %v3839_v19, 0.0  ;;  %5310 = vmatprep.subr.bf16.mxu0 %v5566_v0 }
0x2387   :  { %3846 = vadd.xlane.f32.xlu1 %v3845_v20 }
0x2389   :  { %5311 = vmatpush3.bf16.msra.mxu0 %v5467_v30 }
0x238a   :  { %5312 = vmatprep.subr.bf16.mxu0 %v5566_v0 }
0x238d   :  { %5313 = vmatpush3.bf16.msra.mxu0 %v5468_v31 }
0x238e   :  { %5314 = vmatprep.subr.bf16.mxu0 %v5566_v0  ;;  %v4611_v0 = vld [vmem:[%s6646_s4 + $0x11] ss:$0 sm:$0xff] }
0x2391   :  { %5315 = vmatpush3.bf16.msra.mxu0 %v5469_v32  ;;  %v4622_v32 = vld [vmem:[%s6646_s4 + $0x18] ss:$0 sm:$0xff] }
0x240c   :  { %v3844_v21 = vpop.xlane.xlu0 %3843 }
0x240d   :  { %v3848_v22 = vmul.f32 0.015625, %v3844_v21 }
0x240f   :  { %v3850_v23 = vsub.f32 %v3838_v15, %v3848_v22 }
0x2410   :  { %v3847_v24 = vpop.xlane.xlu1 %3846 }
0x2411   :  { %v3849_v25 = vmul.f32 0.015625, %v3847_v24  ;;  %v3852_v26 = vmul.f32 %v3850_v23, %v3850_v23 }
0x2413   :  { %v3851_v27 = vsub.f32 %v3839_v19, %v3849_v25  ;;  %v3854_v28 = vsel %vm69_vm1, %v3852_v26, 0.0 }
0x2414   :  { %3855 = vadd.xlane.f32.xlu0 %v3854_v28 }
0x2415   :  { %v3853_v51 = vmul.f32 %v3851_v27, %v3851_v27 }
0x2417   :  { %v3857_v29 = vsel %vm69_vm1, %v3853_v51, 0.0 }
0x2418   :  { %3858 = vadd.xlane.f32.xlu1 %v3857_v29 }
0x249d   :  { %v3856_v35 = vpop.xlane.xlu0 %3855 }
0x249e   :  { %v3860_v60 = vmul.f32 0.015625, %v3856_v35 }
0x24a0   :  { %v3862_v36 = vadd.f32 1e-05, %v3860_v60 }
0x24a1   :  { %v3859_v37 = vpop.xlane.xlu1 %3858 }
0x24a2   :  { %5558 = vrsqrt.f32 %v3862_v36  ;;  %v3861_v38 = vmul.f32 0.015625, %v3859_v37 }
0x24a4   :  { %v3863_v2 = vadd.f32 1e-05, %v3861_v38 }
0x24a6   :  { %5560 = vrsqrt.f32 %v3863_v2 }
0x24af   :  { %v5559_v39 = vpop.eup %5558 }
0x24b0   :  { %v3866_v3 = vmul.f32 %v5559_v39, %v3850_v23 }
0x24b2   :  { %v3872_v8 = vmul.f32 %v4577_v40, %v3866_v3 }
0x24b3   :  { %v5561_v41 = vpop.eup %5560 }
0x24b4   :  { %v3867_v42 = vmul.f32 %v5561_v41, %v3851_v27  ;;  %v3878_v44 = vadd.f32 %v4578_v43, %v3872_v8 }
0x24b6   :  { %v3873_v9 = vmul.f32 %v4577_v40, %v3867_v42 }
0x24b8   :  { %v3879_v45 = vadd.f32 %v4578_v43, %v3873_v9 }
0x24ba   :  { %v3880_v46 = vpack.c.bf16 %v3879_v45, %v3878_v44 }
0x24bc   :  { %5317 = vmatmul.mubr.msk.bf16.vlgmr.msra.gmra.mxu0 %vm69_vm1, %v3880_v46 }
0x257c   :  { %v3956_v53 = vpop.f32.mrf.mxu0 }
0x257d   :  { %v3957_v55 = vadd.f32 %v4588_v50, %v3956_v53 }
0x257e   :  { %v5318_v54 = vpop.f32.mrf.mxu0 }
0x257f   :  { %v3963_v62 = vmax.f32 %v3957_v55, 0.0 }
0x2580   :  { %v3959_v56 = vpop.f32.mrf.mxu0 }
0x2581   :  { %v3960_v59 = vadd.f32 %v4588_v50, %v3959_v56 }
0x2582   :  { %v5319_v61 = vpop.f32.mrf.mxu0 }
0x2583   :  { %v3964_v63 = vmax.f32 %v3960_v59, 0.0 }
0x2585   :  { %v3965_v1 = vpack.c.bf16 %v3964_v63, %v3963_v62 }
0x2587   :  { %5337 = vmatmul.mubr.bf16.vlgmr.msra.gmra.mxu1 %v3965_v1 }
0x2647   :  { %v4070_v4 = vpop.f32.mrf.mxu1 }
0x2648   :  { %v4071_v5 = vadd.f32 %v4611_v0, %v4070_v4 }
0x2649   :  { %v5338_v6 = vpop.f32.mrf.mxu1 }
0x264a   :  { %v4077_v7 = vadd.f32 %v4071_v5, %v3878_v44 }
0x264b   :  { %v4073_v10 = vpop.f32.mrf.mxu1 }
0x264c   :  { %v4074_v12 = vadd.f32 %v4611_v0, %v4073_v10  ;;  %v4081_v13 = vsel %vm69_vm1, %v4077_v7, 0.0 }
0x264d   :  { %4082 = vadd.xlane.f32.xlu0 %v4081_v13  ;;  %v5339_v14 = vpop.f32.mrf.mxu1 }
0x264e   :  { %v4078_v15 = vadd.f32 %v4074_v12, %v3879_v45 }
0x2650   :  { %v4084_v16 = vsel %vm69_vm1, %v4078_v15, 0.0 }
0x2651   :  { %4085 = vadd.xlane.f32.xlu1 %v4084_v16 }
0x26d6   :  { %v4083_v17 = vpop.xlane.xlu0 %4082 }
0x26d7   :  { %v4087_v18 = vmul.f32 0.015625, %v4083_v17 }
0x26d9   :  { %v4089_v19 = vsub.f32 %v4077_v7, %v4087_v18 }
0x26da   :  { %v4086_v20 = vpop.xlane.xlu1 %4085 }
0x26db   :  { %v4088_v21 = vmul.f32 0.015625, %v4086_v20  ;;  %v4091_v22 = vmul.f32 %v4089_v19, %v4089_v19 }
0x26dd   :  { %v4090_v23 = vsub.f32 %v4078_v15, %v4088_v21  ;;  %v4093_v24 = vsel %vm69_vm1, %v4091_v22, 0.0 }
0x26de   :  { %4094 = vadd.xlane.f32.xlu0 %v4093_v24 }
0x26df   :  { %v4092_v25 = vmul.f32 %v4090_v23, %v4090_v23 }
0x26e1   :  { %v4096_v26 = vsel %vm69_vm1, %v4092_v25, 0.0 }
0x26e2   :  { %4097 = vadd.xlane.f32.xlu1 %v4096_v26 }
0x2767   :  { %v4095_v27 = vpop.xlane.xlu0 %4094 }
0x2768   :  { %v4099_v28 = vmul.f32 0.015625, %v4095_v27 }
0x276a   :  { %v4101_v51 = vadd.f32 1e-05, %v4099_v28 }
0x276b   :  { %v4098_v29 = vpop.xlane.xlu1 %4097 }
0x276c   :  { %5562 = vrsqrt.f32 %v4101_v51  ;;  %v4100_v52 = vmul.f32 0.015625, %v4098_v29 }
0x276e   :  { %v4102_v30 = vadd.f32 1e-05, %v4100_v52 }
0x2770   :  { %5564 = vrsqrt.f32 %v4102_v30 }
0x2779   :  { %v5563_v31 = vpop.eup %5562 }
0x277a   :  { %v4105_v33 = vmul.f32 %v5563_v31, %v4089_v19 }
0x277c   :  { %v4111_v34 = vmul.f32 %v4622_v32, %v4105_v33 }
0x277d   :  { %v5565_v11 = vpop.eup %5564 }
0x277e   :  { %v4117_v58 = vadd.f32 %v4623_v57, %v4111_v34  ;;  %v4106_v35 = vmul.f32 %v5565_v11, %v4090_v23 }
0x2780   :  { %4119 = vst.msk [vmem:[%s6649_s7] sm:$0xff] %vm69_vm1, %v4117_v58  ;;  %v4112_v60 = vmul.f32 %v4622_v32, %v4106_v35 }
0x2782   :  { %v4118_v36 = vadd.f32 %v4623_v57, %v4112_v60 }
0x2784   :  { %4120 = vst.msk [vmem:[%s6649_s7 + $0x8] sm:$0xff] %vm69_vm1, %v4118_v36 }

// kernel: goalflow_navi_forward.3
= control target key start
LH: loop header
LB: loop body
LE: loop exit
PB: predicated region body
PF: predicated region fallthrough
CT: control target
= control target key end

     0   :  { %s9574_s24 = smov 0   ;;  %s11234_s0 = inlined_call_operand.vmem [shape: bf16[2,64,512], index: 0, kind: input, shape index: {}]   ;;  %s11235_s1 = inlined_call_operand.vmem [shape: bf16[2,9,8,128], index: 1, kind: input, shape index: {}]   ;;  %s11236_s2 = inlined_call_operand.vmem [shape: f32[2,1,9], index: 2, kind: input, shape index: {}]   ;;  %s11237_s3 = inlined_call_operand.vmem [shape: f32[16,64], index: 3, kind: input, shape index: {}]   ;;  %s11238_s4 = inlined_call_operand.vmem [shape: bf16[512,64], index: 4, kind: input, shape index: {}]   ;;  %s11239_s5 = inlined_call_operand.vmem [shape: f32[64,64], index: 5, kind: input, shape index: {}]   ;;  %s11240_s6 = inlined_call_operand.vmem [shape: f32[9,64], index: 6, kind: input, shape index: {}]   ;;  %s11241_s7 = inlined_call_operand.vmem [shape: bf16[24,64,32], index: 7, kind: input, shape index: {}]   ;;  %s11242_s8 = inlined_call_operand.vmem [shape: f32[24,1,32], index: 8, kind: input, shape index: {}]   ;;  %s11243_s9 = inlined_call_operand.vmem [shape: bf16[8,32,64], index: 9, kind: input, shape index: {}]   ;;  %s11244_s10 = inlined_call_operand.vmem [shape: f32[2,10,128], index: 10, kind: input, shape index: {}]   ;;  %s11245_s11 = inlined_call_operand.vmem [shape: bf16[2,64,128], index: 11, kind: input, shape index: {}]   ;;  %s11246_s12 = inlined_call_operand.vmem [shape: bf16[2,128,64], index: 12, kind: input, shape index: {}]   ;;  %s11247_s13 = inlined_call_operand.vmem [shape: bf16[2,128,128], index: 13, kind: input, shape index: {}]   ;;  %s11248_s14 = inlined_call_operand.vmem [shape: f32[2,1,128], index: 14, kind: input, shape index: {}]   ;;  %s11249_s15 = inlined_call_operand.vmem [shape: bf16[11,128,128], index: 15, kind: input, shape index: {}]   ;;  %s11250_s16 = inlined_call_operand.vmem [shape: f32[2,1,128], index: 16, kind: input, shape index: {}]   ;;  %s11251_s17 = inlined_call_operand.vmem [shape: f32[2,2,16,128], index: 17, kind: output, shape index: {}]  }
   0x1   :  { %11252 = sst [smem:[#allocation2_spill]] %s11234_s0 }
   0x2   :  { %11253 = sst [smem:[#allocation3_spill]] %s11235_s1 }
   0x3 LB: > { %s6952_s25 = sadd.s32 4294967295, %s9480_s24   ;;  %p6956_p0 = scmp.ge.s32.totalorder %s9480_s24, 1  ;;  %s9480_s24 = sphi %s9574_s24, %s27_s24  }
   0x4   : > { %p505_p1 = scmp.lt.s32.totalorder %s9480_s24, 3 }
   0x6   : > { %p506_p2 = pnand %p6956_p0, %p505_p1 }
   0x7   : > { %p565_p3 = scmp.lt.s32.totalorder (!%p506_p2), %s6952_s25, 1  ;;  %s11254_s22 = sld [smem:[#allocation2_spill]] (!%p506_p2) }
   0x8   : > { %509 = sbr.rel (%p506_p2) target bundleno = 11297 (0x2c21), region = 88  ;;  %s11255_s30 = sld [smem:[#allocation3_spill]] (!%p506_p2) }
   0xd   : > { %v9101_v0 = vld [vmem:[%s11238_s4 + $0x78] sm:$0xff]   ;;  %v9105_v4 = vld [vmem:[%s11238_s4 + $0x70] sm:$0xff]   ;;  %v9109_v8 = vld [vmem:[%s11238_s4 + $0x68] sm:$0xff]   ;;  %s11257_s25 = smov (!%p565_p3, %s6952_s25), 1  ;;  %v9482_v34 = vmov 0.0   ;;  %vm1081_vm0 = vcmask 1040384  }
   0xe   : > { %v9102_v1 = vld [vmem:[%s11238_s4 + $0xf8] sm:$0xff]   ;;  %7812 = vmatprep.subr.bf16.mxu0 %v9101_v0  ;;  %v9106_v5 = vld [vmem:[%s11238_s4 + $0xf0] sm:$0xff]   ;;  %v9110_v9 = vld [vmem:[%s11238_s4 + $0xe8] sm:$0xff]   ;;  %s7810_s28 = sshll.u32 %s11257_s25, 7  ;;  %vm1077_vm1 = vcmask 72704   ;;  %s577_s21 = scalar_lea.vmem %s11236_s2, %s11257_s25  ;;  %vm9483_vm2 = vmmov 0  }
   0xf   : > { %v9103_v2 = vld [vmem:[%s11238_s4 + $0x38] sm:$0xff]   ;;  %7852 = vmatprep.subr.bf16.mxu1 %v9102_v1  ;;  %v9107_v6 = vld [vmem:[%s11238_s4 + $0x30] sm:$0xff]   ;;  %v9111_v10 = vld [vmem:[%s11238_s4 + $0x28] sm:$0xff]   ;;  %s9682_s23 = scalar_lea.vmem %s11254_s22, %s7810_s28  ;;  %vm1203_vm3 = vcmask 523264   ;;  %vm1414_vm4 = vcmask 261120   ;;  %vm1462_vm5 = vcmask 130048  }
  0x10   : > { %v9104_v3 = vld [vmem:[%s11238_s4 + $0xb8] sm:$0xff]   ;;  %7813 = vmatpush3.bf16.msra.mxu0 %v9103_v2  ;;  %v9108_v7 = vld [vmem:[%s11238_s4 + $0xb0] sm:$0xff]   ;;  %v9112_v11 = vld [vmem:[%s11238_s4 + $0xa8] sm:$0xff]   ;;  %s9090_s26 = smul.u32 36, %s11257_s25  ;;  %s7811_s27 = sshll.u32 %s11257_s25, 5  ;;  %vm6826_vm6 = vcmask 1043456  }
  0x11   : > { %7853 = vmatpush3.bf16.msra.mxu1 %v9104_v3  ;;  %7814 = vmatprep.subr.bf16.mxu0 %v9105_v4  ;;  %v9113_v12 = vld [vmem:[%s11238_s4 + $0x60] sm:$0xff]   ;;  %v9117_v16 = vld [vmem:[%s11238_s4 + $0x58] sm:$0xff]   ;;  %v9121_v20 = vld [vmem:[%s11238_s4 + $0x50] sm:$0xff]   ;;  %s11205_s1 = scalar_lea.vmem %s11251_s17, %s7811_s27  ;;  %vm6822_vm7 = vcmask 64512  }
  0x12   : > { %7854 = vmatprep.subr.bf16.mxu1 %v9106_v5  ;;  %v9114_v13 = vld [vmem:[%s11238_s4 + $0xe0] sm:$0xff]   ;;  %v9118_v17 = vld [vmem:[%s11238_s4 + $0xd8] sm:$0xff]   ;;  %v9122_v21 = vld [vmem:[%s11238_s4 + $0xd0] sm:$0xff]   ;;  %s10878_s18 = scalar_lea.vmem %s11255_s30, %s9090_s26 }
  0x13   : > { %v9115_v14 = vld [vmem:[%s11238_s4 + $0x20] sm:$0xff]   ;;  %v9119_v18 = vld [vmem:[%s11238_s4 + $0x18] sm:$0xff]   ;;  %v9123_v22 = vld [vmem:[%s11238_s4 + $0x10] sm:$0xff]  }
  0x14   : > { %7815 = vmatpush3.bf16.msra.mxu0 %v9107_v6  ;;  %v9116_v15 = vld [vmem:[%s11238_s4 + $0xa0] sm:$0xff]   ;;  %v9120_v19 = vld [vmem:[%s11238_s4 + $0x98] sm:$0xff]   ;;  %v9124_v23 = vld [vmem:[%s11238_s4 + $0x90] sm:$0xff]  }
  0x15   : > { %7855 = vmatpush3.bf16.msra.mxu1 %v9108_v7  ;;  %7816 = vmatprep.subr.bf16.mxu0 %v9109_v8  ;;  %v9125_v24 = vld [vmem:[%s11238_s4 + $0x48] sm:$0xff]   ;;  %v9129_v28 = vld [vmem:[%s11238_s4 + $0x40] sm:$0xff]   ;;  %v9157_v52 = vld [vmem:[%s11241_s7 + $0x58] sm:$0xff]  }
  0x16   : > { %7856 = vmatprep.subr.bf16.mxu1 %v9110_v9  ;;  %v9126_v25 = vld [vmem:[%s11238_s4 + $0xc8] sm:$0xff]   ;;  %v9130_v29 = vld [vmem:[%s11238_s4 + $0xc0] sm:$0xff]   ;;  %v9159_v53 = vld [vmem:[%s11241_s7 + $0x18] sm:$0xff]  }
  0x17   : > { %v9127_v26 = vld [vmem:[%s11238_s4 + $0x8] sm:$0xff]   ;;  %v9131_v30 = vld [vmem:[%s11238_s4] sm:$0xff]   ;;  %v9158_v54 = vld [vmem:[%s11241_s7 + $0x50] sm:$0xff]  }
  0x18   : > { %7817 = vmatpush3.bf16.msra.mxu0 %v9111_v10  ;;  %v9128_v27 = vld [vmem:[%s11238_s4 + $0x88] sm:$0xff]   ;;  %v9132_v31 = vld [vmem:[%s11238_s4 + $0x80] sm:$0xff]   ;;  %v9160_v55 = vld [vmem:[%s11241_s7 + $0x10] sm:$0xff]  }
  0x19   : > { %7857 = vmatpush3.bf16.msra.mxu1 %v9112_v11  ;;  %7818 = vmatprep.subr.bf16.mxu0 %v9113_v12  ;;  %v9133_v32 = vld [vmem:[%s9682_s23] ss:$16 sps:$4 sm:$0xff]   ;;  %v9135_v33 = vld [vmem:[%s9682_s23 + $0x4] ss:$16 sps:$4 sm:$0xff]   ;;  %v9136_v35 = vld [vmem:[%s9682_s23 + $0x8] ss:$16 sps:$4 sm:$0xff]  }
  0x1a   : > { %7858 = vmatprep.subr.bf16.mxu1 %v9114_v13  ;;  %v9138_v36 = vld [vmem:[%s9682_s23 + $0xc] ss:$16 sps:$4 sm:$0xff]   ;;  %v1076_v37 = vld [vmem:[%s11240_s6 + $0x8] sm:$0x1]  ;;  %976 = vmatprep.mubr.bf16.mxu0 %v9135_v33  ;;  %v9139_v38 = vld [vmem:[%s9682_s23 + $0x24] ss:$16 sps:$4 sm:$0xff]  }
  0x1b   : > { %1041 = vmatprep.mubr.bf16.mxu1 %v9138_v36  ;;  %v9141_v39 = vld [vmem:[%s9682_s23 + $0x2c] ss:$16 sps:$4 sm:$0xff]   ;;  %v9143_v40 = vld [vmem:[%s9682_s23 + $0x20] ss:$16 sps:$4 sm:$0xff]   ;;  %v9144_v41 = vld [vmem:[%s9682_s23 + $0x28] ss:$16 sps:$4 sm:$0xff]  }
  0x1c   : > { %7819 = vmatpush3.bf16.msra.mxu0 %v9115_v14  ;;  %v1075_v42 = vld [vmem:[%s11240_s6] sm:$0xff]  ;;  %v9147_v44 = vld [vmem:[%s9682_s23 + $0x4c] ss:$16 sps:$4 sm:$0xff]   ;;  %v9150_v46 = vld [vmem:[%s9682_s23 + $0x48] ss:$16 sps:$4 sm:$0xff]  }
  0x1d   : > { %7859 = vmatpush3.bf16.msra.mxu1 %v9116_v15  ;;  %7820 = vmatprep.subr.bf16.mxu0 %v9117_v16  ;;  %v9145_v43 = vld [vmem:[%s9682_s23 + $0x44] ss:$16 sps:$4 sm:$0xff]   ;;  %v9149_v45 = vld [vmem:[%s9682_s23 + $0x40] ss:$16 sps:$4 sm:$0xff]   ;;  %v9153_v48 = vld [vmem:[%s9682_s23 + $0x6c] ss:$16 sps:$4 sm:$0xff]  }
  0x1e   : > { %7860 = vmatprep.subr.bf16.mxu1 %v9118_v17  ;;  %v9151_v47 = vld [vmem:[%s9682_s23 + $0x64] ss:$16 sps:$4 sm:$0xff]   ;;  %v9155_v49 = vld [vmem:[%s9682_s23 + $0x60] ss:$16 sps:$4 sm:$0xff]   ;;  %v9156_v50 = vld [vmem:[%s9682_s23 + $0x68] ss:$16 sps:$4 sm:$0xff]  }
  0x1f   : > { %v1074_v51 = vld [vmem:[%s577_s21] sm:$0x1]  ;;  %v9162_v56 = vld [vmem:[%s11241_s7 + $0x8] sm:$0xff]   ;;  %v666_v15 = vld [vmem:[%s11239_s5 + $0x10] sm:$0xff] }
  0x20   : > { %7821 = vmatpush3.bf16.msra.mxu0 %v9119_v18  ;;  %v9161_v57 = vld [vmem:[%s11241_s7 + $0x48] sm:$0xff]   ;;  %v9163_v58 = vld [vmem:[%s11241_s7] sm:$0xff]  }
  0x21   : > { %7861 = vmatpush3.bf16.msra.mxu1 %v9120_v19  ;;  %7822 = vmatprep.subr.bf16.mxu0 %v9121_v20  ;;  %v9164_v59 = vld [vmem:[%s11241_s7 + $0x40] sm:$0xff]   ;;  %v665_v6 = vld [vmem:[%s11239_s5 + $0x8] sm:$0xff] }
  0x22   : > { %7862 = vmatprep.subr.bf16.mxu1 %v9122_v21  ;;  %v664_v62 = vld [vmem:[%s11239_s5] sm:$0xff] }
  0x24   : > { %7823 = vmatpush3.bf16.msra.mxu0 %v9123_v22 }
  0x25   : > { %7863 = vmatpush3.bf16.msra.mxu1 %v9124_v23  ;;  %7824 = vmatprep.subr.bf16.mxu0 %v9125_v24 }
  0x26   : > { %7864 = vmatprep.subr.bf16.mxu1 %v9126_v25  ;;  %v667_v25 = vld [vmem:[%s11239_s5 + $0x18] sm:$0xff] }
  0x28   : > { %7825 = vmatpush3.bf16.msra.mxu0 %v9127_v26 }
  0x29   : > { %7865 = vmatpush3.bf16.msra.mxu1 %v9128_v27  ;;  %7826 = vmatprep.subr.bf16.mxu0 %v9129_v28 }
  0x2a   : > { %7866 = vmatprep.subr.bf16.mxu1 %v9130_v29 }
  0x2c   : > { %7827 = vmatpush3.bf16.msra.mxu0 %v9131_v30 }
  0x2d   : > { %7867 = vmatpush3.bf16.msra.mxu1 %v9132_v31  ;;  %8272 = vmatprep.subr.bf16.mxu0 %v9482_v34 }
  0x2e   : > { %8253 = vmatprep.subr.mxu1 %v9482_v34 }
  0x2f   : > { %977 = vmatmul.mubr.bf16.vlgmr.msra.gmra.mxu0 %v9133_v32 }
  0x30   : > { %1042 = vmatmul.mubr.bf16.vlgmr.msra.gmra.mxu1 %v9136_v35  ;;  %984 = vmatprep.mubr.bf16.mxu0 %v9139_v38  ;;  %v668_v35 = vld [vmem:[%s11239_s5 + $0x20] sm:$0xff] }
  0x31   : > { %8254 = vmatpush3.msk.msra.mxu1 %vm1081_vm0, %v1076_v37  ;;  %1049 = vmatprep.mubr.bf16.mxu1 %v9141_v39 }
  0x32   : > { %8255 = vmatprep.subr.mxu1 %v9482_v34  ;;  %8273 = vmatpush3.bf16.msra.mxu0 %v9157_v52 }
  0x33   : > { %8256 = vmatpush3.msra.mxu1 %v1075_v42  ;;  %8274 = vmatprep.subr.bf16.mxu0 %v9482_v34 }
  0x34   : > { %8260 = vmatprep.subr.bf16.mxu1 %v9482_v34 }
  0x36   : > { %8275 = vmatpush3.bf16.msra.mxu0 %v9158_v54 }
  0x37   : > { %985 = vmatmul.mubr.bf16.gmra.mxu0 %v9143_v40  ;;  %8276 = vmatprep.subr.bf16.mxu0 %v9482_v34 }
  0x38   : > { %1050 = vmatmul.mubr.bf16.gmra.mxu1 %v9144_v41  ;;  %992 = vmatprep.mubr.bf16.mxu0 %v9145_v43 }
  0x39   : > { %1057 = vmatprep.mubr.bf16.mxu1 %v9147_v44 }
  0x3a   : > { %8277 = vmatpush3.bf16.msra.mxu0 %v9161_v57 }
  0x3b   : > { %8278 = vmatprep.subr.bf16.mxu0 %v9482_v34 }
  0x3e   : > { %8279 = vmatpush3.bf16.msra.mxu0 %v9164_v59 }
  0x3f   : > { %993 = vmatmul.mubr.bf16.gmra.mxu0 %v9149_v45  ;;  %8296 = vmatprep.subr.bf16.mxu0 %v9482_v34  ;;  %v669_v45 = vld [vmem:[%s11239_s5 + $0x28] sm:$0xff] }
  0x40   : > { %1058 = vmatmul.mubr.bf16.gmra.mxu1 %v9150_v46  ;;  %1000 = vmatprep.mubr.bf16.mxu0 %v9151_v47  ;;  %v1157_v47 = vlaneseq }
  0x41   : > { %1065 = vmatprep.mubr.bf16.mxu1 %v9153_v48 }
  0x42   : > { %v1158_v57 = vshrl.u32 %v1157_v47, 7 }
  0x47   : > { %1001 = vmatmul.mubr.bf16.gmra.mxu0 %v9155_v49 }
  0x48   : > { %1066 = vmatmul.mubr.bf16.gmra.mxu1 %v9156_v50  ;;  %8280 = vmatprep.mubr.msk.bf16.mxu0 %vm9483_vm2, %v9482_v34 }
  0x49   : > { %8257 = vmatprep.mubr.msk.f32.mxu1 %vm9483_vm2, %v9482_v34 }
  0x50   : > { %8258 = vmatmul.mubr.msk.f32.vlgmr.msra.gmra.mxu1 %vm1077_vm1, %v1074_v51 }
  0x51   : > { %8268 = vmatprep.mubr.msk.bf16.mxu1 %vm9483_vm2, %v9482_v34  ;;  %8261 = vmatpush3.bf16.msra.mxu1 %v9159_v53 }
  0x52   : > { %8262 = vmatprep.subr.bf16.mxu1 %v9482_v34 }
  0x55   : > { %8263 = vmatpush3.bf16.msra.mxu1 %v9160_v55  ;;  %v670_v55 = vld [vmem:[%s11239_s5 + $0x30] sm:$0xff] }
  0x56   : > { %8264 = vmatprep.subr.bf16.mxu1 %v9482_v34 }
  0x59   : > { %8265 = vmatpush3.bf16.msra.mxu1 %v9162_v56 }
  0x5a   : > { %8266 = vmatprep.subr.bf16.mxu1 %v9482_v34 }
  0x5d   : > { %8267 = vmatpush3.bf16.msra.mxu1 %v9163_v58 }
  0x5e   : > { %8284 = vmatprep.subr.bf16.mxu1 %v9482_v34 }
  0xef   : > { %v7828_v60 = vpop.f32.mrf.mxu0 }
  0xf0   : > { %v7868_v61 = vpop.f32.mrf.mxu1 }
  0xf1   : > { %v7829_v63 = vpop.f32.mrf.mxu0 }
  0xf2   : > { %v7830_v0 = vadd.f32 %v7829_v63, %v7828_v60  ;;  %v7869_v1 = vpop.f32.mrf.mxu1 }
  0xf3   : > { %v7831_v2 = vpop.f32.mrf.mxu0  ;;  %v7870_v4 = vadd.f32 %v7869_v1, %v7868_v61 }
  0xf4   : > { %v979_v3 = vadd.f32 %v7830_v0, %v664_v62  ;;  %v7871_v5 = vpop.f32.mrf.mxu1 }
  0xf5   : > { %v7832_v7 = vpop.f32.mrf.mxu0 }
  0xf6   : > { %v1044_v8 = vadd.f32 %v7870_v4, %v979_v3  ;;  %v7833_v9 = vadd.f32 %v7832_v7, %v7831_v2  ;;  %v7872_v10 = vpop.f32.mrf.mxu1  ;;  %v671_v2 = vld [vmem:[%s11239_s5 + $0x38] sm:$0xff]  ;;  %v1159_v4 = vsub.s32 0, %v1158_v57  ;;  %v9174_v57 = vld [vmem:[%s11241_s7 + $0xb0] sm:$0xff]  }
  0xf7   : > { %v7873_v11 = vadd.f32 %v7872_v10, %v7871_v5  ;;  %v7834_v12 = vpop.f32.mrf.mxu0 }
  0xf8   : > { %v982_v13 = vadd.f32 %v7833_v9, %v665_v6  ;;  %v7874_v14 = vpop.f32.mrf.mxu1 }
  0xf9   : > { %v7835_v16 = vpop.f32.mrf.mxu0 }
  0xfa   : > { %v1047_v17 = vadd.f32 %v7873_v11, %v982_v13  ;;  %v7836_v18 = vadd.f32 %v7835_v16, %v7834_v12  ;;  %v7875_v19 = vpop.f32.mrf.mxu1  ;;  %v1155_v11 = vld [vmem:[%s11237_s3] sm:$0xff]  ;;  %v1156_v12 = vld [vmem:[%s11237_s3 + $0x8] sm:$0xff] }
  0xfb   : > { %v7837_v20 = vpop.f32.mrf.mxu0  ;;  %v7876_v23 = vadd.f32 %v7875_v19, %v7874_v14  ;;  %v9165_v19 = vld [vmem:[%s11241_s7 + $0x98] sm:$0xff]  }
  0xfc   : > { %v9767_v21 = vpack.c.bf16 %v1047_v17, %v1044_v8  ;;  %v987_v22 = vadd.f32 %v7836_v18, %v666_v15  ;;  %v7877_v24 = vpop.f32.mrf.mxu1 }
  0xfd   : > { %v7838_v26 = vpop.f32.mrf.mxu0 }
  0xfe   : > { %v1052_v27 = vadd.f32 %v7876_v23, %v987_v22  ;;  %v7839_v28 = vadd.f32 %v7838_v26, %v7837_v20  ;;  %v7878_v29 = vpop.f32.mrf.mxu1  ;;  %v9166_v22 = vld [vmem:[%s11241_s7 + $0x90] sm:$0xff]   ;;  %v9167_v23 = vld [vmem:[%s11241_s7 + $0x88] sm:$0xff]  }
  0xff   : > { %v7879_v30 = vadd.f32 %v7878_v29, %v7877_v24  ;;  %v7840_v31 = vpop.f32.mrf.mxu0  ;;  %v9168_v24 = vld [vmem:[%s11241_s7 + $0x80] sm:$0xff]  }
 0x100   : > { %v990_v32 = vadd.f32 %v7839_v28, %v667_v25  ;;  %v7880_v33 = vpop.f32.mrf.mxu1 }
 0x101   : > { %v7841_v36 = vpop.f32.mrf.mxu0 }
 0x102   : > { %v1055_v37 = vadd.f32 %v7879_v30, %v990_v32  ;;  %v7842_v38 = vadd.f32 %v7841_v36, %v7840_v31  ;;  %v7881_v39 = vpop.f32.mrf.mxu1 }
 0x103   : > { %v7843_v40 = vpop.f32.mrf.mxu0  ;;  %v7882_v43 = vadd.f32 %v7881_v39, %v7880_v33  ;;  %v7012_v39 = vld [vmem:[%s11242_s8] ss:$0 sm:$0xff] }
 0x104   : > { %v9775_v41 = vpack.c.bf16 %v1055_v37, %v1052_v27  ;;  %v995_v42 = vadd.f32 %v7842_v38, %v668_v35  ;;  %v7883_v44 = vpop.f32.mrf.mxu1  ;;  %v7027_v27 = vld [vmem:[%s11242_s8 + $0x2] ss:$0 sm:$0xff] }
 0x105   : > { %v7844_v46 = vpop.f32.mrf.mxu0 }
 0x106   : > { %v1060_v48 = vadd.f32 %v7882_v43, %v995_v42  ;;  %v7845_v49 = vadd.f32 %v7844_v46, %v7843_v40  ;;  %v7884_v50 = vpop.f32.mrf.mxu1  ;;  %v9169_v43 = vld [vmem:[%s11241_s7 + $0x38] sm:$0xff]   ;;  %v7042_v46 = vld [vmem:[%s11242_s8 + $0x4] ss:$0 sm:$0xff] }
 0x107   : > { %v7885_v51 = vadd.f32 %v7884_v50, %v7883_v44  ;;  %v7846_v52 = vpop.f32.mrf.mxu0 }
 0x108   : > { %v998_v53 = vadd.f32 %v7845_v49, %v669_v45  ;;  %v7886_v54 = vpop.f32.mrf.mxu1 }
 0x109   : > { %v7847_v56 = vpop.f32.mrf.mxu0 }
 0x10a   : > { %v1063_v58 = vadd.f32 %v7885_v51, %v998_v53  ;;  %v7848_v59 = vadd.f32 %v7847_v56, %v7846_v52  ;;  %v7887_v60 = vpop.f32.mrf.mxu1  ;;  %v9171_v53 = vld [vmem:[%s11241_s7 + $0x28] sm:$0xff]   ;;  %v9173_v56 = vld [vmem:[%s11241_s7 + $0xb8] sm:$0xff]  }
 0x10b   : > { %v7849_v61 = vpop.f32.mrf.mxu0  ;;  %v7888_v0 = vadd.f32 %v7887_v60, %v7886_v54 }
 0x10c   : > { %v9783_v62 = vpack.c.bf16 %v1063_v58, %v1060_v48  ;;  %v1003_v63 = vadd.f32 %v7848_v59, %v670_v55  ;;  %v7889_v1 = vpop.f32.mrf.mxu1  ;;  %v9170_v48 = vld [vmem:[%s11241_s7 + $0x30] sm:$0xff]   ;;  %v9172_v55 = vld [vmem:[%s11241_s7 + $0x20] sm:$0xff]   ;;  %v9175_v58 = vld [vmem:[%s11241_s7 + $0xa8] sm:$0xff]  }
 0x10d   : > { %v7850_v3 = vpop.f32.mrf.mxu0  ;;  %v9176_v59 = vld [vmem:[%s11241_s7 + $0xa0] sm:$0xff]  }
 0x10e   : > { %v1068_v5 = vadd.f32 %v7888_v0, %v1003_v63  ;;  %v7851_v6 = vadd.f32 %v7850_v3, %v7849_v61  ;;  %v7890_v7 = vpop.f32.mrf.mxu1 }
 0x10f   : > { %v7891_v8 = vadd.f32 %v7890_v7, %v7889_v1 }
 0x110   : > { %v1006_v9 = vadd.f32 %v7851_v6, %v671_v2  ;;  %v1151_v10 = vpop.f32.mrf.mxu1 }
 0x111   : > { %v1160_v13 = vrot.slane %v1151_v10, %v1159_v4  ;;  %v7059_v4 = vld [vmem:[%s11242_s8 + $0x1] ss:$0 sm:$0xff] }
 0x112   : > { %v1071_v14 = vadd.f32 %v7891_v8, %v1006_v9  ;;  %v8259_v15 = vpop.f32.mrf.mxu1 }
 0x113   : > { %v9794_v16 = vadd.f32 %v1160_v13, %v1155_v11  ;;  %v9796_v17 = vadd.f32 %v1160_v13, %v1156_v12  ;;  %v7089_v12 = vld [vmem:[%s11242_s8 + $0x5] ss:$0 sm:$0xff] }
 0x114   : > { %v9798_v18 = vpack.c.bf16 %v1071_v14, %v1068_v5 }
 0x115   : > { %v9805_v20 = vpack.c.bf16 %v9796_v17, %v9794_v16 }
 0x117   : > { %8269 = vmatmul.mubr.msk.bf16.vlgmr.msra.gmra.mxu1 %vm1203_vm3, %v9805_v20  ;;  %8281 = vmatmul.mubr.msk.bf16.vlgmr.msra.gmra.mxu0 %vm1203_vm3, %v9805_v20 }
 0x118   : > { %8285 = vmatpush3.bf16.msra.mxu1 %v9165_v19  ;;  %8292 = vmatprep.mubr.msk.bf16.mxu1 %vm9483_vm2, %v9482_v34 }
 0x119   : > { %8286 = vmatprep.subr.bf16.mxu1 %v9482_v34  ;;  %8298 = vmatprep.mubr.msk.bf16.mxu0 %vm9483_vm2, %v9482_v34 }
 0x11c   : > { %8287 = vmatpush3.bf16.msra.mxu1 %v9166_v22 }
 0x11d   : > { %8288 = vmatprep.subr.bf16.mxu1 %v9482_v34 }
 0x120   : > { %8289 = vmatpush3.bf16.msra.mxu1 %v9167_v23 }
 0x121   : > { %8290 = vmatprep.subr.bf16.mxu1 %v9482_v34 }
 0x124   : > { %8291 = vmatpush3.bf16.msra.mxu1 %v9168_v24 }
 0x125   : > { %8302 = vmatprep.subr.bf16.mxu1 %v9482_v34 }
 0x127   : > { %8293 = vmatmul.mubr.msk.bf16.vlgmr.msra.gmra.mxu1 %vm1203_vm3, %v9805_v20 }
 0x128   : > { %8304 = vmatprep.mubr.msk.bf16.mxu1 %vm9483_vm2, %v9482_v34 }
 0x1d7   : > { %v1241_v25 = vpop.f32.mrf.mxu1  ;;  %v1323_v26 = vpop.f32.mrf.mxu0 }
 0x1d8   : > { %v1324_v32 = vadd.f32 %v7027_v27, %v1323_v26  ;;  %v1242_v42 = vadd.f32 %v7012_v39, %v1241_v25 }
 0x1d9   : > { %v8270_v28 = vpop.f32.mrf.mxu1  ;;  %v8282_v29 = vpop.f32.mrf.mxu0 }
 0x1db   : > { %v1244_v30 = vpop.f32.mrf.mxu1  ;;  %v1326_v31 = vpop.f32.mrf.mxu0 }
 0x1dc   : > { %v1327_v33 = vadd.f32 %v7027_v27, %v1326_v31  ;;  %v1245_v40 = vadd.f32 %v7012_v39, %v1244_v30 }
 0x1dd   : > { %v8271_v35 = vpop.f32.mrf.mxu1  ;;  %v8283_v36 = vpop.f32.mrf.mxu0 }
 0x1de   : > { %v1413_v37 = vpack.c.bf16 %v1327_v33, %v1324_v32  ;;  %v1412_v44 = vpack.c.bf16 %v1245_v40, %v1242_v42  ;;  %v9177_v42 = vld [vmem:[%s11241_s7 + $0x78] sm:$0xff]  }
 0x1e0   : > { %v1419_v38 = vsel %vm1414_vm4, %v1413_v37, 0 }
 0x1e1   : > { %8297 = vmatpush3.bf16.xpose.msra.mxu0 %v1419_v38 }
 0x1e2   : > { %8308 = vmatprep.subr.bf16.mxu0 %v9482_v34 }
 0x1e7   : > { %v1405_v45 = vpop.f32.mrf.mxu1 }
 0x1e8   : > { %8299 = vmatmul.mubr.msk.bf16.vlgmr.msra.gmra.mxu0 %vm1414_vm4, %v1412_v44  ;;  %v1406_v50 = vadd.f32 %v7042_v46, %v1405_v45  ;;  %v9178_v44 = vld [vmem:[%s11241_s7 + $0x70] sm:$0xff]   ;;  %v9179_v45 = vld [vmem:[%s11241_s7 + $0x68] sm:$0xff]  }
 0x1e9   : > { %v8294_v47 = vpop.f32.mrf.mxu1  ;;  %8309 = vmatpush3.bf16.msra.mxu0 %v9169_v43  ;;  %8316 = vmatprep.mubr.msk.bf16.mxu0 %vm9483_vm2, %v9482_v34 }
 0x1ea   : > { %8310 = vmatprep.subr.bf16.mxu0 %v9482_v34 }
 0x1eb   : > { %v1408_v49 = vpop.f32.mrf.mxu1 }
 0x1ec   : > { %v1409_v51 = vadd.f32 %v7042_v46, %v1408_v49  ;;  %v9180_v46 = vld [vmem:[%s11241_s7 + $0x60] sm:$0xff]  }
 0x1ed   : > { %v8295_v52 = vpop.f32.mrf.mxu1  ;;  %8311 = vmatpush3.bf16.msra.mxu0 %v9170_v48 }
 0x1ee   : > { %v1486_v54 = vpack.c.bf16 %v1409_v51, %v1406_v50  ;;  %8312 = vmatprep.subr.bf16.mxu0 %v9482_v34 }
 0x1f0   : > { %8303 = vmatpush3.bf16.msra.mxu1 %v1486_v54 }
 0x1f1   : > { %8313 = vmatpush3.bf16.msra.mxu0 %v9171_v53  ;;  %8320 = vmatprep.subr.bf16.mxu1 %v9482_v34  ;;  %v7074_v53 = vld [vmem:[%s11242_s8 + $0x3] ss:$0 sm:$0xff] }
 0x1f2   : > { %8314 = vmatprep.subr.bf16.mxu0 %v9482_v34 }
 0x1f5   : > { %8315 = vmatpush3.bf16.msra.mxu0 %v9172_v55 }
 0x1f6   : > { %8332 = vmatprep.subr.bf16.mxu0 %v9482_v34 }
 0x1f8   : > { %8317 = vmatmul.mubr.msk.bf16.vlgmr.msra.gmra.mxu0 %vm1203_vm3, %v9805_v20 }
 0x1f9   : > { %8333 = vmatpush3.bf16.msra.mxu0 %v9173_v56  ;;  %8340 = vmatprep.mubr.msk.bf16.mxu0 %vm9483_vm2, %v9482_v34 }
 0x1fa   : > { %8334 = vmatprep.subr.bf16.mxu0 %v9482_v34 }
 0x1fd   : > { %8335 = vmatpush3.bf16.msra.mxu0 %v9174_v57 }
 0x1fe   : > { %8336 = vmatprep.subr.bf16.mxu0 %v9482_v34 }
 0x201   : > { %8337 = vmatpush3.bf16.msra.mxu0 %v9175_v58 }
 0x202   : > { %8338 = vmatprep.subr.bf16.mxu0 %v9482_v34 }
 0x205   : > { %8339 = vmatpush3.bf16.msra.mxu0 %v9176_v59 }
 0x206   : > { %8356 = vmatprep.subr.bf16.mxu0 %v9482_v34 }
 0x208   : > { %8341 = vmatmul.mubr.msk.bf16.vlgmr.msra.gmra.mxu0 %vm1203_vm3, %v9805_v20 }
 0x209   : > { %8360 = vmatprep.mubr.msk.bf16.mxu0 %vm9483_vm2, %v9482_v34 }
 0x2a8   : > { %v1455_v60 = vpop.f32.mrf.mxu0 }
 0x2a9   : > { %v1463_v61 = vsel %vm1462_vm5, %v1455_v60, -inf }
 0x2aa   : > { %1464 = vmax.xlane.f32.xlu0 %v1463_v61  ;;  %v8300_v63 = vpop.f32.mrf.mxu0 }
 0x2ac   : > { %v1458_v0 = vpop.f32.mrf.mxu0 }
 0x2ad   : > { %v1466_v1 = vsel %vm1462_vm5, %v1458_v0, -inf }
 0x2ae   : > { %1467 = vmax.xlane.f32.xlu0 %v1466_v1  ;;  %v8301_v2 = vpop.f32.mrf.mxu0 }
 0x2b8   : > { %v1611_v3 = vpop.f32.mrf.mxu0 }
 0x2b9   : > { %v9892_v7 = vadd.f32 %v7059_v4, %v1611_v3 }
 0x2ba   : > { %v8318_v5 = vpop.f32.mrf.mxu0 }
 0x2bc   : > { %v1614_v6 = vpop.f32.mrf.mxu0 }
 0x2bd   : > { %v9894_v8 = vadd.f32 %v7059_v4, %v1614_v6 }
 0x2be   : > { %v8319_v9 = vpop.f32.mrf.mxu0 }
 0x2bf   : > { %v1782_v10 = vpack.c.bf16 %v9894_v8, %v9892_v7 }
 0x2c8   : > { %v1775_v11 = vpop.f32.mrf.mxu0 }
 0x2c9   : > { %v1776_v15 = vadd.f32 %v7089_v12, %v1775_v11 }
 0x2ca   : > { %v8342_v13 = vpop.f32.mrf.mxu0 }
 0x2cc   : > { %v1778_v14 = vpop.f32.mrf.mxu0 }
 0x2cd   : > { %v1779_v19 = vadd.f32 %v7089_v12, %v1778_v14 }
 0x2ce   : > { %v8343_v22 = vpop.f32.mrf.mxu0 }
 0x2cf   : > { %v1854_v23 = vpack.c.bf16 %v1779_v19, %v1776_v15 }
 0x333   : > { %v1465_v24 = vpop.xlane.xlu0 %1464 }
 0x334   : > { %v1469_v25 = vsub.f32 %v1455_v60, %v1465_v24  ;;  %v9181_v24 = vld [vmem:[%s11243_s9 + $0x8] sm:$0xff]  }
 0x336   : > { %v1471_v26 = vmul.f32 1.442695, %v1469_v25 }
 0x337   : > { %v1468_v27 = vpop.xlane.xlu0 %1467 }
 0x338   : > { %9386 = vpow2.f32 %v1471_v26  ;;  %v1470_v28 = vsub.f32 %v1458_v0, %v1468_v27  ;;  %v9182_v26 = vld [vmem:[%s11243_s9] sm:$0xff]   ;;  %v9183_v27 = vld [vmem:[%s11241_s7 + $0x118] sm:$0xff]  }
 0x33a   : > { %v1473_v29 = vmul.f32 1.442695, %v1470_v28  ;;  %v9184_v28 = vld [vmem:[%s11241_s7 + $0x110] sm:$0xff]  }
 0x33c   : > { %9388 = vpow2.f32 %v1473_v29  ;;  %v9185_v29 = vld [vmem:[%s11241_s7 + $0x108] sm:$0xff]  }
 0x345   : > { %v9387_v30 = vpop.eup %9386 }
 0x346   : > { %v1475_v31 = vsel %vm1462_vm5, %v9387_v30, 0.0 }
 0x347   : > { %1476 = vadd.xlane.f32.xlu1 %v1475_v31  ;;  %v9187_v31 = vld [vmem:[%s11243_s9 + $0x18] sm:$0xff]  }
 0x348   : > { %8357 = vmatpush3.bf16.msra.mxu0 %v9187_v31 }
 0x349   : > { %v9389_v32 = vpop.eup %9388  ;;  %8358 = vmatprep.subr.bf16.mxu0 %v9482_v34 }
 0x34a   : > { %v1478_v33 = vsel %vm1462_vm5, %v9389_v32, 0.0 }
 0x34b   : > { %1479 = vadd.xlane.f32.xlu1 %v1478_v33 }
 0x3d0   : > { %v1477_v35 = vpop.xlane.xlu1 %1476 }
 0x3d1   : > { %9390 = vrcp.f32 %v1477_v35 }
 0x3d4   : > { %v1480_v36 = vpop.xlane.xlu1 %1479 }
 0x3d5   : > { %9392 = vrcp.f32 %v1480_v36 }
 0x3de   : > { %v9391_v37 = vpop.eup %9390 }
 0x3df   : > { %v1483_v39 = vmul.f32 %v9391_v37, %v9387_v30  ;;  %v9186_v30 = vld [vmem:[%s11241_s7 + $0x100] sm:$0xff]  }
 0x3e2   : > { %v9393_v38 = vpop.eup %9392 }
 0x3e3   : > { %v1484_v40 = vmul.f32 %v9393_v38, %v9389_v32  ;;  %v9188_v32 = vld [vmem:[%s11243_s9 + $0x10] sm:$0xff]  }
 0x3e4   : > { %8359 = vmatpush3.bf16.msra.mxu0 %v9188_v32  ;;  %v9190_v32 = vld [vmem:[%s11241_s7 + $0xd0] sm:$0xff]  }
 0x3e5   : > { %v1485_v43 = vpack.c.bf16 %v1484_v40, %v1483_v39  ;;  %8372 = vmatprep.subr.bf16.mxu0 %v9482_v34 }
 0x3e7   : > { %8305 = vmatmul.mubr.msk.bf16.vlgmr.msra.gmra.mxu1 %vm1462_vm5, %v1485_v43 }
 0x3e8   : > { %8321 = vmatpush3.bf16.msra.mxu1 %v9177_v42  ;;  %8328 = vmatprep.mubr.msk.bf16.mxu1 %vm9483_vm2, %v9482_v34 }
 0x3e9   : > { %8322 = vmatprep.subr.bf16.mxu1 %v9482_v34 }
 0x3ec   : > { %8323 = vmatpush3.bf16.msra.mxu1 %v9178_v44 }
 0x3ed   : > { %8324 = vmatprep.subr.bf16.mxu1 %v9482_v34 }
 0x3f0   : > { %8325 = vmatpush3.bf16.msra.mxu1 %v9179_v45 }
 0x3f1   : > { %8326 = vmatprep.subr.bf16.mxu1 %v9482_v34 }
 0x3f4   : > { %8327 = vmatpush3.bf16.msra.mxu1 %v9180_v46 }
 0x3f5   : > { %8344 = vmatprep.subr.bf16.mxu1 %v9482_v34 }
 0x3f7   : > { %8329 = vmatmul.mubr.msk.bf16.vlgmr.msra.gmra.mxu1 %vm1203_vm3, %v9805_v20 }
 0x3f8   : > { %8346 = vmatprep.mubr.msk.bf16.mxu1 %vm9483_vm2, %v9482_v34 }
 0x4a7   : > { %v1524_v47 = vpop.f32.mrf.mxu1 }
 0x4a9   : > { %v8306_v48 = vpop.f32.mrf.mxu1 }
 0x4ab   : > { %v1527_v49 = vpop.f32.mrf.mxu1 }
 0x4ac   : > { %v1531_v50 = vpack.c.bf16 %v1527_v49, %v1524_v47 }
 0x4ad   : > { %v8307_v51 = vpop.f32.mrf.mxu1 }
 0x4b7   : > { %v1693_v52 = vpop.f32.mrf.mxu1 }
 0x4b8   : > { %v1694_v56 = vadd.f32 %v7074_v53, %v1693_v52 }
 0x4b9   : > { %v8330_v54 = vpop.f32.mrf.mxu1 }
 0x4bb   : > { %v1696_v55 = vpop.f32.mrf.mxu1 }
 0x4bc   : > { %v1697_v57 = vadd.f32 %v7074_v53, %v1696_v55 }
 0x4bd   : > { %v8331_v58 = vpop.f32.mrf.mxu1 }
 0x4be   : > { %v1783_v59 = vpack.c.bf16 %v1697_v57, %v1694_v56 }
 0x4c0   : > { %v1788_v20 = vsel %vm1414_vm4, %v1783_v59, 0 }
 0x4c1   : > { %8345 = vmatpush3.bf16.xpose.msra.mxu1 %v1788_v20 }
 0x4c2   : > { %8350 = vmatprep.subr.bf16.mxu1 %v9482_v34 }
 0x4c8   : > { %8347 = vmatmul.mubr.msk.bf16.vlgmr.msra.gmra.mxu1 %vm1414_vm4, %v1782_v10 }
 0x4c9   : > { %8351 = vmatpush3.bf16.msra.mxu1 %v1854_v23  ;;  %8352 = vmatprep.mubr.msk.bf16.mxu1 %vm9483_vm2, %v9482_v34 }
 0x4ca   : > { %8364 = vmatprep.subr.bf16.mxu1 %v9482_v34 }
 0x588   : > { %v1824_v60 = vpop.f32.mrf.mxu1 }
 0x589   : > { %v1831_v61 = vsel %vm1462_vm5, %v1824_v60, -inf }
 0x58a   : > { %1832 = vmax.xlane.f32.xlu0 %v1831_v61  ;;  %v8348_v63 = vpop.f32.mrf.mxu1 }
 0x58c   : > { %v1827_v0 = vpop.f32.mrf.mxu1 }
 0x58d   : > { %v1834_v1 = vsel %vm1462_vm5, %v1827_v0, -inf }
 0x58e   : > { %1835 = vmax.xlane.f32.xlu1 %v1834_v1  ;;  %v8349_v2 = vpop.f32.mrf.mxu1 }
 0x613   : > { %v1833_v3 = vpop.xlane.xlu0 %1832 }
 0x614   : > { %v1837_v4 = vsub.f32 %v1824_v60, %v1833_v3 }
 0x616   : > { %v1839_v5 = vmul.f32 1.442695, %v1837_v4 }
 0x617   : > { %v1836_v6 = vpop.xlane.xlu1 %1835 }
 0x618   : > { %9394 = vpow2.f32 %v1839_v5  ;;  %v1838_v7 = vsub.f32 %v1827_v0, %v1836_v6  ;;  %v7107_v6 = vld [vmem:[%s11244_s10 + $0x2] ss:$0 sm:$0xff] }
 0x61a   : > { %v1841_v8 = vmul.f32 1.442695, %v1838_v7 }
 0x61c   : > { %9396 = vpow2.f32 %v1841_v8 }
 0x625   : > { %v9395_v9 = vpop.eup %9394 }
 0x626   : > { %v1843_v10 = vsel %vm1462_vm5, %v9395_v9, 0.0 }
 0x627   : > { %1844 = vadd.xlane.f32.xlu0 %v1843_v10 }
 0x629   : > { %v9397_v11 = vpop.eup %9396 }
 0x62a   : > { %v1846_v12 = vsel %vm1462_vm5, %v9397_v11, 0.0 }
 0x62b   : > { %1847 = vadd.xlane.f32.xlu1 %v1846_v12 }
 0x6b0   : > { %v1845_v13 = vpop.xlane.xlu0 %1844 }
 0x6b1   : > { %9398 = vrcp.f32 %v1845_v13 }
 0x6b4   : > { %v1848_v14 = vpop.xlane.xlu1 %1847 }
 0x6b5   : > { %9400 = vrcp.f32 %v1848_v14 }
 0x6be   : > { %v9399_v15 = vpop.eup %9398 }
 0x6bf   : > { %v1851_v22 = vmul.f32 %v9399_v15, %v9395_v9 }
 0x6c2   : > { %v9401_v19 = vpop.eup %9400 }
 0x6c3   : > { %v1852_v23 = vmul.f32 %v9401_v19, %v9397_v11 }
 0x6c5   : > { %v1853_v25 = vpack.c.bf16 %v1852_v23, %v1851_v22 }
 0x6c7   : > { %8353 = vmatmul.mubr.msk.bf16.vlgmr.msra.gmra.mxu1 %vm1462_vm5, %v1853_v25 }
 0x6c8   : > { %8365 = vmatpush3.bf16.msra.mxu1 %v9181_v24  ;;  %8368 = vmatprep.mubr.msk.bf16.mxu1 %vm9483_vm2, %v9482_v34 }
 0x6c9   : > { %8366 = vmatprep.subr.bf16.mxu1 %v9482_v34 }
 0x6cc   : > { %8367 = vmatpush3.bf16.msra.mxu1 %v9182_v26 }
 0x6cd   : > { %8384 = vmatprep.subr.bf16.mxu1 %v9183_v27 }
 0x6cf   : > { %8369 = vmatmul.mubr.msk.bf16.vlgmr.msra.gmra.mxu1 %vm1414_vm4, %v1531_v50  ;;  %v7134_v50 = vld [vmem:[%s11242_s8 + $0x8] ss:$0 sm:$0xff] }
 0x6d0   : > { %8385 = vmatpush3.bf16.msra.mxu1 %v9183_v27  ;;  %8392 = vmatprep.mubr.msk.bf16.mxu1 %vm1203_vm3, %v9767_v21 }
 0x6d1   : > { %8386 = vmatprep.subr.bf16.mxu1 %v9184_v28 }
 0x6d4   : > { %8387 = vmatpush3.bf16.msra.mxu1 %v9184_v28 }
 0x6d5   : > { %8388 = vmatprep.subr.bf16.mxu1 %v9185_v29 }
 0x6d8   : > { %8389 = vmatpush3.bf16.msra.mxu1 %v9185_v29 }
 0x6d9   : > { %8390 = vmatprep.subr.bf16.mxu1 %v9186_v30 }
 0x6dc   : > { %8391 = vmatpush3.bf16.msra.mxu1 %v9186_v30 }
 0x6dd   : > { %8416 = vmatprep.subr.bf16.mxu1 %v9482_v34 }
 0x6df   : > { %8393 = vmatmul.mubr.msk.bf16.vlgmr.msra.gmra.mxu1 %vm1203_vm3, %v9775_v41 }
 0x6e0   : > { %8396 = vmatprep.mubr.msk.bf16.mxu1 %vm1203_vm3, %v9783_v62 }
 0x6e7   : > { %8397 = vmatmul.mubr.msk.bf16.gmra.mxu1 %vm1203_vm3, %v9798_v18 }
 0x6e8   : > { %8424 = vmatprep.mubr.msk.bf16.mxu1 %vm9483_vm2, %v9482_v34 }
 0x787   : > { %v1892_v33 = vpop.f32.mrf.mxu1 }
 0x789   : > { %v8354_v35 = vpop.f32.mrf.mxu1 }
 0x78a   : > { %v9192_v35 = vld [vmem:[%s11241_s7 + $0xc0] sm:$0xff]  }
 0x78b   : > { %v1895_v36 = vpop.f32.mrf.mxu1 }
 0x78c   : > { %v1899_v37 = vpack.c.bf16 %v1895_v36, %v1892_v33  ;;  %v9191_v33 = vld [vmem:[%s11241_s7 + $0xc8] sm:$0xff]   ;;  %v9193_v36 = vld [vmem:[%s11241_s7 + $0x158] sm:$0xff]  }
 0x78d   : > { %v8355_v38 = vpop.f32.mrf.mxu1 }
 0x78e   : > { %8361 = vmatmul.mubr.msk.bf16.vlgmr.msra.gmra.mxu0 %vm1414_vm4, %v1899_v37 }
 0x78f   : > { %v2010_v39 = vpop.f32.mrf.mxu1  ;;  %8380 = vmatprep.mubr.msk.bf16.mxu0 %vm9483_vm2, %v9482_v34 }
 0x791   : > { %v8370_v40 = vpop.f32.mrf.mxu1 }
 0x793   : > { %v2013_v42 = vpop.f32.mrf.mxu1 }
 0x795   : > { %v8371_v43 = vpop.f32.mrf.mxu1 }
 0x79f   : > { %v8394_v44 = vpop.f32.mrf.mxu1 }
 0x7a0   : > { %v2253_v61 = vadd.f32 %v8394_v44, %v7134_v50 }
 0x7a1   : > { %v2244_v45 = vpop.f32.mrf.mxu1 }
 0x7a2   : > { %v2245_v2 = vadd.f32 %v7134_v50, %v2244_v45 }
 0x7a3   : > { %v8395_v46 = vpop.f32.mrf.mxu1 }
 0x7a4   : > { %v2256_v20 = vadd.f32 %v8395_v46, %v7134_v50  ;;  %v7108_v46 = vld [vmem:[%s11244_s10 + $0x4] ss:$0 sm:$0xff] }
 0x7a5   : > { %v2247_v47 = vpop.f32.mrf.mxu1 }
 0x7a6   : > { %v2383_v63 = vpack.c.bf16 %v2256_v20, %v2253_v61  ;;  %v2248_v0 = vadd.f32 %v7134_v50, %v2247_v47  ;;  %v7119_v20 = vld [vmem:[%s11242_s8 + $0x6] ss:$0 sm:$0xff] }
 0x7a7   : > { %v8398_v48 = vpop.f32.mrf.mxu1 }
 0x7a8   : > { %v2269_v52 = vadd.f32 %v8398_v48, %v7134_v50  ;;  %v2393_v1 = vsel %vm1414_vm4, %v2383_v63, 0  ;;  %v2382_v3 = vpack.c.bf16 %v2248_v0, %v2245_v2 }
 0x7a9   : > { %v2260_v49 = vpop.f32.mrf.mxu1 }
 0x7aa   : > { %v2261_v58 = vadd.f32 %v7134_v50, %v2260_v49  ;;  %v2390_v4 = vsel %vm1414_vm4, %v2382_v3, 0  ;;  %v9198_v3 = vld [vmem:[%s11241_s7 + $0x130] sm:$0xff]  }
 0x7ab   : > { %v8399_v51 = vpop.f32.mrf.mxu1 }
 0x7ac   : > { %v2272_v53 = vadd.f32 %v8399_v51, %v7134_v50 }
 0x7ad   : > { %v2263_v54 = vpop.f32.mrf.mxu1 }
 0x7ae   : > { %v2385_v55 = vpack.c.bf16 %v2272_v53, %v2269_v52  ;;  %v2264_v56 = vadd.f32 %v7134_v50, %v2263_v54  ;;  %v7109_v50 = vld [vmem:[%s11244_s10 + $0x5] ss:$0 sm:$0xff] }
 0x7b0   : > { %v2399_v57 = vsel %vm1414_vm4, %v2385_v55, 0  ;;  %v2384_v59 = vpack.c.bf16 %v2264_v56, %v2261_v58  ;;  %v9194_v55 = vld [vmem:[%s11241_s7 + $0x150] sm:$0xff]   ;;  %v9195_v56 = vld [vmem:[%s11241_s7 + $0x148] sm:$0xff]   ;;  %v9197_v58 = vld [vmem:[%s11241_s7 + $0x138] sm:$0xff]  }
 0x7b1   : > { %8417 = vmatpush3.bf16.xpose.msra.mxu1 %v2399_v57  ;;  %v9196_v57 = vld [vmem:[%s11241_s7 + $0x140] sm:$0xff]  }
 0x7b2   : > { %8418 = vmatprep.subr.bf16.mxu1 %v9482_v34  ;;  %v2396_v60 = vsel %vm1414_vm4, %v2384_v59, 0 }
 0x7b9   : > { %8419 = vmatpush3.bf16.xpose.msra.mxu1 %v2396_v60 }
 0x7ba   : > { %8420 = vmatprep.subr.bf16.mxu1 %v9482_v34 }
 0x7c1   : > { %8421 = vmatpush3.bf16.xpose.msra.mxu1 %v2393_v1 }
 0x7c2   : > { %8422 = vmatprep.subr.bf16.mxu1 %v9482_v34 }
 0x7c9   : > { %8423 = vmatpush3.bf16.xpose.msra.mxu1 %v2390_v4  ;;  %v9199_v4 = vld [vmem:[%s11241_s7 + $0x128] sm:$0xff]  }
 0x7ca   : > { %8452 = vmatprep.subr.bf16.mxu1 %v9197_v58 }
 0x84e   : > { %v1954_v5 = vpop.f32.mrf.mxu0 }
 0x84f   : > { %v2011_v7 = vadd.f32 %v2010_v39, %v1954_v5  ;;  %v9200_v5 = vld [vmem:[%s11241_s7 + $0x120] sm:$0xff]  }
 0x850   : > { %v8362_v8 = vpop.f32.mrf.mxu0 }
 0x851   : > { %v2022_v9 = vadd.f32 %v7107_v6, %v2011_v7 }
 0x852   : > { %v1957_v10 = vpop.f32.mrf.mxu0 }
 0x853   : > { %v2014_v11 = vadd.f32 %v2013_v42, %v1957_v10  ;;  %v2024_v12 = vadd.f32 %v2022_v9, %v9794_v16 }
 0x854   : > { %v8363_v13 = vpop.f32.mrf.mxu0 }
 0x855   : > { %v2023_v14 = vadd.f32 %v7107_v6, %v2014_v11  ;;  %v2028_v15 = vsel %vm1203_vm3, %v2024_v12, 0.0 }
 0x856   : > { %2029 = vadd.xlane.f32.xlu0 %v2028_v15 }
 0x857   : > { %v2025_v19 = vadd.f32 %v2023_v14, %v9796_v17  ;;  %v9189_v17 = vld [vmem:[%s11241_s7 + $0xd8] sm:$0xff]  }
 0x858   : > { %8373 = vmatpush3.bf16.msra.mxu0 %v9189_v17 }
 0x859   : > { %v2031_v22 = vsel %vm1203_vm3, %v2025_v19, 0.0  ;;  %8374 = vmatprep.subr.bf16.mxu0 %v9482_v34 }
 0x85a   : > { %2032 = vadd.xlane.f32.xlu1 %v2031_v22 }
 0x85c   : > { %8375 = vmatpush3.bf16.msra.mxu0 %v9190_v32 }
 0x85d   : > { %8376 = vmatprep.subr.bf16.mxu0 %v9482_v34 }
 0x860   : > { %8377 = vmatpush3.bf16.msra.mxu0 %v9191_v33 }
 0x861   : > { %8378 = vmatprep.subr.bf16.mxu0 %v9482_v34 }
 0x864   : > { %8379 = vmatpush3.bf16.msra.mxu0 %v9192_v35 }
 0x865   : > { %8400 = vmatprep.subr.bf16.mxu0 %v9193_v36 }
 0x8df   : > { %v2030_v23 = vpop.xlane.xlu0 %2029 }
 0x8e0   : > { %v2035_v24 = vmul.f32 0.015625, %v2030_v23 }
 0x8e2   : > { %v2037_v25 = vsub.f32 %v2024_v12, %v2035_v24  ;;  %v7152_v12 = vld [vmem:[%s11242_s8 + $0xa] ss:$0 sm:$0xff] }
 0x8e3   : > { %v2033_v26 = vpop.xlane.xlu1 %2032 }
 0x8e4   : > { %v2036_v27 = vmul.f32 0.015625, %v2033_v26  ;;  %v2039_v28 = vmul.f32 %v2037_v25, %v2037_v25 }
 0x8e6   : > { %v2038_v29 = vsub.f32 %v2025_v19, %v2036_v27  ;;  %v2041_v30 = vsel %vm1203_vm3, %v2039_v28, 0.0 }
 0x8e7   : > { %2042 = vadd.xlane.f32.xlu0 %v2041_v30 }
 0x8e8   : > { %v2040_v16 = vmul.f32 %v2038_v29, %v2038_v29 }
 0x8ea   : > { %v2044_v31 = vsel %vm1203_vm3, %v2040_v16, 0.0 }
 0x8eb   : > { %2045 = vadd.xlane.f32.xlu1 %v2044_v31 }
 0x970   : > { %v2043_v37 = vpop.xlane.xlu0 %2042 }
 0x971   : > { %v2047_v38 = vmul.f32 0.015625, %v2043_v37 }
 0x973   : > { %v2049_v39 = vadd.f32 1e-05, %v2047_v38 }
 0x974   : > { %v2046_v40 = vpop.xlane.xlu1 %2045 }
 0x975   : > { %9402 = vrsqrt.f32 %v2049_v39  ;;  %v2048_v42 = vmul.f32 0.015625, %v2046_v40 }
 0x977   : > { %v2050_v43 = vadd.f32 1e-05, %v2048_v42 }
 0x979   : > { %9404 = vrsqrt.f32 %v2050_v43 }
 0x982   : > { %v9403_v44 = vpop.eup %9402 }
 0x983   : > { %v2053_v45 = vmul.f32 %v9403_v44, %v2037_v25  ;;  %v7191_v44 = vld [vmem:[%s11242_s8 + $0x9] ss:$0 sm:$0xff] }
 0x985   : > { %v2059_v49 = vmul.f32 %v7108_v46, %v2053_v45 }
 0x986   : > { %v9405_v47 = vpop.eup %9404 }
 0x987   : > { %v2054_v48 = vmul.f32 %v9405_v47, %v2038_v29  ;;  %v10030_v52 = vadd.f32 %v7109_v50, %v2059_v49 }
 0x989   : > { %v2060_v51 = vmul.f32 %v7108_v46, %v2054_v48 }
 0x98b   : > { %v10032_v53 = vadd.f32 %v7109_v50, %v2060_v51 }
 0x98d   : > { %v10036_v54 = vpack.c.bf16 %v10032_v53, %v10030_v52 }
 0x98f   : > { %8381 = vmatmul.mubr.msk.bf16.vlgmr.msra.gmra.mxu0 %vm1203_vm3, %v10036_v54 }
 0x990   : > { %8401 = vmatpush3.bf16.msra.mxu0 %v9193_v36  ;;  %8408 = vmatprep.mubr.msk.bf16.mxu0 %vm1203_vm3, %v9767_v21 }
 0x991   : > { %8402 = vmatprep.subr.bf16.mxu0 %v9194_v55 }
 0x994   : > { %8403 = vmatpush3.bf16.msra.mxu0 %v9194_v55 }
 0x995   : > { %8404 = vmatprep.subr.bf16.mxu0 %v9195_v56 }
 0x998   : > { %8405 = vmatpush3.bf16.msra.mxu0 %v9195_v56 }
 0x999   : > { %8406 = vmatprep.subr.bf16.mxu0 %v9196_v57 }
 0x99c   : > { %8407 = vmatpush3.bf16.msra.mxu0 %v9196_v57 }
 0x99d   : > { %8428 = vmatprep.subr.bf16.mxu0 %v9482_v34 }
 0x99f   : > { %8409 = vmatmul.mubr.msk.bf16.vlgmr.msra.gmra.mxu0 %vm1203_vm3, %v9775_v41 }
 0x9a0   : > { %8412 = vmatprep.mubr.msk.bf16.mxu0 %vm1203_vm3, %v9783_v62 }
 0x9a7   : > { %8413 = vmatmul.mubr.msk.bf16.gmra.mxu0 %vm1203_vm3, %v9798_v18 }
 0x9a8   : > { %8436 = vmatprep.mubr.msk.bf16.mxu0 %vm9483_vm2, %v9482_v34 }
 0xa4f   : > { %v2150_v59 = vpop.f32.mrf.mxu0 }
 0xa50   : > { %v2151_v63 = vadd.f32 %v7119_v20, %v2150_v59 }
 0xa51   : > { %v8382_v60 = vpop.f32.mrf.mxu0 }
 0xa53   : > { %v2153_v61 = vpop.f32.mrf.mxu0 }
 0xa54   : > { %v2154_v0 = vadd.f32 %v7119_v20, %v2153_v61 }
 0xa55   : > { %v8383_v1 = vpop.f32.mrf.mxu0 }
 0xa56   : > { %v2381_v2 = vpack.c.bf16 %v2154_v0, %v2151_v63 }
 0xa58   : > { %8425 = vmatmul.mubr.msk.bf16.vlgmr.msra.gmra.mxu1 %vm1414_vm4, %v2381_v2 }
 0xa59   : > { %8453 = vmatpush3.bf16.msra.mxu1 %v9197_v58  ;;  %8460 = vmatprep.mubr.msk.bf16.mxu1 %vm1203_vm3, %v9767_v21 }
 0xa5a   : > { %8454 = vmatprep.subr.bf16.mxu1 %v9198_v3 }
 0xa5d   : > { %8455 = vmatpush3.bf16.msra.mxu1 %v9198_v3 }
 0xa5e   : > { %8456 = vmatprep.subr.bf16.mxu1 %v9199_v4 }
 0xa5f   : > { %v8410_v6 = vpop.f32.mrf.mxu0 }
 0xa60   : > { %v2359_v27 = vadd.f32 %v8410_v6, %v7152_v12 }
 0xa61   : > { %v2350_v7 = vpop.f32.mrf.mxu0  ;;  %8457 = vmatpush3.bf16.msra.mxu1 %v9199_v4 }
 0xa62   : > { %8458 = vmatprep.subr.bf16.mxu1 %v9200_v5  ;;  %v2351_v30 = vadd.f32 %v7152_v12, %v2350_v7 }
 0xa63   : > { %v8411_v8 = vpop.f32.mrf.mxu0 }
 0xa64   : > { %v2362_v25 = vadd.f32 %v8411_v8, %v7152_v12 }
 0xa65   : > { %v2353_v9 = vpop.f32.mrf.mxu0  ;;  %8459 = vmatpush3.bf16.msra.mxu1 %v9200_v5 }
 0xa66   : > { %8484 = vmatprep.subr.bf16.mxu1 %v9482_v34  ;;  %v2466_v28 = vpack.c.bf16 %v2362_v25, %v2359_v27  ;;  %v2354_v29 = vadd.f32 %v7152_v12, %v2353_v9  ;;  %v9202_v25 = vld [vmem:[%s11241_s7 + $0xf0] sm:$0xff]   ;;  %v9204_v27 = vld [vmem:[%s11241_s7 + $0xe0] sm:$0xff]  }
 0xa67   : > { %v8414_v10 = vpop.f32.mrf.mxu0 }
 0xa68   : > { %8461 = vmatmul.mubr.msk.bf16.vlgmr.msra.gmra.mxu1 %vm1203_vm3, %v9775_v41  ;;  %v2375_v14 = vadd.f32 %v8414_v10, %v7152_v12  ;;  %v2465_v16 = vpack.c.bf16 %v2354_v29, %v2351_v30  ;;  %v9206_v29 = vld [vmem:[%s11241_s7 + $0x170] sm:$0xff]   ;;  %v9207_v30 = vld [vmem:[%s11241_s7 + $0x168] sm:$0xff]  }
 0xa69   : > { %v2366_v11 = vpop.f32.mrf.mxu0  ;;  %8464 = vmatprep.mubr.msk.bf16.mxu1 %vm1203_vm3, %v9783_v62 }
 0xa6a   : > { %v2367_v24 = vadd.f32 %v7152_v12, %v2366_v11 }
 0xa6b   : > { %v8415_v13 = vpop.f32.mrf.mxu0 }
 0xa6c   : > { %v2378_v15 = vadd.f32 %v8415_v13, %v7152_v12 }
 0xa6d   : > { %v2369_v19 = vpop.f32.mrf.mxu0 }
 0xa6e   : > { %v2468_v22 = vpack.c.bf16 %v2378_v15, %v2375_v14  ;;  %v2370_v23 = vadd.f32 %v7152_v12, %v2369_v19 }
 0xa70   : > { %8429 = vmatpush3.bf16.msra.mxu0 %v2468_v22  ;;  %8465 = vmatmul.mubr.msk.bf16.gmra.mxu1 %vm1203_vm3, %v9798_v18  ;;  %v2467_v26 = vpack.c.bf16 %v2370_v23, %v2367_v24  ;;  %v9201_v23 = vld [vmem:[%s11241_s7 + $0xf8] sm:$0xff]  }
 0xa71   : > { %8430 = vmatprep.subr.bf16.mxu0 %v9482_v34  ;;  %8492 = vmatprep.mubr.msk.bf16.mxu1 %vm9483_vm2, %v9482_v34 }
 0xa74   : > { %8431 = vmatpush3.bf16.msra.mxu0 %v2467_v26  ;;  %v9203_v26 = vld [vmem:[%s11241_s7 + $0xe8] sm:$0xff]  }
 0xa75   : > { %8432 = vmatprep.subr.bf16.mxu0 %v9482_v34 }
 0xa78   : > { %8433 = vmatpush3.bf16.msra.mxu0 %v2466_v28  ;;  %v9205_v28 = vld [vmem:[%s11241_s7 + $0x178] sm:$0xff]  }
 0xa79   : > { %8434 = vmatprep.subr.bf16.mxu0 %v9482_v34 }
 0xa7c   : > { %8435 = vmatpush3.bf16.msra.mxu0 %v2465_v16  ;;  %v9208_v16 = vld [vmem:[%s11241_s7 + $0x160] sm:$0xff]  }
 0xa7d   : > { %8440 = vmatprep.subr.bf16.mxu0 %v9482_v34 }
 0xb18   : > { %v2435_v31 = vpop.f32.mrf.mxu1 }
 0xb19   : > { %v2442_v17 = vsel %vm1203_vm3, %v2435_v31, -inf }
 0xb1a   : > { %2443 = vmax.xlane.f32.xlu0 %v2442_v17  ;;  %v8426_v32 = vpop.f32.mrf.mxu1 }
 0xb1c   : > { %v2438_v33 = vpop.f32.mrf.mxu1 }
 0xb1d   : > { %v2445_v35 = vsel %vm1203_vm3, %v2438_v33, -inf }
 0xb1e   : > { %2446 = vmax.xlane.f32.xlu1 %v2445_v35  ;;  %v8427_v36 = vpop.f32.mrf.mxu1  ;;  %v7176_v35 = vld [vmem:[%s11242_s8 + $0x7] ss:$0 sm:$0xff] }
 0xb28   : > { %v8462_v37 = vpop.f32.mrf.mxu1 }
 0xb29   : > { %v2685_v59 = vadd.f32 %v8462_v37, %v7191_v44 }
 0xb2a   : > { %v2676_v38 = vpop.f32.mrf.mxu1 }
 0xb2b   : > { %v2677_v63 = vadd.f32 %v7191_v44, %v2676_v38 }
 0xb2c   : > { %v8463_v39 = vpop.f32.mrf.mxu1 }
 0xb2d   : > { %v2688_v57 = vadd.f32 %v8463_v39, %v7191_v44 }
 0xb2e   : > { %v2679_v40 = vpop.f32.mrf.mxu1 }
 0xb2f   : > { %v2815_v20 = vpack.c.bf16 %v2688_v57, %v2685_v59  ;;  %v2680_v60 = vadd.f32 %v7191_v44, %v2679_v40 }
 0xb30   : > { %v8466_v42 = vpop.f32.mrf.mxu1 }
 0xb31   : > { %v2701_v46 = vadd.f32 %v8466_v42, %v7191_v44  ;;  %v2825_v61 = vsel %vm1414_vm4, %v2815_v20, 0  ;;  %v2814_v0 = vpack.c.bf16 %v2680_v60, %v2677_v63  ;;  %v9209_v42 = vld [vmem:[%s11243_s9 + $0x28] sm:$0xff]  }
 0xb32   : > { %v2692_v43 = vpop.f32.mrf.mxu1 }
 0xb33   : > { %v2693_v55 = vadd.f32 %v7191_v44, %v2692_v43  ;;  %v2822_v1 = vsel %vm1414_vm4, %v2814_v0, 0 }
 0xb34   : > { %v8467_v45 = vpop.f32.mrf.mxu1 }
 0xb35   : > { %v2704_v47 = vadd.f32 %v8467_v45, %v7191_v44 }
 0xb36   : > { %v2695_v48 = vpop.f32.mrf.mxu1 }
 0xb37   : > { %v2817_v49 = vpack.c.bf16 %v2704_v47, %v2701_v46  ;;  %v2696_v50 = vadd.f32 %v7191_v44, %v2695_v48  ;;  %v9210_v44 = vld [vmem:[%s11243_s9 + $0x20] sm:$0xff]  }
 0xb39   : > { %v2831_v51 = vsel %vm1414_vm4, %v2817_v49, 0  ;;  %v2816_v56 = vpack.c.bf16 %v2696_v50, %v2693_v55  ;;  %v7209_v55 = vld [vmem:[%s11242_s8 + $0xb] ss:$0 sm:$0xff] }
 0xb3a   : > { %8485 = vmatpush3.bf16.xpose.msra.mxu1 %v2831_v51 }
 0xb3b   : > { %8486 = vmatprep.subr.bf16.mxu1 %v9482_v34  ;;  %v2828_v58 = vsel %vm1414_vm4, %v2816_v56, 0 }
 0xb42   : > { %8487 = vmatpush3.bf16.xpose.msra.mxu1 %v2828_v58 }
 0xb43   : > { %8488 = vmatprep.subr.bf16.mxu1 %v9482_v34 }
 0xb4a   : > { %8489 = vmatpush3.bf16.xpose.msra.mxu1 %v2825_v61 }
 0xb4b   : > { %8490 = vmatprep.subr.bf16.mxu1 %v9482_v34 }
 0xb52   : > { %8491 = vmatpush3.bf16.xpose.msra.mxu1 %v2822_v1 }
 0xb53   : > { %8516 = vmatprep.subr.bf16.mxu1 %v9482_v34 }
 0xba3   : > { %v2444_v2 = vpop.xlane.xlu0 %2443 }
 0xba4   : > { %v2448_v3 = vsub.f32 %v2435_v31, %v2444_v2 }
 0xba6   : > { %v2450_v4 = vmul.f32 1.442695, %v2448_v3 }
 0xba7   : > { %v2447_v5 = vpop.xlane.xlu1 %2446 }
 0xba8   : > { %9406 = vpow2.f32 %v2450_v4  ;;  %v2449_v6 = vsub.f32 %v2438_v33, %v2447_v5 }
 0xbaa   : > { %v2452_v7 = vmul.f32 1.442695, %v2449_v6 }
 0xbac   : > { %9408 = vpow2.f32 %v2452_v7 }
 0xbb5   : > { %v9407_v8 = vpop.eup %9406 }
 0xbb6   : > { %v2454_v9 = vsel %vm1203_vm3, %v9407_v8, 0.0 }
 0xbb7   : > { %2455 = vadd.xlane.f32.xlu0 %v2454_v9 }
 0xbb9   : > { %v9409_v10 = vpop.eup %9408 }
 0xbba   : > { %v2457_v11 = vsel %vm1203_vm3, %v9409_v10, 0.0 }
 0xbbb   : > { %2458 = vadd.xlane.f32.xlu1 %v2457_v11 }
 0xc40   : > { %v2456_v12 = vpop.xlane.xlu0 %2455 }
 0xc41   : > { %9410 = vrcp.f32 %v2456_v12 }
 0xc44   : > { %v2459_v13 = vpop.xlane.xlu1 %2458 }
 0xc45   : > { %9412 = vrcp.f32 %v2459_v13 }
 0xc4e   : > { %v9411_v14 = vpop.eup %9410 }
 0xc4f   : > { %v2462_v19 = vmul.f32 %v9411_v14, %v9407_v8 }
 0xc52   : > { %v9413_v15 = vpop.eup %9412 }
 0xc53   : > { %v2463_v22 = vmul.f32 %v9413_v15, %v9409_v10 }
 0xc55   : > { %v2464_v24 = vpack.c.bf16 %v2463_v22, %v2462_v19 }
 0xc57   : > { %8437 = vmatmul.mubr.msk.bf16.vlgmr.msra.gmra.mxu0 %vm1203_vm3, %v2464_v24 }
 0xc58   : > { %8441 = vmatpush3.bf16.msra.mxu0 %v9201_v23  ;;  %8448 = vmatprep.mubr.msk.bf16.mxu0 %vm9483_vm2, %v9482_v34 }
 0xc59   : > { %8442 = vmatprep.subr.bf16.mxu0 %v9482_v34 }
 0xc5c   : > { %8443 = vmatpush3.bf16.msra.mxu0 %v9202_v25 }
 0xc5d   : > { %8444 = vmatprep.subr.bf16.mxu0 %v9482_v34 }
 0xc60   : > { %8445 = vmatpush3.bf16.msra.mxu0 %v9203_v26 }
 0xc61   : > { %8446 = vmatprep.subr.bf16.mxu0 %v9482_v34 }
 0xc64   : > { %8447 = vmatpush3.bf16.msra.mxu0 %v9204_v27 }
 0xc65   : > { %8468 = vmatprep.subr.bf16.mxu0 %v9205_v28 }
 0xc67   : > { %8449 = vmatmul.mubr.msk.bf16.vlgmr.msra.gmra.mxu0 %vm1203_vm3, %v10036_v54 }
 0xc68   : > { %8469 = vmatpush3.bf16.msra.mxu0 %v9205_v28  ;;  %8476 = vmatprep.mubr.msk.bf16.mxu0 %vm1203_vm3, %v9767_v21 }
 0xc69   : > { %8470 = vmatprep.subr.bf16.mxu0 %v9206_v29 }
 0xc6c   : > { %8471 = vmatpush3.bf16.msra.mxu0 %v9206_v29 }
 0xc6d   : > { %8472 = vmatprep.subr.bf16.mxu0 %v9207_v30 }
 0xc70   : > { %8473 = vmatpush3.bf16.msra.mxu0 %v9207_v30 }
 0xc71   : > { %8474 = vmatprep.subr.bf16.mxu0 %v9208_v16 }
 0xc74   : > { %8475 = vmatpush3.bf16.msra.mxu0 %v9208_v16 }
 0xc75   : > { %8496 = vmatprep.subr.bf16.mxu0 %v9482_v34 }
 0xc77   : > { %8477 = vmatmul.mubr.msk.bf16.vlgmr.msra.gmra.mxu0 %vm1203_vm3, %v9775_v41 }
 0xc78   : > { %8480 = vmatprep.mubr.msk.bf16.mxu0 %vm1203_vm3, %v9783_v62 }
 0xc7f   : > { %8481 = vmatmul.mubr.msk.bf16.gmra.mxu0 %vm1203_vm3, %v9798_v18 }
 0xc80   : > { %8504 = vmatprep.mubr.msk.bf16.mxu0 %vm9483_vm2, %v9482_v34 }
 0xd17   : > { %v2506_v54 = vpop.f32.mrf.mxu0 }
 0xd19   : > { %v8438_v31 = vpop.f32.mrf.mxu0 }
 0xd1b   : > { %v2509_v17 = vpop.f32.mrf.mxu0 }
 0xd1c   : > { %v2513_v45 = vpack.c.bf16 %v2509_v17, %v2506_v54 }
 0xd1d   : > { %v8439_v32 = vpop.f32.mrf.mxu0 }
 0xd27   : > { %v2594_v33 = vpop.f32.mrf.mxu0 }
 0xd28   : > { %v2595_v38 = vadd.f32 %v7176_v35, %v2594_v33 }
 0xd29   : > { %v8450_v36 = vpop.f32.mrf.mxu0 }
 0xd2a   : > { %v9211_v36 = vld [vmem:[%s11243_s9 + $0x38] sm:$0xff]  }
 0xd2b   : > { %v2597_v37 = vpop.f32.mrf.mxu0 }
 0xd2c   : > { %v2598_v39 = vadd.f32 %v7176_v35, %v2597_v37  ;;  %v9212_v37 = vld [vmem:[%s11243_s9 + $0x30] sm:$0xff]  }
 0xd2d   : > { %v8451_v40 = vpop.f32.mrf.mxu0 }
 0xd2e   : > { %v2813_v43 = vpack.c.bf16 %v2598_v39, %v2595_v38 }
 0xd30   : > { %8493 = vmatmul.mubr.msk.bf16.vlgmr.msra.gmra.mxu1 %vm1414_vm4, %v2813_v43 }
 0xd31   : > { %8517 = vmatpush3.bf16.msra.mxu1 %v9209_v42  ;;  %8520 = vmatprep.mubr.msk.bf16.mxu1 %vm9483_vm2, %v9482_v34 }
 0xd32   : > { %8518 = vmatprep.subr.bf16.mxu1 %v9482_v34 }
 0xd35   : > { %8519 = vmatpush3.bf16.msra.mxu1 %v9210_v44 }
 0xd36   : > { %8536 = vmatprep.subr.bf16.mxu1 %v9482_v34 }
 0xd37   : > { %v8478_v46 = vpop.f32.mrf.mxu0 }
 0xd38   : > { %8521 = vmatmul.mubr.msk.bf16.vlgmr.msra.gmra.mxu1 %vm1414_vm4, %v2513_v45  ;;  %v2791_v1 = vadd.f32 %v8478_v46, %v7209_v55  ;;  %v7230_v45 = vld [vmem:[%s11244_s10 + $0x3] ss:$0 sm:$0xff] }
 0xd39   : > { %v2782_v47 = vpop.f32.mrf.mxu0  ;;  %8552 = vmatprep.mubr.msk.bf16.mxu1 %vm9483_vm2, %v9482_v34 }
 0xd3a   : > { %v2783_v4 = vadd.f32 %v7209_v55, %v2782_v47 }
 0xd3b   : > { %v8479_v48 = vpop.f32.mrf.mxu0 }
 0xd3c   : > { %v2794_v63 = vadd.f32 %v8479_v48, %v7209_v55 }
 0xd3d   : > { %v2785_v49 = vpop.f32.mrf.mxu0 }
 0xd3e   : > { %v2898_v2 = vpack.c.bf16 %v2794_v63, %v2791_v1  ;;  %v2786_v3 = vadd.f32 %v7209_v55, %v2785_v49 }
 0xd3f   : > { %v8482_v50 = vpop.f32.mrf.mxu0 }
 0xd40   : > { %v2807_v57 = vadd.f32 %v8482_v50, %v7209_v55  ;;  %v2897_v5 = vpack.c.bf16 %v2786_v3, %v2783_v4 }
 0xd41   : > { %v2798_v51 = vpop.f32.mrf.mxu0 }
 0xd42   : > { %v2799_v61 = vadd.f32 %v7209_v55, %v2798_v51 }
 0xd43   : > { %v8483_v56 = vpop.f32.mrf.mxu0 }
 0xd44   : > { %v2810_v58 = vadd.f32 %v8483_v56, %v7209_v55 }
 0xd45   : > { %v2801_v59 = vpop.f32.mrf.mxu0 }
 0xd46   : > { %v2900_v20 = vpack.c.bf16 %v2810_v58, %v2807_v57  ;;  %v2802_v60 = vadd.f32 %v7209_v55, %v2801_v59 }
 0xd48   : > { %8497 = vmatpush3.bf16.msra.mxu0 %v2900_v20  ;;  %v2899_v0 = vpack.c.bf16 %v2802_v60, %v2799_v61 }
 0xd49   : > { %8498 = vmatprep.subr.bf16.mxu0 %v9482_v34 }
 0xd4c   : > { %8499 = vmatpush3.bf16.msra.mxu0 %v2899_v0 }
 0xd4d   : > { %8500 = vmatprep.subr.bf16.mxu0 %v9482_v34 }
 0xd50   : > { %8501 = vmatpush3.bf16.msra.mxu0 %v2898_v2 }
 0xd51   : > { %8502 = vmatprep.subr.bf16.mxu0 %v9482_v34 }
 0xd54   : > { %8503 = vmatpush3.bf16.msra.mxu0 %v2897_v5  ;;  %v9214_v5 = vld [vmem:[%s11245_s11 + $0x10] sm:$0xff]  }
 0xd55   : > { %8508 = vmatprep.subr.bf16.mxu0 %v9482_v34 }
 0xdf0   : > { %v2867_v6 = vpop.f32.mrf.mxu1 }
 0xdf1   : > { %v2874_v7 = vsel %vm1203_vm3, %v2867_v6, -inf }
 0xdf2   : > { %2875 = vmax.xlane.f32.xlu0 %v2874_v7  ;;  %v8494_v8 = vpop.f32.mrf.mxu1  ;;  %v9216_v7 = vld [vmem:[%s11245_s11] sm:$0xff]  }
 0xdf3   : > { %v9217_v8 = vld [vmem:[%s11246_s12 + $0x38] sm:$0xff]  }
 0xdf4   : > { %v2870_v9 = vpop.f32.mrf.mxu1  ;;  %8537 = vmatpush3.bf16.msra.mxu1 %v9217_v8  ;;  %v9228_v8 = vld [vmem:[%s11241_s7 + $0x210] sm:$0xff]  }
 0xdf5   : > { %v2877_v10 = vsel %vm1203_vm3, %v2870_v9, -inf  ;;  %8538 = vmatprep.subr.bf16.mxu1 %v9482_v34 }
 0xdf6   : > { %2878 = vmax.xlane.f32.xlu1 %v2877_v10  ;;  %v8495_v11 = vpop.f32.mrf.mxu1  ;;  %v9219_v10 = vld [vmem:[%s11246_s12 + $0x28] sm:$0xff]  }
 0xdf7   : > { %v9220_v11 = vld [vmem:[%s11246_s12 + $0x20] sm:$0xff]  }
 0xdf8   : > { %v3056_v12 = vpop.f32.mrf.mxu1 }
 0xdfa   : > { %v8522_v13 = vpop.f32.mrf.mxu1 }
 0xdfc   : > { %v3059_v14 = vpop.f32.mrf.mxu1 }
 0xdfe   : > { %v8523_v15 = vpop.f32.mrf.mxu1 }
 0xe7b   : > { %v2876_v19 = vpop.xlane.xlu0 %2875 }
 0xe7c   : > { %v2880_v22 = vsub.f32 %v2867_v6, %v2876_v19  ;;  %v9215_v6 = vld [vmem:[%s11245_s11 + $0x8] sm:$0xff]  }
 0xe7e   : > { %v2882_v23 = vmul.f32 1.442695, %v2880_v22 }
 0xe7f   : > { %v2879_v24 = vpop.xlane.xlu1 %2878 }
 0xe80   : > { %9414 = vpow2.f32 %v2882_v23  ;;  %v2881_v25 = vsub.f32 %v2870_v9, %v2879_v24  ;;  %v9218_v9 = vld [vmem:[%s11246_s12 + $0x30] sm:$0xff]  }
 0xe81   : > { %8539 = vmatpush3.bf16.msra.mxu1 %v9218_v9  ;;  %v9229_v9 = vld [vmem:[%s11241_s7 + $0x188] sm:$0xff]  }
 0xe82   : > { %v2884_v26 = vmul.f32 1.442695, %v2881_v25  ;;  %8540 = vmatprep.subr.bf16.mxu1 %v9482_v34 }
 0xe84   : > { %9416 = vpow2.f32 %v2884_v26  ;;  %v7231_v26 = vld [vmem:[%s11244_s10 + $0x6] ss:$0 sm:$0xff] }
 0xe85   : > { %8541 = vmatpush3.bf16.msra.mxu1 %v9219_v10  ;;  %v9230_v10 = vld [vmem:[%s11241_s7 + $0x208] sm:$0xff]  }
 0xe86   : > { %8542 = vmatprep.subr.bf16.mxu1 %v9482_v34 }
 0xe89   : > { %8543 = vmatpush3.bf16.msra.mxu1 %v9220_v11  ;;  %v9231_v11 = vld [vmem:[%s11241_s7 + $0x180] sm:$0xff]  }
 0xe8a   : > { %8544 = vmatprep.subr.bf16.mxu1 %v9482_v34 }
 0xe8d   : > { %v9415_v27 = vpop.eup %9414 }
 0xe8e   : > { %v2886_v28 = vsel %vm1203_vm3, %v9415_v27, 0.0 }
 0xe8f   : > { %2887 = vadd.xlane.f32.xlu0 %v2886_v28 }
 0xe91   : > { %v9417_v29 = vpop.eup %9416 }
 0xe92   : > { %v2889_v30 = vsel %vm1203_vm3, %v9417_v29, 0.0 }
 0xe93   : > { %2890 = vadd.xlane.f32.xlu1 %v2889_v30  ;;  %v7232_v30 = vld [vmem:[%s11244_s10 + $0x7] ss:$0 sm:$0xff] }
 0xf18   : > { %v2888_v16 = vpop.xlane.xlu0 %2887 }
 0xf19   : > { %9418 = vrcp.f32 %v2888_v16 }
 0xf1c   : > { %v2891_v54 = vpop.xlane.xlu1 %2890 }
 0xf1d   : > { %9420 = vrcp.f32 %v2891_v54 }
 0xf26   : > { %v9419_v31 = vpop.eup %9418 }
 0xf27   : > { %v2894_v32 = vmul.f32 %v9419_v31, %v9415_v27 }
 0xf2a   : > { %v9421_v17 = vpop.eup %9420 }
 0xf2b   : > { %v2895_v33 = vmul.f32 %v9421_v17, %v9417_v29 }
 0xf2d   : > { %v2896_v35 = vpack.c.bf16 %v2895_v33, %v2894_v32  ;;  %v9222_v32 = vld [vmem:[%s11246_s12 + $0x10] sm:$0xff]   ;;  %v9223_v33 = vld [vmem:[%s11246_s12 + $0x8] sm:$0xff]  }
 0xf2f   : > { %8505 = vmatmul.mubr.msk.bf16.vlgmr.msra.gmra.mxu0 %vm1203_vm3, %v2896_v35  ;;  %v9224_v35 = vld [vmem:[%s11246_s12] sm:$0xff]  }
 0xf30   : > { %8512 = vmatprep.mubr.msk.bf16.mxu0 %vm9483_vm2, %v9482_v34  ;;  %8509 = vmatpush3.bf16.msra.mxu0 %v9211_v36  ;;  %v7233_v36 = vld [vmem:[%s11244_s10] ss:$0 sm:$0xff] }
 0xf31   : > { %8510 = vmatprep.subr.bf16.mxu0 %v9482_v34 }
 0xf34   : > { %8511 = vmatpush3.bf16.msra.mxu0 %v9212_v37 }
 0xf35   : > { %8524 = vmatprep.subr.bf16.mxu0 %v9482_v34 }
 0xfef   : > { %v2938_v38 = vpop.f32.mrf.mxu0 }
 0xff1   : > { %v8506_v39 = vpop.f32.mrf.mxu0 }
 0xff3   : > { %v2941_v40 = vpop.f32.mrf.mxu0 }
 0xff4   : > { %v2945_v42 = vpack.c.bf16 %v2941_v40, %v2938_v38 }
 0xff5   : > { %v8507_v43 = vpop.f32.mrf.mxu0 }
 0xff6   : > { %8513 = vmatmul.mubr.msk.bf16.vlgmr.msra.gmra.mxu0 %vm1414_vm4, %v2945_v42 }
 0xff7   : > { %8532 = vmatprep.mubr.msk.bf16.mxu0 %vm9483_vm2, %v9482_v34 }
0x10b6   : > { %v3000_v44 = vpop.f32.mrf.mxu0 }
0x10b7   : > { %v3057_v46 = vadd.f32 %v3056_v12, %v3000_v44  ;;  %v9221_v12 = vld [vmem:[%s11246_s12 + $0x18] sm:$0xff]  }
0x10b8   : > { %v8514_v47 = vpop.f32.mrf.mxu0  ;;  %8545 = vmatpush3.bf16.msra.mxu1 %v9221_v12  ;;  %v9232_v12 = vld [vmem:[%s11241_s7 + $0x200] sm:$0xff]  }
0x10b9   : > { %v3068_v48 = vadd.f32 %v7230_v45, %v3057_v46  ;;  %8546 = vmatprep.subr.bf16.mxu1 %v9482_v34  ;;  %v7239_v47 = vld [vmem:[%s11244_s10 + $0x1] ss:$0 sm:$0xff] }
0x10ba   : > { %v3003_v49 = vpop.f32.mrf.mxu0 }
0x10bb   : > { %v3060_v50 = vadd.f32 %v3059_v14, %v3003_v49  ;;  %v3070_v51 = vadd.f32 %v3068_v48, %v10030_v52 }
0x10bc   : > { %v8515_v55 = vpop.f32.mrf.mxu0  ;;  %8547 = vmatpush3.bf16.msra.mxu1 %v9222_v32 }
0x10bd   : > { %v3069_v56 = vadd.f32 %v7230_v45, %v3060_v50  ;;  %v3074_v57 = vsel %vm1203_vm3, %v3070_v51, 0.0  ;;  %8548 = vmatprep.subr.bf16.mxu1 %v9482_v34 }
0x10be   : > { %3075 = vadd.xlane.f32.xlu0 %v3074_v57 }
0x10bf   : > { %v3071_v58 = vadd.f32 %v3069_v56, %v10032_v53  ;;  %v9213_v53 = vld [vmem:[%s11245_s11 + $0x18] sm:$0xff]  }
0x10c0   : > { %8525 = vmatpush3.bf16.msra.mxu0 %v9213_v53  ;;  %8549 = vmatpush3.bf16.msra.mxu1 %v9223_v33  ;;  %v9234_v33 = vld [vmem:[%s11241_s7 + $0x1d0] sm:$0xff]  }
0x10c1   : > { %v3077_v59 = vsel %vm1203_vm3, %v3071_v58, 0.0  ;;  %8526 = vmatprep.subr.bf16.mxu0 %v9482_v34  ;;  %8550 = vmatprep.subr.bf16.mxu1 %v9482_v34 }
0x10c2   : > { %3078 = vadd.xlane.f32.xlu1 %v3077_v59 }
0x10c4   : > { %8527 = vmatpush3.bf16.msra.mxu0 %v9214_v5  ;;  %8551 = vmatpush3.bf16.msra.mxu1 %v9224_v35  ;;  %v9225_v5 = vld [vmem:[%s11241_s7 + $0x198] sm:$0xff]   ;;  %v9235_v35 = vld [vmem:[%s11241_s7 + $0x1c8] sm:$0xff]  }
0x10c5   : > { %8528 = vmatprep.subr.bf16.mxu0 %v9482_v34  ;;  %8580 = vmatprep.subr.bf16.mxu1 %v9482_v34 }
0x10c8   : > { %8529 = vmatpush3.bf16.msra.mxu0 %v9215_v6  ;;  %v9226_v6 = vld [vmem:[%s11241_s7 + $0x218] sm:$0xff]  }
0x10c9   : > { %8530 = vmatprep.subr.bf16.mxu0 %v9482_v34 }
0x10cc   : > { %8531 = vmatpush3.bf16.msra.mxu0 %v9216_v7  ;;  %v9227_v7 = vld [vmem:[%s11241_s7 + $0x190] sm:$0xff]  }
0x10cd   : > { %8556 = vmatprep.subr.bf16.mxu0 %v9482_v34 }
0x1147   : > { %v3076_v20 = vpop.xlane.xlu0 %3075 }
0x1148   : > { %v3080_v60 = vmul.f32 0.015625, %v3076_v20 }
0x114a   : > { %v3082_v61 = vsub.f32 %v3070_v51, %v3080_v60 }
0x114b   : > { %v3079_v63 = vpop.xlane.xlu1 %3078 }
0x114c   : > { %v3081_v0 = vmul.f32 0.015625, %v3079_v63  ;;  %v3084_v1 = vmul.f32 %v3082_v61, %v3082_v61 }
0x114e   : > { %v3083_v2 = vsub.f32 %v3071_v58, %v3081_v0  ;;  %v3086_v3 = vsel %vm1203_vm3, %v3084_v1, 0.0 }
0x114f   : > { %3087 = vadd.xlane.f32.xlu0 %v3086_v3 }
0x1150   : > { %v3085_v52 = vmul.f32 %v3083_v2, %v3083_v2 }
0x1152   : > { %v3089_v4 = vsel %vm1203_vm3, %v3085_v52, 0.0 }
0x1153   : > { %3090 = vadd.xlane.f32.xlu1 %v3089_v4 }
0x11d8   : > { %v3088_v13 = vpop.xlane.xlu0 %3087 }
0x11d9   : > { %v3092_v14 = vmul.f32 0.015625, %v3088_v13 }
0x11db   : > { %v3094_v15 = vadd.f32 1e-05, %v3092_v14 }
0x11dc   : > { %v3091_v19 = vpop.xlane.xlu1 %3090 }
0x11dd   : > { %9422 = vrsqrt.f32 %v3094_v15  ;;  %v3093_v22 = vmul.f32 0.015625, %v3091_v19 }
0x11df   : > { %v3095_v23 = vadd.f32 1e-05, %v3093_v22 }
0x11e1   : > { %9424 = vrsqrt.f32 %v3095_v23 }
0x11ea   : > { %v9423_v24 = vpop.eup %9422 }
0x11eb   : > { %v3098_v25 = vmul.f32 %v9423_v24, %v3082_v61 }
0x11ed   : > { %v3104_v29 = vmul.f32 %v7231_v26, %v3098_v25 }
0x11ee   : > { %v9425_v27 = vpop.eup %9424 }
0x11ef   : > { %v3099_v28 = vmul.f32 %v9425_v27, %v3083_v2  ;;  %v3110_v54 = vadd.f32 %v7232_v30, %v3104_v29 }
0x11f1   : > { %v3105_v16 = vmul.f32 %v7231_v26, %v3099_v28  ;;  %v7248_v26 = vld [vmem:[%s11244_s10 + $0x8] ss:$0 sm:$0xff] }
0x11f3   : > { %v3111_v31 = vadd.f32 %v7232_v30, %v3105_v16  ;;  %v7249_v30 = vld [vmem:[%s11244_s10 + $0x9] ss:$0 sm:$0xff] }
0x11f5   : > { %v3112_v17 = vpack.c.bf16 %v3111_v31, %v3110_v54 }
0x11f7   : > { %8533 = vmatmul.mubr.msk.bf16.vlgmr.msra.gmra.mxu0 %vm1203_vm3, %v3112_v17  ;;  %v9233_v17 = vld [vmem:[%s11241_s7 + $0x1d8] sm:$0xff]  }
0x11f8   : > { %8564 = vmatprep.mubr.msk.bf16.mxu0 %vm9483_vm2, %v9482_v34  ;;  %8557 = vmatpush3.bf16.msra.mxu0 %v9225_v5  ;;  %v9242_v5 = vld [vmem:[%s11241_s7 + $0x230] sm:$0xff]  }
0x11f9   : > { %8558 = vmatprep.subr.bf16.mxu0 %v9482_v34 }
0x11fc   : > { %8559 = vmatpush3.bf16.msra.mxu0 %v9227_v7  ;;  %v9244_v7 = vld [vmem:[%s11241_s7 + $0x220] sm:$0xff]  }
0x11fd   : > { %8560 = vmatprep.subr.bf16.mxu0 %v9482_v34 }
0x1200   : > { %8561 = vmatpush3.bf16.msra.mxu0 %v9229_v9 }
0x1201   : > { %8562 = vmatprep.subr.bf16.mxu0 %v9482_v34 }
0x1204   : > { %8563 = vmatpush3.bf16.msra.mxu0 %v9231_v11 }
0x1205   : > { %8568 = vmatprep.subr.bf16.mxu0 %v9482_v34 }
0x12b7   : > { %v3187_v37 = vpop.f32.mrf.mxu0 }
0x12b8   : > { %v3188_v39 = vadd.f32 %v7233_v36, %v3187_v37 }
0x12b9   : > { %v8534_v38 = vpop.f32.mrf.mxu0 }
0x12ba   : > { %v3194_v44 = vmax.f32 %v3188_v39, 0.0  ;;  %v7289_v39 = vld [vmem:[%s11242_s8 + $0x10] ss:$0 sm:$0xff] }
0x12bb   : > { %v3190_v40 = vpop.f32.mrf.mxu0 }
0x12bc   : > { %v3191_v42 = vadd.f32 %v7233_v36, %v3190_v40  ;;  %v9236_v36 = vld [vmem:[%s11241_s7 + $0x1c0] sm:$0xff]  }
0x12bd   : > { %v8535_v43 = vpop.f32.mrf.mxu0 }
0x12be   : > { %v3195_v45 = vmax.f32 %v3191_v42, 0.0 }
0x12c0   : > { %v3196_v46 = vpack.c.bf16 %v3195_v45, %v3194_v44 }
0x12c2   : > { %8553 = vmatmul.mubr.bf16.vlgmr.msra.gmra.mxu1 %v3196_v46 }
0x12c3   : > { %8588 = vmatprep.mubr.msk.bf16.mxu1 %vm9483_vm2, %v9482_v34  ;;  %8581 = vmatpush3.bf16.msra.mxu1 %v9226_v6  ;;  %v9243_v6 = vld [vmem:[%s11241_s7 + $0x228] sm:$0xff]  }
0x12c4   : > { %8582 = vmatprep.subr.bf16.mxu1 %v9482_v34 }
0x12c7   : > { %8583 = vmatpush3.bf16.msra.mxu1 %v9228_v8 }
0x12c8   : > { %8584 = vmatprep.subr.bf16.mxu1 %v9482_v34 }
0x12cb   : > { %8585 = vmatpush3.bf16.msra.mxu1 %v9230_v10 }
0x12cc   : > { %8586 = vmatprep.subr.bf16.mxu1 %v9482_v34 }
0x12cf   : > { %8587 = vmatpush3.bf16.msra.mxu1 %v9232_v12 }
0x12d0   : > { %8598 = vmatprep.subr.bf16.mxu1 %v9482_v34 }
0x1382   : > { %v3300_v48 = vpop.f32.mrf.mxu1 }
0x1383   : > { %v3301_v49 = vadd.f32 %v7239_v47, %v3300_v48 }
0x1384   : > { %v8554_v50 = vpop.f32.mrf.mxu1 }
0x1385   : > { %v3307_v51 = vadd.f32 %v3301_v49, %v3110_v54 }
0x1386   : > { %v3303_v55 = vpop.f32.mrf.mxu1 }
0x1387   : > { %v3304_v56 = vadd.f32 %v7239_v47, %v3303_v55  ;;  %v3311_v57 = vsel %vm1203_vm3, %v3307_v51, 0.0 }
0x1388   : > { %3312 = vadd.xlane.f32.xlu0 %v3311_v57  ;;  %v8555_v58 = vpop.f32.mrf.mxu1 }
0x1389   : > { %v3308_v59 = vadd.f32 %v3304_v56, %v3111_v31 }
0x138b   : > { %v3314_v20 = vsel %vm1203_vm3, %v3308_v59, 0.0 }
0x138c   : > { %3315 = vadd.xlane.f32.xlu1 %v3314_v20 }
0x1411   : > { %v3313_v60 = vpop.xlane.xlu0 %3312 }
0x1412   : > { %v3317_v61 = vmul.f32 0.015625, %v3313_v60 }
0x1414   : > { %v3319_v63 = vsub.f32 %v3307_v51, %v3317_v61  ;;  %v7274_v51 = vld [vmem:[%s11242_s8 + $0xe] ss:$0 sm:$0xff]  ;;  %v7259_v61 = vld [vmem:[%s11242_s8 + $0xc] ss:$0 sm:$0xff] }
0x1415   : > { %v3316_v0 = vpop.xlane.xlu1 %3315 }
0x1416   : > { %v3318_v1 = vmul.f32 0.015625, %v3316_v0  ;;  %v3321_v2 = vmul.f32 %v3319_v63, %v3319_v63 }
0x1418   : > { %v3320_v3 = vsub.f32 %v3308_v59, %v3318_v1  ;;  %v3323_v52 = vsel %vm1203_vm3, %v3321_v2, 0.0  ;;  %v9237_v1 = vld [vmem:[%s11241_s7 + $0x1b8] sm:$0xff]  }
0x1419   : > { %3324 = vadd.xlane.f32.xlu0 %v3323_v52  ;;  %v9239_v52 = vld [vmem:[%s11241_s7 + $0x1a8] sm:$0xff]  }
0x141a   : > { %v3322_v4 = vmul.f32 %v3320_v3, %v3320_v3 }
0x141c   : > { %v3326_v53 = vsel %vm1203_vm3, %v3322_v4, 0.0  ;;  %v9240_v4 = vld [vmem:[%s11241_s7 + $0x1a0] sm:$0xff]  }
0x141d   : > { %3327 = vadd.xlane.f32.xlu1 %v3326_v53  ;;  %v9241_v53 = vld [vmem:[%s11241_s7 + $0x238] sm:$0xff]  }
0x14a2   : > { %v3325_v13 = vpop.xlane.xlu0 %3324 }
0x14a3   : > { %v3329_v14 = vmul.f32 0.015625, %v3325_v13 }
0x14a5   : > { %v3331_v15 = vadd.f32 1e-05, %v3329_v14 }
0x14a6   : > { %v3328_v19 = vpop.xlane.xlu1 %3327 }
0x14a7   : > { %9426 = vrsqrt.f32 %v3331_v15  ;;  %v3330_v22 = vmul.f32 0.015625, %v3328_v19  ;;  %v7310_v15 = vld [vmem:[%s11242_s8 + $0xd] ss:$0 sm:$0xff] }
0x14a9   : > { %v3332_v23 = vadd.f32 1e-05, %v3330_v22 }
0x14ab   : > { %9428 = vrsqrt.f32 %v3332_v23 }
0x14b4   : > { %v9427_v24 = vpop.eup %9426 }
0x14b5   : > { %v3335_v25 = vmul.f32 %v9427_v24, %v3319_v63 }
0x14b7   : > { %v3341_v28 = vmul.f32 %v7248_v26, %v3335_v25 }
0x14b8   : > { %v9429_v27 = vpop.eup %9428 }
0x14b9   : > { %v3336_v29 = vmul.f32 %v9429_v27, %v3320_v3  ;;  %v10310_v54 = vadd.f32 %v7249_v30, %v3341_v28  ;;  %v9238_v3 = vld [vmem:[%s11241_s7 + $0x1b0] sm:$0xff]  }
0x14ba   : > { %v7340_v28 = vld [vmem:[%s11242_s8 + $0x11] ss:$0 sm:$0xff] }
0x14bb   : > { %v3342_v16 = vmul.f32 %v7248_v26, %v3336_v29 }
0x14bd   : > { %v10312_v31 = vadd.f32 %v7249_v30, %v3342_v16 }
0x14bf   : > { %v10319_v32 = vpack.c.bf16 %v10312_v31, %v10310_v54 }
0x14c1   : > { %8565 = vmatmul.mubr.msk.bf16.vlgmr.msra.gmra.mxu0 %vm1203_vm3, %v10319_v32  ;;  %8589 = vmatmul.mubr.msk.bf16.vlgmr.msra.gmra.mxu1 %vm1203_vm3, %v10319_v32 }
0x14c2   : > { %8569 = vmatpush3.bf16.msra.mxu0 %v9233_v17  ;;  %8576 = vmatprep.mubr.msk.bf16.mxu0 %vm9483_vm2, %v9482_v34 }
0x14c3   : > { %8570 = vmatprep.subr.bf16.mxu0 %v9482_v34  ;;  %8600 = vmatprep.mubr.msk.bf16.mxu1 %vm9483_vm2, %v9482_v34 }
0x14c6   : > { %8571 = vmatpush3.bf16.msra.mxu0 %v9234_v33 }
0x14c7   : > { %8572 = vmatprep.subr.bf16.mxu0 %v9482_v34 }
0x14ca   : > { %8573 = vmatpush3.bf16.msra.mxu0 %v9235_v35 }
0x14cb   : > { %8574 = vmatprep.subr.bf16.mxu0 %v9482_v34 }
0x14ce   : > { %8575 = vmatpush3.bf16.msra.mxu0 %v9236_v36 }
0x14cf   : > { %8592 = vmatprep.subr.bf16.mxu0 %v9482_v34 }
0x14d1   : > { %8577 = vmatmul.mubr.msk.bf16.vlgmr.msra.gmra.mxu0 %vm1203_vm3, %v10319_v32 }
0x14d2   : > { %8594 = vmatprep.mubr.msk.bf16.mxu0 %vm9483_vm2, %v9482_v34 }
0x1581   : > { %v3428_v37 = vpop.f32.mrf.mxu0  ;;  %v3592_v38 = vpop.f32.mrf.mxu1 }
0x1582   : > { %v3593_v45 = vadd.f32 %v7289_v39, %v3592_v38  ;;  %v3429_v0 = vadd.f32 %v7259_v61, %v3428_v37 }
0x1583   : > { %v8566_v40 = vpop.f32.mrf.mxu0  ;;  %v8590_v42 = vpop.f32.mrf.mxu1 }
0x1585   : > { %v3431_v43 = vpop.f32.mrf.mxu0  ;;  %v3595_v44 = vpop.f32.mrf.mxu1 }
0x1586   : > { %v3596_v46 = vadd.f32 %v7289_v39, %v3595_v44  ;;  %v3432_v63 = vadd.f32 %v7259_v61, %v3431_v43 }
0x1587   : > { %v8567_v47 = vpop.f32.mrf.mxu0  ;;  %v8591_v48 = vpop.f32.mrf.mxu1 }
0x1588   : > { %v3671_v49 = vpack.c.bf16 %v3596_v46, %v3593_v45  ;;  %v3599_v2 = vpack.c.bf16 %v3432_v63, %v3429_v0 }
0x158a   : > { %8599 = vmatpush3.bf16.msra.mxu1 %v3671_v49 }
0x158b   : > { %8616 = vmatprep.subr.bf16.mxu1 %v9482_v34 }
0x1591   : > { %v3510_v50 = vpop.f32.mrf.mxu0 }
0x1592   : > { %v3511_v57 = vadd.f32 %v7274_v51, %v3510_v50 }
0x1593   : > { %v8578_v55 = vpop.f32.mrf.mxu0 }
0x1595   : > { %v3513_v56 = vpop.f32.mrf.mxu0 }
0x1596   : > { %v3514_v58 = vadd.f32 %v7274_v51, %v3513_v56  ;;  %v9245_v56 = vld [vmem:[%s11241_s7 + $0x1f8] sm:$0xff]  }
0x1597   : > { %v8579_v59 = vpop.f32.mrf.mxu0 }
0x1598   : > { %v3600_v20 = vpack.c.bf16 %v3514_v58, %v3511_v57  ;;  %v9246_v58 = vld [vmem:[%s11241_s7 + $0x1f0] sm:$0xff]   ;;  %v9247_v59 = vld [vmem:[%s11241_s7 + $0x1e8] sm:$0xff]  }
0x159a   : > { %v3605_v60 = vsel %vm1414_vm4, %v3600_v20, 0  ;;  %v9248_v20 = vld [vmem:[%s11241_s7 + $0x1e0] sm:$0xff]  }
0x159b   : > { %8593 = vmatpush3.bf16.xpose.msra.mxu0 %v3605_v60 }
0x159c   : > { %8604 = vmatprep.subr.bf16.mxu0 %v9482_v34 }
0x15a2   : > { %8595 = vmatmul.mubr.msk.bf16.vlgmr.msra.gmra.mxu0 %vm1414_vm4, %v3599_v2 }
0x15a3   : > { %8605 = vmatpush3.bf16.msra.mxu0 %v9237_v1  ;;  %8612 = vmatprep.mubr.msk.bf16.mxu0 %vm9483_vm2, %v9482_v34 }
0x15a4   : > { %8606 = vmatprep.subr.bf16.mxu0 %v9482_v34 }
0x15a7   : > { %8607 = vmatpush3.bf16.msra.mxu0 %v9238_v3  ;;  %v7325_v3 = vld [vmem:[%s11242_s8 + $0xf] ss:$0 sm:$0xff] }
0x15a8   : > { %8608 = vmatprep.subr.bf16.mxu0 %v9482_v34 }
0x15ab   : > { %8609 = vmatpush3.bf16.msra.mxu0 %v9239_v52 }
0x15ac   : > { %8610 = vmatprep.subr.bf16.mxu0 %v9482_v34 }
0x15af   : > { %8611 = vmatpush3.bf16.msra.mxu0 %v9240_v4 }
0x15b0   : > { %8628 = vmatprep.subr.bf16.mxu0 %v9482_v34 }
0x15b2   : > { %8613 = vmatmul.mubr.msk.bf16.vlgmr.msra.gmra.mxu0 %vm1203_vm3, %v10319_v32 }
0x15b3   : > { %8629 = vmatpush3.bf16.msra.mxu0 %v9241_v53  ;;  %8636 = vmatprep.mubr.msk.bf16.mxu0 %vm9483_vm2, %v9482_v34 }
0x15b4   : > { %8630 = vmatprep.subr.bf16.mxu0 %v9482_v34 }
0x15b7   : > { %8631 = vmatpush3.bf16.msra.mxu0 %v9242_v5 }
0x15b8   : > { %8632 = vmatprep.subr.bf16.mxu0 %v9482_v34 }
0x15bb   : > { %8633 = vmatpush3.bf16.msra.mxu0 %v9243_v6 }
0x15bc   : > { %8634 = vmatprep.subr.bf16.mxu0 %v9482_v34 }
0x15bf   : > { %8635 = vmatpush3.bf16.msra.mxu0 %v9244_v7 }
0x15c0   : > { %8652 = vmatprep.subr.bf16.mxu0 %v9482_v34 }
0x15c2   : > { %8637 = vmatmul.mubr.msk.bf16.vlgmr.msra.gmra.mxu0 %vm1203_vm3, %v10319_v32 }
0x15c3   : > { %8656 = vmatprep.mubr.msk.bf16.mxu0 %vm9483_vm2, %v9482_v34 }
0x1662   : > { %v3641_v8 = vpop.f32.mrf.mxu0 }
0x1663   : > { %v3648_v9 = vsel %vm1462_vm5, %v3641_v8, -inf }
0x1664   : > { %3649 = vmax.xlane.f32.xlu0 %v3648_v9  ;;  %v8596_v10 = vpop.f32.mrf.mxu0 }
0x1666   : > { %v3644_v11 = vpop.f32.mrf.mxu0 }
0x1667   : > { %v3651_v12 = vsel %vm1462_vm5, %v3644_v11, -inf }
0x1668   : > { %3652 = vmax.xlane.f32.xlu1 %v3651_v12  ;;  %v8597_v13 = vpop.f32.mrf.mxu0 }
0x1672   : > { %v3797_v14 = vpop.f32.mrf.mxu0 }
0x1673   : > { %v10406_v23 = vadd.f32 %v7310_v15, %v3797_v14 }
0x1674   : > { %v8614_v19 = vpop.f32.mrf.mxu0 }
0x1676   : > { %v3800_v22 = vpop.f32.mrf.mxu0 }
0x1677   : > { %v10408_v24 = vadd.f32 %v7310_v15, %v3800_v22 }
0x1678   : > { %v8615_v25 = vpop.f32.mrf.mxu0 }
0x1679   : > { %v3968_v26 = vpack.c.bf16 %v10408_v24, %v10406_v23 }
0x1682   : > { %v3961_v27 = vpop.f32.mrf.mxu0 }
0x1683   : > { %v3962_v16 = vadd.f32 %v7340_v28, %v3961_v27 }
0x1684   : > { %v8638_v29 = vpop.f32.mrf.mxu0 }
0x1686   : > { %v3964_v30 = vpop.f32.mrf.mxu0 }
0x1687   : > { %v3965_v17 = vadd.f32 %v7340_v28, %v3964_v30 }
0x1688   : > { %v8639_v33 = vpop.f32.mrf.mxu0 }
0x1689   : > { %v4040_v35 = vpack.c.bf16 %v3965_v17, %v3962_v16 }
0x16ed   : > { %v3650_v36 = vpop.xlane.xlu0 %3649 }
0x16ee   : > { %v3654_v37 = vsub.f32 %v3641_v8, %v3650_v36  ;;  %v9249_v36 = vld [vmem:[%s11243_s9 + $0x48] sm:$0xff]  }
0x16f0   : > { %v3656_v38 = vmul.f32 1.442695, %v3654_v37 }
0x16f1   : > { %v3653_v39 = vpop.xlane.xlu1 %3652 }
0x16f2   : > { %9430 = vpow2.f32 %v3656_v38  ;;  %v3655_v40 = vsub.f32 %v3644_v11, %v3653_v39  ;;  %v9250_v38 = vld [vmem:[%s11243_s9 + $0x40] sm:$0xff]   ;;  %v9251_v39 = vld [vmem:[%s11241_s7 + $0x298] sm:$0xff]  }
0x16f4   : > { %v3658_v42 = vmul.f32 1.442695, %v3655_v40  ;;  %v9252_v40 = vld [vmem:[%s11241_s7 + $0x290] sm:$0xff]  }
0x16f6   : > { %9432 = vpow2.f32 %v3658_v42  ;;  %v9253_v42 = vld [vmem:[%s11241_s7 + $0x288] sm:$0xff]  }
0x16ff   : > { %v9431_v43 = vpop.eup %9430 }
0x1700   : > { %v3660_v44 = vsel %vm1462_vm5, %v9431_v43, 0.0 }
0x1701   : > { %3661 = vadd.xlane.f32.xlu0 %v3660_v44  ;;  %v9255_v44 = vld [vmem:[%s11243_s9 + $0x58] sm:$0xff]  }
0x1702   : > { %8653 = vmatpush3.bf16.msra.mxu0 %v9255_v44 }
0x1703   : > { %v9433_v45 = vpop.eup %9432  ;;  %8654 = vmatprep.subr.bf16.mxu0 %v9482_v34 }
0x1704   : > { %v3663_v46 = vsel %vm1462_vm5, %v9433_v45, 0.0 }
0x1705   : > { %3664 = vadd.xlane.f32.xlu1 %v3663_v46 }
0x178a   : > { %v3662_v47 = vpop.xlane.xlu0 %3661 }
0x178b   : > { %9434 = vrcp.f32 %v3662_v47 }
0x178e   : > { %v3665_v48 = vpop.xlane.xlu1 %3664 }
0x178f   : > { %9436 = vrcp.f32 %v3665_v48 }
0x1798   : > { %v9435_v49 = vpop.eup %9434 }
0x1799   : > { %v3668_v51 = vmul.f32 %v9435_v49, %v9431_v43  ;;  %v9254_v43 = vld [vmem:[%s11241_s7 + $0x280] sm:$0xff]  }
0x179c   : > { %v9437_v50 = vpop.eup %9436 }
0x179d   : > { %v3669_v55 = vmul.f32 %v9437_v50, %v9433_v45  ;;  %v9256_v45 = vld [vmem:[%s11243_s9 + $0x50] sm:$0xff]  }
0x179e   : > { %8655 = vmatpush3.bf16.msra.mxu0 %v9256_v45  ;;  %v9258_v45 = vld [vmem:[%s11241_s7 + $0x250] sm:$0xff]  }
0x179f   : > { %v3670_v57 = vpack.c.bf16 %v3669_v55, %v3668_v51  ;;  %8668 = vmatprep.subr.bf16.mxu0 %v9482_v34 }
0x17a1   : > { %8601 = vmatmul.mubr.msk.bf16.vlgmr.msra.gmra.mxu1 %vm1462_vm5, %v3670_v57 }
0x17a2   : > { %8617 = vmatpush3.bf16.msra.mxu1 %v9245_v56  ;;  %8624 = vmatprep.mubr.msk.bf16.mxu1 %vm9483_vm2, %v9482_v34 }
0x17a3   : > { %8618 = vmatprep.subr.bf16.mxu1 %v9482_v34 }
0x17a6   : > { %8619 = vmatpush3.bf16.msra.mxu1 %v9246_v58 }
0x17a7   : > { %8620 = vmatprep.subr.bf16.mxu1 %v9482_v34 }
0x17aa   : > { %8621 = vmatpush3.bf16.msra.mxu1 %v9247_v59 }
0x17ab   : > { %8622 = vmatprep.subr.bf16.mxu1 %v9482_v34 }
0x17ae   : > { %8623 = vmatpush3.bf16.msra.mxu1 %v9248_v20 }
0x17af   : > { %8640 = vmatprep.subr.bf16.mxu1 %v9482_v34 }
0x17b1   : > { %8625 = vmatmul.mubr.msk.bf16.vlgmr.msra.gmra.mxu1 %vm1203_vm3, %v10319_v32 }
0x17b2   : > { %8642 = vmatprep.mubr.msk.bf16.mxu1 %vm9483_vm2, %v9482_v34 }
0x1861   : > { %v3709_v60 = vpop.f32.mrf.mxu1 }
0x1863   : > { %v8602_v61 = vpop.f32.mrf.mxu1 }
0x1865   : > { %v3712_v63 = vpop.f32.mrf.mxu1 }
0x1866   : > { %v3716_v0 = vpack.c.bf16 %v3712_v63, %v3709_v60 }
0x1867   : > { %v8603_v1 = vpop.f32.mrf.mxu1 }
0x1871   : > { %v3879_v2 = vpop.f32.mrf.mxu1 }
0x1872   : > { %v3880_v53 = vadd.f32 %v7325_v3, %v3879_v2 }
0x1873   : > { %v8626_v52 = vpop.f32.mrf.mxu1 }
0x1875   : > { %v3882_v4 = vpop.f32.mrf.mxu1 }
0x1876   : > { %v3883_v5 = vadd.f32 %v7325_v3, %v3882_v4 }
0x1877   : > { %v8627_v6 = vpop.f32.mrf.mxu1 }
0x1878   : > { %v3969_v7 = vpack.c.bf16 %v3883_v5, %v3880_v53 }
0x187a   : > { %v3974_v32 = vsel %vm1414_vm4, %v3969_v7, 0 }
0x187b   : > { %8641 = vmatpush3.bf16.xpose.msra.mxu1 %v3974_v32 }
0x187c   : > { %8646 = vmatprep.subr.bf16.mxu1 %v9482_v34 }
0x1882   : > { %8643 = vmatmul.mubr.msk.bf16.vlgmr.msra.gmra.mxu1 %vm1414_vm4, %v3968_v26 }
0x1883   : > { %8647 = vmatpush3.bf16.msra.mxu1 %v4040_v35  ;;  %8648 = vmatprep.mubr.msk.bf16.mxu1 %vm9483_vm2, %v9482_v34 }
0x1884   : > { %8660 = vmatprep.subr.bf16.mxu1 %v9482_v34 }
0x1942   : > { %v4010_v8 = vpop.f32.mrf.mxu1 }
0x1943   : > { %v4017_v9 = vsel %vm1462_vm5, %v4010_v8, -inf }
0x1944   : > { %4018 = vmax.xlane.f32.xlu0 %v4017_v9  ;;  %v8644_v10 = vpop.f32.mrf.mxu1 }
0x1946   : > { %v4013_v11 = vpop.f32.mrf.mxu1 }
0x1947   : > { %v4020_v12 = vsel %vm1462_vm5, %v4013_v11, -inf }
0x1948   : > { %4021 = vmax.xlane.f32.xlu1 %v4020_v12  ;;  %v8645_v13 = vpop.f32.mrf.mxu1 }
0x19cd   : > { %v4019_v14 = vpop.xlane.xlu0 %4018 }
0x19ce   : > { %v4023_v15 = vsub.f32 %v4010_v8, %v4019_v14 }
0x19d0   : > { %v4025_v19 = vmul.f32 1.442695, %v4023_v15 }
0x19d1   : > { %v4022_v22 = vpop.xlane.xlu1 %4021 }
0x19d2   : > { %9438 = vpow2.f32 %v4025_v19  ;;  %v4024_v23 = vsub.f32 %v4013_v11, %v4022_v22  ;;  %v7359_v22 = vld [vmem:[%s11244_s10 + $0x12] ss:$0 sm:$0xff] }
0x19d4   : > { %v4027_v24 = vmul.f32 1.442695, %v4024_v23 }
0x19d6   : > { %9440 = vpow2.f32 %v4027_v24 }
0x19df   : > { %v9439_v25 = vpop.eup %9438 }
0x19e0   : > { %v4029_v26 = vsel %vm1462_vm5, %v9439_v25, 0.0 }
0x19e1   : > { %4030 = vadd.xlane.f32.xlu0 %v4029_v26 }
0x19e3   : > { %v9441_v27 = vpop.eup %9440 }
0x19e4   : > { %v4032_v28 = vsel %vm1462_vm5, %v9441_v27, 0.0 }
0x19e5   : > { %4033 = vadd.xlane.f32.xlu1 %v4032_v28 }
0x1a6a   : > { %v4031_v29 = vpop.xlane.xlu0 %4030 }
0x1a6b   : > { %9442 = vrcp.f32 %v4031_v29 }
0x1a6e   : > { %v4034_v30 = vpop.xlane.xlu1 %4033 }
0x1a6f   : > { %9444 = vrcp.f32 %v4034_v30 }
0x1a78   : > { %v9443_v16 = vpop.eup %9442 }
0x1a79   : > { %v4037_v33 = vmul.f32 %v9443_v16, %v9439_v25 }
0x1a7c   : > { %v9445_v17 = vpop.eup %9444 }
0x1a7d   : > { %v4038_v35 = vmul.f32 %v9445_v17, %v9441_v27 }
0x1a7f   : > { %v4039_v37 = vpack.c.bf16 %v4038_v35, %v4037_v33 }
0x1a81   : > { %8649 = vmatmul.mubr.msk.bf16.vlgmr.msra.gmra.mxu1 %vm1462_vm5, %v4039_v37 }
0x1a82   : > { %8661 = vmatpush3.bf16.msra.mxu1 %v9249_v36  ;;  %8664 = vmatprep.mubr.msk.bf16.mxu1 %vm9483_vm2, %v9482_v34 }
0x1a83   : > { %8662 = vmatprep.subr.bf16.mxu1 %v9482_v34 }
0x1a86   : > { %8663 = vmatpush3.bf16.msra.mxu1 %v9250_v38 }
0x1a87   : > { %8680 = vmatprep.subr.bf16.mxu1 %v9251_v39 }
0x1a89   : > { %8665 = vmatmul.mubr.msk.bf16.vlgmr.msra.gmra.mxu1 %vm1414_vm4, %v3716_v0  ;;  %v7388_v0 = vld [vmem:[%s11242_s8 + $0x14] ss:$0 sm:$0xff] }
0x1a8a   : > { %8681 = vmatpush3.bf16.msra.mxu1 %v9251_v39  ;;  %8688 = vmatprep.mubr.msk.bf16.mxu1 %vm1203_vm3, %v9767_v21 }
0x1a8b   : > { %8682 = vmatprep.subr.bf16.mxu1 %v9252_v40 }
0x1a8e   : > { %8683 = vmatpush3.bf16.msra.mxu1 %v9252_v40 }
0x1a8f   : > { %8684 = vmatprep.subr.bf16.mxu1 %v9253_v42 }
0x1a92   : > { %8685 = vmatpush3.bf16.msra.mxu1 %v9253_v42 }
0x1a93   : > { %8686 = vmatprep.subr.bf16.mxu1 %v9254_v43 }
0x1a96   : > { %8687 = vmatpush3.bf16.msra.mxu1 %v9254_v43 }
0x1a97   : > { %8712 = vmatprep.subr.bf16.mxu1 %v9482_v34 }
0x1a99   : > { %8689 = vmatmul.mubr.msk.bf16.vlgmr.msra.gmra.mxu1 %vm1203_vm3, %v9775_v41 }
0x1a9a   : > { %8692 = vmatprep.mubr.msk.bf16.mxu1 %vm1203_vm3, %v9783_v62 }
0x1aa1   : > { %8693 = vmatmul.mubr.msk.bf16.gmra.mxu1 %vm1203_vm3, %v9798_v18 }
0x1aa2   : > { %8720 = vmatprep.mubr.msk.bf16.mxu1 %vm9483_vm2, %v9482_v34 }
0x1b41   : > { %v4078_v46 = vpop.f32.mrf.mxu1 }
0x1b43   : > { %v8650_v47 = vpop.f32.mrf.mxu1 }
0x1b44   : > { %v9260_v47 = vld [vmem:[%s11241_s7 + $0x240] sm:$0xff]  }
0x1b45   : > { %v4081_v48 = vpop.f32.mrf.mxu1 }
0x1b46   : > { %v4085_v49 = vpack.c.bf16 %v4081_v48, %v4078_v46  ;;  %v9259_v46 = vld [vmem:[%s11241_s7 + $0x248] sm:$0xff]   ;;  %v9261_v48 = vld [vmem:[%s11241_s7 + $0x2d8] sm:$0xff]  }
0x1b47   : > { %v8651_v50 = vpop.f32.mrf.mxu1 }
0x1b48   : > { %8657 = vmatmul.mubr.msk.bf16.vlgmr.msra.gmra.mxu0 %vm1414_vm4, %v4085_v49 }
0x1b49   : > { %v4196_v51 = vpop.f32.mrf.mxu1  ;;  %8676 = vmatprep.mubr.msk.bf16.mxu0 %vm9483_vm2, %v9482_v34 }
0x1b4b   : > { %v8666_v55 = vpop.f32.mrf.mxu1 }
0x1b4d   : > { %v4199_v56 = vpop.f32.mrf.mxu1 }
0x1b4f   : > { %v8667_v57 = vpop.f32.mrf.mxu1 }
0x1b59   : > { %v8690_v58 = vpop.f32.mrf.mxu1 }
0x1b5a   : > { %v4423_v9 = vadd.f32 %v8690_v58, %v7388_v0 }
0x1b5b   : > { %v4414_v59 = vpop.f32.mrf.mxu1 }
0x1b5c   : > { %v4415_v13 = vadd.f32 %v7388_v0, %v4414_v59 }
0x1b5d   : > { %v8691_v20 = vpop.f32.mrf.mxu1 }
0x1b5e   : > { %v4426_v32 = vadd.f32 %v8691_v20, %v7388_v0  ;;  %v7362_v20 = vld [vmem:[%s11244_s10 + $0x14] ss:$0 sm:$0xff] }
0x1b5f   : > { %v4417_v60 = vpop.f32.mrf.mxu1 }
0x1b60   : > { %v4553_v10 = vpack.c.bf16 %v4426_v32, %v4423_v9  ;;  %v4418_v11 = vadd.f32 %v7388_v0, %v4417_v60  ;;  %v7373_v32 = vld [vmem:[%s11242_s8 + $0x12] ss:$0 sm:$0xff] }
0x1b61   : > { %v8694_v61 = vpop.f32.mrf.mxu1 }
0x1b62   : > { %v4439_v2 = vadd.f32 %v8694_v61, %v7388_v0  ;;  %v4563_v12 = vsel %vm1414_vm4, %v4553_v10, 0  ;;  %v4552_v14 = vpack.c.bf16 %v4418_v11, %v4415_v13 }
0x1b63   : > { %v4430_v63 = vpop.f32.mrf.mxu1 }
0x1b64   : > { %v4431_v6 = vadd.f32 %v7388_v0, %v4430_v63  ;;  %v4560_v15 = vsel %vm1414_vm4, %v4552_v14, 0  ;;  %v9266_v14 = vld [vmem:[%s11241_s7 + $0x2b0] sm:$0xff]  }
0x1b65   : > { %v8695_v1 = vpop.f32.mrf.mxu1 }
0x1b66   : > { %v4442_v3 = vadd.f32 %v8695_v1, %v7388_v0 }
0x1b67   : > { %v4433_v52 = vpop.f32.mrf.mxu1 }
0x1b68   : > { %v4555_v4 = vpack.c.bf16 %v4442_v3, %v4439_v2  ;;  %v4434_v53 = vadd.f32 %v7388_v0, %v4433_v52  ;;  %v7363_v0 = vld [vmem:[%s11244_s10 + $0x15] ss:$0 sm:$0xff] }
0x1b6a   : > { %v4569_v5 = vsel %vm1414_vm4, %v4555_v4, 0  ;;  %v4554_v7 = vpack.c.bf16 %v4434_v53, %v4431_v6  ;;  %v9262_v4 = vld [vmem:[%s11241_s7 + $0x2d0] sm:$0xff]   ;;  %v9263_v53 = vld [vmem:[%s11241_s7 + $0x2c8] sm:$0xff]   ;;  %v9265_v6 = vld [vmem:[%s11241_s7 + $0x2b8] sm:$0xff]  }
0x1b6b   : > { %8713 = vmatpush3.bf16.xpose.msra.mxu1 %v4569_v5  ;;  %v9264_v5 = vld [vmem:[%s11241_s7 + $0x2c0] sm:$0xff]  }
0x1b6c   : > { %8714 = vmatprep.subr.bf16.mxu1 %v9482_v34  ;;  %v4566_v8 = vsel %vm1414_vm4, %v4554_v7, 0 }
0x1b73   : > { %8715 = vmatpush3.bf16.xpose.msra.mxu1 %v4566_v8 }
0x1b74   : > { %8716 = vmatprep.subr.bf16.mxu1 %v9482_v34 }
0x1b7b   : > { %8717 = vmatpush3.bf16.xpose.msra.mxu1 %v4563_v12 }
0x1b7c   : > { %8718 = vmatprep.subr.bf16.mxu1 %v9482_v34 }
0x1b83   : > { %8719 = vmatpush3.bf16.xpose.msra.mxu1 %v4560_v15  ;;  %v9267_v15 = vld [vmem:[%s11241_s7 + $0x2a8] sm:$0xff]  }
0x1b84   : > { %8748 = vmatprep.subr.bf16.mxu1 %v9265_v6 }
0x1c08   : > { %v4140_v19 = vpop.f32.mrf.mxu0 }
0x1c09   : > { %v4197_v23 = vadd.f32 %v4196_v51, %v4140_v19  ;;  %v9268_v19 = vld [vmem:[%s11241_s7 + $0x2a0] sm:$0xff]  }
0x1c0a   : > { %v8658_v24 = vpop.f32.mrf.mxu0 }
0x1c0b   : > { %v4209_v25 = vadd.f32 %v7359_v22, %v4197_v23 }
0x1c0c   : > { %v4143_v26 = vpop.f32.mrf.mxu0 }
0x1c0d   : > { %v4200_v27 = vadd.f32 %v4199_v56, %v4143_v26  ;;  %v4211_v28 = vadd.f32 %v4209_v25, %v10310_v54 }
0x1c0e   : > { %v8659_v29 = vpop.f32.mrf.mxu0 }
0x1c0f   : > { %v4210_v30 = vadd.f32 %v7359_v22, %v4200_v27  ;;  %v4215_v16 = vsel %vm1203_vm3, %v4211_v28, 0.0 }
0x1c10   : > { %4216 = vadd.xlane.f32.xlu0 %v4215_v16 }
0x1c11   : > { %v4212_v17 = vadd.f32 %v4210_v30, %v10312_v31  ;;  %v9257_v31 = vld [vmem:[%s11241_s7 + $0x258] sm:$0xff]  }
0x1c12   : > { %8669 = vmatpush3.bf16.msra.mxu0 %v9257_v31 }
0x1c13   : > { %v4218_v33 = vsel %vm1203_vm3, %v4212_v17, 0.0  ;;  %8670 = vmatprep.subr.bf16.mxu0 %v9482_v34 }
0x1c14   : > { %4219 = vadd.xlane.f32.xlu1 %v4218_v33 }
0x1c16   : > { %8671 = vmatpush3.bf16.msra.mxu0 %v9258_v45 }
0x1c17   : > { %8672 = vmatprep.subr.bf16.mxu0 %v9482_v34 }
0x1c1a   : > { %8673 = vmatpush3.bf16.msra.mxu0 %v9259_v46 }
0x1c1b   : > { %8674 = vmatprep.subr.bf16.mxu0 %v9482_v34 }
0x1c1e   : > { %8675 = vmatpush3.bf16.msra.mxu0 %v9260_v47 }
0x1c1f   : > { %8696 = vmatprep.subr.bf16.mxu0 %v9261_v48 }
0x1c99   : > { %v4217_v35 = vpop.xlane.xlu0 %4216 }
0x1c9a   : > { %v4221_v36 = vmul.f32 0.015625, %v4217_v35 }
0x1c9c   : > { %v4223_v37 = vsub.f32 %v4211_v28, %v4221_v36  ;;  %v7406_v28 = vld [vmem:[%s11242_s8 + $0x16] ss:$0 sm:$0xff] }
0x1c9d   : > { %v4220_v38 = vpop.xlane.xlu1 %4219 }
0x1c9e   : > { %v4222_v39 = vmul.f32 0.015625, %v4220_v38  ;;  %v4225_v40 = vmul.f32 %v4223_v37, %v4223_v37 }
0x1ca0   : > { %v4224_v42 = vsub.f32 %v4212_v17, %v4222_v39  ;;  %v4227_v43 = vsel %vm1203_vm3, %v4225_v40, 0.0 }
0x1ca1   : > { %4228 = vadd.xlane.f32.xlu0 %v4227_v43 }
0x1ca2   : > { %v4226_v54 = vmul.f32 %v4224_v42, %v4224_v42 }
0x1ca4   : > { %v4230_v44 = vsel %vm1203_vm3, %v4226_v54, 0.0 }
0x1ca5   : > { %4231 = vadd.xlane.f32.xlu1 %v4230_v44 }
0x1d2a   : > { %v4229_v49 = vpop.xlane.xlu0 %4228 }
0x1d2b   : > { %v4233_v50 = vmul.f32 0.015625, %v4229_v49 }
0x1d2d   : > { %v4235_v51 = vadd.f32 1e-05, %v4233_v50 }
0x1d2e   : > { %v4232_v55 = vpop.xlane.xlu1 %4231 }
0x1d2f   : > { %9446 = vrsqrt.f32 %v4235_v51  ;;  %v4234_v56 = vmul.f32 0.015625, %v4232_v55 }
0x1d31   : > { %v4236_v57 = vadd.f32 1e-05, %v4234_v56 }
0x1d33   : > { %9448 = vrsqrt.f32 %v4236_v57 }
0x1d3c   : > { %v9447_v58 = vpop.eup %9446 }
0x1d3d   : > { %v4239_v59 = vmul.f32 %v9447_v58, %v4223_v37  ;;  %v7445_v58 = vld [vmem:[%s11242_s8 + $0x15] ss:$0 sm:$0xff] }
0x1d3f   : > { %v4245_v63 = vmul.f32 %v7362_v20, %v4239_v59 }
0x1d40   : > { %v9449_v60 = vpop.eup %9448 }
0x1d41   : > { %v4240_v61 = vmul.f32 %v9449_v60, %v4224_v42  ;;  %v10544_v2 = vadd.f32 %v7363_v0, %v4245_v63 }
0x1d43   : > { %v4246_v1 = vmul.f32 %v7362_v20, %v4240_v61 }
0x1d45   : > { %v10546_v3 = vadd.f32 %v7363_v0, %v4246_v1 }
0x1d47   : > { %v10550_v52 = vpack.c.bf16 %v10546_v3, %v10544_v2 }
0x1d49   : > { %8677 = vmatmul.mubr.msk.bf16.vlgmr.msra.gmra.mxu0 %vm1203_vm3, %v10550_v52 }
0x1d4a   : > { %8697 = vmatpush3.bf16.msra.mxu0 %v9261_v48  ;;  %8704 = vmatprep.mubr.msk.bf16.mxu0 %vm1203_vm3, %v9767_v21 }
0x1d4b   : > { %8698 = vmatprep.subr.bf16.mxu0 %v9262_v4 }
0x1d4e   : > { %8699 = vmatpush3.bf16.msra.mxu0 %v9262_v4 }
0x1d4f   : > { %8700 = vmatprep.subr.bf16.mxu0 %v9263_v53 }
0x1d52   : > { %8701 = vmatpush3.bf16.msra.mxu0 %v9263_v53 }
0x1d53   : > { %8702 = vmatprep.subr.bf16.mxu0 %v9264_v5 }
0x1d56   : > { %8703 = vmatpush3.bf16.msra.mxu0 %v9264_v5 }
0x1d57   : > { %8724 = vmatprep.subr.bf16.mxu0 %v9482_v34 }
0x1d59   : > { %8705 = vmatmul.mubr.msk.bf16.vlgmr.msra.gmra.mxu0 %vm1203_vm3, %v9775_v41 }
0x1d5a   : > { %8708 = vmatprep.mubr.msk.bf16.mxu0 %vm1203_vm3, %v9783_v62 }
0x1d61   : > { %8709 = vmatmul.mubr.msk.bf16.gmra.mxu0 %vm1203_vm3, %v9798_v18 }
0x1d62   : > { %8732 = vmatprep.mubr.msk.bf16.mxu0 %vm9483_vm2, %v9482_v34 }
0x1e09   : > { %v4332_v7 = vpop.f32.mrf.mxu0 }
0x1e0a   : > { %v4333_v10 = vadd.f32 %v7373_v32, %v4332_v7 }
0x1e0b   : > { %v8678_v8 = vpop.f32.mrf.mxu0 }
0x1e0d   : > { %v4335_v9 = vpop.f32.mrf.mxu0 }
0x1e0e   : > { %v4336_v11 = vadd.f32 %v7373_v32, %v4335_v9 }
0x1e0f   : > { %v8679_v12 = vpop.f32.mrf.mxu0 }
0x1e10   : > { %v4551_v13 = vpack.c.bf16 %v4336_v11, %v4333_v10 }
0x1e12   : > { %8721 = vmatmul.mubr.msk.bf16.vlgmr.msra.gmra.mxu1 %vm1414_vm4, %v4551_v13 }
0x1e13   : > { %8749 = vmatpush3.bf16.msra.mxu1 %v9265_v6  ;;  %8756 = vmatprep.mubr.msk.bf16.mxu1 %vm1203_vm3, %v9767_v21 }
0x1e14   : > { %8750 = vmatprep.subr.bf16.mxu1 %v9266_v14 }
0x1e17   : > { %8751 = vmatpush3.bf16.msra.mxu1 %v9266_v14 }
0x1e18   : > { %8752 = vmatprep.subr.bf16.mxu1 %v9267_v15 }
0x1e19   : > { %v8706_v22 = vpop.f32.mrf.mxu0 }
0x1e1a   : > { %v4529_v39 = vadd.f32 %v8706_v22, %v7406_v28 }
0x1e1b   : > { %v4520_v23 = vpop.f32.mrf.mxu0  ;;  %8753 = vmatpush3.bf16.msra.mxu1 %v9267_v15 }
0x1e1c   : > { %8754 = vmatprep.subr.bf16.mxu1 %v9268_v19  ;;  %v4521_v43 = vadd.f32 %v7406_v28, %v4520_v23 }
0x1e1d   : > { %v8707_v24 = vpop.f32.mrf.mxu0 }
0x1e1e   : > { %v4532_v37 = vadd.f32 %v8707_v24, %v7406_v28 }
0x1e1f   : > { %v4523_v25 = vpop.f32.mrf.mxu0  ;;  %8755 = vmatpush3.bf16.msra.mxu1 %v9268_v19 }
0x1e20   : > { %8780 = vmatprep.subr.bf16.mxu1 %v9482_v34  ;;  %v4636_v40 = vpack.c.bf16 %v4532_v37, %v4529_v39  ;;  %v4524_v42 = vadd.f32 %v7406_v28, %v4523_v25  ;;  %v9270_v37 = vld [vmem:[%s11241_s7 + $0x270] sm:$0xff]   ;;  %v9272_v39 = vld [vmem:[%s11241_s7 + $0x260] sm:$0xff]  }
0x1e21   : > { %v8710_v26 = vpop.f32.mrf.mxu0 }
0x1e22   : > { %8757 = vmatmul.mubr.msk.bf16.vlgmr.msra.gmra.mxu1 %vm1203_vm3, %v9775_v41  ;;  %v4545_v30 = vadd.f32 %v8710_v26, %v7406_v28  ;;  %v4635_v54 = vpack.c.bf16 %v4524_v42, %v4521_v43  ;;  %v9274_v42 = vld [vmem:[%s11241_s7 + $0x2f0] sm:$0xff]   ;;  %v9275_v43 = vld [vmem:[%s11241_s7 + $0x2e8] sm:$0xff]  }
0x1e23   : > { %v4536_v27 = vpop.f32.mrf.mxu0  ;;  %8760 = vmatprep.mubr.msk.bf16.mxu1 %vm1203_vm3, %v9783_v62 }
0x1e24   : > { %v4537_v36 = vadd.f32 %v7406_v28, %v4536_v27 }
0x1e25   : > { %v8711_v29 = vpop.f32.mrf.mxu0 }
0x1e26   : > { %v4548_v16 = vadd.f32 %v8711_v29, %v7406_v28 }
0x1e27   : > { %v4539_v17 = vpop.f32.mrf.mxu0 }
0x1e28   : > { %v4638_v33 = vpack.c.bf16 %v4548_v16, %v4545_v30  ;;  %v4540_v35 = vadd.f32 %v7406_v28, %v4539_v17 }
0x1e2a   : > { %8725 = vmatpush3.bf16.msra.mxu0 %v4638_v33  ;;  %8761 = vmatmul.mubr.msk.bf16.gmra.mxu1 %vm1203_vm3, %v9798_v18  ;;  %v4637_v38 = vpack.c.bf16 %v4540_v35, %v4537_v36  ;;  %v9269_v35 = vld [vmem:[%s11241_s7 + $0x278] sm:$0xff]  }
0x1e2b   : > { %8726 = vmatprep.subr.bf16.mxu0 %v9482_v34  ;;  %8788 = vmatprep.mubr.msk.bf16.mxu1 %vm9483_vm2, %v9482_v34 }
0x1e2e   : > { %8727 = vmatpush3.bf16.msra.mxu0 %v4637_v38  ;;  %v9271_v38 = vld [vmem:[%s11241_s7 + $0x268] sm:$0xff]  }
0x1e2f   : > { %8728 = vmatprep.subr.bf16.mxu0 %v9482_v34 }
0x1e32   : > { %8729 = vmatpush3.bf16.msra.mxu0 %v4636_v40  ;;  %v9273_v40 = vld [vmem:[%s11241_s7 + $0x2f8] sm:$0xff]  }
0x1e33   : > { %8730 = vmatprep.subr.bf16.mxu0 %v9482_v34 }
0x1e36   : > { %8731 = vmatpush3.bf16.msra.mxu0 %v4635_v54  ;;  %v9276_v54 = vld [vmem:[%s11241_s7 + $0x2e0] sm:$0xff]  }
0x1e37   : > { %8736 = vmatprep.subr.bf16.mxu0 %v9482_v34 }
0x1ed2   : > { %v4605_v44 = vpop.f32.mrf.mxu1 }
0x1ed3   : > { %v4612_v31 = vsel %vm1203_vm3, %v4605_v44, -inf }
0x1ed4   : > { %4613 = vmax.xlane.f32.xlu0 %v4612_v31  ;;  %v8722_v45 = vpop.f32.mrf.mxu1 }
0x1ed6   : > { %v4608_v46 = vpop.f32.mrf.mxu1 }
0x1ed7   : > { %v4615_v47 = vsel %vm1203_vm3, %v4608_v46, -inf }
0x1ed8   : > { %4616 = vmax.xlane.f32.xlu1 %v4615_v47  ;;  %v8723_v48 = vpop.f32.mrf.mxu1 }
0x1ee2   : > { %v8758_v49 = vpop.f32.mrf.mxu1 }
0x1ee3   : > { %v4855_v7 = vadd.f32 %v8758_v49, %v7445_v58 }
0x1ee4   : > { %v4846_v50 = vpop.f32.mrf.mxu1 }
0x1ee5   : > { %v4847_v10 = vadd.f32 %v7445_v58, %v4846_v50 }
0x1ee6   : > { %v8759_v51 = vpop.f32.mrf.mxu1 }
0x1ee7   : > { %v4858_v5 = vadd.f32 %v8759_v51, %v7445_v58  ;;  %v9278_v51 = vld [vmem:[%s11243_s9 + $0x60] sm:$0xff]  }
0x1ee8   : > { %v4849_v55 = vpop.f32.mrf.mxu1 }
0x1ee9   : > { %v4985_v32 = vpack.c.bf16 %v4858_v5, %v4855_v7  ;;  %v4850_v8 = vadd.f32 %v7445_v58, %v4849_v55 }
0x1eea   : > { %v8762_v56 = vpop.f32.mrf.mxu1 }
0x1eeb   : > { %v4871_v20 = vadd.f32 %v8762_v56, %v7445_v58  ;;  %v4995_v9 = vsel %vm1414_vm4, %v4985_v32, 0  ;;  %v4984_v11 = vpack.c.bf16 %v4850_v8, %v4847_v10 }
0x1eec   : > { %v4862_v57 = vpop.f32.mrf.mxu1 }
0x1eed   : > { %v4863_v4 = vadd.f32 %v7445_v58, %v4862_v57  ;;  %v4992_v12 = vsel %vm1414_vm4, %v4984_v11, 0 }
0x1eee   : > { %v8763_v59 = vpop.f32.mrf.mxu1 }
0x1eef   : > { %v4874_v60 = vadd.f32 %v8763_v59, %v7445_v58 }
0x1ef0   : > { %v4865_v61 = vpop.f32.mrf.mxu1 }
0x1ef1   : > { %v4987_v63 = vpack.c.bf16 %v4874_v60, %v4871_v20  ;;  %v4866_v0 = vadd.f32 %v7445_v58, %v4865_v61  ;;  %v7463_v61 = vld [vmem:[%s11242_s8 + $0x17] ss:$0 sm:$0xff] }
0x1ef3   : > { %v5001_v1 = vsel %vm1414_vm4, %v4987_v63, 0  ;;  %v4986_v53 = vpack.c.bf16 %v4866_v0, %v4863_v4 }
0x1ef4   : > { %8781 = vmatpush3.bf16.xpose.msra.mxu1 %v5001_v1 }
0x1ef5   : > { %8782 = vmatprep.subr.bf16.mxu1 %v9482_v34  ;;  %v4998_v6 = vsel %vm1414_vm4, %v4986_v53, 0 }
0x1efc   : > { %8783 = vmatpush3.bf16.xpose.msra.mxu1 %v4998_v6 }
0x1efd   : > { %8784 = vmatprep.subr.bf16.mxu1 %v9482_v34 }
0x1f04   : > { %8785 = vmatpush3.bf16.xpose.msra.mxu1 %v4995_v9 }
0x1f05   : > { %8786 = vmatprep.subr.bf16.mxu1 %v9482_v34 }
0x1f0c   : > { %8787 = vmatpush3.bf16.xpose.msra.mxu1 %v4992_v12 }
0x1f0d   : > { %8812 = vmatprep.subr.bf16.mxu1 %v9482_v34 }
0x1f5d   : > { %v4614_v13 = vpop.xlane.xlu0 %4613 }
0x1f5e   : > { %v4618_v14 = vsub.f32 %v4605_v44, %v4614_v13 }
0x1f60   : > { %v4620_v15 = vmul.f32 1.442695, %v4618_v14 }
0x1f61   : > { %v4617_v19 = vpop.xlane.xlu1 %4616 }
0x1f62   : > { %9450 = vpow2.f32 %v4620_v15  ;;  %v4619_v22 = vsub.f32 %v4608_v46, %v4617_v19  ;;  %v7430_v46 = vld [vmem:[%s11242_s8 + $0x13] ss:$0 sm:$0xff] }
0x1f64   : > { %v4622_v23 = vmul.f32 1.442695, %v4619_v22 }
0x1f66   : > { %9452 = vpow2.f32 %v4622_v23 }
0x1f6f   : > { %v9451_v24 = vpop.eup %9450 }
0x1f70   : > { %v4624_v25 = vsel %vm1203_vm3, %v9451_v24, 0.0 }
0x1f71   : > { %4625 = vadd.xlane.f32.xlu0 %v4624_v25 }
0x1f73   : > { %v9453_v26 = vpop.eup %9452 }
0x1f74   : > { %v4627_v27 = vsel %vm1203_vm3, %v9453_v26, 0.0 }
0x1f75   : > { %4628 = vadd.xlane.f32.xlu1 %v4627_v27 }
0x1ffa   : > { %v4626_v28 = vpop.xlane.xlu0 %4625 }
0x1ffb   : > { %9454 = vrcp.f32 %v4626_v28 }
0x1ffe   : > { %v4629_v29 = vpop.xlane.xlu1 %4628 }
0x1fff   : > { %9456 = vrcp.f32 %v4629_v29 }
0x2008   : > { %v9455_v30 = vpop.eup %9454 }
0x2009   : > { %v4632_v17 = vmul.f32 %v9455_v30, %v9451_v24 }
0x200c   : > { %v9457_v16 = vpop.eup %9456 }
0x200d   : > { %v4633_v33 = vmul.f32 %v9457_v16, %v9453_v26 }
0x200f   : > { %v4634_v36 = vpack.c.bf16 %v4633_v33, %v4632_v17 }
0x2011   : > { %8733 = vmatmul.mubr.msk.bf16.vlgmr.msra.gmra.mxu0 %vm1203_vm3, %v4634_v36 }
0x2012   : > { %8737 = vmatpush3.bf16.msra.mxu0 %v9269_v35  ;;  %8744 = vmatprep.mubr.msk.bf16.mxu0 %vm9483_vm2, %v9482_v34 }
0x2013   : > { %8738 = vmatprep.subr.bf16.mxu0 %v9482_v34 }
0x2016   : > { %8739 = vmatpush3.bf16.msra.mxu0 %v9270_v37 }
0x2017   : > { %8740 = vmatprep.subr.bf16.mxu0 %v9482_v34 }
0x201a   : > { %8741 = vmatpush3.bf16.msra.mxu0 %v9271_v38 }
0x201b   : > { %8742 = vmatprep.subr.bf16.mxu0 %v9482_v34 }
0x201e   : > { %8743 = vmatpush3.bf16.msra.mxu0 %v9272_v39 }
0x201f   : > { %8764 = vmatprep.subr.bf16.mxu0 %v9273_v40 }
0x2021   : > { %8745 = vmatmul.mubr.msk.bf16.vlgmr.msra.gmra.mxu0 %vm1203_vm3, %v10550_v52 }
0x2022   : > { %8765 = vmatpush3.bf16.msra.mxu0 %v9273_v40  ;;  %8772 = vmatprep.mubr.msk.bf16.mxu0 %vm1203_vm3, %v9767_v21 }
0x2023   : > { %8766 = vmatprep.subr.bf16.mxu0 %v9274_v42 }
0x2026   : > { %8767 = vmatpush3.bf16.msra.mxu0 %v9274_v42 }
0x2027   : > { %8768 = vmatprep.subr.bf16.mxu0 %v9275_v43 }
0x202a   : > { %8769 = vmatpush3.bf16.msra.mxu0 %v9275_v43 }
0x202b   : > { %8770 = vmatprep.subr.bf16.mxu0 %v9276_v54 }
0x202e   : > { %8771 = vmatpush3.bf16.msra.mxu0 %v9276_v54 }
0x202f   : > { %8792 = vmatprep.subr.bf16.mxu0 %v9482_v34 }
0x2031   : > { %8773 = vmatmul.mubr.msk.bf16.vlgmr.msra.gmra.mxu0 %vm1203_vm3, %v9775_v41 }
0x2032   : > { %8776 = vmatprep.mubr.msk.bf16.mxu0 %vm1203_vm3, %v9783_v62 }
0x2039   : > { %8777 = vmatmul.mubr.msk.bf16.gmra.mxu0 %vm1203_vm3, %v9798_v18  ;;  %v9277_v18 = vld [vmem:[%s11243_s9 + $0x68] sm:$0xff]  }
0x203a   : > { %8800 = vmatprep.mubr.msk.bf16.mxu0 %vm9483_vm2, %v9482_v34 }
0x20d1   : > { %v4676_v21 = vpop.f32.mrf.mxu0 }
0x20d3   : > { %v8734_v52 = vpop.f32.mrf.mxu0 }
0x20d5   : > { %v4679_v44 = vpop.f32.mrf.mxu0 }
0x20d6   : > { %v4683_v55 = vpack.c.bf16 %v4679_v44, %v4676_v21  ;;  %v9279_v44 = vld [vmem:[%s11243_s9 + $0x78] sm:$0xff]  }
0x20d7   : > { %v8735_v31 = vpop.f32.mrf.mxu0 }
0x20d8   : > { %v9280_v31 = vld [vmem:[%s11243_s9 + $0x70] sm:$0xff]  }
0x20e1   : > { %v4764_v45 = vpop.f32.mrf.mxu0 }
0x20e2   : > { %v4765_v48 = vadd.f32 %v7430_v46, %v4764_v45 }
0x20e3   : > { %v8746_v47 = vpop.f32.mrf.mxu0 }
0x20e5   : > { %v4767_v41 = vpop.f32.mrf.mxu0 }
0x20e6   : > { %v4768_v49 = vadd.f32 %v7430_v46, %v4767_v41 }
0x20e7   : > { %v8747_v62 = vpop.f32.mrf.mxu0 }
0x20e8   : > { %v4983_v50 = vpack.c.bf16 %v4768_v49, %v4765_v48  ;;  %v7485_v62 = vld [vmem:[%s11244_s10 + $0x13] ss:$0 sm:$0xff] }
0x20ea   : > { %8789 = vmatmul.mubr.msk.bf16.vlgmr.msra.gmra.mxu1 %vm1414_vm4, %v4983_v50 }
0x20eb   : > { %8813 = vmatpush3.bf16.msra.mxu1 %v9277_v18  ;;  %8816 = vmatprep.mubr.msk.bf16.mxu1 %vm9483_vm2, %v9482_v34 }
0x20ec   : > { %8814 = vmatprep.subr.bf16.mxu1 %v9482_v34 }
0x20ef   : > { %8815 = vmatpush3.bf16.msra.mxu1 %v9278_v51 }
0x20f0   : > { %8832 = vmatprep.subr.bf16.mxu1 %v9482_v34 }
0x20f1   : > { %v8774_v56 = vpop.f32.mrf.mxu0 }
0x20f2   : > { %8817 = vmatmul.mubr.msk.bf16.vlgmr.msra.gmra.mxu1 %vm1414_vm4, %v4683_v55  ;;  %v4961_v8 = vadd.f32 %v8774_v56, %v7463_v61 }
0x20f3   : > { %v4952_v57 = vpop.f32.mrf.mxu0  ;;  %8848 = vmatprep.mubr.msk.bf16.mxu1 %vm9483_vm2, %v9482_v34 }
0x20f4   : > { %v4953_v11 = vadd.f32 %v7463_v61, %v4952_v57 }
0x20f5   : > { %v8775_v58 = vpop.f32.mrf.mxu0 }
0x20f6   : > { %v4964_v7 = vadd.f32 %v8775_v58, %v7463_v61 }
0x20f7   : > { %v4955_v59 = vpop.f32.mrf.mxu0 }
0x20f8   : > { %v5068_v9 = vpack.c.bf16 %v4964_v7, %v4961_v8  ;;  %v4956_v10 = vadd.f32 %v7463_v61, %v4955_v59  ;;  %v9282_v8 = vld [vmem:[%s11245_s11 + $0x30] sm:$0xff]  }
0x20f9   : > { %v8778_v20 = vpop.f32.mrf.mxu0 }
0x20fa   : > { %v4977_v0 = vadd.f32 %v8778_v20, %v7463_v61  ;;  %v5067_v12 = vpack.c.bf16 %v4956_v10, %v4953_v11  ;;  %v9284_v10 = vld [vmem:[%s11245_s11 + $0x20] sm:$0xff]   ;;  %v9285_v11 = vld [vmem:[%s11246_s12 + $0x78] sm:$0xff]  }
0x20fb   : > { %v4968_v60 = vpop.f32.mrf.mxu0  ;;  %8833 = vmatpush3.bf16.msra.mxu1 %v9285_v11  ;;  %v9303_v11 = vld [vmem:[%s11249_s15 + $0x60] sm:$0xff]  }
0x20fc   : > { %v4969_v6 = vadd.f32 %v7463_v61, %v4968_v60  ;;  %8834 = vmatprep.subr.bf16.mxu1 %v9482_v34 }
0x20fd   : > { %v8779_v63 = vpop.f32.mrf.mxu0 }
0x20fe   : > { %v4980_v1 = vadd.f32 %v8779_v63, %v7463_v61 }
0x20ff   : > { %v4971_v4 = vpop.f32.mrf.mxu0 }
0x2100   : > { %v5070_v53 = vpack.c.bf16 %v4980_v1, %v4977_v0  ;;  %v4972_v5 = vadd.f32 %v7463_v61, %v4971_v4 }
0x2102   : > { %8793 = vmatpush3.bf16.msra.mxu0 %v5070_v53  ;;  %v5069_v32 = vpack.c.bf16 %v4972_v5, %v4969_v6 }
0x2103   : > { %8794 = vmatprep.subr.bf16.mxu0 %v9482_v34 }
0x2106   : > { %8795 = vmatpush3.bf16.msra.mxu0 %v5069_v32 }
0x2107   : > { %8796 = vmatprep.subr.bf16.mxu0 %v9482_v34 }
0x210a   : > { %8797 = vmatpush3.bf16.msra.mxu0 %v5068_v9  ;;  %v9283_v9 = vld [vmem:[%s11245_s11 + $0x28] sm:$0xff]  }
0x210b   : > { %8798 = vmatprep.subr.bf16.mxu0 %v9482_v34 }
0x210e   : > { %8799 = vmatpush3.bf16.msra.mxu0 %v5067_v12  ;;  %v9286_v12 = vld [vmem:[%s11246_s12 + $0x70] sm:$0xff]  }
0x210f   : > { %8804 = vmatprep.subr.bf16.mxu0 %v9482_v34  ;;  %8835 = vmatpush3.bf16.msra.mxu1 %v9286_v12  ;;  %v9305_v12 = vld [vmem:[%s11249_s15 + $0x58] sm:$0xff]  }
0x2110   : > { %8836 = vmatprep.subr.bf16.mxu1 %v9482_v34 }
0x21aa   : > { %v5037_v13 = vpop.f32.mrf.mxu1 }
0x21ab   : > { %v5044_v14 = vsel %vm1203_vm3, %v5037_v13, -inf }
0x21ac   : > { %5045 = vmax.xlane.f32.xlu0 %v5044_v14  ;;  %v8790_v15 = vpop.f32.mrf.mxu1  ;;  %v9288_v14 = vld [vmem:[%s11246_s12 + $0x60] sm:$0xff]  }
0x21ad   : > { %v9289_v15 = vld [vmem:[%s11246_s12 + $0x58] sm:$0xff]  }
0x21ae   : > { %v5040_v19 = vpop.f32.mrf.mxu1 }
0x21af   : > { %v5047_v22 = vsel %vm1203_vm3, %v5040_v19, -inf }
0x21b0   : > { %5048 = vmax.xlane.f32.xlu1 %v5047_v22  ;;  %v8791_v23 = vpop.f32.mrf.mxu1 }
0x21b2   : > { %v5226_v24 = vpop.f32.mrf.mxu1 }
0x21b4   : > { %v8818_v25 = vpop.f32.mrf.mxu1 }
0x21b6   : > { %v5229_v26 = vpop.f32.mrf.mxu1 }
0x21b8   : > { %v8819_v27 = vpop.f32.mrf.mxu1 }
0x2235   : > { %v5046_v28 = vpop.xlane.xlu0 %5045 }
0x2236   : > { %v5050_v29 = vsub.f32 %v5037_v13, %v5046_v28  ;;  %v9287_v13 = vld [vmem:[%s11246_s12 + $0x68] sm:$0xff]  }
0x2237   : > { %8837 = vmatpush3.bf16.msra.mxu1 %v9287_v13  ;;  %v9307_v13 = vld [vmem:[%s11249_s15 + $0x50] sm:$0xff]  }
0x2238   : > { %v5052_v30 = vmul.f32 1.442695, %v5050_v29  ;;  %8838 = vmatprep.subr.bf16.mxu1 %v9482_v34  ;;  %v7488_v29 = vld [vmem:[%s11244_s10 + $0x16] ss:$0 sm:$0xff] }
0x2239   : > { %v5049_v16 = vpop.xlane.xlu1 %5048 }
0x223a   : > { %9458 = vpow2.f32 %v5052_v30  ;;  %v5051_v17 = vsub.f32 %v5040_v19, %v5049_v16 }
0x223b   : > { %8839 = vmatpush3.bf16.msra.mxu1 %v9288_v14  ;;  %v9309_v14 = vld [vmem:[%s11249_s15 + $0x48] sm:$0xff]  }
0x223c   : > { %v5054_v33 = vmul.f32 1.442695, %v5051_v17  ;;  %8840 = vmatprep.subr.bf16.mxu1 %v9482_v34 }
0x223e   : > { %9460 = vpow2.f32 %v5054_v33  ;;  %v7489_v33 = vld [vmem:[%s11244_s10 + $0x17] ss:$0 sm:$0xff] }
0x223f   : > { %8841 = vmatpush3.bf16.msra.mxu1 %v9289_v15 }
0x2240   : > { %8842 = vmatprep.subr.bf16.mxu1 %v9482_v34 }
0x2247   : > { %v9459_v35 = vpop.eup %9458 }
0x2248   : > { %v5056_v36 = vsel %vm1203_vm3, %v9459_v35, 0.0 }
0x2249   : > { %5057 = vadd.xlane.f32.xlu0 %v5056_v36 }
0x224b   : > { %v9461_v37 = vpop.eup %9460 }
0x224c   : > { %v5059_v38 = vsel %vm1203_vm3, %v9461_v37, 0.0 }
0x224d   : > { %5060 = vadd.xlane.f32.xlu1 %v5059_v38 }
0x22d2   : > { %v5058_v39 = vpop.xlane.xlu0 %5057 }
0x22d3   : > { %9462 = vrcp.f32 %v5058_v39  ;;  %v9290_v39 = vld [vmem:[%s11246_s12 + $0x50] sm:$0xff]  }
0x22d4   : > { %8843 = vmatpush3.bf16.msra.mxu1 %v9290_v39  ;;  %v9300_v39 = vld [vmem:[%s11247_s13 + $0x70] sm:$0xff]  }
0x22d5   : > { %8844 = vmatprep.subr.bf16.mxu1 %v9482_v34 }
0x22d6   : > { %v5061_v40 = vpop.xlane.xlu1 %5060 }
0x22d7   : > { %9464 = vrcp.f32 %v5061_v40  ;;  %v9291_v40 = vld [vmem:[%s11246_s12 + $0x48] sm:$0xff]  }
0x22d8   : > { %8845 = vmatpush3.bf16.msra.mxu1 %v9291_v40  ;;  %v9302_v40 = vld [vmem:[%s11247_s13 + $0x68] sm:$0xff]  }
0x22d9   : > { %8846 = vmatprep.subr.bf16.mxu1 %v9482_v34 }
0x22e0   : > { %v9463_v42 = vpop.eup %9462 }
0x22e1   : > { %v5064_v54 = vmul.f32 %v9463_v42, %v9459_v35  ;;  %v9292_v42 = vld [vmem:[%s11246_s12 + $0x40] sm:$0xff]  }
0x22e2   : > { %8847 = vmatpush3.bf16.msra.mxu1 %v9292_v42  ;;  %v9304_v42 = vld [vmem:[%s11247_s13 + $0x60] sm:$0xff]  }
0x22e3   : > { %8884 = vmatprep.subr.bf16.mxu1 %v9482_v34 }
0x22e4   : > { %v9465_v43 = vpop.eup %9464 }
0x22e5   : > { %v5065_v21 = vmul.f32 %v9465_v43, %v9461_v37  ;;  %v7499_v43 = vld [vmem:[%s11244_s10 + $0x10] ss:$0 sm:$0xff] }
0x22e7   : > { %v5066_v52 = vpack.c.bf16 %v5065_v21, %v5064_v54 }
0x22e9   : > { %8801 = vmatmul.mubr.msk.bf16.vlgmr.msra.gmra.mxu0 %vm1203_vm3, %v5066_v52 }
0x22ea   : > { %8808 = vmatprep.mubr.msk.bf16.mxu0 %vm9483_vm2, %v9482_v34  ;;  %8805 = vmatpush3.bf16.msra.mxu0 %v9279_v44 }
0x22eb   : > { %8806 = vmatprep.subr.bf16.mxu0 %v9482_v34 }
0x22ee   : > { %8807 = vmatpush3.bf16.msra.mxu0 %v9280_v31 }
0x22ef   : > { %8820 = vmatprep.subr.bf16.mxu0 %v9482_v34 }
0x23a9   : > { %v5108_v45 = vpop.f32.mrf.mxu0 }
0x23ab   : > { %v8802_v46 = vpop.f32.mrf.mxu0 }
0x23ad   : > { %v5111_v47 = vpop.f32.mrf.mxu0 }
0x23ae   : > { %v5115_v41 = vpack.c.bf16 %v5111_v47, %v5108_v45 }
0x23af   : > { %v8803_v48 = vpop.f32.mrf.mxu0 }
0x23b0   : > { %8809 = vmatmul.mubr.msk.bf16.vlgmr.msra.gmra.mxu0 %vm1414_vm4, %v5115_v41  ;;  %v7522_v48 = vld [vmem:[%s11244_s10 + $0x11] ss:$0 sm:$0xff] }
0x23b1   : > { %8828 = vmatprep.mubr.msk.bf16.mxu0 %vm9483_vm2, %v9482_v34 }
0x2470   : > { %v5170_v49 = vpop.f32.mrf.mxu0 }
0x2471   : > { %v5227_v18 = vadd.f32 %v5226_v24, %v5170_v49 }
0x2472   : > { %v8810_v50 = vpop.f32.mrf.mxu0 }
0x2473   : > { %v5238_v51 = vadd.f32 %v7485_v62, %v5227_v18 }
0x2474   : > { %v5173_v55 = vpop.f32.mrf.mxu0 }
0x2475   : > { %v5230_v56 = vadd.f32 %v5229_v26, %v5173_v55  ;;  %v5240_v57 = vadd.f32 %v5238_v51, %v10544_v2 }
0x2476   : > { %v8811_v58 = vpop.f32.mrf.mxu0 }
0x2477   : > { %v5239_v59 = vadd.f32 %v7485_v62, %v5230_v56  ;;  %v5244_v20 = vsel %vm1203_vm3, %v5240_v57, 0.0 }
0x2478   : > { %5245 = vadd.xlane.f32.xlu0 %v5244_v20 }
0x2479   : > { %v5241_v60 = vadd.f32 %v5239_v59, %v10546_v3  ;;  %v9281_v3 = vld [vmem:[%s11245_s11 + $0x38] sm:$0xff]  }
0x247a   : > { %8821 = vmatpush3.bf16.msra.mxu0 %v9281_v3  ;;  %v9296_v3 = vld [vmem:[%s11247_s13] sm:$0xff]  }
0x247b   : > { %v5247_v61 = vsel %vm1203_vm3, %v5241_v60, 0.0  ;;  %8822 = vmatprep.subr.bf16.mxu0 %v9482_v34 }
0x247c   : > { %5248 = vadd.xlane.f32.xlu1 %v5247_v61 }
0x247e   : > { %8823 = vmatpush3.bf16.msra.mxu0 %v9282_v8  ;;  %v9297_v8 = vld [vmem:[%s11249_s15 + $0x78] sm:$0xff]  }
0x247f   : > { %8824 = vmatprep.subr.bf16.mxu0 %v9482_v34 }
0x2482   : > { %8825 = vmatpush3.bf16.msra.mxu0 %v9283_v9  ;;  %v9299_v9 = vld [vmem:[%s11249_s15 + $0x70] sm:$0xff]  }
0x2483   : > { %8826 = vmatprep.subr.bf16.mxu0 %v9482_v34 }
0x2486   : > { %8827 = vmatpush3.bf16.msra.mxu0 %v9284_v10  ;;  %v9301_v10 = vld [vmem:[%s11249_s15 + $0x68] sm:$0xff]  }
0x2487   : > { %8852 = vmatprep.subr.bf16.mxu0 %v9482_v34 }
0x2501   : > { %v5246_v63 = vpop.xlane.xlu0 %5245 }
0x2502   : > { %v5250_v0 = vmul.f32 0.015625, %v5246_v63 }
0x2504   : > { %v5252_v1 = vsub.f32 %v5240_v57, %v5250_v0 }
0x2505   : > { %v5249_v4 = vpop.xlane.xlu1 %5248 }
0x2506   : > { %v5251_v53 = vmul.f32 0.015625, %v5249_v4  ;;  %v5254_v5 = vmul.f32 %v5252_v1, %v5252_v1 }
0x2508   : > { %v5253_v6 = vsub.f32 %v5241_v60, %v5251_v53  ;;  %v5256_v7 = vsel %vm1203_vm3, %v5254_v5, 0.0 }
0x2509   : > { %5257 = vadd.xlane.f32.xlu0 %v5256_v7  ;;  %v9293_v7 = vld [vmem:[%s11247_s13 + $0x18] sm:$0xff]  }
0x250a   : > { %v5255_v2 = vmul.f32 %v5253_v6, %v5253_v6 }
0x250c   : > { %v5259_v32 = vsel %vm1203_vm3, %v5255_v2, 0.0  ;;  %v9294_v2 = vld [vmem:[%s11247_s13 + $0x10] sm:$0xff]  }
0x250d   : > { %5260 = vadd.xlane.f32.xlu1 %v5259_v32  ;;  %v9295_v32 = vld [vmem:[%s11247_s13 + $0x8] sm:$0xff]  }
0x2592   : > { %v5258_v19 = vpop.xlane.xlu0 %5257 }
0x2593   : > { %v5262_v22 = vmul.f32 0.015625, %v5258_v19 }
0x2595   : > { %v5264_v23 = vadd.f32 1e-05, %v5262_v22 }
0x2596   : > { %v5261_v24 = vpop.xlane.xlu1 %5260 }
0x2597   : > { %9466 = vrsqrt.f32 %v5264_v23  ;;  %v5263_v25 = vmul.f32 0.015625, %v5261_v24 }
0x2599   : > { %v5265_v26 = vadd.f32 1e-05, %v5263_v25 }
0x259b   : > { %9468 = vrsqrt.f32 %v5265_v26 }
0x25a4   : > { %v9467_v27 = vpop.eup %9466 }
0x25a5   : > { %v5268_v28 = vmul.f32 %v9467_v27, %v5252_v1 }
0x25a7   : > { %v5274_v16 = vmul.f32 %v7488_v29, %v5268_v28  ;;  %v7533_v28 = vld [vmem:[%s11244_s10 + $0x18] ss:$0 sm:$0xff] }
0x25a8   : > { %v9469_v30 = vpop.eup %9468 }
0x25a9   : > { %v5269_v17 = vmul.f32 %v9469_v30, %v5253_v6  ;;  %v5280_v36 = vadd.f32 %v7489_v33, %v5274_v16 }
0x25ab   : > { %v5275_v35 = vmul.f32 %v7488_v29, %v5269_v17  ;;  %v7534_v17 = vld [vmem:[%s11244_s10 + $0x19] ss:$0 sm:$0xff] }
0x25ad   : > { %v5281_v37 = vadd.f32 %v7489_v33, %v5275_v35 }
0x25af   : > { %v5282_v38 = vpack.c.bf16 %v5281_v37, %v5280_v36 }
0x25b1   : > { %8829 = vmatmul.mubr.msk.bf16.vlgmr.msra.gmra.mxu0 %vm1203_vm3, %v5282_v38 }
0x25b2   : > { %8860 = vmatprep.mubr.msk.bf16.mxu0 %vm9483_vm2, %v9482_v34  ;;  %8853 = vmatpush3.bf16.msra.mxu0 %v9293_v7  ;;  %v9359_v7 = vld [vmem:[%s11249_s15 + $0x180] sm:$0xff]  }
0x25b3   : > { %8854 = vmatprep.subr.bf16.mxu0 %v9482_v34 }
0x25b6   : > { %8855 = vmatpush3.bf16.msra.mxu0 %v9294_v2  ;;  %v9361_v2 = vld [vmem:[%s11249_s15 + $0x238] sm:$0xff]  }
0x25b7   : > { %8856 = vmatprep.subr.bf16.mxu0 %v9482_v34 }
0x25ba   : > { %8857 = vmatpush3.bf16.msra.mxu0 %v9295_v32  ;;  %v7700_v32 = vld [vmem:[%s10878_s18 + $0x18] sm:$0xf] }
0x25bb   : > { %8858 = vmatprep.subr.bf16.mxu0 %v9482_v34 }
0x25be   : > { %8859 = vmatpush3.bf16.msra.mxu0 %v9296_v3  ;;  %v9363_v3 = vld [vmem:[%s11249_s15 + $0x230] sm:$0xff]  }
0x25bf   : > { %8864 = vmatprep.subr.bf16.mxu0 %v9482_v34 }
0x2671   : > { %v5358_v54 = vpop.f32.mrf.mxu0 }
0x2672   : > { %v5359_v52 = vadd.f32 %v7499_v43, %v5358_v54  ;;  %v9308_v54 = vld [vmem:[%s11247_s13 + $0x50] sm:$0xff]  }
0x2673   : > { %v8830_v21 = vpop.f32.mrf.mxu0 }
0x2674   : > { %v5365_v46 = vmax.f32 %v5359_v52, 0.0  ;;  %v9310_v21 = vld [vmem:[%s11247_s13 + $0x48] sm:$0xff]   ;;  %v9311_v52 = vld [vmem:[%s11249_s15 + $0x40] sm:$0xff]  }
0x2675   : > { %v5361_v44 = vpop.f32.mrf.mxu0 }
0x2676   : > { %v5362_v31 = vadd.f32 %v7499_v43, %v5361_v44  ;;  %v9306_v43 = vld [vmem:[%s11247_s13 + $0x58] sm:$0xff]   ;;  %v9312_v44 = vld [vmem:[%s11247_s13 + $0x40] sm:$0xff]  }
0x2677   : > { %v8831_v45 = vpop.f32.mrf.mxu0 }
0x2678   : > { %v5366_v47 = vmax.f32 %v5362_v31, 0.0  ;;  %v9313_v31 = vld [vmem:[%s11249_s15 + $0xb8] sm:$0xff]   ;;  %v7567_v45 = vld [vmem:[%s10878_s18 + $0x4] sm:$0xf] }
0x267a   : > { %v5367_v41 = vpack.c.bf16 %v5366_v47, %v5365_v46  ;;  %v9315_v46 = vld [vmem:[%s11249_s15 + $0xb0] sm:$0xff]   ;;  %v9317_v47 = vld [vmem:[%s11249_s15 + $0xa8] sm:$0xff]  }
0x267c   : > { %8849 = vmatmul.mubr.bf16.vlgmr.msra.gmra.mxu1 %v5367_v41  ;;  %v9319_v41 = vld [vmem:[%s11249_s15 + $0xa0] sm:$0xff]  }
0x267d   : > { %8900 = vmatprep.mubr.msk.bf16.mxu1 %vm9483_vm2, %v9482_v34  ;;  %8885 = vmatpush3.bf16.msra.mxu1 %v9297_v8  ;;  %v9365_v8 = vld [vmem:[%s11249_s15 + $0x228] sm:$0xff]  }
0x267e   : > { %8886 = vmatprep.subr.bf16.mxu1 %v9482_v34 }
0x2681   : > { %8887 = vmatpush3.bf16.msra.mxu1 %v9299_v9  ;;  %v9367_v9 = vld [vmem:[%s11249_s15 + $0x220] sm:$0xff]  }
0x2682   : > { %8888 = vmatprep.subr.bf16.mxu1 %v9482_v34 }
0x2685   : > { %8889 = vmatpush3.bf16.msra.mxu1 %v9301_v10  ;;  %v9369_v10 = vld [vmem:[%s11249_s15 + $0x218] sm:$0xff]  }
0x2686   : > { %8890 = vmatprep.subr.bf16.mxu1 %v9482_v34 }
0x2689   : > { %8891 = vmatpush3.bf16.msra.mxu1 %v9303_v11  ;;  %v9371_v11 = vld [vmem:[%s11249_s15 + $0x210] sm:$0xff]  }
0x268a   : > { %8892 = vmatprep.subr.bf16.mxu1 %v9482_v34 }
0x268d   : > { %8893 = vmatpush3.bf16.msra.mxu1 %v9305_v12  ;;  %v9373_v12 = vld [vmem:[%s11249_s15 + $0x208] sm:$0xff]  }
0x268e   : > { %8894 = vmatprep.subr.bf16.mxu1 %v9482_v34 }
0x2691   : > { %8895 = vmatpush3.bf16.msra.mxu1 %v9307_v13  ;;  %v7535_v13 = vld [vmem:[%s11248_s14] ss:$0 sm:$0xff] }
0x2692   : > { %8896 = vmatprep.subr.bf16.mxu1 %v9482_v34 }
0x2695   : > { %8897 = vmatpush3.bf16.msra.mxu1 %v9309_v14 }
0x2696   : > { %8898 = vmatprep.subr.bf16.mxu1 %v9482_v34 }
0x2699   : > { %8899 = vmatpush3.bf16.msra.mxu1 %v9311_v52  ;;  %v9340_v52 = vld [vmem:[%s11249_s15 + $0xd0] sm:$0xff]  }
0x269a   : > { %8924 = vmatprep.subr.bf16.mxu1 %v9482_v34 }
0x269c   : > { %8901 = vmatmul.mubr.bf16.vlgmr.msra.gmra.mxu1 %v7567_v45 }
0x269d   : > { %8925 = vmatpush3.bf16.msra.mxu1 %v9313_v31  ;;  %8940 = vmatprep.mubr.msk.bf16.mxu1 %vm9483_vm2, %v9482_v34  ;;  %v9344_v31 = vld [vmem:[%s11249_s15 + $0xc0] sm:$0xff]  }
0x269e   : > { %8926 = vmatprep.subr.bf16.mxu1 %v9482_v34 }
0x26a1   : > { %8927 = vmatpush3.bf16.msra.mxu1 %v9315_v46  ;;  %v7625_v46 = vld [vmem:[%s10878_s18 + $0xc] sm:$0xf] }
0x26a2   : > { %8928 = vmatprep.subr.bf16.mxu1 %v9482_v34 }
0x26a5   : > { %8929 = vmatpush3.bf16.msra.mxu1 %v9317_v47  ;;  %v9346_v47 = vld [vmem:[%s11249_s15 + $0x178] sm:$0xff]  }
0x26a6   : > { %8930 = vmatprep.subr.bf16.mxu1 %v9482_v34 }
0x26a9   : > { %8931 = vmatpush3.bf16.msra.mxu1 %v9319_v41 }
0x26aa   : > { %8932 = vmatprep.subr.bf16.mxu1 %v9482_v34 }
0x273c   : > { %v5472_v49 = vpop.f32.mrf.mxu1 }
0x273d   : > { %v5473_v62 = vadd.f32 %v7522_v48, %v5472_v49  ;;  %v9323_v49 = vld [vmem:[%s11249_s15 + $0x90] sm:$0xff]  }
0x273e   : > { %v8850_v18 = vpop.f32.mrf.mxu1 }
0x273f   : > { %v5479_v50 = vadd.f32 %v5473_v62, %v5280_v36  ;;  %v9325_v62 = vld [vmem:[%s11249_s15 + $0x88] sm:$0xff]   ;;  %v9327_v18 = vld [vmem:[%s11249_s15 + $0x80] sm:$0xff]  }
0x2740   : > { %v5475_v51 = vpop.f32.mrf.mxu1 }
0x2741   : > { %v5476_v55 = vadd.f32 %v7522_v48, %v5475_v51  ;;  %v5483_v56 = vsel %vm1203_vm3, %v5479_v50, 0.0  ;;  %v9321_v48 = vld [vmem:[%s11249_s15 + $0x98] sm:$0xff]   ;;  %v7600_v51 = vld [vmem:[%s10878_s18 + $0x8] sm:$0xf] }
0x2742   : > { %5484 = vadd.xlane.f32.xlu0 %v5483_v56  ;;  %v8851_v57 = vpop.f32.mrf.mxu1  ;;  %8933 = vmatpush3.bf16.msra.mxu1 %v9321_v48  ;;  %v9333_v56 = vld [vmem:[%s11249_s15 + $0x128] sm:$0xff]  }
0x2743   : > { %v5480_v58 = vadd.f32 %v5476_v55, %v5281_v37  ;;  %v9298_v37 = vld [vmem:[%s11247_s13 + $0x78] sm:$0xff]   ;;  %8934 = vmatprep.subr.bf16.mxu1 %v9482_v34  ;;  %v9331_v55 = vld [vmem:[%s11249_s15 + $0x130] sm:$0xff]   ;;  %v9335_v57 = vld [vmem:[%s11249_s15 + $0x120] sm:$0xff]  }
0x2745   : > { %v5486_v59 = vsel %vm1203_vm3, %v5480_v58, 0.0 }
0x2746   : > { %5487 = vadd.xlane.f32.xlu1 %v5486_v59  ;;  %8935 = vmatpush3.bf16.msra.mxu1 %v9323_v49  ;;  %v9339_v59 = vld [vmem:[%s11249_s15 + $0x110] sm:$0xff]  }
0x2747   : > { %8936 = vmatprep.subr.bf16.mxu1 %v9482_v34  ;;  %v9348_v49 = vld [vmem:[%s11249_s15 + $0x170] sm:$0xff]  }
0x274a   : > { %8937 = vmatpush3.bf16.msra.mxu1 %v9325_v62 }
0x274b   : > { %8938 = vmatprep.subr.bf16.mxu1 %v9482_v34 }
0x274e   : > { %8939 = vmatpush3.bf16.msra.mxu1 %v9327_v18  ;;  %v9350_v18 = vld [vmem:[%s11249_s15 + $0x168] sm:$0xff]  }
0x274f   : > { %8964 = vmatprep.subr.bf16.mxu1 %v9482_v34 }
0x2751   : > { %8941 = vmatmul.mubr.bf16.vlgmr.msra.gmra.mxu1 %v7600_v51  ;;  %v9354_v51 = vld [vmem:[%s11249_s15 + $0x158] sm:$0xff]  }
0x2752   : > { %8980 = vmatprep.mubr.msk.bf16.mxu1 %vm9483_vm2, %v9482_v34 }
0x275c   : > { %v11095_v45 = vpop.f32.mrf.mxu1 }
0x275e   : > { %v8902_v41 = vpop.f32.mrf.mxu1 }
0x2760   : > { %v5843_v48 = vpop.f32.mrf.mxu1 }
0x2762   : > { %v8903_v62 = vpop.f32.mrf.mxu1 }
0x27cb   : > { %v5485_v20 = vpop.xlane.xlu0 %5484 }
0x27cc   : > { %v5489_v60 = vmul.f32 0.015625, %v5485_v20  ;;  %v9341_v20 = vld [vmem:[%s11249_s15 + $0x108] sm:$0xff]  }
0x27ce   : > { %v5491_v61 = vsub.f32 %v5479_v50, %v5489_v60  ;;  %v9329_v50 = vld [vmem:[%s11249_s15 + $0x138] sm:$0xff]   ;;  %v9343_v60 = vld [vmem:[%s11249_s15 + $0x100] sm:$0xff]  }
0x27cf   : > { %v5488_v63 = vpop.xlane.xlu1 %5487  ;;  %8965 = vmatpush3.bf16.msra.mxu1 %v9329_v50  ;;  %v9352_v50 = vld [vmem:[%s11249_s15 + $0x160] sm:$0xff]  }
0x27d0   : > { %v5490_v0 = vmul.f32 0.015625, %v5488_v63  ;;  %v5493_v1 = vmul.f32 %v5491_v61, %v5491_v61  ;;  %8966 = vmatprep.subr.bf16.mxu1 %v9482_v34  ;;  %v7650_v63 = vld [vmem:[%s10878_s18 + $0x10] sm:$0xf] }
0x27d2   : > { %v5492_v4 = vsub.f32 %v5480_v58, %v5490_v0  ;;  %v5495_v53 = vsel %vm1203_vm3, %v5493_v1, 0.0  ;;  %v9337_v58 = vld [vmem:[%s11249_s15 + $0x118] sm:$0xff]   ;;  %v9347_v0 = vld [vmem:[%s11249_s15 + $0x1b0] sm:$0xff]   ;;  %v9349_v1 = vld [vmem:[%s11249_s15 + $0x1a8] sm:$0xff]  }
0x27d3   : > { %5496 = vadd.xlane.f32.xlu0 %v5495_v53  ;;  %8967 = vmatpush3.bf16.msra.mxu1 %v9331_v55  ;;  %v9353_v53 = vld [vmem:[%s11249_s15 + $0x198] sm:$0xff]   ;;  %v9356_v55 = vld [vmem:[%s11249_s15 + $0x150] sm:$0xff]  }
0x27d4   : > { %v5494_v5 = vmul.f32 %v5492_v4, %v5492_v4  ;;  %8968 = vmatprep.subr.bf16.mxu1 %v9482_v34 }
0x27d6   : > { %v5498_v6 = vsel %vm1203_vm3, %v5494_v5, 0.0  ;;  %v9355_v5 = vld [vmem:[%s11249_s15 + $0x190] sm:$0xff]  }
0x27d7   : > { %5499 = vadd.xlane.f32.xlu1 %v5498_v6  ;;  %8969 = vmatpush3.bf16.msra.mxu1 %v9333_v56  ;;  %v9357_v6 = vld [vmem:[%s11249_s15 + $0x188] sm:$0xff]  }
0x27d8   : > { %8970 = vmatprep.subr.bf16.mxu1 %v9482_v34  ;;  %v9358_v56 = vld [vmem:[%s11249_s15 + $0x148] sm:$0xff]  }
0x27db   : > { %8971 = vmatpush3.bf16.msra.mxu1 %v9335_v57  ;;  %v9360_v57 = vld [vmem:[%s11249_s15 + $0x140] sm:$0xff]  }
0x27dc   : > { %8972 = vmatprep.subr.bf16.mxu1 %v9482_v34 }
0x27df   : > { %8973 = vmatpush3.bf16.msra.mxu1 %v9337_v58  ;;  %v7675_v58 = vld [vmem:[%s10878_s18 + $0x14] sm:$0xf] }
0x27e0   : > { %8974 = vmatprep.subr.bf16.mxu1 %v9482_v34 }
0x27e3   : > { %8975 = vmatpush3.bf16.msra.mxu1 %v9339_v59  ;;  %v9362_v59 = vld [vmem:[%s11249_s15 + $0x1f8] sm:$0xff]  }
0x27e4   : > { %8976 = vmatprep.subr.bf16.mxu1 %v9482_v34 }
0x27e7   : > { %8977 = vmatpush3.bf16.msra.mxu1 %v9341_v20 }
0x27e8   : > { %8978 = vmatprep.subr.bf16.mxu1 %v9482_v34 }
0x27eb   : > { %8979 = vmatpush3.bf16.msra.mxu1 %v9343_v60 }
0x27ec   : > { %9004 = vmatprep.subr.bf16.mxu1 %v9482_v34 }
0x27ee   : > { %8981 = vmatmul.mubr.bf16.vlgmr.msra.gmra.mxu1 %v7650_v63 }
0x27ef   : > { %9020 = vmatprep.mubr.msk.bf16.mxu1 %vm9483_vm2, %v9482_v34 }
0x2811   : > { %v11136_v20 = vpop.f32.mrf.mxu1 }
0x2813   : > { %v8942_v60 = vpop.f32.mrf.mxu1 }
0x2815   : > { %v6038_v63 = vpop.f32.mrf.mxu1 }
0x285c   : > { %v5497_v15 = vpop.xlane.xlu0 %5496 }
0x285d   : > { %v5501_v19 = vmul.f32 0.015625, %v5497_v15 }
0x285f   : > { %v5503_v22 = vadd.f32 1e-05, %v5501_v19  ;;  %v9375_v19 = vld [vmem:[%s11249_s15 + $0x200] sm:$0xff]  }
0x2860   : > { %v5500_v23 = vpop.xlane.xlu1 %5499 }
0x2861   : > { %9470 = vrsqrt.f32 %v5503_v22  ;;  %v5502_v24 = vmul.f32 0.015625, %v5500_v23 }
0x2863   : > { %v5504_v25 = vadd.f32 1e-05, %v5502_v24 }
0x2865   : > { %9472 = vrsqrt.f32 %v5504_v25  ;;  %v7750_v25 = vld [vmem:[%s10878_s18 + $0x20] sm:$0xf] }
0x286e   : > { %v9471_v26 = vpop.eup %9470 }
0x286f   : > { %v5507_v27 = vmul.f32 %v9471_v26, %v5491_v61  ;;  %v9345_v61 = vld [vmem:[%s11249_s15 + $0x1b8] sm:$0xff]  }
0x2870   : > { %9005 = vmatpush3.bf16.msra.mxu1 %v9345_v61  ;;  %v9364_v61 = vld [vmem:[%s11249_s15 + $0x1f0] sm:$0xff]  }
0x2871   : > { %v5513_v30 = vmul.f32 %v7533_v28, %v5507_v27  ;;  %9006 = vmatprep.subr.bf16.mxu1 %v9482_v34 }
0x2872   : > { %v9473_v29 = vpop.eup %9472 }
0x2873   : > { %v5508_v16 = vmul.f32 %v9473_v29, %v5492_v4  ;;  %v5519_v35 = vadd.f32 %v7534_v17, %v5513_v30  ;;  %v9351_v4 = vld [vmem:[%s11249_s15 + $0x1a0] sm:$0xff]   ;;  %v9314_v29 = vld [vmem:[%s11249_s15 + $0x38] sm:$0xff]  }
0x2874   : > { %9007 = vmatpush3.bf16.msra.mxu1 %v9347_v0  ;;  %v8943_v0 = vpop.f32.mrf.mxu1 }
0x2875   : > { %v5514_v33 = vmul.f32 %v7533_v28, %v5508_v16  ;;  %9008 = vmatprep.subr.bf16.mxu1 %v9482_v34  ;;  %v9316_v16 = vld [vmem:[%s11249_s15 + $0x30] sm:$0xff]  }
0x2877   : > { %v5520_v36 = vadd.f32 %v7534_v17, %v5514_v33  ;;  %v9318_v17 = vld [vmem:[%s11249_s15 + $0x28] sm:$0xff]   ;;  %v9320_v33 = vld [vmem:[%s11249_s15 + $0x20] sm:$0xff]  }
0x2878   : > { %9009 = vmatpush3.bf16.msra.mxu1 %v9349_v1  ;;  %v9366_v1 = vld [vmem:[%s11249_s15 + $0x1e8] sm:$0xff]  }
0x2879   : > { %v5521_v38 = vpack.c.bf16 %v5520_v36, %v5519_v35  ;;  %9010 = vmatprep.subr.bf16.mxu1 %v9482_v34  ;;  %v9322_v35 = vld [vmem:[%s11249_s15 + $0x18] sm:$0xff]   ;;  %v9324_v36 = vld [vmem:[%s11249_s15 + $0x10] sm:$0xff]  }
0x287b   : > { %8861 = vmatmul.mubr.msk.bf16.vlgmr.msra.gmra.mxu0 %vm1203_vm3, %v5521_v38  ;;  %v9328_v38 = vld [vmem:[%s11249_s15] sm:$0xff]  }
0x287c   : > { %8865 = vmatpush3.bf16.msra.mxu0 %v9298_v37  ;;  %8880 = vmatprep.mubr.msk.bf16.mxu0 %vm9483_vm2, %v9482_v34  ;;  %v9326_v37 = vld [vmem:[%s11249_s15 + $0x8] sm:$0xff]  }
0x287d   : > { %8866 = vmatprep.subr.bf16.mxu0 %v9482_v34  ;;  %9011 = vmatpush3.bf16.msra.mxu1 %v9351_v4  ;;  %v9368_v4 = vld [vmem:[%s11249_s15 + $0x1e0] sm:$0xff]  }
0x287e   : > { %9012 = vmatprep.subr.bf16.mxu1 %v9482_v34 }
0x2880   : > { %8867 = vmatpush3.bf16.msra.mxu0 %v9300_v39  ;;  %v5722_v39 = vld [vmem:[%s10878_s18] sm:$0xf] }
0x2881   : > { %8868 = vmatprep.subr.bf16.mxu0 %v9482_v34  ;;  %9013 = vmatpush3.bf16.msra.mxu1 %v9353_v53  ;;  %v9370_v53 = vld [vmem:[%s11249_s15 + $0x1d8] sm:$0xff]  }
0x2882   : > { %9014 = vmatprep.subr.bf16.mxu1 %v9482_v34 }
0x2884   : > { %8869 = vmatpush3.bf16.msra.mxu0 %v9302_v40  ;;  %v9330_v40 = vld [vmem:[%s11249_s15 + $0xf8] sm:$0xff]  }
0x2885   : > { %8870 = vmatprep.subr.bf16.mxu0 %v9482_v34  ;;  %9015 = vmatpush3.bf16.msra.mxu1 %v9355_v5  ;;  %v9372_v5 = vld [vmem:[%s11249_s15 + $0x1d0] sm:$0xff]  }
0x2886   : > { %9016 = vmatprep.subr.bf16.mxu1 %v9482_v34 }
0x2888   : > { %8871 = vmatpush3.bf16.msra.mxu0 %v9304_v42  ;;  %v9332_v42 = vld [vmem:[%s11249_s15 + $0xf0] sm:$0xff]  }
0x2889   : > { %8872 = vmatprep.subr.bf16.mxu0 %v9482_v34  ;;  %9017 = vmatpush3.bf16.msra.mxu1 %v9357_v6  ;;  %v9374_v6 = vld [vmem:[%s11249_s15 + $0x1c8] sm:$0xff]  }
0x288a   : > { %9018 = vmatprep.subr.bf16.mxu1 %v9482_v34 }
0x288c   : > { %8873 = vmatpush3.bf16.msra.mxu0 %v9306_v43  ;;  %v9334_v43 = vld [vmem:[%s11249_s15 + $0xe8] sm:$0xff]  }
0x288d   : > { %8874 = vmatprep.subr.bf16.mxu0 %v9482_v34  ;;  %9019 = vmatpush3.bf16.msra.mxu1 %v9359_v7  ;;  %v9376_v7 = vld [vmem:[%s11249_s15 + $0x1c0] sm:$0xff]  }
0x288e   : > { %9044 = vmatprep.subr.bf16.mxu1 %v9482_v34 }
0x2890   : > { %8875 = vmatpush3.bf16.msra.mxu0 %v9308_v54  ;;  %9021 = vmatmul.mubr.bf16.vlgmr.msra.gmra.mxu1 %v7700_v32  ;;  %v9336_v54 = vld [vmem:[%s11249_s15 + $0xe0] sm:$0xff]  }
0x2891   : > { %8876 = vmatprep.subr.bf16.mxu0 %v9482_v34  ;;  %9045 = vmatpush3.bf16.msra.mxu1 %v9361_v2  ;;  %v7725_v2 = vld [vmem:[%s10878_s18 + $0x1c] sm:$0xf] }
0x2892   : > { %9060 = vmatprep.mubr.msk.bf16.mxu1 %vm9483_vm2, %v9482_v34  ;;  %9046 = vmatprep.subr.bf16.mxu1 %v9482_v34 }
0x2894   : > { %8877 = vmatpush3.bf16.msra.mxu0 %v9310_v21  ;;  %v9338_v21 = vld [vmem:[%s11249_s15 + $0xd8] sm:$0xff]  }
0x2895   : > { %8878 = vmatprep.subr.bf16.mxu0 %v9482_v34  ;;  %9047 = vmatpush3.bf16.msra.mxu1 %v9363_v3 }
0x2896   : > { %9048 = vmatprep.subr.bf16.mxu1 %v9482_v34 }
0x2898   : > { %8879 = vmatpush3.bf16.msra.mxu0 %v9312_v44  ;;  %v9342_v44 = vld [vmem:[%s11249_s15 + $0xc8] sm:$0xff]  }
0x2899   : > { %8904 = vmatprep.subr.bf16.mxu0 %v9482_v34  ;;  %9049 = vmatpush3.bf16.msra.mxu1 %v9365_v8 }
0x289a   : > { %9050 = vmatprep.subr.bf16.mxu1 %v9482_v34 }
0x289d   : > { %9051 = vmatpush3.bf16.msra.mxu1 %v9367_v9 }
0x289e   : > { %9052 = vmatprep.subr.bf16.mxu1 %v9482_v34 }
0x28a1   : > { %9053 = vmatpush3.bf16.msra.mxu1 %v9369_v10 }
0x28a2   : > { %9054 = vmatprep.subr.bf16.mxu1 %v9482_v34 }
0x28a5   : > { %9055 = vmatpush3.bf16.msra.mxu1 %v9371_v11 }
0x28a6   : > { %9056 = vmatprep.subr.bf16.mxu1 %v9482_v34 }
0x28a9   : > { %9057 = vmatpush3.bf16.msra.mxu1 %v9373_v12 }
0x28aa   : > { %9058 = vmatprep.subr.bf16.mxu1 %v9482_v34 }
0x28ad   : > { %9059 = vmatpush3.bf16.msra.mxu1 %v9375_v19  ;;  %v9379_v19 = vld [vmem:[%s11249_s15 + $0x268] sm:$0xff]  }
0x28ae   : > { %9084 = vmatprep.subr.bf16.mxu1 %v9482_v34  ;;  %v11170_v32 = vpop.f32.mrf.mxu1 }
0x28b0   : > { %9061 = vmatmul.mubr.bf16.vlgmr.msra.gmra.mxu1 %v7750_v25  ;;  %v8982_v3 = vpop.f32.mrf.mxu1  ;;  %v7558_v25 = vld [vmem:[%s11248_s14 + $0x1] ss:$0 sm:$0xff] }
0x28b1   : > { %9086 = vmatprep.mubr.msk.bf16.mxu1 %vm9483_vm2, %v9482_v34 }
0x28b2   : > { %v6254_v8 = vpop.f32.mrf.mxu1 }
0x28b4   : > { %v8983_v9 = vpop.f32.mrf.mxu1 }
0x293b   : > { %v5598_v14 = vpop.f32.mrf.mxu0 }
0x293c   : > { %v5599_v22 = vadd.f32 %v7535_v13, %v5598_v14  ;;  %v9377_v14 = vld [vmem:[%s11249_s15 + $0x278] sm:$0xff]  }
0x293d   : > { %v8862_v15 = vpop.f32.mrf.mxu0 }
0x293e   : > { %v5605_v27 = vmax.f32 %v5599_v22, 0.0  ;;  %v9378_v15 = vld [vmem:[%s11249_s15 + $0x270] sm:$0xff]   ;;  %v9380_v22 = vld [vmem:[%s11249_s15 + $0x260] sm:$0xff]  }
0x293f   : > { %v5601_v23 = vpop.f32.mrf.mxu0 }
0x2940   : > { %v5602_v24 = vadd.f32 %v7535_v13, %v5601_v23  ;;  %v9381_v23 = vld [vmem:[%s11249_s15 + $0x258] sm:$0xff]  }
0x2941   : > { %v8863_v26 = vpop.f32.mrf.mxu0 }
0x2942   : > { %v5606_v28 = vmax.f32 %v5602_v24, 0.0  ;;  %v9382_v26 = vld [vmem:[%s11249_s15 + $0x250] sm:$0xff]  }
0x2944   : > { %v5607_v30 = vpack.c.bf16 %v5606_v28, %v5605_v27 }
0x2946   : > { %8881 = vmatmul.mubr.bf16.vlgmr.msra.gmra.mxu0 %v5607_v30 }
0x2947   : > { %8905 = vmatpush3.bf16.msra.mxu0 %v9314_v29  ;;  %8920 = vmatprep.mubr.msk.bf16.mxu0 %vm9483_vm2, %v9482_v34 }
0x2948   : > { %8906 = vmatprep.subr.bf16.mxu0 %v9482_v34 }
0x294b   : > { %8907 = vmatpush3.bf16.msra.mxu0 %v9316_v16 }
0x294c   : > { %8908 = vmatprep.subr.bf16.mxu0 %v9482_v34 }
0x294f   : > { %8909 = vmatpush3.bf16.msra.mxu0 %v9318_v17  ;;  %v9383_v17 = vld [vmem:[%s11249_s15 + $0x248] sm:$0xff]  }
0x2950   : > { %8910 = vmatprep.subr.bf16.mxu0 %v9482_v34  ;;  %v6467_v10 = vpop.f32.mrf.mxu1 }
0x2952   : > { %v9022_v11 = vpop.f32.mrf.mxu1 }
0x2953   : > { %8911 = vmatpush3.bf16.msra.mxu0 %v9320_v33 }
0x2954   : > { %8912 = vmatprep.subr.bf16.mxu0 %v9482_v34  ;;  %v6470_v12 = vpop.f32.mrf.mxu1 }
0x2956   : > { %v9023_v13 = vpop.f32.mrf.mxu1 }
0x2957   : > { %8913 = vmatpush3.bf16.msra.mxu0 %v9322_v35 }
0x2958   : > { %8914 = vmatprep.subr.bf16.mxu0 %v9482_v34 }
0x295b   : > { %8915 = vmatpush3.bf16.msra.mxu0 %v9324_v36 }
0x295c   : > { %8916 = vmatprep.subr.bf16.mxu0 %v9482_v34 }
0x295f   : > { %8917 = vmatpush3.bf16.msra.mxu0 %v9326_v37 }
0x2960   : > { %8918 = vmatprep.subr.bf16.mxu0 %v9482_v34 }
0x2963   : > { %8919 = vmatpush3.bf16.msra.mxu0 %v9328_v38  ;;  %v9384_v38 = vld [vmem:[%s11249_s15 + $0x240] sm:$0xff]  }
0x2964   : > { %8944 = vmatprep.subr.bf16.mxu0 %v9482_v34 }
0x2966   : > { %8921 = vmatmul.mubr.bf16.vlgmr.msra.gmra.mxu0 %v5722_v39 }
0x2967   : > { %8945 = vmatpush3.bf16.msra.mxu0 %v9330_v40  ;;  %8960 = vmatprep.mubr.msk.bf16.mxu0 %vm9483_vm2, %v9482_v34 }
0x2968   : > { %8946 = vmatprep.subr.bf16.mxu0 %v9482_v34 }
0x296b   : > { %8947 = vmatpush3.bf16.msra.mxu0 %v9332_v42 }
0x296c   : > { %8948 = vmatprep.subr.bf16.mxu0 %v9482_v34 }
0x296f   : > { %8949 = vmatpush3.bf16.msra.mxu0 %v9334_v43 }
0x2970   : > { %8950 = vmatprep.subr.bf16.mxu0 %v9482_v34  ;;  %v6683_v24 = vpop.f32.mrf.mxu1 }
0x2972   : > { %v9062_v27 = vpop.f32.mrf.mxu1 }
0x2973   : > { %8951 = vmatpush3.bf16.msra.mxu0 %v9336_v54 }
0x2974   : > { %8952 = vmatprep.subr.bf16.mxu0 %v9482_v34  ;;  %v6686_v30 = vpop.f32.mrf.mxu1 }
0x2976   : > { %v9063_v33 = vpop.f32.mrf.mxu1 }
0x2977   : > { %8953 = vmatpush3.bf16.msra.mxu0 %v9338_v21 }
0x2978   : > { %8954 = vmatprep.subr.bf16.mxu0 %v9482_v34 }
0x297b   : > { %8955 = vmatpush3.bf16.msra.mxu0 %v9340_v52 }
0x297c   : > { %8956 = vmatprep.subr.bf16.mxu0 %v9482_v34 }
0x297f   : > { %8957 = vmatpush3.bf16.msra.mxu0 %v9342_v44 }
0x2980   : > { %8958 = vmatprep.subr.bf16.mxu0 %v9482_v34 }
0x2983   : > { %8959 = vmatpush3.bf16.msra.mxu0 %v9344_v31 }
0x2984   : > { %8984 = vmatprep.subr.bf16.mxu0 %v9482_v34 }
0x2986   : > { %8961 = vmatmul.mubr.bf16.vlgmr.msra.gmra.mxu0 %v7625_v46 }
0x2987   : > { %8985 = vmatpush3.bf16.msra.mxu0 %v9346_v47  ;;  %9000 = vmatprep.mubr.msk.bf16.mxu0 %vm9483_vm2, %v9482_v34 }
0x2988   : > { %8986 = vmatprep.subr.bf16.mxu0 %v9482_v34 }
0x298b   : > { %8987 = vmatpush3.bf16.msra.mxu0 %v9348_v49 }
0x298c   : > { %8988 = vmatprep.subr.bf16.mxu0 %v9482_v34 }
0x298f   : > { %8989 = vmatpush3.bf16.msra.mxu0 %v9350_v18 }
0x2990   : > { %8990 = vmatprep.subr.bf16.mxu0 %v9482_v34 }
0x2993   : > { %8991 = vmatpush3.bf16.msra.mxu0 %v9352_v50 }
0x2994   : > { %8992 = vmatprep.subr.bf16.mxu0 %v9482_v34 }
0x2997   : > { %8993 = vmatpush3.bf16.msra.mxu0 %v9354_v51 }
0x2998   : > { %8994 = vmatprep.subr.bf16.mxu0 %v9482_v34 }
0x299b   : > { %8995 = vmatpush3.bf16.msra.mxu0 %v9356_v55 }
0x299c   : > { %8996 = vmatprep.subr.bf16.mxu0 %v9482_v34 }
0x299f   : > { %8997 = vmatpush3.bf16.msra.mxu0 %v9358_v56  ;;  %v7775_v56 = vld [vmem:[%s11250_s16] ss:$0 sm:$0xff] }
0x29a0   : > { %8998 = vmatprep.subr.bf16.mxu0 %v9482_v34 }
0x29a3   : > { %8999 = vmatpush3.bf16.msra.mxu0 %v9360_v57 }
0x29a4   : > { %9024 = vmatprep.subr.bf16.mxu0 %v9482_v34 }
0x29a6   : > { %9001 = vmatmul.mubr.bf16.vlgmr.msra.gmra.mxu0 %v7675_v58 }
0x29a7   : > { %9025 = vmatpush3.bf16.msra.mxu0 %v9362_v59  ;;  %9040 = vmatprep.mubr.msk.bf16.mxu0 %vm9483_vm2, %v9482_v34 }
0x29a8   : > { %9026 = vmatprep.subr.bf16.mxu0 %v9482_v34 }
0x29ab   : > { %9027 = vmatpush3.bf16.msra.mxu0 %v9364_v61 }
0x29ac   : > { %9028 = vmatprep.subr.bf16.mxu0 %v9482_v34 }
0x29af   : > { %9029 = vmatpush3.bf16.msra.mxu0 %v9366_v1 }
0x29b0   : > { %9030 = vmatprep.subr.bf16.mxu0 %v9482_v34 }
0x29b3   : > { %9031 = vmatpush3.bf16.msra.mxu0 %v9368_v4 }
0x29b4   : > { %9032 = vmatprep.subr.bf16.mxu0 %v9482_v34 }
0x29b7   : > { %9033 = vmatpush3.bf16.msra.mxu0 %v9370_v53 }
0x29b8   : > { %9034 = vmatprep.subr.bf16.mxu0 %v9482_v34 }
0x29bb   : > { %9035 = vmatpush3.bf16.msra.mxu0 %v9372_v5 }
0x29bc   : > { %9036 = vmatprep.subr.bf16.mxu0 %v9482_v34 }
0x29bf   : > { %9037 = vmatpush3.bf16.msra.mxu0 %v9374_v6 }
0x29c0   : > { %9038 = vmatprep.subr.bf16.mxu0 %v9482_v34 }
0x29c3   : > { %9039 = vmatpush3.bf16.msra.mxu0 %v9376_v7  ;;  %v9385_v7 = vld [vmem:[%s11249_s15 + $0x280] sm:$0xff]  }
0x29c4   : > { %9064 = vmatprep.subr.bf16.mxu0 %v9482_v34 }
0x29c6   : > { %9041 = vmatmul.mubr.bf16.vlgmr.msra.gmra.mxu0 %v7725_v2 }
0x29c7   : > { %9080 = vmatprep.mubr.msk.bf16.mxu0 %vm9483_vm2, %v9482_v34  ;;  %9065 = vmatpush3.bf16.msra.mxu0 %v9377_v14 }
0x29c8   : > { %9066 = vmatprep.subr.bf16.mxu0 %v9482_v34 }
0x29cb   : > { %9067 = vmatpush3.bf16.msra.mxu0 %v9378_v15 }
0x29cc   : > { %9068 = vmatprep.subr.bf16.mxu0 %v9482_v34 }
0x29cf   : > { %9069 = vmatpush3.bf16.msra.mxu0 %v9379_v19 }
0x29d0   : > { %9070 = vmatprep.subr.bf16.mxu0 %v9482_v34 }
0x29d3   : > { %9071 = vmatpush3.bf16.msra.mxu0 %v9380_v22 }
0x29d4   : > { %9072 = vmatprep.subr.bf16.mxu0 %v9482_v34 }
0x29d7   : > { %9073 = vmatpush3.bf16.msra.mxu0 %v9381_v23 }
0x29d8   : > { %9074 = vmatprep.subr.bf16.mxu0 %v9482_v34 }
0x29db   : > { %9075 = vmatpush3.bf16.msra.mxu0 %v9382_v26 }
0x29dc   : > { %9076 = vmatprep.subr.bf16.mxu0 %v9482_v34 }
0x29df   : > { %9077 = vmatpush3.bf16.msra.mxu0 %v9383_v17 }
0x29e0   : > { %9078 = vmatprep.subr.bf16.mxu0 %v9482_v34 }
0x29e3   : > { %9079 = vmatpush3.bf16.msra.mxu0 %v9384_v38 }
0x2a06   : > { %v5715_v28 = vpop.f32.mrf.mxu0 }
0x2a07   : > { %v5716_v29 = vadd.f32 %v7558_v25, %v5715_v28 }
0x2a08   : > { %v8882_v16 = vpop.f32.mrf.mxu0 }
0x2a09   : > { %7806 = vst [vmem:[%s11205_s1 + $0x10] sm:$0xff] %v5716_v29 }
0x2a0a   : > { %v5718_v35 = vpop.f32.mrf.mxu0 }
0x2a0b   : > { %v5719_v36 = vadd.f32 %v7558_v25, %v5718_v35 }
0x2a0c   : > { %v8883_v37 = vpop.f32.mrf.mxu0 }
0x2a0d   : > { %7807 = vst [vmem:[%s11205_s1 + $0x18] sm:$0xff] %v5719_v36 }
0x2a26   : > { %v5928_v39 = vpop.f32.mrf.mxu0 }
0x2a27   : > { %v5929_v34 = vadd.f32 %v5928_v39, %v11095_v45 }
0x2a28   : > { %v8922_v40 = vpop.f32.mrf.mxu0 }
0x2a29   : > { %v6041_v48 = vadd.f32 %v11136_v20, %v5929_v34  ;;  %v7793_v20 = vld [vmem:[%s11250_s16 + $0x1] ss:$0 sm:$0xff] }
0x2a2a   : > { %v5931_v42 = vpop.f32.mrf.mxu0 }
0x2a2c   : > { %v8923_v43 = vpop.f32.mrf.mxu0 }
0x2a46   : > { %v6143_v54 = vpop.f32.mrf.mxu0 }
0x2a47   : > { %v6149_v49 = vadd.f32 %v6143_v54, %v6041_v48 }
0x2a48   : > { %v8962_v21 = vpop.f32.mrf.mxu0 }
0x2a49   : > { %v6257_v62 = vadd.f32 %v11170_v32, %v6149_v49 }
0x2a4a   : > { %v6146_v52 = vpop.f32.mrf.mxu0 }
0x2a4c   : > { %v8963_v44 = vpop.f32.mrf.mxu0 }
0x2a66   : > { %v6359_v31 = vpop.f32.mrf.mxu0 }
0x2a67   : > { %v6365_v18 = vadd.f32 %v6359_v31, %v6257_v62 }
0x2a68   : > { %v9002_v46 = vpop.f32.mrf.mxu0 }
0x2a69   : > { %v6473_v50 = vadd.f32 %v6467_v10, %v6365_v18 }
0x2a6a   : > { %v6362_v47 = vpop.f32.mrf.mxu0 }
0x2a6c   : > { %v9003_v41 = vpop.f32.mrf.mxu0 }
0x2a86   : > { %v6575_v51 = vpop.f32.mrf.mxu0 }
0x2a87   : > { %v6581_v55 = vadd.f32 %v6575_v51, %v6473_v50 }
0x2a88   : > { %v9042_v57 = vpop.f32.mrf.mxu0 }
0x2a89   : > { %v6689_v58 = vadd.f32 %v6683_v24, %v6581_v55 }
0x2a8a   : > { %v6578_v59 = vpop.f32.mrf.mxu0 }
0x2a8b   : > { %v6697_v60 = vadd.f32 %v7775_v56, %v6689_v58 }
0x2a8c   : > { %v9043_v61 = vpop.f32.mrf.mxu0 }
0x2a8d   : > { %v6698_v63 = vmax.f32 %v6697_v60, 0.0 }
0x2a8f   : > { %v6699_v45 = vpack.c.bf16 %v6698_v63, %v6698_v63 }
0x2a91   : > { %9081 = vmatmul.mubr.bf16.vlgmr.msra.gmra.mxu0 %v6699_v45 }
0x2b51   : > { %v6807_v0 = vpop.f32.mrf.mxu0 }
0x2b52   : > { %v6808_v1 = vadd.f32 %v7793_v20, %v6807_v0 }
0x2b53   : > { %v9082_v4 = vpop.f32.mrf.mxu0 }
0x2b54   : > { %v6816_v53 = vpack.c.bf16 %v6808_v1, %v6808_v1 }
0x2b55   : > { %v6810_v5 = vpop.f32.mrf.mxu0 }
0x2b56   : > { %v6828_v6 = vsel %vm6826_vm6, %v6816_v53, 0 }
0x2b57   : > { %v9083_v2 = vpop.f32.mrf.mxu0  ;;  %9085 = vmatpush3.bf16.msra.mxu1 %v6828_v6 }
0x2b5a   : > { %9087 = vmatmul.mubr.msk.bf16.vlgmr.msra.gmra.mxu1 %vm6822_vm7, %v9385_v7 }
0x2c1a   : > { %v6864_v32 = vpop.f32.mrf.mxu1 }
0x2c1b   : > { %6871 = vst [vmem:[%s11205_s1] sm:$0xff] %v6864_v32 }
0x2c1c   : > { %v9088_v3 = vpop.f32.mrf.mxu1 }
0x2c1e   : > { %v6867_v8 = vpop.f32.mrf.mxu1 }
0x2c1f   : > { %6872 = vst [vmem:[%s11205_s1 + $0x8] sm:$0xff] %v6867_v8 }
0x2c20   : > { %v9089_v9 = vpop.f32.mrf.mxu1 }
0x2c21 PF: > { %s27_s24 = sadd.s32 1, %s9480_s24  }
0x2c22   : > { %p24_p4 = scmp.ge.s32.totalorder %s27_s24, 4  }
0x2c24   :  { %26 = sbr.rel (!%p24_p4) target bundleno = 3 (0x3), region = 202 }

</bundles_post_ra>
